<compile_context>
chip_gen: v6e
topology: v6e:2x2x1
jax: 0.10.0
libtpu: 0.0.40
codegen_flags: <defaults>
</compile_context>

<pallas_src>
import functools

import jax
import jax.numpy as jnp
import numpy as np
from jax.experimental import pallas as pl
from jax.experimental.pallas import tpu as pltpu

# ---- model hyper-parameters (small, consistent with the module) -------------
B = 2            # graphs per batch
N_NODES = 22     # electrodes per graph (fixed by the module's 22x22 entropy view)
F_IN = 22        # input node features (GATv2Conv(22, ...))
HIDDEN = 8       # hidden_channels
HEADS = 2        # heads
HC = HIDDEN * HEADS
NEG_SLOPE = 0.2  # GATv2 leaky-relu slope (PyG default)
GN_EPS = 1e-5    # GraphNorm eps (PyG default)


# ----------------------------- fused Pallas kernel ----------------------------
def _fused_forward_kernel(x_ref, w_ref, amat_ref, vec_ref,
                          pooled_ref, a1_ref, a2_ref, a3_ref,
                          *, heads, out_ch, graphs):
    """Whole GATWithEntropy forward; `graphs` graphs per grid step.

    x_ref    : [graphs, N, F_IN]
    w_ref    : [3, max_Fin, 2*hc]      merged lin_l | lin_r weights (zero padded)
    amat_ref : [3, N*hc, heads*N]      block-structured attention matrices
    vec_ref  : [3, 6, hc]              rows: bl, br, conv_bias, gn_w, gn_b, gn_mean_scale
    """
    hc = heads * out_ch
    n = x_ref.shape[1]
    a_refs = (a1_ref, a2_ref, a3_ref)

    for g in range(graphs):                              # static unroll over graphs
        h = x_ref[g]                                     # [N, Fin]
        for layer in range(3):                           # static unroll over layers
            # ---- GATv2 conv -------------------------------------------------
            w = w_ref[layer][: h.shape[1], :]            # [Fin, 2*hc]
            vec = vec_ref[layer]                         # [6, hc]
            proj = jnp.dot(h, w, preferred_element_type=jnp.float32)   # [N, 2*hc]
            xl = proj[:, :hc] + vec[0:1, :]              # source side (lin_l)
            xr = proj[:, hc:] + vec[1:2, :]              # target side (lin_r)

            # s[i, j*hc + k] = xr[i, k] + xl[j, k] as ONE lane-dense [N, N*hc] tile.
            xr_tiled = jnp.concatenate([xr] * n, axis=1)                        # [N, N*hc]
            xl_flat = jnp.concatenate([xl[j:j + 1, :] for j in range(n)], axis=1)  # [1, N*hc]
            s = xr_tiled + xl_flat
            s = jnp.maximum(s, NEG_SLOPE * s)            # LeakyReLU, one pass

            # e[i, hd*N + j] = sum_c att[hd,c] * s[i, j*hc + hd*C + c]  -- one MXU matmul.
            e_all = jnp.dot(s, amat_ref[layer],
                            preferred_element_type=jnp.float32)        # [N, heads*N]

            head_outs, head_alphas = [], []
            for hd in range(heads):                      # static unroll (heads=2)
                e = e_all[:, hd * n:(hd + 1) * n]        # [N, N]
                e = e - jnp.max(e, axis=-1, keepdims=True)
                p = jnp.exp(e)
                inv = pl.reciprocal(jnp.sum(p, axis=-1, keepdims=True), approx=True)
                alpha = p * inv                          # softmax over source nodes j
                head_alphas.append(alpha)
                head_outs.append(
                    jnp.dot(alpha, xl[:, hd * out_ch:(hd + 1) * out_ch],
                            preferred_element_type=jnp.float32))       # [N, C]

            # one lane-dense [N, heads*N] alpha store per layer per graph
            a_refs[layer][g] = jnp.concatenate(head_alphas, axis=1).astype(
                a_refs[layer].dtype)
            h = jnp.concatenate(head_outs, axis=1) + vec[2:3, :]       # [N, hc]

            # ---- ReLU (layers 1,2 only) + GraphNorm --------------------------
            if layer < 2:
                h = jnp.maximum(h, 0.0)
            mean = jnp.mean(h, axis=0, keepdims=True)
            cen = h - mean * vec[5:6, :]                 # mean_scale
            var = jnp.mean(cen * cen, axis=0, keepdims=True)
            h = vec[3:4, :] * cen * jax.lax.rsqrt(var + GN_EPS) + vec[4:5, :]

        # global mean pool over the graph's nodes
        pooled_ref[g:g + 1, :] = jnp.mean(h, axis=0, keepdims=True).astype(pooled_ref.dtype)


# ----------------------------- wrapper ----------------------------------------
def _graphs_per_step(batch):
    """v7x (2 TC/chip): one graph per grid step so the 'parallel' axis uses both
    cores.  Single-TC chips (v2..v6e): whole batch in one step (no per-step
    overhead)."""
    kind = ""
    try:
        kind = jax.devices()[0].device_kind.lower()
    except Exception:
        pass
    if "v7" in kind or "7x" in kind:
        return 1
    return batch


def _pack_params(params):
    """Pack the 21 small parameter arrays into 3 contiguous slabs."""
    hc = HEADS * HIDDEN
    fmax = max(F_IN, hc)
    eye_h = jnp.eye(HEADS, dtype=jnp.float32)
    eye_n = jnp.eye(N_NODES, dtype=jnp.float32)
    w_list, a_list, v_list = [], [], []
    for cname, gname in (("conv1", "gn1"), ("conv2", "gn2"), ("conv3", "gn3")):
        conv, gn = params[cname], params[gname]
        w = conv["wlr"]                                              # [fin, 2*hc]
        w_list.append(jnp.pad(w, ((0, fmax - w.shape[0]), (0, 0))))
        # A[j*hc + h*C + c, h'*N + j'] = att[h, c] * (h == h') * (j == j')
        amat = jnp.einsum("hc,hg,jm->jhcgm", conv["att"], eye_h, eye_n)
        a_list.append(amat.reshape(N_NODES * hc, HEADS * N_NODES))   # [N*hc, heads*N]
        blr = conv["blr"]
        v_list.append(jnp.concatenate(
            [blr[:, :hc], blr[:, hc:], conv["bias"],
             gn["weight"], gn["bias"], gn["mean_scale"]], axis=0))   # [6, hc]
    return jnp.stack(w_list), jnp.stack(a_list), jnp.stack(v_list)


def forward(x, params):
    """GATWithEntropy.forward: (conv -> relu -> gn) x2, conv -> gn, mean pool."""
    Bq, N, Fin = x.shape
    hc = HEADS * HIDDEN
    w_slab, a_slab, v_slab = _pack_params(params)

    G = _graphs_per_step(Bq)
    grid = (Bq // G,)
    kernel = functools.partial(_fused_forward_kernel,
                               heads=HEADS, out_ch=HIDDEN, graphs=G)

    alpha_spec = pl.BlockSpec((G, N, HEADS * N), lambda b: (b, 0, 0))
    alpha_shape = jax.ShapeDtypeStruct((Bq, N, HEADS * N), jnp.float32)

    pooled, a1, a2, a3 = pl.pallas_call(
        kernel,
        out_shape=(
            jax.ShapeDtypeStruct((Bq, hc), jnp.float32),
            alpha_shape, alpha_shape, alpha_shape,
        ),
        grid=grid,
        in_specs=[
            pl.BlockSpec((G, N, Fin), lambda b: (b, 0, 0)),
            pl.BlockSpec(w_slab.shape, lambda b: (0, 0, 0)),
            pl.BlockSpec(a_slab.shape, lambda b: (0, 0, 0)),
            pl.BlockSpec(v_slab.shape, lambda b: (0, 0, 0)),
        ],
        out_specs=(
            pl.BlockSpec((G, hc), lambda b: (b, 0)),
            alpha_spec, alpha_spec, alpha_spec,
        ),
        compiler_params=pltpu.CompilerParams(dimension_semantics=("parallel",)),
    )(x, w_slab, a_slab, v_slab)

    # [B, N(target), heads*N(source)] -> [B, heads, N, N]  (layout plumbing in XLA)
    def unflatten(a):
        return a.reshape(Bq, N, HEADS, N).transpose(0, 2, 1, 3)

    return pooled, [unflatten(a1), unflatten(a2), unflatten(a3)]


# ----------------------- deterministic parameter init ------------------------
def _glorot(key, shape):
    fan_in, fan_out = shape[-2], shape[-1]
    limit = float(np.sqrt(6.0 / (fan_in + fan_out)))
    return jax.random.uniform(key, shape, jnp.float32, minval=-limit, maxval=limit)


def init_params(key):
    keys = jax.random.split(key, 3)

    def conv(k, fin, heads, c):
        k1, k2, k3 = jax.random.split(k, 3)
        hc = heads * c
        wl = _glorot(k1, (fin, hc))
        wr = _glorot(k2, (fin, hc))
        return {
            "wlr": jnp.concatenate([wl, wr], axis=1),        # merged lin_l | lin_r
            "blr": jnp.zeros((1, 2 * hc), jnp.float32),
            "att": _glorot(k3, (heads, c)),
            "bias": jnp.zeros((1, hc), jnp.float32),
        }

    def gn(d):
        return {
            "weight": jnp.ones((1, d), jnp.float32),
            "bias": jnp.zeros((1, d), jnp.float32),
            "mean_scale": jnp.ones((1, d), jnp.float32),
        }

    return {
        "conv1": conv(keys[0], F_IN, HEADS, HIDDEN),
        "conv2": conv(keys[1], HC, HEADS, HIDDEN),
        "conv3": conv(keys[2], HC, HEADS, HIDDEN),
        "gn1": gn(HC), "gn2": gn(HC), "gn3": gn(HC),
    }


# ----------------------------- pure-JAX reference ----------------------------
def _ref_gatv2(x, p, heads, out_ch):
    Bq, N, _ = x.shape
    hc = heads * out_ch
    wl, wr = p["wlr"][:, :hc], p["wlr"][:, hc:]
    bl, br = p["blr"][:, :hc], p["blr"][:, hc:]
    xl = x @ wl + bl
    xr = x @ wr + br
    xl_h = xl.reshape(Bq, N, heads, out_ch)
    xr_h = xr.reshape(Bq, N, heads, out_ch)
    s = xr_h[:, :, None] + xl_h[:, None, :]                  # [B, i, j, H, C]
    s = jnp.where(s > 0, s, NEG_SLOPE * s)
    e = jnp.einsum("bijhc,hc->bijh", s, p["att"])
    e = e - e.max(axis=2, keepdims=True)
    w = jnp.exp(e)
    alpha = w / w.sum(axis=2, keepdims=True)
    out = jnp.einsum("bijh,bjhc->bihc", alpha, xl_h)
    out = out.reshape(Bq, N, hc) + p["bias"]
    return out, jnp.transpose(alpha, (0, 3, 1, 2))           # [B, heads, N, N]


def _ref_graphnorm(x, p, relu):
    if relu:
        x = jnp.maximum(x, 0.0)
    mean = jnp.mean(x, axis=1, keepdims=True)
    out = x - mean * p["mean_scale"]
    var = jnp.mean(out * out, axis=1, keepdims=True)
    return p["weight"] * out / jnp.sqrt(var + GN_EPS) + p["bias"]


def ref_forward(x, params):
    h, a1 = _ref_gatv2(x, params["conv1"], HEADS, HIDDEN)
    h = _ref_graphnorm(h, params["gn1"], True)
    h, a2 = _ref_gatv2(h, params["conv2"], HEADS, HIDDEN)
    h = _ref_graphnorm(h, params["gn2"], True)
    h, a3 = _ref_gatv2(h, params["conv3"], HEADS, HIDDEN)
    h = _ref_graphnorm(h, params["gn3"], False)
    return h.mean(axis=1), [a1, a2, a3]


# ----------------------------------- main -------------------------------------
if __name__ == "__main__":
    # TODO(synk): calculate_entropy / plot_entropy_heatmap / rank_connections_by_entropy
    # are post-hoc analysis & plotting, not part of forward(); not implemented here.
    key = jax.random.PRNGKey(0)
    kx, kp = jax.random.split(key)
    x = jax.random.normal(kx, (B, N_NODES, F_IN), dtype=jnp.float32)
    params = init_params(kp)

    fwd = jax.jit(forward)
    out, attention_scores = fwd(x, params)
    out = jax.block_until_ready(out)

    ref_out, ref_alphas = ref_forward(x, params)
    np.testing.assert_allclose(np.asarray(out), np.asarray(ref_out),
                               rtol=1e-2, atol=1e-2)
    for a, ra in zip(attention_scores, ref_alphas):
        np.testing.assert_allclose(np.asarray(a), np.asarray(ra),
                                   rtol=1e-2, atol=1e-2)

    print("KERNEL_OK")
</pallas_src>

<mosaic_0001>
module attributes {stable_mosaic.version = 11 : i64} {
  func.func @_fused_forward_kernel(%arg0: i32, %arg1: memref<2x22x22xf32, #tpu.memory_space<vmem>>, %arg2: memref<3x22x32xf32, #tpu.memory_space<vmem>>, %arg3: memref<3x352x44xf32, #tpu.memory_space<vmem>>, %arg4: memref<3x6x16xf32, #tpu.memory_space<vmem>>, %arg5: memref<2x16xf32, #tpu.memory_space<vmem>>, %arg6: memref<2x22x44xf32, #tpu.memory_space<vmem>>, %arg7: memref<2x22x44xf32, #tpu.memory_space<vmem>>, %arg8: memref<2x22x44xf32, #tpu.memory_space<vmem>>) attributes {dimension_semantics = [#tpu.dimension_semantics<parallel>], iteration_bounds = array<i64: 1>, scalar_prefetch = 0 : i64, scratch_operands = 0 : i64, tpu.core_type = #tpu.core_type<tc>, window_params = [{transform_indices = @transform_0, window_bounds = array<i64: 2, 22, 22>}, {pipeline_mode = #tpu.pipeline_mode<synchronous>, transform_indices = @transform_1, window_bounds = array<i64: 3, 22, 32>}, {pipeline_mode = #tpu.pipeline_mode<synchronous>, transform_indices = @transform_2, window_bounds = array<i64: 3, 352, 44>}, {pipeline_mode = #tpu.pipeline_mode<synchronous>, transform_indices = @transform_3, window_bounds = array<i64: 3, 6, 16>}, {transform_indices = @transform_4, window_bounds = array<i64: 2, 16>}, {transform_indices = @transform_5, window_bounds = array<i64: 2, 22, 44>}, {transform_indices = @transform_6, window_bounds = array<i64: 2, 22, 44>}, {transform_indices = @transform_7, window_bounds = array<i64: 2, 22, 44>}]} {
    %c0 = arith.constant 0 : index
    %c0_0 = arith.constant 0 : index
    %c0_1 = arith.constant 0 : index
    %0 = vector.load %arg1[%c0, %c0_0, %c0_1] : memref<2x22x22xf32, #tpu.memory_space<vmem>>, vector<1x22x22xf32>
    %1 = vector.shape_cast %0 : vector<1x22x22xf32> to vector<22x22xf32>
    %c0_2 = arith.constant 0 : index
    %c0_3 = arith.constant 0 : index
    %c0_4 = arith.constant 0 : index
    %2 = vector.load %arg2[%c0_2, %c0_3, %c0_4] : memref<3x22x32xf32, #tpu.memory_space<vmem>>, vector<1x22x32xf32>
    %3 = vector.shape_cast %2 : vector<1x22x32xf32> to vector<22x32xf32>
    %c0_5 = arith.constant 0 : index
    %c0_6 = arith.constant 0 : index
    %c0_7 = arith.constant 0 : index
    %4 = vector.load %arg4[%c0_5, %c0_6, %c0_7] : memref<3x6x16xf32, #tpu.memory_space<vmem>>, vector<1x6x16xf32>
    %5 = vector.shape_cast %4 : vector<1x6x16xf32> to vector<6x16xf32>
    %cst = arith.constant dense<0.000000e+00> : vector<22x32xf32>
    %6 = tpu.matmul %1, %3, %cst {dimension_numbers = #tpu.dot_dimension_numbers<[1], [0], [0], [1], [0, 0, 1, 1], [], []>} : vector<22x22xf32>, vector<22x32xf32>, vector<22x32xf32> -> vector<22x32xf32>
    %7 = vector.extract_strided_slice %6 {offsets = [0, 0], sizes = [22, 16], strides = [1, 1]} : vector<22x32xf32> to vector<22x16xf32>
    %8 = vector.extract_strided_slice %5 {offsets = [0, 0], sizes = [1, 16], strides = [1, 1]} : vector<6x16xf32> to vector<1x16xf32>
    %9 = vector.broadcast %8 : vector<1x16xf32> to vector<22x16xf32>
    %10 = arith.addf %7, %9 : vector<22x16xf32>
    %11 = vector.extract_strided_slice %6 {offsets = [0, 16], sizes = [22, 16], strides = [1, 1]} : vector<22x32xf32> to vector<22x16xf32>
    %12 = vector.extract_strided_slice %5 {offsets = [1, 0], sizes = [1, 16], strides = [1, 1]} : vector<6x16xf32> to vector<1x16xf32>
    %13 = vector.broadcast %12 : vector<1x16xf32> to vector<22x16xf32>
    %14 = arith.addf %11, %13 : vector<22x16xf32>
    %15 = tpu.concatenate %14, %14, %14, %14, %14, %14, %14, %14, %14, %14, %14, %14, %14, %14, %14, %14 in 1 : vector<22x16xf32>, vector<22x16xf32>, vector<22x16xf32>, vector<22x16xf32>, vector<22x16xf32>, vector<22x16xf32>, vector<22x16xf32>, vector<22x16xf32>, vector<22x16xf32>, vector<22x16xf32>, vector<22x16xf32>, vector<22x16xf32>, vector<22x16xf32>, vector<22x16xf32>, vector<22x16xf32>, vector<22x16xf32> -> vector<22x256xf32>
    %16 = tpu.concatenate %14, %14, %14, %14, %14, %14 in 1 : vector<22x16xf32>, vector<22x16xf32>, vector<22x16xf32>, vector<22x16xf32>, vector<22x16xf32>, vector<22x16xf32> -> vector<22x96xf32>
    %17 = tpu.concatenate %15, %16 in 1 : vector<22x256xf32>, vector<22x96xf32> -> vector<22x352xf32>
    %18 = vector.extract_strided_slice %10 {offsets = [0, 0], sizes = [1, 16], strides = [1, 1]} : vector<22x16xf32> to vector<1x16xf32>
    %19 = vector.extract_strided_slice %10 {offsets = [1, 0], sizes = [1, 16], strides = [1, 1]} : vector<22x16xf32> to vector<1x16xf32>
    %20 = vector.extract_strided_slice %10 {offsets = [2, 0], sizes = [1, 16], strides = [1, 1]} : vector<22x16xf32> to vector<1x16xf32>
    %21 = vector.extract_strided_slice %10 {offsets = [3, 0], sizes = [1, 16], strides = [1, 1]} : vector<22x16xf32> to vector<1x16xf32>
    %22 = vector.extract_strided_slice %10 {offsets = [4, 0], sizes = [1, 16], strides = [1, 1]} : vector<22x16xf32> to vector<1x16xf32>
    %23 = vector.extract_strided_slice %10 {offsets = [5, 0], sizes = [1, 16], strides = [1, 1]} : vector<22x16xf32> to vector<1x16xf32>
    %24 = vector.extract_strided_slice %10 {offsets = [6, 0], sizes = [1, 16], strides = [1, 1]} : vector<22x16xf32> to vector<1x16xf32>
    %25 = vector.extract_strided_slice %10 {offsets = [7, 0], sizes = [1, 16], strides = [1, 1]} : vector<22x16xf32> to vector<1x16xf32>
    %26 = vector.extract_strided_slice %10 {offsets = [8, 0], sizes = [1, 16], strides = [1, 1]} : vector<22x16xf32> to vector<1x16xf32>
    %27 = vector.extract_strided_slice %10 {offsets = [9, 0], sizes = [1, 16], strides = [1, 1]} : vector<22x16xf32> to vector<1x16xf32>
    %28 = vector.extract_strided_slice %10 {offsets = [10, 0], sizes = [1, 16], strides = [1, 1]} : vector<22x16xf32> to vector<1x16xf32>
    %29 = vector.extract_strided_slice %10 {offsets = [11, 0], sizes = [1, 16], strides = [1, 1]} : vector<22x16xf32> to vector<1x16xf32>
    %30 = vector.extract_strided_slice %10 {offsets = [12, 0], sizes = [1, 16], strides = [1, 1]} : vector<22x16xf32> to vector<1x16xf32>
    %31 = vector.extract_strided_slice %10 {offsets = [13, 0], sizes = [1, 16], strides = [1, 1]} : vector<22x16xf32> to vector<1x16xf32>
    %32 = vector.extract_strided_slice %10 {offsets = [14, 0], sizes = [1, 16], strides = [1, 1]} : vector<22x16xf32> to vector<1x16xf32>
    %33 = vector.extract_strided_slice %10 {offsets = [15, 0], sizes = [1, 16], strides = [1, 1]} : vector<22x16xf32> to vector<1x16xf32>
    %34 = vector.extract_strided_slice %10 {offsets = [16, 0], sizes = [1, 16], strides = [1, 1]} : vector<22x16xf32> to vector<1x16xf32>
    %35 = vector.extract_strided_slice %10 {offsets = [17, 0], sizes = [1, 16], strides = [1, 1]} : vector<22x16xf32> to vector<1x16xf32>
    %36 = vector.extract_strided_slice %10 {offsets = [18, 0], sizes = [1, 16], strides = [1, 1]} : vector<22x16xf32> to vector<1x16xf32>
    %37 = vector.extract_strided_slice %10 {offsets = [19, 0], sizes = [1, 16], strides = [1, 1]} : vector<22x16xf32> to vector<1x16xf32>
    %38 = vector.extract_strided_slice %10 {offsets = [20, 0], sizes = [1, 16], strides = [1, 1]} : vector<22x16xf32> to vector<1x16xf32>
    %39 = vector.extract_strided_slice %10 {offsets = [21, 0], sizes = [1, 16], strides = [1, 1]} : vector<22x16xf32> to vector<1x16xf32>
    %40 = tpu.concatenate %18, %19, %20, %21, %22, %23, %24, %25, %26, %27, %28, %29, %30, %31, %32, %33 in 1 : vector<1x16xf32>, vector<1x16xf32>, vector<1x16xf32>, vector<1x16xf32>, vector<1x16xf32>, vector<1x16xf32>, vector<1x16xf32>, vector<1x16xf32>, vector<1x16xf32>, vector<1x16xf32>, vector<1x16xf32>, vector<1x16xf32>, vector<1x16xf32>, vector<1x16xf32>, vector<1x16xf32>, vector<1x16xf32> -> vector<1x256xf32>
    %41 = tpu.concatenate %34, %35, %36, %37, %38, %39 in 1 : vector<1x16xf32>, vector<1x16xf32>, vector<1x16xf32>, vector<1x16xf32>, vector<1x16xf32>, vector<1x16xf32> -> vector<1x96xf32>
    %42 = tpu.concatenate %40, %41 in 1 : vector<1x256xf32>, vector<1x96xf32> -> vector<1x352xf32>
    %43 = vector.broadcast %42 : vector<1x352xf32> to vector<22x352xf32>
    %44 = arith.addf %17, %43 : vector<22x352xf32>
    %cst_8 = arith.constant 2.000000e-01 : f32
    %45 = vector.broadcast %cst_8 : f32 to vector<22x352xf32>
    %46 = arith.mulf %45, %44 : vector<22x352xf32>
    %47 = arith.maximumf %44, %46 : vector<22x352xf32>
    %c0_9 = arith.constant 0 : index
    %c0_10 = arith.constant 0 : index
    %c0_11 = arith.constant 0 : index
    %48 = vector.load %arg3[%c0_9, %c0_10, %c0_11] : memref<3x352x44xf32, #tpu.memory_space<vmem>>, vector<1x352x44xf32>
    %49 = vector.shape_cast %48 : vector<1x352x44xf32> to vector<352x44xf32>
    %cst_12 = arith.constant dense<0.000000e+00> : vector<22x44xf32>
    %50 = tpu.matmul %47, %49, %cst_12 {dimension_numbers = #tpu.dot_dimension_numbers<[1], [0], [0], [1], [0, 0, 1, 1], [], []>} : vector<22x352xf32>, vector<352x44xf32>, vector<22x44xf32> -> vector<22x44xf32>
    %51 = vector.extract_strided_slice %50 {offsets = [0, 0], sizes = [22, 22], strides = [1, 1]} : vector<22x44xf32> to vector<22x22xf32>
    %cst_13 = arith.constant dense<0xFF800000> : vector<22xf32>
    %52 = vector.multi_reduction <maximumf>, %51, %cst_13 [1] : vector<22x22xf32> to vector<22xf32>
    %53 = vector.shape_cast %52 : vector<22xf32> to vector<22x1xf32>
    %54 = vector.broadcast %53 : vector<22x1xf32> to vector<22x22xf32>
    %55 = arith.subf %51, %54 : vector<22x22xf32>
    %56 = math.exp %55 : vector<22x22xf32>
    %cst_14 = arith.constant dense<0.000000e+00> : vector<22xf32>
    %57 = vector.multi_reduction <add>, %56, %cst_14 [1] : vector<22x22xf32> to vector<22xf32>
    %58 = vector.shape_cast %57 : vector<22xf32> to vector<22x1xf32>
    %59 = tpu.reciprocal %58 {approx = true} : vector<22x1xf32> -> vector<22x1xf32>
    %60 = vector.broadcast %59 : vector<22x1xf32> to vector<22x22xf32>
    %61 = arith.mulf %56, %60 : vector<22x22xf32>
    %62 = vector.extract_strided_slice %10 {offsets = [0, 0], sizes = [22, 8], strides = [1, 1]} : vector<22x16xf32> to vector<22x8xf32>
    %cst_15 = arith.constant dense<0.000000e+00> : vector<22x8xf32>
    %63 = tpu.matmul %61, %62, %cst_15 {dimension_numbers = #tpu.dot_dimension_numbers<[1], [0], [0], [1], [0, 0, 1, 1], [], []>} : vector<22x22xf32>, vector<22x8xf32>, vector<22x8xf32> -> vector<22x8xf32>
    %64 = vector.extract_strided_slice %50 {offsets = [0, 22], sizes = [22, 22], strides = [1, 1]} : vector<22x44xf32> to vector<22x22xf32>
    %cst_16 = arith.constant dense<0xFF800000> : vector<22xf32>
    %65 = vector.multi_reduction <maximumf>, %64, %cst_16 [1] : vector<22x22xf32> to vector<22xf32>
    %66 = vector.shape_cast %65 : vector<22xf32> to vector<22x1xf32>
    %67 = vector.broadcast %66 : vector<22x1xf32> to vector<22x22xf32>
    %68 = arith.subf %64, %67 : vector<22x22xf32>
    %69 = math.exp %68 : vector<22x22xf32>
    %cst_17 = arith.constant dense<0.000000e+00> : vector<22xf32>
    %70 = vector.multi_reduction <add>, %69, %cst_17 [1] : vector<22x22xf32> to vector<22xf32>
    %71 = vector.shape_cast %70 : vector<22xf32> to vector<22x1xf32>
    %72 = tpu.reciprocal %71 {approx = true} : vector<22x1xf32> -> vector<22x1xf32>
    %73 = vector.broadcast %72 : vector<22x1xf32> to vector<22x22xf32>
    %74 = arith.mulf %69, %73 : vector<22x22xf32>
    %75 = vector.extract_strided_slice %10 {offsets = [0, 8], sizes = [22, 8], strides = [1, 1]} : vector<22x16xf32> to vector<22x8xf32>
    %cst_18 = arith.constant dense<0.000000e+00> : vector<22x8xf32>
    %76 = tpu.matmul %74, %75, %cst_18 {dimension_numbers = #tpu.dot_dimension_numbers<[1], [0], [0], [1], [0, 0, 1, 1], [], []>} : vector<22x22xf32>, vector<22x8xf32>, vector<22x8xf32> -> vector<22x8xf32>
    %77 = tpu.concatenate %61, %74 in 1 : vector<22x22xf32>, vector<22x22xf32> -> vector<22x44xf32>
    %c0_19 = arith.constant 0 : index
    %c0_20 = arith.constant 0 : index
    %c0_21 = arith.constant 0 : index
    %78 = vector.load %arg6[%c0_19, %c0_20, %c0_21] : memref<2x22x44xf32, #tpu.memory_space<vmem>>, vector<1x22x44xf32>
    %79 = vector.shape_cast %78 : vector<1x22x44xf32> to vector<22x44xf32>
    %80 = vector.shape_cast %77 : vector<22x44xf32> to vector<1x22x44xf32>
    tpu.vector_store %arg6[%c0_19, %c0_20, %c0_21], %80 {strides = array<i32>} : memref<2x22x44xf32, #tpu.memory_space<vmem>>, vector<1x22x44xf32>,
    %81 = tpu.concatenate %63, %76 in 1 : vector<22x8xf32>, vector<22x8xf32> -> vector<22x16xf32>
    %82 = vector.extract_strided_slice %5 {offsets = [2, 0], sizes = [1, 16], strides = [1, 1]} : vector<6x16xf32> to vector<1x16xf32>
    %83 = vector.broadcast %82 : vector<1x16xf32> to vector<22x16xf32>
    %84 = arith.addf %81, %83 : vector<22x16xf32>
    %cst_22 = arith.constant 0.000000e+00 : f32
    %85 = vector.broadcast %cst_22 : f32 to vector<22x16xf32>
    %86 = arith.maximumf %84, %85 : vector<22x16xf32>
    %cst_23 = arith.constant dense<0.000000e+00> : vector<16xf32>
    %87 = vector.multi_reduction <add>, %86, %cst_23 [0] : vector<22x16xf32> to vector<16xf32>
    %88 = vector.shape_cast %87 : vector<16xf32> to vector<1x16xf32>
    %cst_24 = arith.constant 2.200000e+01 : f32
    %89 = vector.broadcast %cst_24 : f32 to vector<1x16xf32>
    %90 = arith.divf %88, %89 : vector<1x16xf32>
    %91 = vector.extract_strided_slice %5 {offsets = [5, 0], sizes = [1, 16], strides = [1, 1]} : vector<6x16xf32> to vector<1x16xf32>
    %92 = arith.mulf %90, %91 : vector<1x16xf32>
    %93 = vector.broadcast %92 : vector<1x16xf32> to vector<22x16xf32>
    %94 = arith.subf %86, %93 : vector<22x16xf32>
    %95 = arith.mulf %94, %94 : vector<22x16xf32>
    %cst_25 = arith.constant dense<0.000000e+00> : vector<16xf32>
    %96 = vector.multi_reduction <add>, %95, %cst_25 [0] : vector<22x16xf32> to vector<16xf32>
    %97 = vector.shape_cast %96 : vector<16xf32> to vector<1x16xf32>
    %cst_26 = arith.constant 2.200000e+01 : f32
    %98 = vector.broadcast %cst_26 : f32 to vector<1x16xf32>
    %99 = arith.divf %97, %98 : vector<1x16xf32>
    %100 = vector.extract_strided_slice %5 {offsets = [3, 0], sizes = [1, 16], strides = [1, 1]} : vector<6x16xf32> to vector<1x16xf32>
    %101 = vector.broadcast %100 : vector<1x16xf32> to vector<22x16xf32>
    %102 = arith.mulf %101, %94 : vector<22x16xf32>
    %cst_27 = arith.constant 9.99999974E-6 : f32
    %103 = vector.broadcast %cst_27 : f32 to vector<1x16xf32>
    %104 = arith.addf %99, %103 : vector<1x16xf32>
    %105 = math.rsqrt %104 : vector<1x16xf32>
    %106 = vector.broadcast %105 : vector<1x16xf32> to vector<22x16xf32>
    %107 = arith.mulf %102, %106 : vector<22x16xf32>
    %108 = vector.extract_strided_slice %5 {offsets = [4, 0], sizes = [1, 16], strides = [1, 1]} : vector<6x16xf32> to vector<1x16xf32>
    %109 = vector.broadcast %108 : vector<1x16xf32> to vector<22x16xf32>
    %110 = arith.addf %107, %109 : vector<22x16xf32>
    %c1 = arith.constant 1 : index
    %c0_28 = arith.constant 0 : index
    %c0_29 = arith.constant 0 : index
    %111 = vector.load %arg2[%c1, %c0_28, %c0_29] : memref<3x22x32xf32, #tpu.memory_space<vmem>>, vector<1x22x32xf32>
    %112 = vector.shape_cast %111 : vector<1x22x32xf32> to vector<22x32xf32>
    %113 = vector.extract_strided_slice %112 {offsets = [0, 0], sizes = [16, 32], strides = [1, 1]} : vector<22x32xf32> to vector<16x32xf32>
    %c1_30 = arith.constant 1 : index
    %c0_31 = arith.constant 0 : index
    %c0_32 = arith.constant 0 : index
    %114 = vector.load %arg4[%c1_30, %c0_31, %c0_32] : memref<3x6x16xf32, #tpu.memory_space<vmem>>, vector<1x6x16xf32>
    %115 = vector.shape_cast %114 : vector<1x6x16xf32> to vector<6x16xf32>
    %cst_33 = arith.constant dense<0.000000e+00> : vector<22x32xf32>
    %116 = tpu.matmul %110, %113, %cst_33 {dimension_numbers = #tpu.dot_dimension_numbers<[1], [0], [0], [1], [0, 0, 1, 1], [], []>} : vector<22x16xf32>, vector<16x32xf32>, vector<22x32xf32> -> vector<22x32xf32>
    %117 = vector.extract_strided_slice %116 {offsets = [0, 0], sizes = [22, 16], strides = [1, 1]} : vector<22x32xf32> to vector<22x16xf32>
    %118 = vector.extract_strided_slice %115 {offsets = [0, 0], sizes = [1, 16], strides = [1, 1]} : vector<6x16xf32> to vector<1x16xf32>
    %119 = vector.broadcast %118 : vector<1x16xf32> to vector<22x16xf32>
    %120 = arith.addf %117, %119 : vector<22x16xf32>
    %121 = vector.extract_strided_slice %116 {offsets = [0, 16], sizes = [22, 16], strides = [1, 1]} : vector<22x32xf32> to vector<22x16xf32>
    %122 = vector.extract_strided_slice %115 {offsets = [1, 0], sizes = [1, 16], strides = [1, 1]} : vector<6x16xf32> to vector<1x16xf32>
    %123 = vector.broadcast %122 : vector<1x16xf32> to vector<22x16xf32>
    %124 = arith.addf %121, %123 : vector<22x16xf32>
    %125 = tpu.concatenate %124, %124, %124, %124, %124, %124, %124, %124, %124, %124, %124, %124, %124, %124, %124, %124 in 1 : vector<22x16xf32>, vector<22x16xf32>, vector<22x16xf32>, vector<22x16xf32>, vector<22x16xf32>, vector<22x16xf32>, vector<22x16xf32>, vector<22x16xf32>, vector<22x16xf32>, vector<22x16xf32>, vector<22x16xf32>, vector<22x16xf32>, vector<22x16xf32>, vector<22x16xf32>, vector<22x16xf32>, vector<22x16xf32> -> vector<22x256xf32>
    %126 = tpu.concatenate %124, %124, %124, %124, %124, %124 in 1 : vector<22x16xf32>, vector<22x16xf32>, vector<22x16xf32>, vector<22x16xf32>, vector<22x16xf32>, vector<22x16xf32> -> vector<22x96xf32>
    %127 = tpu.concatenate %125, %126 in 1 : vector<22x256xf32>, vector<22x96xf32> -> vector<22x352xf32>
    %128 = vector.extract_strided_slice %120 {offsets = [0, 0], sizes = [1, 16], strides = [1, 1]} : vector<22x16xf32> to vector<1x16xf32>
    %129 = vector.extract_strided_slice %120 {offsets = [1, 0], sizes = [1, 16], strides = [1, 1]} : vector<22x16xf32> to vector<1x16xf32>
    %130 = vector.extract_strided_slice %120 {offsets = [2, 0], sizes = [1, 16], strides = [1, 1]} : vector<22x16xf32> to vector<1x16xf32>
    %131 = vector.extract_strided_slice %120 {offsets = [3, 0], sizes = [1, 16], strides = [1, 1]} : vector<22x16xf32> to vector<1x16xf32>
    %132 = vector.extract_strided_slice %120 {offsets = [4, 0], sizes = [1, 16], strides = [1, 1]} : vector<22x16xf32> to vector<1x16xf32>
    %133 = vector.extract_strided_slice %120 {offsets = [5, 0], sizes = [1, 16], strides = [1, 1]} : vector<22x16xf32> to vector<1x16xf32>
    %134 = vector.extract_strided_slice %120 {offsets = [6, 0], sizes = [1, 16], strides = [1, 1]} : vector<22x16xf32> to vector<1x16xf32>
    %135 = vector.extract_strided_slice %120 {offsets = [7, 0], sizes = [1, 16], strides = [1, 1]} : vector<22x16xf32> to vector<1x16xf32>
    %136 = vector.extract_strided_slice %120 {offsets = [8, 0], sizes = [1, 16], strides = [1, 1]} : vector<22x16xf32> to vector<1x16xf32>
    %137 = vector.extract_strided_slice %120 {offsets = [9, 0], sizes = [1, 16], strides = [1, 1]} : vector<22x16xf32> to vector<1x16xf32>
    %138 = vector.extract_strided_slice %120 {offsets = [10, 0], sizes = [1, 16], strides = [1, 1]} : vector<22x16xf32> to vector<1x16xf32>
    %139 = vector.extract_strided_slice %120 {offsets = [11, 0], sizes = [1, 16], strides = [1, 1]} : vector<22x16xf32> to vector<1x16xf32>
    %140 = vector.extract_strided_slice %120 {offsets = [12, 0], sizes = [1, 16], strides = [1, 1]} : vector<22x16xf32> to vector<1x16xf32>
    %141 = vector.extract_strided_slice %120 {offsets = [13, 0], sizes = [1, 16], strides = [1, 1]} : vector<22x16xf32> to vector<1x16xf32>
    %142 = vector.extract_strided_slice %120 {offsets = [14, 0], sizes = [1, 16], strides = [1, 1]} : vector<22x16xf32> to vector<1x16xf32>
    %143 = vector.extract_strided_slice %120 {offsets = [15, 0], sizes = [1, 16], strides = [1, 1]} : vector<22x16xf32> to vector<1x16xf32>
    %144 = vector.extract_strided_slice %120 {offsets = [16, 0], sizes = [1, 16], strides = [1, 1]} : vector<22x16xf32> to vector<1x16xf32>
    %145 = vector.extract_strided_slice %120 {offsets = [17, 0], sizes = [1, 16], strides = [1, 1]} : vector<22x16xf32> to vector<1x16xf32>
    %146 = vector.extract_strided_slice %120 {offsets = [18, 0], sizes = [1, 16], strides = [1, 1]} : vector<22x16xf32> to vector<1x16xf32>
    %147 = vector.extract_strided_slice %120 {offsets = [19, 0], sizes = [1, 16], strides = [1, 1]} : vector<22x16xf32> to vector<1x16xf32>
    %148 = vector.extract_strided_slice %120 {offsets = [20, 0], sizes = [1, 16], strides = [1, 1]} : vector<22x16xf32> to vector<1x16xf32>
    %149 = vector.extract_strided_slice %120 {offsets = [21, 0], sizes = [1, 16], strides = [1, 1]} : vector<22x16xf32> to vector<1x16xf32>
    %150 = tpu.concatenate %128, %129, %130, %131, %132, %133, %134, %135, %136, %137, %138, %139, %140, %141, %142, %143 in 1 : vector<1x16xf32>, vector<1x16xf32>, vector<1x16xf32>, vector<1x16xf32>, vector<1x16xf32>, vector<1x16xf32>, vector<1x16xf32>, vector<1x16xf32>, vector<1x16xf32>, vector<1x16xf32>, vector<1x16xf32>, vector<1x16xf32>, vector<1x16xf32>, vector<1x16xf32>, vector<1x16xf32>, vector<1x16xf32> -> vector<1x256xf32>
    %151 = tpu.concatenate %144, %145, %146, %147, %148, %149 in 1 : vector<1x16xf32>, vector<1x16xf32>, vector<1x16xf32>, vector<1x16xf32>, vector<1x16xf32>, vector<1x16xf32> -> vector<1x96xf32>
    %152 = tpu.concatenate %150, %151 in 1 : vector<1x256xf32>, vector<1x96xf32> -> vector<1x352xf32>
    %153 = vector.broadcast %152 : vector<1x352xf32> to vector<22x352xf32>
    %154 = arith.addf %127, %153 : vector<22x352xf32>
    %cst_34 = arith.constant 2.000000e-01 : f32
    %155 = vector.broadcast %cst_34 : f32 to vector<22x352xf32>
    %156 = arith.mulf %155, %154 : vector<22x352xf32>
    %157 = arith.maximumf %154, %156 : vector<22x352xf32>
    %c1_35 = arith.constant 1 : index
    %c0_36 = arith.constant 0 : index
    %c0_37 = arith.constant 0 : index
    %158 = vector.load %arg3[%c1_35, %c0_36, %c0_37] : memref<3x352x44xf32, #tpu.memory_space<vmem>>, vector<1x352x44xf32>
    %159 = vector.shape_cast %158 : vector<1x352x44xf32> to vector<352x44xf32>
    %cst_38 = arith.constant dense<0.000000e+00> : vector<22x44xf32>
    %160 = tpu.matmul %157, %159, %cst_38 {dimension_numbers = #tpu.dot_dimension_numbers<[1], [0], [0], [1], [0, 0, 1, 1], [], []>} : vector<22x352xf32>, vector<352x44xf32>, vector<22x44xf32> -> vector<22x44xf32>
    %161 = vector.extract_strided_slice %160 {offsets = [0, 0], sizes = [22, 22], strides = [1, 1]} : vector<22x44xf32> to vector<22x22xf32>
    %cst_39 = arith.constant dense<0xFF800000> : vector<22xf32>
    %162 = vector.multi_reduction <maximumf>, %161, %cst_39 [1] : vector<22x22xf32> to vector<22xf32>
    %163 = vector.shape_cast %162 : vector<22xf32> to vector<22x1xf32>
    %164 = vector.broadcast %163 : vector<22x1xf32> to vector<22x22xf32>
    %165 = arith.subf %161, %164 : vector<22x22xf32>
    %166 = math.exp %165 : vector<22x22xf32>
    %cst_40 = arith.constant dense<0.000000e+00> : vector<22xf32>
    %167 = vector.multi_reduction <add>, %166, %cst_40 [1] : vector<22x22xf32> to vector<22xf32>
    %168 = vector.shape_cast %167 : vector<22xf32> to vector<22x1xf32>
    %169 = tpu.reciprocal %168 {approx = true} : vector<22x1xf32> -> vector<22x1xf32>
    %170 = vector.broadcast %169 : vector<22x1xf32> to vector<22x22xf32>
    %171 = arith.mulf %166, %170 : vector<22x22xf32>
    %172 = vector.extract_strided_slice %120 {offsets = [0, 0], sizes = [22, 8], strides = [1, 1]} : vector<22x16xf32> to vector<22x8xf32>
    %cst_41 = arith.constant dense<0.000000e+00> : vector<22x8xf32>
    %173 = tpu.matmul %171, %172, %cst_41 {dimension_numbers = #tpu.dot_dimension_numbers<[1], [0], [0], [1], [0, 0, 1, 1], [], []>} : vector<22x22xf32>, vector<22x8xf32>, vector<22x8xf32> -> vector<22x8xf32>
    %174 = vector.extract_strided_slice %160 {offsets = [0, 22], sizes = [22, 22], strides = [1, 1]} : vector<22x44xf32> to vector<22x22xf32>
    %cst_42 = arith.constant dense<0xFF800000> : vector<22xf32>
    %175 = vector.multi_reduction <maximumf>, %174, %cst_42 [1] : vector<22x22xf32> to vector<22xf32>
    %176 = vector.shape_cast %175 : vector<22xf32> to vector<22x1xf32>
    %177 = vector.broadcast %176 : vector<22x1xf32> to vector<22x22xf32>
    %178 = arith.subf %174, %177 : vector<22x22xf32>
    %179 = math.exp %178 : vector<22x22xf32>
    %cst_43 = arith.constant dense<0.000000e+00> : vector<22xf32>
    %180 = vector.multi_reduction <add>, %179, %cst_43 [1] : vector<22x22xf32> to vector<22xf32>
    %181 = vector.shape_cast %180 : vector<22xf32> to vector<22x1xf32>
    %182 = tpu.reciprocal %181 {approx = true} : vector<22x1xf32> -> vector<22x1xf32>
    %183 = vector.broadcast %182 : vector<22x1xf32> to vector<22x22xf32>
    %184 = arith.mulf %179, %183 : vector<22x22xf32>
    %185 = vector.extract_strided_slice %120 {offsets = [0, 8], sizes = [22, 8], strides = [1, 1]} : vector<22x16xf32> to vector<22x8xf32>
    %cst_44 = arith.constant dense<0.000000e+00> : vector<22x8xf32>
    %186 = tpu.matmul %184, %185, %cst_44 {dimension_numbers = #tpu.dot_dimension_numbers<[1], [0], [0], [1], [0, 0, 1, 1], [], []>} : vector<22x22xf32>, vector<22x8xf32>, vector<22x8xf32> -> vector<22x8xf32>
    %187 = tpu.concatenate %171, %184 in 1 : vector<22x22xf32>, vector<22x22xf32> -> vector<22x44xf32>
    %c0_45 = arith.constant 0 : index
    %c0_46 = arith.constant 0 : index
    %c0_47 = arith.constant 0 : index
    %188 = vector.load %arg7[%c0_45, %c0_46, %c0_47] : memref<2x22x44xf32, #tpu.memory_space<vmem>>, vector<1x22x44xf32>
    %189 = vector.shape_cast %188 : vector<1x22x44xf32> to vector<22x44xf32>
    %190 = vector.shape_cast %187 : vector<22x44xf32> to vector<1x22x44xf32>
    tpu.vector_store %arg7[%c0_45, %c0_46, %c0_47], %190 {strides = array<i32>} : memref<2x22x44xf32, #tpu.memory_space<vmem>>, vector<1x22x44xf32>,
    %191 = tpu.concatenate %173, %186 in 1 : vector<22x8xf32>, vector<22x8xf32> -> vector<22x16xf32>
    %192 = vector.extract_strided_slice %115 {offsets = [2, 0], sizes = [1, 16], strides = [1, 1]} : vector<6x16xf32> to vector<1x16xf32>
    %193 = vector.broadcast %192 : vector<1x16xf32> to vector<22x16xf32>
    %194 = arith.addf %191, %193 : vector<22x16xf32>
    %cst_48 = arith.constant 0.000000e+00 : f32
    %195 = vector.broadcast %cst_48 : f32 to vector<22x16xf32>
    %196 = arith.maximumf %194, %195 : vector<22x16xf32>
    %cst_49 = arith.constant dense<0.000000e+00> : vector<16xf32>
    %197 = vector.multi_reduction <add>, %196, %cst_49 [0] : vector<22x16xf32> to vector<16xf32>
    %198 = vector.shape_cast %197 : vector<16xf32> to vector<1x16xf32>
    %cst_50 = arith.constant 2.200000e+01 : f32
    %199 = vector.broadcast %cst_50 : f32 to vector<1x16xf32>
    %200 = arith.divf %198, %199 : vector<1x16xf32>
    %201 = vector.extract_strided_slice %115 {offsets = [5, 0], sizes = [1, 16], strides = [1, 1]} : vector<6x16xf32> to vector<1x16xf32>
    %202 = arith.mulf %200, %201 : vector<1x16xf32>
    %203 = vector.broadcast %202 : vector<1x16xf32> to vector<22x16xf32>
    %204 = arith.subf %196, %203 : vector<22x16xf32>
    %205 = arith.mulf %204, %204 : vector<22x16xf32>
    %cst_51 = arith.constant dense<0.000000e+00> : vector<16xf32>
    %206 = vector.multi_reduction <add>, %205, %cst_51 [0] : vector<22x16xf32> to vector<16xf32>
    %207 = vector.shape_cast %206 : vector<16xf32> to vector<1x16xf32>
    %cst_52 = arith.constant 2.200000e+01 : f32
    %208 = vector.broadcast %cst_52 : f32 to vector<1x16xf32>
    %209 = arith.divf %207, %208 : vector<1x16xf32>
    %210 = vector.extract_strided_slice %115 {offsets = [3, 0], sizes = [1, 16], strides = [1, 1]} : vector<6x16xf32> to vector<1x16xf32>
    %211 = vector.broadcast %210 : vector<1x16xf32> to vector<22x16xf32>
    %212 = arith.mulf %211, %204 : vector<22x16xf32>
    %cst_53 = arith.constant 9.99999974E-6 : f32
    %213 = vector.broadcast %cst_53 : f32 to vector<1x16xf32>
    %214 = arith.addf %209, %213 : vector<1x16xf32>
    %215 = math.rsqrt %214 : vector<1x16xf32>
    %216 = vector.broadcast %215 : vector<1x16xf32> to vector<22x16xf32>
    %217 = arith.mulf %212, %216 : vector<22x16xf32>
    %218 = vector.extract_strided_slice %115 {offsets = [4, 0], sizes = [1, 16], strides = [1, 1]} : vector<6x16xf32> to vector<1x16xf32>
    %219 = vector.broadcast %218 : vector<1x16xf32> to vector<22x16xf32>
    %220 = arith.addf %217, %219 : vector<22x16xf32>
    %c2 = arith.constant 2 : index
    %c0_54 = arith.constant 0 : index
    %c0_55 = arith.constant 0 : index
    %221 = vector.load %arg2[%c2, %c0_54, %c0_55] : memref<3x22x32xf32, #tpu.memory_space<vmem>>, vector<1x22x32xf32>
    %222 = vector.shape_cast %221 : vector<1x22x32xf32> to vector<22x32xf32>
    %223 = vector.extract_strided_slice %222 {offsets = [0, 0], sizes = [16, 32], strides = [1, 1]} : vector<22x32xf32> to vector<16x32xf32>
    %c2_56 = arith.constant 2 : index
    %c0_57 = arith.constant 0 : index
    %c0_58 = arith.constant 0 : index
    %224 = vector.load %arg4[%c2_56, %c0_57, %c0_58] : memref<3x6x16xf32, #tpu.memory_space<vmem>>, vector<1x6x16xf32>
    %225 = vector.shape_cast %224 : vector<1x6x16xf32> to vector<6x16xf32>
    %cst_59 = arith.constant dense<0.000000e+00> : vector<22x32xf32>
    %226 = tpu.matmul %220, %223, %cst_59 {dimension_numbers = #tpu.dot_dimension_numbers<[1], [0], [0], [1], [0, 0, 1, 1], [], []>} : vector<22x16xf32>, vector<16x32xf32>, vector<22x32xf32> -> vector<22x32xf32>
    %227 = vector.extract_strided_slice %226 {offsets = [0, 0], sizes = [22, 16], strides = [1, 1]} : vector<22x32xf32> to vector<22x16xf32>
    %228 = vector.extract_strided_slice %225 {offsets = [0, 0], sizes = [1, 16], strides = [1, 1]} : vector<6x16xf32> to vector<1x16xf32>
    %229 = vector.broadcast %228 : vector<1x16xf32> to vector<22x16xf32>
    %230 = arith.addf %227, %229 : vector<22x16xf32>
    %231 = vector.extract_strided_slice %226 {offsets = [0, 16], sizes = [22, 16], strides = [1, 1]} : vector<22x32xf32> to vector<22x16xf32>
    %232 = vector.extract_strided_slice %225 {offsets = [1, 0], sizes = [1, 16], strides = [1, 1]} : vector<6x16xf32> to vector<1x16xf32>
    %233 = vector.broadcast %232 : vector<1x16xf32> to vector<22x16xf32>
    %234 = arith.addf %231, %233 : vector<22x16xf32>
    %235 = tpu.concatenate %234, %234, %234, %234, %234, %234, %234, %234, %234, %234, %234, %234, %234, %234, %234, %234 in 1 : vector<22x16xf32>, vector<22x16xf32>, vector<22x16xf32>, vector<22x16xf32>, vector<22x16xf32>, vector<22x16xf32>, vector<22x16xf32>, vector<22x16xf32>, vector<22x16xf32>, vector<22x16xf32>, vector<22x16xf32>, vector<22x16xf32>, vector<22x16xf32>, vector<22x16xf32>, vector<22x16xf32>, vector<22x16xf32> -> vector<22x256xf32>
    %236 = tpu.concatenate %234, %234, %234, %234, %234, %234 in 1 : vector<22x16xf32>, vector<22x16xf32>, vector<22x16xf32>, vector<22x16xf32>, vector<22x16xf32>, vector<22x16xf32> -> vector<22x96xf32>
    %237 = tpu.concatenate %235, %236 in 1 : vector<22x256xf32>, vector<22x96xf32> -> vector<22x352xf32>
    %238 = vector.extract_strided_slice %230 {offsets = [0, 0], sizes = [1, 16], strides = [1, 1]} : vector<22x16xf32> to vector<1x16xf32>
    %239 = vector.extract_strided_slice %230 {offsets = [1, 0], sizes = [1, 16], strides = [1, 1]} : vector<22x16xf32> to vector<1x16xf32>
    %240 = vector.extract_strided_slice %230 {offsets = [2, 0], sizes = [1, 16], strides = [1, 1]} : vector<22x16xf32> to vector<1x16xf32>
    %241 = vector.extract_strided_slice %230 {offsets = [3, 0], sizes = [1, 16], strides = [1, 1]} : vector<22x16xf32> to vector<1x16xf32>
    %242 = vector.extract_strided_slice %230 {offsets = [4, 0], sizes = [1, 16], strides = [1, 1]} : vector<22x16xf32> to vector<1x16xf32>
    %243 = vector.extract_strided_slice %230 {offsets = [5, 0], sizes = [1, 16], strides = [1, 1]} : vector<22x16xf32> to vector<1x16xf32>
    %244 = vector.extract_strided_slice %230 {offsets = [6, 0], sizes = [1, 16], strides = [1, 1]} : vector<22x16xf32> to vector<1x16xf32>
    %245 = vector.extract_strided_slice %230 {offsets = [7, 0], sizes = [1, 16], strides = [1, 1]} : vector<22x16xf32> to vector<1x16xf32>
    %246 = vector.extract_strided_slice %230 {offsets = [8, 0], sizes = [1, 16], strides = [1, 1]} : vector<22x16xf32> to vector<1x16xf32>
    %247 = vector.extract_strided_slice %230 {offsets = [9, 0], sizes = [1, 16], strides = [1, 1]} : vector<22x16xf32> to vector<1x16xf32>
    %248 = vector.extract_strided_slice %230 {offsets = [10, 0], sizes = [1, 16], strides = [1, 1]} : vector<22x16xf32> to vector<1x16xf32>
    %249 = vector.extract_strided_slice %230 {offsets = [11, 0], sizes = [1, 16], strides = [1, 1]} : vector<22x16xf32> to vector<1x16xf32>
    %250 = vector.extract_strided_slice %230 {offsets = [12, 0], sizes = [1, 16], strides = [1, 1]} : vector<22x16xf32> to vector<1x16xf32>
    %251 = vector.extract_strided_slice %230 {offsets = [13, 0], sizes = [1, 16], strides = [1, 1]} : vector<22x16xf32> to vector<1x16xf32>
    %252 = vector.extract_strided_slice %230 {offsets = [14, 0], sizes = [1, 16], strides = [1, 1]} : vector<22x16xf32> to vector<1x16xf32>
    %253 = vector.extract_strided_slice %230 {offsets = [15, 0], sizes = [1, 16], strides = [1, 1]} : vector<22x16xf32> to vector<1x16xf32>
    %254 = vector.extract_strided_slice %230 {offsets = [16, 0], sizes = [1, 16], strides = [1, 1]} : vector<22x16xf32> to vector<1x16xf32>
    %255 = vector.extract_strided_slice %230 {offsets = [17, 0], sizes = [1, 16], strides = [1, 1]} : vector<22x16xf32> to vector<1x16xf32>
    %256 = vector.extract_strided_slice %230 {offsets = [18, 0], sizes = [1, 16], strides = [1, 1]} : vector<22x16xf32> to vector<1x16xf32>
    %257 = vector.extract_strided_slice %230 {offsets = [19, 0], sizes = [1, 16], strides = [1, 1]} : vector<22x16xf32> to vector<1x16xf32>
    %258 = vector.extract_strided_slice %230 {offsets = [20, 0], sizes = [1, 16], strides = [1, 1]} : vector<22x16xf32> to vector<1x16xf32>
    %259 = vector.extract_strided_slice %230 {offsets = [21, 0], sizes = [1, 16], strides = [1, 1]} : vector<22x16xf32> to vector<1x16xf32>
    %260 = tpu.concatenate %238, %239, %240, %241, %242, %243, %244, %245, %246, %247, %248, %249, %250, %251, %252, %253 in 1 : vector<1x16xf32>, vector<1x16xf32>, vector<1x16xf32>, vector<1x16xf32>, vector<1x16xf32>, vector<1x16xf32>, vector<1x16xf32>, vector<1x16xf32>, vector<1x16xf32>, vector<1x16xf32>, vector<1x16xf32>, vector<1x16xf32>, vector<1x16xf32>, vector<1x16xf32>, vector<1x16xf32>, vector<1x16xf32> -> vector<1x256xf32>
    %261 = tpu.concatenate %254, %255, %256, %257, %258, %259 in 1 : vector<1x16xf32>, vector<1x16xf32>, vector<1x16xf32>, vector<1x16xf32>, vector<1x16xf32>, vector<1x16xf32> -> vector<1x96xf32>
    %262 = tpu.concatenate %260, %261 in 1 : vector<1x256xf32>, vector<1x96xf32> -> vector<1x352xf32>
    %263 = vector.broadcast %262 : vector<1x352xf32> to vector<22x352xf32>
    %264 = arith.addf %237, %263 : vector<22x352xf32>
    %cst_60 = arith.constant 2.000000e-01 : f32
    %265 = vector.broadcast %cst_60 : f32 to vector<22x352xf32>
    %266 = arith.mulf %265, %264 : vector<22x352xf32>
    %267 = arith.maximumf %264, %266 : vector<22x352xf32>
    %c2_61 = arith.constant 2 : index
    %c0_62 = arith.constant 0 : index
    %c0_63 = arith.constant 0 : index
    %268 = vector.load %arg3[%c2_61, %c0_62, %c0_63] : memref<3x352x44xf32, #tpu.memory_space<vmem>>, vector<1x352x44xf32>
    %269 = vector.shape_cast %268 : vector<1x352x44xf32> to vector<352x44xf32>
    %cst_64 = arith.constant dense<0.000000e+00> : vector<22x44xf32>
    %270 = tpu.matmul %267, %269, %cst_64 {dimension_numbers = #tpu.dot_dimension_numbers<[1], [0], [0], [1], [0, 0, 1, 1], [], []>} : vector<22x352xf32>, vector<352x44xf32>, vector<22x44xf32> -> vector<22x44xf32>
    %271 = vector.extract_strided_slice %270 {offsets = [0, 0], sizes = [22, 22], strides = [1, 1]} : vector<22x44xf32> to vector<22x22xf32>
    %cst_65 = arith.constant dense<0xFF800000> : vector<22xf32>
    %272 = vector.multi_reduction <maximumf>, %271, %cst_65 [1] : vector<22x22xf32> to vector<22xf32>
    %273 = vector.shape_cast %272 : vector<22xf32> to vector<22x1xf32>
    %274 = vector.broadcast %273 : vector<22x1xf32> to vector<22x22xf32>
    %275 = arith.subf %271, %274 : vector<22x22xf32>
    %276 = math.exp %275 : vector<22x22xf32>
    %cst_66 = arith.constant dense<0.000000e+00> : vector<22xf32>
    %277 = vector.multi_reduction <add>, %276, %cst_66 [1] : vector<22x22xf32> to vector<22xf32>
    %278 = vector.shape_cast %277 : vector<22xf32> to vector<22x1xf32>
    %279 = tpu.reciprocal %278 {approx = true} : vector<22x1xf32> -> vector<22x1xf32>
    %280 = vector.broadcast %279 : vector<22x1xf32> to vector<22x22xf32>
    %281 = arith.mulf %276, %280 : vector<22x22xf32>
    %282 = vector.extract_strided_slice %230 {offsets = [0, 0], sizes = [22, 8], strides = [1, 1]} : vector<22x16xf32> to vector<22x8xf32>
    %cst_67 = arith.constant dense<0.000000e+00> : vector<22x8xf32>
    %283 = tpu.matmul %281, %282, %cst_67 {dimension_numbers = #tpu.dot_dimension_numbers<[1], [0], [0], [1], [0, 0, 1, 1], [], []>} : vector<22x22xf32>, vector<22x8xf32>, vector<22x8xf32> -> vector<22x8xf32>
    %284 = vector.extract_strided_slice %270 {offsets = [0, 22], sizes = [22, 22], strides = [1, 1]} : vector<22x44xf32> to vector<22x22xf32>
    %cst_68 = arith.constant dense<0xFF800000> : vector<22xf32>
    %285 = vector.multi_reduction <maximumf>, %284, %cst_68 [1] : vector<22x22xf32> to vector<22xf32>
    %286 = vector.shape_cast %285 : vector<22xf32> to vector<22x1xf32>
    %287 = vector.broadcast %286 : vector<22x1xf32> to vector<22x22xf32>
    %288 = arith.subf %284, %287 : vector<22x22xf32>
    %289 = math.exp %288 : vector<22x22xf32>
    %cst_69 = arith.constant dense<0.000000e+00> : vector<22xf32>
    %290 = vector.multi_reduction <add>, %289, %cst_69 [1] : vector<22x22xf32> to vector<22xf32>
    %291 = vector.shape_cast %290 : vector<22xf32> to vector<22x1xf32>
    %292 = tpu.reciprocal %291 {approx = true} : vector<22x1xf32> -> vector<22x1xf32>
    %293 = vector.broadcast %292 : vector<22x1xf32> to vector<22x22xf32>
    %294 = arith.mulf %289, %293 : vector<22x22xf32>
    %295 = vector.extract_strided_slice %230 {offsets = [0, 8], sizes = [22, 8], strides = [1, 1]} : vector<22x16xf32> to vector<22x8xf32>
    %cst_70 = arith.constant dense<0.000000e+00> : vector<22x8xf32>
    %296 = tpu.matmul %294, %295, %cst_70 {dimension_numbers = #tpu.dot_dimension_numbers<[1], [0], [0], [1], [0, 0, 1, 1], [], []>} : vector<22x22xf32>, vector<22x8xf32>, vector<22x8xf32> -> vector<22x8xf32>
    %297 = tpu.concatenate %281, %294 in 1 : vector<22x22xf32>, vector<22x22xf32> -> vector<22x44xf32>
    %c0_71 = arith.constant 0 : index
    %c0_72 = arith.constant 0 : index
    %c0_73 = arith.constant 0 : index
    %298 = vector.load %arg8[%c0_71, %c0_72, %c0_73] : memref<2x22x44xf32, #tpu.memory_space<vmem>>, vector<1x22x44xf32>
    %299 = vector.shape_cast %298 : vector<1x22x44xf32> to vector<22x44xf32>
    %300 = vector.shape_cast %297 : vector<22x44xf32> to vector<1x22x44xf32>
    tpu.vector_store %arg8[%c0_71, %c0_72, %c0_73], %300 {strides = array<i32>} : memref<2x22x44xf32, #tpu.memory_space<vmem>>, vector<1x22x44xf32>,
    %301 = tpu.concatenate %283, %296 in 1 : vector<22x8xf32>, vector<22x8xf32> -> vector<22x16xf32>
    %302 = vector.extract_strided_slice %225 {offsets = [2, 0], sizes = [1, 16], strides = [1, 1]} : vector<6x16xf32> to vector<1x16xf32>
    %303 = vector.broadcast %302 : vector<1x16xf32> to vector<22x16xf32>
    %304 = arith.addf %301, %303 : vector<22x16xf32>
    %cst_74 = arith.constant dense<0.000000e+00> : vector<16xf32>
    %305 = vector.multi_reduction <add>, %304, %cst_74 [0] : vector<22x16xf32> to vector<16xf32>
    %306 = vector.shape_cast %305 : vector<16xf32> to vector<1x16xf32>
    %cst_75 = arith.constant 2.200000e+01 : f32
    %307 = vector.broadcast %cst_75 : f32 to vector<1x16xf32>
    %308 = arith.divf %306, %307 : vector<1x16xf32>
    %309 = vector.extract_strided_slice %225 {offsets = [5, 0], sizes = [1, 16], strides = [1, 1]} : vector<6x16xf32> to vector<1x16xf32>
    %310 = arith.mulf %308, %309 : vector<1x16xf32>
    %311 = vector.broadcast %310 : vector<1x16xf32> to vector<22x16xf32>
    %312 = arith.subf %304, %311 : vector<22x16xf32>
    %313 = arith.mulf %312, %312 : vector<22x16xf32>
    %cst_76 = arith.constant dense<0.000000e+00> : vector<16xf32>
    %314 = vector.multi_reduction <add>, %313, %cst_76 [0] : vector<22x16xf32> to vector<16xf32>
    %315 = vector.shape_cast %314 : vector<16xf32> to vector<1x16xf32>
    %cst_77 = arith.constant 2.200000e+01 : f32
    %316 = vector.broadcast %cst_77 : f32 to vector<1x16xf32>
    %317 = arith.divf %315, %316 : vector<1x16xf32>
    %318 = vector.extract_strided_slice %225 {offsets = [3, 0], sizes = [1, 16], strides = [1, 1]} : vector<6x16xf32> to vector<1x16xf32>
    %319 = vector.broadcast %318 : vector<1x16xf32> to vector<22x16xf32>
    %320 = arith.mulf %319, %312 : vector<22x16xf32>
    %cst_78 = arith.constant 9.99999974E-6 : f32
    %321 = vector.broadcast %cst_78 : f32 to vector<1x16xf32>
    %322 = arith.addf %317, %321 : vector<1x16xf32>
    %323 = math.rsqrt %322 : vector<1x16xf32>
    %324 = vector.broadcast %323 : vector<1x16xf32> to vector<22x16xf32>
    %325 = arith.mulf %320, %324 : vector<22x16xf32>
    %326 = vector.extract_strided_slice %225 {offsets = [4, 0], sizes = [1, 16], strides = [1, 1]} : vector<6x16xf32> to vector<1x16xf32>
    %327 = vector.broadcast %326 : vector<1x16xf32> to vector<22x16xf32>
    %328 = arith.addf %325, %327 : vector<22x16xf32>
    %cst_79 = arith.constant dense<0.000000e+00> : vector<16xf32>
    %329 = vector.multi_reduction <add>, %328, %cst_79 [0] : vector<22x16xf32> to vector<16xf32>
    %330 = vector.shape_cast %329 : vector<16xf32> to vector<1x16xf32>
    %cst_80 = arith.constant 2.200000e+01 : f32
    %331 = vector.broadcast %cst_80 : f32 to vector<1x16xf32>
    %332 = arith.divf %330, %331 : vector<1x16xf32>
    %c0_81 = arith.constant 0 : index
    %c0_82 = arith.constant 0 : index
    %333 = vector.load %arg5[%c0_81, %c0_82] : memref<2x16xf32, #tpu.memory_space<vmem>>, vector<1x16xf32>
    tpu.vector_store %arg5[%c0_81, %c0_82], %332 {strides = array<i32>} : memref<2x16xf32, #tpu.memory_space<vmem>>, vector<1x16xf32>,
    %c1_83 = arith.constant 1 : index
    %c0_84 = arith.constant 0 : index
    %c0_85 = arith.constant 0 : index
    %334 = vector.load %arg1[%c1_83, %c0_84, %c0_85] : memref<2x22x22xf32, #tpu.memory_space<vmem>>, vector<1x22x22xf32>
    %335 = vector.shape_cast %334 : vector<1x22x22xf32> to vector<22x22xf32>
    %c0_86 = arith.constant 0 : index
    %c0_87 = arith.constant 0 : index
    %c0_88 = arith.constant 0 : index
    %336 = vector.load %arg2[%c0_86, %c0_87, %c0_88] : memref<3x22x32xf32, #tpu.memory_space<vmem>>, vector<1x22x32xf32>
    %337 = vector.shape_cast %336 : vector<1x22x32xf32> to vector<22x32xf32>
    %c0_89 = arith.constant 0 : index
    %c0_90 = arith.constant 0 : index
    %c0_91 = arith.constant 0 : index
    %338 = vector.load %arg4[%c0_89, %c0_90, %c0_91] : memref<3x6x16xf32, #tpu.memory_space<vmem>>, vector<1x6x16xf32>
    %339 = vector.shape_cast %338 : vector<1x6x16xf32> to vector<6x16xf32>
    %cst_92 = arith.constant dense<0.000000e+00> : vector<22x32xf32>
    %340 = tpu.matmul %335, %337, %cst_92 {dimension_numbers = #tpu.dot_dimension_numbers<[1], [0], [0], [1], [0, 0, 1, 1], [], []>} : vector<22x22xf32>, vector<22x32xf32>, vector<22x32xf32> -> vector<22x32xf32>
    %341 = vector.extract_strided_slice %340 {offsets = [0, 0], sizes = [22, 16], strides = [1, 1]} : vector<22x32xf32> to vector<22x16xf32>
    %342 = vector.extract_strided_slice %339 {offsets = [0, 0], sizes = [1, 16], strides = [1, 1]} : vector<6x16xf32> to vector<1x16xf32>
    %343 = vector.broadcast %342 : vector<1x16xf32> to vector<22x16xf32>
    %344 = arith.addf %341, %343 : vector<22x16xf32>
    %345 = vector.extract_strided_slice %340 {offsets = [0, 16], sizes = [22, 16], strides = [1, 1]} : vector<22x32xf32> to vector<22x16xf32>
    %346 = vector.extract_strided_slice %339 {offsets = [1, 0], sizes = [1, 16], strides = [1, 1]} : vector<6x16xf32> to vector<1x16xf32>
    %347 = vector.broadcast %346 : vector<1x16xf32> to vector<22x16xf32>
    %348 = arith.addf %345, %347 : vector<22x16xf32>
    %349 = tpu.concatenate %348, %348, %348, %348, %348, %348, %348, %348, %348, %348, %348, %348, %348, %348, %348, %348 in 1 : vector<22x16xf32>, vector<22x16xf32>, vector<22x16xf32>, vector<22x16xf32>, vector<22x16xf32>, vector<22x16xf32>, vector<22x16xf32>, vector<22x16xf32>, vector<22x16xf32>, vector<22x16xf32>, vector<22x16xf32>, vector<22x16xf32>, vector<22x16xf32>, vector<22x16xf32>, vector<22x16xf32>, vector<22x16xf32> -> vector<22x256xf32>
    %350 = tpu.concatenate %348, %348, %348, %348, %348, %348 in 1 : vector<22x16xf32>, vector<22x16xf32>, vector<22x16xf32>, vector<22x16xf32>, vector<22x16xf32>, vector<22x16xf32> -> vector<22x96xf32>
    %351 = tpu.concatenate %349, %350 in 1 : vector<22x256xf32>, vector<22x96xf32> -> vector<22x352xf32>
    %352 = vector.extract_strided_slice %344 {offsets = [0, 0], sizes = [1, 16], strides = [1, 1]} : vector<22x16xf32> to vector<1x16xf32>
    %353 = vector.extract_strided_slice %344 {offsets = [1, 0], sizes = [1, 16], strides = [1, 1]} : vector<22x16xf32> to vector<1x16xf32>
    %354 = vector.extract_strided_slice %344 {offsets = [2, 0], sizes = [1, 16], strides = [1, 1]} : vector<22x16xf32> to vector<1x16xf32>
    %355 = vector.extract_strided_slice %344 {offsets = [3, 0], sizes = [1, 16], strides = [1, 1]} : vector<22x16xf32> to vector<1x16xf32>
    %356 = vector.extract_strided_slice %344 {offsets = [4, 0], sizes = [1, 16], strides = [1, 1]} : vector<22x16xf32> to vector<1x16xf32>
    %357 = vector.extract_strided_slice %344 {offsets = [5, 0], sizes = [1, 16], strides = [1, 1]} : vector<22x16xf32> to vector<1x16xf32>
    %358 = vector.extract_strided_slice %344 {offsets = [6, 0], sizes = [1, 16], strides = [1, 1]} : vector<22x16xf32> to vector<1x16xf32>
    %359 = vector.extract_strided_slice %344 {offsets = [7, 0], sizes = [1, 16], strides = [1, 1]} : vector<22x16xf32> to vector<1x16xf32>
    %360 = vector.extract_strided_slice %344 {offsets = [8, 0], sizes = [1, 16], strides = [1, 1]} : vector<22x16xf32> to vector<1x16xf32>
    %361 = vector.extract_strided_slice %344 {offsets = [9, 0], sizes = [1, 16], strides = [1, 1]} : vector<22x16xf32> to vector<1x16xf32>
    %362 = vector.extract_strided_slice %344 {offsets = [10, 0], sizes = [1, 16], strides = [1, 1]} : vector<22x16xf32> to vector<1x16xf32>
    %363 = vector.extract_strided_slice %344 {offsets = [11, 0], sizes = [1, 16], strides = [1, 1]} : vector<22x16xf32> to vector<1x16xf32>
    %364 = vector.extract_strided_slice %344 {offsets = [12, 0], sizes = [1, 16], strides = [1, 1]} : vector<22x16xf32> to vector<1x16xf32>
    %365 = vector.extract_strided_slice %344 {offsets = [13, 0], sizes = [1, 16], strides = [1, 1]} : vector<22x16xf32> to vector<1x16xf32>
    %366 = vector.extract_strided_slice %344 {offsets = [14, 0], sizes = [1, 16], strides = [1, 1]} : vector<22x16xf32> to vector<1x16xf32>
    %367 = vector.extract_strided_slice %344 {offsets = [15, 0], sizes = [1, 16], strides = [1, 1]} : vector<22x16xf32> to vector<1x16xf32>
    %368 = vector.extract_strided_slice %344 {offsets = [16, 0], sizes = [1, 16], strides = [1, 1]} : vector<22x16xf32> to vector<1x16xf32>
    %369 = vector.extract_strided_slice %344 {offsets = [17, 0], sizes = [1, 16], strides = [1, 1]} : vector<22x16xf32> to vector<1x16xf32>
    %370 = vector.extract_strided_slice %344 {offsets = [18, 0], sizes = [1, 16], strides = [1, 1]} : vector<22x16xf32> to vector<1x16xf32>
    %371 = vector.extract_strided_slice %344 {offsets = [19, 0], sizes = [1, 16], strides = [1, 1]} : vector<22x16xf32> to vector<1x16xf32>
    %372 = vector.extract_strided_slice %344 {offsets = [20, 0], sizes = [1, 16], strides = [1, 1]} : vector<22x16xf32> to vector<1x16xf32>
    %373 = vector.extract_strided_slice %344 {offsets = [21, 0], sizes = [1, 16], strides = [1, 1]} : vector<22x16xf32> to vector<1x16xf32>
    %374 = tpu.concatenate %352, %353, %354, %355, %356, %357, %358, %359, %360, %361, %362, %363, %364, %365, %366, %367 in 1 : vector<1x16xf32>, vector<1x16xf32>, vector<1x16xf32>, vector<1x16xf32>, vector<1x16xf32>, vector<1x16xf32>, vector<1x16xf32>, vector<1x16xf32>, vector<1x16xf32>, vector<1x16xf32>, vector<1x16xf32>, vector<1x16xf32>, vector<1x16xf32>, vector<1x16xf32>, vector<1x16xf32>, vector<1x16xf32> -> vector<1x256xf32>
    %375 = tpu.concatenate %368, %369, %370, %371, %372, %373 in 1 : vector<1x16xf32>, vector<1x16xf32>, vector<1x16xf32>, vector<1x16xf32>, vector<1x16xf32>, vector<1x16xf32> -> vector<1x96xf32>
    %376 = tpu.concatenate %374, %375 in 1 : vector<1x256xf32>, vector<1x96xf32> -> vector<1x352xf32>
    %377 = vector.broadcast %376 : vector<1x352xf32> to vector<22x352xf32>
    %378 = arith.addf %351, %377 : vector<22x352xf32>
    %cst_93 = arith.constant 2.000000e-01 : f32
    %379 = vector.broadcast %cst_93 : f32 to vector<22x352xf32>
    %380 = arith.mulf %379, %378 : vector<22x352xf32>
    %381 = arith.maximumf %378, %380 : vector<22x352xf32>
    %c0_94 = arith.constant 0 : index
    %c0_95 = arith.constant 0 : index
    %c0_96 = arith.constant 0 : index
    %382 = vector.load %arg3[%c0_94, %c0_95, %c0_96] : memref<3x352x44xf32, #tpu.memory_space<vmem>>, vector<1x352x44xf32>
    %383 = vector.shape_cast %382 : vector<1x352x44xf32> to vector<352x44xf32>
    %cst_97 = arith.constant dense<0.000000e+00> : vector<22x44xf32>
    %384 = tpu.matmul %381, %383, %cst_97 {dimension_numbers = #tpu.dot_dimension_numbers<[1], [0], [0], [1], [0, 0, 1, 1], [], []>} : vector<22x352xf32>, vector<352x44xf32>, vector<22x44xf32> -> vector<22x44xf32>
    %385 = vector.extract_strided_slice %384 {offsets = [0, 0], sizes = [22, 22], strides = [1, 1]} : vector<22x44xf32> to vector<22x22xf32>
    %cst_98 = arith.constant dense<0xFF800000> : vector<22xf32>
    %386 = vector.multi_reduction <maximumf>, %385, %cst_98 [1] : vector<22x22xf32> to vector<22xf32>
    %387 = vector.shape_cast %386 : vector<22xf32> to vector<22x1xf32>
    %388 = vector.broadcast %387 : vector<22x1xf32> to vector<22x22xf32>
    %389 = arith.subf %385, %388 : vector<22x22xf32>
    %390 = math.exp %389 : vector<22x22xf32>
    %cst_99 = arith.constant dense<0.000000e+00> : vector<22xf32>
    %391 = vector.multi_reduction <add>, %390, %cst_99 [1] : vector<22x22xf32> to vector<22xf32>
    %392 = vector.shape_cast %391 : vector<22xf32> to vector<22x1xf32>
    %393 = tpu.reciprocal %392 {approx = true} : vector<22x1xf32> -> vector<22x1xf32>
    %394 = vector.broadcast %393 : vector<22x1xf32> to vector<22x22xf32>
    %395 = arith.mulf %390, %394 : vector<22x22xf32>
    %396 = vector.extract_strided_slice %344 {offsets = [0, 0], sizes = [22, 8], strides = [1, 1]} : vector<22x16xf32> to vector<22x8xf32>
    %cst_100 = arith.constant dense<0.000000e+00> : vector<22x8xf32>
    %397 = tpu.matmul %395, %396, %cst_100 {dimension_numbers = #tpu.dot_dimension_numbers<[1], [0], [0], [1], [0, 0, 1, 1], [], []>} : vector<22x22xf32>, vector<22x8xf32>, vector<22x8xf32> -> vector<22x8xf32>
    %398 = vector.extract_strided_slice %384 {offsets = [0, 22], sizes = [22, 22], strides = [1, 1]} : vector<22x44xf32> to vector<22x22xf32>
    %cst_101 = arith.constant dense<0xFF800000> : vector<22xf32>
    %399 = vector.multi_reduction <maximumf>, %398, %cst_101 [1] : vector<22x22xf32> to vector<22xf32>
    %400 = vector.shape_cast %399 : vector<22xf32> to vector<22x1xf32>
    %401 = vector.broadcast %400 : vector<22x1xf32> to vector<22x22xf32>
    %402 = arith.subf %398, %401 : vector<22x22xf32>
    %403 = math.exp %402 : vector<22x22xf32>
    %cst_102 = arith.constant dense<0.000000e+00> : vector<22xf32>
    %404 = vector.multi_reduction <add>, %403, %cst_102 [1] : vector<22x22xf32> to vector<22xf32>
    %405 = vector.shape_cast %404 : vector<22xf32> to vector<22x1xf32>
    %406 = tpu.reciprocal %405 {approx = true} : vector<22x1xf32> -> vector<22x1xf32>
    %407 = vector.broadcast %406 : vector<22x1xf32> to vector<22x22xf32>
    %408 = arith.mulf %403, %407 : vector<22x22xf32>
    %409 = vector.extract_strided_slice %344 {offsets = [0, 8], sizes = [22, 8], strides = [1, 1]} : vector<22x16xf32> to vector<22x8xf32>
    %cst_103 = arith.constant dense<0.000000e+00> : vector<22x8xf32>
    %410 = tpu.matmul %408, %409, %cst_103 {dimension_numbers = #tpu.dot_dimension_numbers<[1], [0], [0], [1], [0, 0, 1, 1], [], []>} : vector<22x22xf32>, vector<22x8xf32>, vector<22x8xf32> -> vector<22x8xf32>
    %411 = tpu.concatenate %395, %408 in 1 : vector<22x22xf32>, vector<22x22xf32> -> vector<22x44xf32>
    %c1_104 = arith.constant 1 : index
    %c0_105 = arith.constant 0 : index
    %c0_106 = arith.constant 0 : index
    %412 = vector.load %arg6[%c1_104, %c0_105, %c0_106] : memref<2x22x44xf32, #tpu.memory_space<vmem>>, vector<1x22x44xf32>
    %413 = vector.shape_cast %412 : vector<1x22x44xf32> to vector<22x44xf32>
    %414 = vector.shape_cast %411 : vector<22x44xf32> to vector<1x22x44xf32>
    tpu.vector_store %arg6[%c1_104, %c0_105, %c0_106], %414 {strides = array<i32>} : memref<2x22x44xf32, #tpu.memory_space<vmem>>, vector<1x22x44xf32>,
    %415 = tpu.concatenate %397, %410 in 1 : vector<22x8xf32>, vector<22x8xf32> -> vector<22x16xf32>
    %416 = vector.extract_strided_slice %339 {offsets = [2, 0], sizes = [1, 16], strides = [1, 1]} : vector<6x16xf32> to vector<1x16xf32>
    %417 = vector.broadcast %416 : vector<1x16xf32> to vector<22x16xf32>
    %418 = arith.addf %415, %417 : vector<22x16xf32>
    %cst_107 = arith.constant 0.000000e+00 : f32
    %419 = vector.broadcast %cst_107 : f32 to vector<22x16xf32>
    %420 = arith.maximumf %418, %419 : vector<22x16xf32>
    %cst_108 = arith.constant dense<0.000000e+00> : vector<16xf32>
    %421 = vector.multi_reduction <add>, %420, %cst_108 [0] : vector<22x16xf32> to vector<16xf32>
    %422 = vector.shape_cast %421 : vector<16xf32> to vector<1x16xf32>
    %cst_109 = arith.constant 2.200000e+01 : f32
    %423 = vector.broadcast %cst_109 : f32 to vector<1x16xf32>
    %424 = arith.divf %422, %423 : vector<1x16xf32>
    %425 = vector.extract_strided_slice %339 {offsets = [5, 0], sizes = [1, 16], strides = [1, 1]} : vector<6x16xf32> to vector<1x16xf32>
    %426 = arith.mulf %424, %425 : vector<1x16xf32>
    %427 = vector.broadcast %426 : vector<1x16xf32> to vector<22x16xf32>
    %428 = arith.subf %420, %427 : vector<22x16xf32>
    %429 = arith.mulf %428, %428 : vector<22x16xf32>
    %cst_110 = arith.constant dense<0.000000e+00> : vector<16xf32>
    %430 = vector.multi_reduction <add>, %429, %cst_110 [0] : vector<22x16xf32> to vector<16xf32>
    %431 = vector.shape_cast %430 : vector<16xf32> to vector<1x16xf32>
    %cst_111 = arith.constant 2.200000e+01 : f32
    %432 = vector.broadcast %cst_111 : f32 to vector<1x16xf32>
    %433 = arith.divf %431, %432 : vector<1x16xf32>
    %434 = vector.extract_strided_slice %339 {offsets = [3, 0], sizes = [1, 16], strides = [1, 1]} : vector<6x16xf32> to vector<1x16xf32>
    %435 = vector.broadcast %434 : vector<1x16xf32> to vector<22x16xf32>
    %436 = arith.mulf %435, %428 : vector<22x16xf32>
    %cst_112 = arith.constant 9.99999974E-6 : f32
    %437 = vector.broadcast %cst_112 : f32 to vector<1x16xf32>
    %438 = arith.addf %433, %437 : vector<1x16xf32>
    %439 = math.rsqrt %438 : vector<1x16xf32>
    %440 = vector.broadcast %439 : vector<1x16xf32> to vector<22x16xf32>
    %441 = arith.mulf %436, %440 : vector<22x16xf32>
    %442 = vector.extract_strided_slice %339 {offsets = [4, 0], sizes = [1, 16], strides = [1, 1]} : vector<6x16xf32> to vector<1x16xf32>
    %443 = vector.broadcast %442 : vector<1x16xf32> to vector<22x16xf32>
    %444 = arith.addf %441, %443 : vector<22x16xf32>
    %c1_113 = arith.constant 1 : index
    %c0_114 = arith.constant 0 : index
    %c0_115 = arith.constant 0 : index
    %445 = vector.load %arg2[%c1_113, %c0_114, %c0_115] : memref<3x22x32xf32, #tpu.memory_space<vmem>>, vector<1x22x32xf32>
    %446 = vector.shape_cast %445 : vector<1x22x32xf32> to vector<22x32xf32>
    %447 = vector.extract_strided_slice %446 {offsets = [0, 0], sizes = [16, 32], strides = [1, 1]} : vector<22x32xf32> to vector<16x32xf32>
    %c1_116 = arith.constant 1 : index
    %c0_117 = arith.constant 0 : index
    %c0_118 = arith.constant 0 : index
    %448 = vector.load %arg4[%c1_116, %c0_117, %c0_118] : memref<3x6x16xf32, #tpu.memory_space<vmem>>, vector<1x6x16xf32>
    %449 = vector.shape_cast %448 : vector<1x6x16xf32> to vector<6x16xf32>
    %cst_119 = arith.constant dense<0.000000e+00> : vector<22x32xf32>
    %450 = tpu.matmul %444, %447, %cst_119 {dimension_numbers = #tpu.dot_dimension_numbers<[1], [0], [0], [1], [0, 0, 1, 1], [], []>} : vector<22x16xf32>, vector<16x32xf32>, vector<22x32xf32> -> vector<22x32xf32>
    %451 = vector.extract_strided_slice %450 {offsets = [0, 0], sizes = [22, 16], strides = [1, 1]} : vector<22x32xf32> to vector<22x16xf32>
    %452 = vector.extract_strided_slice %449 {offsets = [0, 0], sizes = [1, 16], strides = [1, 1]} : vector<6x16xf32> to vector<1x16xf32>
    %453 = vector.broadcast %452 : vector<1x16xf32> to vector<22x16xf32>
    %454 = arith.addf %451, %453 : vector<22x16xf32>
    %455 = vector.extract_strided_slice %450 {offsets = [0, 16], sizes = [22, 16], strides = [1, 1]} : vector<22x32xf32> to vector<22x16xf32>
    %456 = vector.extract_strided_slice %449 {offsets = [1, 0], sizes = [1, 16], strides = [1, 1]} : vector<6x16xf32> to vector<1x16xf32>
    %457 = vector.broadcast %456 : vector<1x16xf32> to vector<22x16xf32>
    %458 = arith.addf %455, %457 : vector<22x16xf32>
    %459 = tpu.concatenate %458, %458, %458, %458, %458, %458, %458, %458, %458, %458, %458, %458, %458, %458, %458, %458 in 1 : vector<22x16xf32>, vector<22x16xf32>, vector<22x16xf32>, vector<22x16xf32>, vector<22x16xf32>, vector<22x16xf32>, vector<22x16xf32>, vector<22x16xf32>, vector<22x16xf32>, vector<22x16xf32>, vector<22x16xf32>, vector<22x16xf32>, vector<22x16xf32>, vector<22x16xf32>, vector<22x16xf32>, vector<22x16xf32> -> vector<22x256xf32>
    %460 = tpu.concatenate %458, %458, %458, %458, %458, %458 in 1 : vector<22x16xf32>, vector<22x16xf32>, vector<22x16xf32>, vector<22x16xf32>, vector<22x16xf32>, vector<22x16xf32> -> vector<22x96xf32>
    %461 = tpu.concatenate %459, %460 in 1 : vector<22x256xf32>, vector<22x96xf32> -> vector<22x352xf32>
    %462 = vector.extract_strided_slice %454 {offsets = [0, 0], sizes = [1, 16], strides = [1, 1]} : vector<22x16xf32> to vector<1x16xf32>
    %463 = vector.extract_strided_slice %454 {offsets = [1, 0], sizes = [1, 16], strides = [1, 1]} : vector<22x16xf32> to vector<1x16xf32>
    %464 = vector.extract_strided_slice %454 {offsets = [2, 0], sizes = [1, 16], strides = [1, 1]} : vector<22x16xf32> to vector<1x16xf32>
    %465 = vector.extract_strided_slice %454 {offsets = [3, 0], sizes = [1, 16], strides = [1, 1]} : vector<22x16xf32> to vector<1x16xf32>
    %466 = vector.extract_strided_slice %454 {offsets = [4, 0], sizes = [1, 16], strides = [1, 1]} : vector<22x16xf32> to vector<1x16xf32>
    %467 = vector.extract_strided_slice %454 {offsets = [5, 0], sizes = [1, 16], strides = [1, 1]} : vector<22x16xf32> to vector<1x16xf32>
    %468 = vector.extract_strided_slice %454 {offsets = [6, 0], sizes = [1, 16], strides = [1, 1]} : vector<22x16xf32> to vector<1x16xf32>
    %469 = vector.extract_strided_slice %454 {offsets = [7, 0], sizes = [1, 16], strides = [1, 1]} : vector<22x16xf32> to vector<1x16xf32>
    %470 = vector.extract_strided_slice %454 {offsets = [8, 0], sizes = [1, 16], strides = [1, 1]} : vector<22x16xf32> to vector<1x16xf32>
    %471 = vector.extract_strided_slice %454 {offsets = [9, 0], sizes = [1, 16], strides = [1, 1]} : vector<22x16xf32> to vector<1x16xf32>
    %472 = vector.extract_strided_slice %454 {offsets = [10, 0], sizes = [1, 16], strides = [1, 1]} : vector<22x16xf32> to vector<1x16xf32>
    %473 = vector.extract_strided_slice %454 {offsets = [11, 0], sizes = [1, 16], strides = [1, 1]} : vector<22x16xf32> to vector<1x16xf32>
    %474 = vector.extract_strided_slice %454 {offsets = [12, 0], sizes = [1, 16], strides = [1, 1]} : vector<22x16xf32> to vector<1x16xf32>
    %475 = vector.extract_strided_slice %454 {offsets = [13, 0], sizes = [1, 16], strides = [1, 1]} : vector<22x16xf32> to vector<1x16xf32>
    %476 = vector.extract_strided_slice %454 {offsets = [14, 0], sizes = [1, 16], strides = [1, 1]} : vector<22x16xf32> to vector<1x16xf32>
    %477 = vector.extract_strided_slice %454 {offsets = [15, 0], sizes = [1, 16], strides = [1, 1]} : vector<22x16xf32> to vector<1x16xf32>
    %478 = vector.extract_strided_slice %454 {offsets = [16, 0], sizes = [1, 16], strides = [1, 1]} : vector<22x16xf32> to vector<1x16xf32>
    %479 = vector.extract_strided_slice %454 {offsets = [17, 0], sizes = [1, 16], strides = [1, 1]} : vector<22x16xf32> to vector<1x16xf32>
    %480 = vector.extract_strided_slice %454 {offsets = [18, 0], sizes = [1, 16], strides = [1, 1]} : vector<22x16xf32> to vector<1x16xf32>
    %481 = vector.extract_strided_slice %454 {offsets = [19, 0], sizes = [1, 16], strides = [1, 1]} : vector<22x16xf32> to vector<1x16xf32>
    %482 = vector.extract_strided_slice %454 {offsets = [20, 0], sizes = [1, 16], strides = [1, 1]} : vector<22x16xf32> to vector<1x16xf32>
    %483 = vector.extract_strided_slice %454 {offsets = [21, 0], sizes = [1, 16], strides = [1, 1]} : vector<22x16xf32> to vector<1x16xf32>
    %484 = tpu.concatenate %462, %463, %464, %465, %466, %467, %468, %469, %470, %471, %472, %473, %474, %475, %476, %477 in 1 : vector<1x16xf32>, vector<1x16xf32>, vector<1x16xf32>, vector<1x16xf32>, vector<1x16xf32>, vector<1x16xf32>, vector<1x16xf32>, vector<1x16xf32>, vector<1x16xf32>, vector<1x16xf32>, vector<1x16xf32>, vector<1x16xf32>, vector<1x16xf32>, vector<1x16xf32>, vector<1x16xf32>, vector<1x16xf32> -> vector<1x256xf32>
    %485 = tpu.concatenate %478, %479, %480, %481, %482, %483 in 1 : vector<1x16xf32>, vector<1x16xf32>, vector<1x16xf32>, vector<1x16xf32>, vector<1x16xf32>, vector<1x16xf32> -> vector<1x96xf32>
    %486 = tpu.concatenate %484, %485 in 1 : vector<1x256xf32>, vector<1x96xf32> -> vector<1x352xf32>
    %487 = vector.broadcast %486 : vector<1x352xf32> to vector<22x352xf32>
    %488 = arith.addf %461, %487 : vector<22x352xf32>
    %cst_120 = arith.constant 2.000000e-01 : f32
    %489 = vector.broadcast %cst_120 : f32 to vector<22x352xf32>
    %490 = arith.mulf %489, %488 : vector<22x352xf32>
    %491 = arith.maximumf %488, %490 : vector<22x352xf32>
    %c1_121 = arith.constant 1 : index
    %c0_122 = arith.constant 0 : index
    %c0_123 = arith.constant 0 : index
    %492 = vector.load %arg3[%c1_121, %c0_122, %c0_123] : memref<3x352x44xf32, #tpu.memory_space<vmem>>, vector<1x352x44xf32>
    %493 = vector.shape_cast %492 : vector<1x352x44xf32> to vector<352x44xf32>
    %cst_124 = arith.constant dense<0.000000e+00> : vector<22x44xf32>
    %494 = tpu.matmul %491, %493, %cst_124 {dimension_numbers = #tpu.dot_dimension_numbers<[1], [0], [0], [1], [0, 0, 1, 1], [], []>} : vector<22x352xf32>, vector<352x44xf32>, vector<22x44xf32> -> vector<22x44xf32>
    %495 = vector.extract_strided_slice %494 {offsets = [0, 0], sizes = [22, 22], strides = [1, 1]} : vector<22x44xf32> to vector<22x22xf32>
    %cst_125 = arith.constant dense<0xFF800000> : vector<22xf32>
    %496 = vector.multi_reduction <maximumf>, %495, %cst_125 [1] : vector<22x22xf32> to vector<22xf32>
    %497 = vector.shape_cast %496 : vector<22xf32> to vector<22x1xf32>
    %498 = vector.broadcast %497 : vector<22x1xf32> to vector<22x22xf32>
    %499 = arith.subf %495, %498 : vector<22x22xf32>
    %500 = math.exp %499 : vector<22x22xf32>
    %cst_126 = arith.constant dense<0.000000e+00> : vector<22xf32>
    %501 = vector.multi_reduction <add>, %500, %cst_126 [1] : vector<22x22xf32> to vector<22xf32>
    %502 = vector.shape_cast %501 : vector<22xf32> to vector<22x1xf32>
    %503 = tpu.reciprocal %502 {approx = true} : vector<22x1xf32> -> vector<22x1xf32>
    %504 = vector.broadcast %503 : vector<22x1xf32> to vector<22x22xf32>
    %505 = arith.mulf %500, %504 : vector<22x22xf32>
    %506 = vector.extract_strided_slice %454 {offsets = [0, 0], sizes = [22, 8], strides = [1, 1]} : vector<22x16xf32> to vector<22x8xf32>
    %cst_127 = arith.constant dense<0.000000e+00> : vector<22x8xf32>
    %507 = tpu.matmul %505, %506, %cst_127 {dimension_numbers = #tpu.dot_dimension_numbers<[1], [0], [0], [1], [0, 0, 1, 1], [], []>} : vector<22x22xf32>, vector<22x8xf32>, vector<22x8xf32> -> vector<22x8xf32>
    %508 = vector.extract_strided_slice %494 {offsets = [0, 22], sizes = [22, 22], strides = [1, 1]} : vector<22x44xf32> to vector<22x22xf32>
    %cst_128 = arith.constant dense<0xFF800000> : vector<22xf32>
    %509 = vector.multi_reduction <maximumf>, %508, %cst_128 [1] : vector<22x22xf32> to vector<22xf32>
    %510 = vector.shape_cast %509 : vector<22xf32> to vector<22x1xf32>
    %511 = vector.broadcast %510 : vector<22x1xf32> to vector<22x22xf32>
    %512 = arith.subf %508, %511 : vector<22x22xf32>
    %513 = math.exp %512 : vector<22x22xf32>
    %cst_129 = arith.constant dense<0.000000e+00> : vector<22xf32>
    %514 = vector.multi_reduction <add>, %513, %cst_129 [1] : vector<22x22xf32> to vector<22xf32>
    %515 = vector.shape_cast %514 : vector<22xf32> to vector<22x1xf32>
    %516 = tpu.reciprocal %515 {approx = true} : vector<22x1xf32> -> vector<22x1xf32>
    %517 = vector.broadcast %516 : vector<22x1xf32> to vector<22x22xf32>
    %518 = arith.mulf %513, %517 : vector<22x22xf32>
    %519 = vector.extract_strided_slice %454 {offsets = [0, 8], sizes = [22, 8], strides = [1, 1]} : vector<22x16xf32> to vector<22x8xf32>
    %cst_130 = arith.constant dense<0.000000e+00> : vector<22x8xf32>
    %520 = tpu.matmul %518, %519, %cst_130 {dimension_numbers = #tpu.dot_dimension_numbers<[1], [0], [0], [1], [0, 0, 1, 1], [], []>} : vector<22x22xf32>, vector<22x8xf32>, vector<22x8xf32> -> vector<22x8xf32>
    %521 = tpu.concatenate %505, %518 in 1 : vector<22x22xf32>, vector<22x22xf32> -> vector<22x44xf32>
    %c1_131 = arith.constant 1 : index
    %c0_132 = arith.constant 0 : index
    %c0_133 = arith.constant 0 : index
    %522 = vector.load %arg7[%c1_131, %c0_132, %c0_133] : memref<2x22x44xf32, #tpu.memory_space<vmem>>, vector<1x22x44xf32>
    %523 = vector.shape_cast %522 : vector<1x22x44xf32> to vector<22x44xf32>
    %524 = vector.shape_cast %521 : vector<22x44xf32> to vector<1x22x44xf32>
    tpu.vector_store %arg7[%c1_131, %c0_132, %c0_133], %524 {strides = array<i32>} : memref<2x22x44xf32, #tpu.memory_space<vmem>>, vector<1x22x44xf32>,
    %525 = tpu.concatenate %507, %520 in 1 : vector<22x8xf32>, vector<22x8xf32> -> vector<22x16xf32>
    %526 = vector.extract_strided_slice %449 {offsets = [2, 0], sizes = [1, 16], strides = [1, 1]} : vector<6x16xf32> to vector<1x16xf32>
    %527 = vector.broadcast %526 : vector<1x16xf32> to vector<22x16xf32>
    %528 = arith.addf %525, %527 : vector<22x16xf32>
    %cst_134 = arith.constant 0.000000e+00 : f32
    %529 = vector.broadcast %cst_134 : f32 to vector<22x16xf32>
    %530 = arith.maximumf %528, %529 : vector<22x16xf32>
    %cst_135 = arith.constant dense<0.000000e+00> : vector<16xf32>
    %531 = vector.multi_reduction <add>, %530, %cst_135 [0] : vector<22x16xf32> to vector<16xf32>
    %532 = vector.shape_cast %531 : vector<16xf32> to vector<1x16xf32>
    %cst_136 = arith.constant 2.200000e+01 : f32
    %533 = vector.broadcast %cst_136 : f32 to vector<1x16xf32>
    %534 = arith.divf %532, %533 : vector<1x16xf32>
    %535 = vector.extract_strided_slice %449 {offsets = [5, 0], sizes = [1, 16], strides = [1, 1]} : vector<6x16xf32> to vector<1x16xf32>
    %536 = arith.mulf %534, %535 : vector<1x16xf32>
    %537 = vector.broadcast %536 : vector<1x16xf32> to vector<22x16xf32>
    %538 = arith.subf %530, %537 : vector<22x16xf32>
    %539 = arith.mulf %538, %538 : vector<22x16xf32>
    %cst_137 = arith.constant dense<0.000000e+00> : vector<16xf32>
    %540 = vector.multi_reduction <add>, %539, %cst_137 [0] : vector<22x16xf32> to vector<16xf32>
    %541 = vector.shape_cast %540 : vector<16xf32> to vector<1x16xf32>
    %cst_138 = arith.constant 2.200000e+01 : f32
    %542 = vector.broadcast %cst_138 : f32 to vector<1x16xf32>
    %543 = arith.divf %541, %542 : vector<1x16xf32>
    %544 = vector.extract_strided_slice %449 {offsets = [3, 0], sizes = [1, 16], strides = [1, 1]} : vector<6x16xf32> to vector<1x16xf32>
    %545 = vector.broadcast %544 : vector<1x16xf32> to vector<22x16xf32>
    %546 = arith.mulf %545, %538 : vector<22x16xf32>
    %cst_139 = arith.constant 9.99999974E-6 : f32
    %547 = vector.broadcast %cst_139 : f32 to vector<1x16xf32>
    %548 = arith.addf %543, %547 : vector<1x16xf32>
    %549 = math.rsqrt %548 : vector<1x16xf32>
    %550 = vector.broadcast %549 : vector<1x16xf32> to vector<22x16xf32>
    %551 = arith.mulf %546, %550 : vector<22x16xf32>
    %552 = vector.extract_strided_slice %449 {offsets = [4, 0], sizes = [1, 16], strides = [1, 1]} : vector<6x16xf32> to vector<1x16xf32>
    %553 = vector.broadcast %552 : vector<1x16xf32> to vector<22x16xf32>
    %554 = arith.addf %551, %553 : vector<22x16xf32>
    %c2_140 = arith.constant 2 : index
    %c0_141 = arith.constant 0 : index
    %c0_142 = arith.constant 0 : index
    %555 = vector.load %arg2[%c2_140, %c0_141, %c0_142] : memref<3x22x32xf32, #tpu.memory_space<vmem>>, vector<1x22x32xf32>
    %556 = vector.shape_cast %555 : vector<1x22x32xf32> to vector<22x32xf32>
    %557 = vector.extract_strided_slice %556 {offsets = [0, 0], sizes = [16, 32], strides = [1, 1]} : vector<22x32xf32> to vector<16x32xf32>
    %c2_143 = arith.constant 2 : index
    %c0_144 = arith.constant 0 : index
    %c0_145 = arith.constant 0 : index
    %558 = vector.load %arg4[%c2_143, %c0_144, %c0_145] : memref<3x6x16xf32, #tpu.memory_space<vmem>>, vector<1x6x16xf32>
    %559 = vector.shape_cast %558 : vector<1x6x16xf32> to vector<6x16xf32>
    %cst_146 = arith.constant dense<0.000000e+00> : vector<22x32xf32>
    %560 = tpu.matmul %554, %557, %cst_146 {dimension_numbers = #tpu.dot_dimension_numbers<[1], [0], [0], [1], [0, 0, 1, 1], [], []>} : vector<22x16xf32>, vector<16x32xf32>, vector<22x32xf32> -> vector<22x32xf32>
    %561 = vector.extract_strided_slice %560 {offsets = [0, 0], sizes = [22, 16], strides = [1, 1]} : vector<22x32xf32> to vector<22x16xf32>
    %562 = vector.extract_strided_slice %559 {offsets = [0, 0], sizes = [1, 16], strides = [1, 1]} : vector<6x16xf32> to vector<1x16xf32>
    %563 = vector.broadcast %562 : vector<1x16xf32> to vector<22x16xf32>
    %564 = arith.addf %561, %563 : vector<22x16xf32>
    %565 = vector.extract_strided_slice %560 {offsets = [0, 16], sizes = [22, 16], strides = [1, 1]} : vector<22x32xf32> to vector<22x16xf32>
    %566 = vector.extract_strided_slice %559 {offsets = [1, 0], sizes = [1, 16], strides = [1, 1]} : vector<6x16xf32> to vector<1x16xf32>
    %567 = vector.broadcast %566 : vector<1x16xf32> to vector<22x16xf32>
    %568 = arith.addf %565, %567 : vector<22x16xf32>
    %569 = tpu.concatenate %568, %568, %568, %568, %568, %568, %568, %568, %568, %568, %568, %568, %568, %568, %568, %568 in 1 : vector<22x16xf32>, vector<22x16xf32>, vector<22x16xf32>, vector<22x16xf32>, vector<22x16xf32>, vector<22x16xf32>, vector<22x16xf32>, vector<22x16xf32>, vector<22x16xf32>, vector<22x16xf32>, vector<22x16xf32>, vector<22x16xf32>, vector<22x16xf32>, vector<22x16xf32>, vector<22x16xf32>, vector<22x16xf32> -> vector<22x256xf32>
    %570 = tpu.concatenate %568, %568, %568, %568, %568, %568 in 1 : vector<22x16xf32>, vector<22x16xf32>, vector<22x16xf32>, vector<22x16xf32>, vector<22x16xf32>, vector<22x16xf32> -> vector<22x96xf32>
    %571 = tpu.concatenate %569, %570 in 1 : vector<22x256xf32>, vector<22x96xf32> -> vector<22x352xf32>
    %572 = vector.extract_strided_slice %564 {offsets = [0, 0], sizes = [1, 16], strides = [1, 1]} : vector<22x16xf32> to vector<1x16xf32>
    %573 = vector.extract_strided_slice %564 {offsets = [1, 0], sizes = [1, 16], strides = [1, 1]} : vector<22x16xf32> to vector<1x16xf32>
    %574 = vector.extract_strided_slice %564 {offsets = [2, 0], sizes = [1, 16], strides = [1, 1]} : vector<22x16xf32> to vector<1x16xf32>
    %575 = vector.extract_strided_slice %564 {offsets = [3, 0], sizes = [1, 16], strides = [1, 1]} : vector<22x16xf32> to vector<1x16xf32>
    %576 = vector.extract_strided_slice %564 {offsets = [4, 0], sizes = [1, 16], strides = [1, 1]} : vector<22x16xf32> to vector<1x16xf32>
    %577 = vector.extract_strided_slice %564 {offsets = [5, 0], sizes = [1, 16], strides = [1, 1]} : vector<22x16xf32> to vector<1x16xf32>
    %578 = vector.extract_strided_slice %564 {offsets = [6, 0], sizes = [1, 16], strides = [1, 1]} : vector<22x16xf32> to vector<1x16xf32>
    %579 = vector.extract_strided_slice %564 {offsets = [7, 0], sizes = [1, 16], strides = [1, 1]} : vector<22x16xf32> to vector<1x16xf32>
    %580 = vector.extract_strided_slice %564 {offsets = [8, 0], sizes = [1, 16], strides = [1, 1]} : vector<22x16xf32> to vector<1x16xf32>
    %581 = vector.extract_strided_slice %564 {offsets = [9, 0], sizes = [1, 16], strides = [1, 1]} : vector<22x16xf32> to vector<1x16xf32>
    %582 = vector.extract_strided_slice %564 {offsets = [10, 0], sizes = [1, 16], strides = [1, 1]} : vector<22x16xf32> to vector<1x16xf32>
    %583 = vector.extract_strided_slice %564 {offsets = [11, 0], sizes = [1, 16], strides = [1, 1]} : vector<22x16xf32> to vector<1x16xf32>
    %584 = vector.extract_strided_slice %564 {offsets = [12, 0], sizes = [1, 16], strides = [1, 1]} : vector<22x16xf32> to vector<1x16xf32>
    %585 = vector.extract_strided_slice %564 {offsets = [13, 0], sizes = [1, 16], strides = [1, 1]} : vector<22x16xf32> to vector<1x16xf32>
    %586 = vector.extract_strided_slice %564 {offsets = [14, 0], sizes = [1, 16], strides = [1, 1]} : vector<22x16xf32> to vector<1x16xf32>
    %587 = vector.extract_strided_slice %564 {offsets = [15, 0], sizes = [1, 16], strides = [1, 1]} : vector<22x16xf32> to vector<1x16xf32>
    %588 = vector.extract_strided_slice %564 {offsets = [16, 0], sizes = [1, 16], strides = [1, 1]} : vector<22x16xf32> to vector<1x16xf32>
    %589 = vector.extract_strided_slice %564 {offsets = [17, 0], sizes = [1, 16], strides = [1, 1]} : vector<22x16xf32> to vector<1x16xf32>
    %590 = vector.extract_strided_slice %564 {offsets = [18, 0], sizes = [1, 16], strides = [1, 1]} : vector<22x16xf32> to vector<1x16xf32>
    %591 = vector.extract_strided_slice %564 {offsets = [19, 0], sizes = [1, 16], strides = [1, 1]} : vector<22x16xf32> to vector<1x16xf32>
    %592 = vector.extract_strided_slice %564 {offsets = [20, 0], sizes = [1, 16], strides = [1, 1]} : vector<22x16xf32> to vector<1x16xf32>
    %593 = vector.extract_strided_slice %564 {offsets = [21, 0], sizes = [1, 16], strides = [1, 1]} : vector<22x16xf32> to vector<1x16xf32>
    %594 = tpu.concatenate %572, %573, %574, %575, %576, %577, %578, %579, %580, %581, %582, %583, %584, %585, %586, %587 in 1 : vector<1x16xf32>, vector<1x16xf32>, vector<1x16xf32>, vector<1x16xf32>, vector<1x16xf32>, vector<1x16xf32>, vector<1x16xf32>, vector<1x16xf32>, vector<1x16xf32>, vector<1x16xf32>, vector<1x16xf32>, vector<1x16xf32>, vector<1x16xf32>, vector<1x16xf32>, vector<1x16xf32>, vector<1x16xf32> -> vector<1x256xf32>
    %595 = tpu.concatenate %588, %589, %590, %591, %592, %593 in 1 : vector<1x16xf32>, vector<1x16xf32>, vector<1x16xf32>, vector<1x16xf32>, vector<1x16xf32>, vector<1x16xf32> -> vector<1x96xf32>
    %596 = tpu.concatenate %594, %595 in 1 : vector<1x256xf32>, vector<1x96xf32> -> vector<1x352xf32>
    %597 = vector.broadcast %596 : vector<1x352xf32> to vector<22x352xf32>
    %598 = arith.addf %571, %597 : vector<22x352xf32>
    %cst_147 = arith.constant 2.000000e-01 : f32
    %599 = vector.broadcast %cst_147 : f32 to vector<22x352xf32>
    %600 = arith.mulf %599, %598 : vector<22x352xf32>
    %601 = arith.maximumf %598, %600 : vector<22x352xf32>
    %c2_148 = arith.constant 2 : index
    %c0_149 = arith.constant 0 : index
    %c0_150 = arith.constant 0 : index
    %602 = vector.load %arg3[%c2_148, %c0_149, %c0_150] : memref<3x352x44xf32, #tpu.memory_space<vmem>>, vector<1x352x44xf32>
    %603 = vector.shape_cast %602 : vector<1x352x44xf32> to vector<352x44xf32>
    %cst_151 = arith.constant dense<0.000000e+00> : vector<22x44xf32>
    %604 = tpu.matmul %601, %603, %cst_151 {dimension_numbers = #tpu.dot_dimension_numbers<[1], [0], [0], [1], [0, 0, 1, 1], [], []>} : vector<22x352xf32>, vector<352x44xf32>, vector<22x44xf32> -> vector<22x44xf32>
    %605 = vector.extract_strided_slice %604 {offsets = [0, 0], sizes = [22, 22], strides = [1, 1]} : vector<22x44xf32> to vector<22x22xf32>
    %cst_152 = arith.constant dense<0xFF800000> : vector<22xf32>
    %606 = vector.multi_reduction <maximumf>, %605, %cst_152 [1] : vector<22x22xf32> to vector<22xf32>
    %607 = vector.shape_cast %606 : vector<22xf32> to vector<22x1xf32>
    %608 = vector.broadcast %607 : vector<22x1xf32> to vector<22x22xf32>
    %609 = arith.subf %605, %608 : vector<22x22xf32>
    %610 = math.exp %609 : vector<22x22xf32>
    %cst_153 = arith.constant dense<0.000000e+00> : vector<22xf32>
    %611 = vector.multi_reduction <add>, %610, %cst_153 [1] : vector<22x22xf32> to vector<22xf32>
    %612 = vector.shape_cast %611 : vector<22xf32> to vector<22x1xf32>
    %613 = tpu.reciprocal %612 {approx = true} : vector<22x1xf32> -> vector<22x1xf32>
    %614 = vector.broadcast %613 : vector<22x1xf32> to vector<22x22xf32>
    %615 = arith.mulf %610, %614 : vector<22x22xf32>
    %616 = vector.extract_strided_slice %564 {offsets = [0, 0], sizes = [22, 8], strides = [1, 1]} : vector<22x16xf32> to vector<22x8xf32>
    %cst_154 = arith.constant dense<0.000000e+00> : vector<22x8xf32>
    %617 = tpu.matmul %615, %616, %cst_154 {dimension_numbers = #tpu.dot_dimension_numbers<[1], [0], [0], [1], [0, 0, 1, 1], [], []>} : vector<22x22xf32>, vector<22x8xf32>, vector<22x8xf32> -> vector<22x8xf32>
    %618 = vector.extract_strided_slice %604 {offsets = [0, 22], sizes = [22, 22], strides = [1, 1]} : vector<22x44xf32> to vector<22x22xf32>
    %cst_155 = arith.constant dense<0xFF800000> : vector<22xf32>
    %619 = vector.multi_reduction <maximumf>, %618, %cst_155 [1] : vector<22x22xf32> to vector<22xf32>
    %620 = vector.shape_cast %619 : vector<22xf32> to vector<22x1xf32>
    %621 = vector.broadcast %620 : vector<22x1xf32> to vector<22x22xf32>
    %622 = arith.subf %618, %621 : vector<22x22xf32>
    %623 = math.exp %622 : vector<22x22xf32>
    %cst_156 = arith.constant dense<0.000000e+00> : vector<22xf32>
    %624 = vector.multi_reduction <add>, %623, %cst_156 [1] : vector<22x22xf32> to vector<22xf32>
    %625 = vector.shape_cast %624 : vector<22xf32> to vector<22x1xf32>
    %626 = tpu.reciprocal %625 {approx = true} : vector<22x1xf32> -> vector<22x1xf32>
    %627 = vector.broadcast %626 : vector<22x1xf32> to vector<22x22xf32>
    %628 = arith.mulf %623, %627 : vector<22x22xf32>
    %629 = vector.extract_strided_slice %564 {offsets = [0, 8], sizes = [22, 8], strides = [1, 1]} : vector<22x16xf32> to vector<22x8xf32>
    %cst_157 = arith.constant dense<0.000000e+00> : vector<22x8xf32>
    %630 = tpu.matmul %628, %629, %cst_157 {dimension_numbers = #tpu.dot_dimension_numbers<[1], [0], [0], [1], [0, 0, 1, 1], [], []>} : vector<22x22xf32>, vector<22x8xf32>, vector<22x8xf32> -> vector<22x8xf32>
    %631 = tpu.concatenate %615, %628 in 1 : vector<22x22xf32>, vector<22x22xf32> -> vector<22x44xf32>
    %c1_158 = arith.constant 1 : index
    %c0_159 = arith.constant 0 : index
    %c0_160 = arith.constant 0 : index
    %632 = vector.load %arg8[%c1_158, %c0_159, %c0_160] : memref<2x22x44xf32, #tpu.memory_space<vmem>>, vector<1x22x44xf32>
    %633 = vector.shape_cast %632 : vector<1x22x44xf32> to vector<22x44xf32>
    %634 = vector.shape_cast %631 : vector<22x44xf32> to vector<1x22x44xf32>
    tpu.vector_store %arg8[%c1_158, %c0_159, %c0_160], %634 {strides = array<i32>} : memref<2x22x44xf32, #tpu.memory_space<vmem>>, vector<1x22x44xf32>,
    %635 = tpu.concatenate %617, %630 in 1 : vector<22x8xf32>, vector<22x8xf32> -> vector<22x16xf32>
    %636 = vector.extract_strided_slice %559 {offsets = [2, 0], sizes = [1, 16], strides = [1, 1]} : vector<6x16xf32> to vector<1x16xf32>
    %637 = vector.broadcast %636 : vector<1x16xf32> to vector<22x16xf32>
    %638 = arith.addf %635, %637 : vector<22x16xf32>
    %cst_161 = arith.constant dense<0.000000e+00> : vector<16xf32>
    %639 = vector.multi_reduction <add>, %638, %cst_161 [0] : vector<22x16xf32> to vector<16xf32>
    %640 = vector.shape_cast %639 : vector<16xf32> to vector<1x16xf32>
    %cst_162 = arith.constant 2.200000e+01 : f32
    %641 = vector.broadcast %cst_162 : f32 to vector<1x16xf32>
    %642 = arith.divf %640, %641 : vector<1x16xf32>
    %643 = vector.extract_strided_slice %559 {offsets = [5, 0], sizes = [1, 16], strides = [1, 1]} : vector<6x16xf32> to vector<1x16xf32>
    %644 = arith.mulf %642, %643 : vector<1x16xf32>
    %645 = vector.broadcast %644 : vector<1x16xf32> to vector<22x16xf32>
    %646 = arith.subf %638, %645 : vector<22x16xf32>
    %647 = arith.mulf %646, %646 : vector<22x16xf32>
    %cst_163 = arith.constant dense<0.000000e+00> : vector<16xf32>
    %648 = vector.multi_reduction <add>, %647, %cst_163 [0] : vector<22x16xf32> to vector<16xf32>
    %649 = vector.shape_cast %648 : vector<16xf32> to vector<1x16xf32>
    %cst_164 = arith.constant 2.200000e+01 : f32
    %650 = vector.broadcast %cst_164 : f32 to vector<1x16xf32>
    %651 = arith.divf %649, %650 : vector<1x16xf32>
    %652 = vector.extract_strided_slice %559 {offsets = [3, 0], sizes = [1, 16], strides = [1, 1]} : vector<6x16xf32> to vector<1x16xf32>
    %653 = vector.broadcast %652 : vector<1x16xf32> to vector<22x16xf32>
    %654 = arith.mulf %653, %646 : vector<22x16xf32>
    %cst_165 = arith.constant 9.99999974E-6 : f32
    %655 = vector.broadcast %cst_165 : f32 to vector<1x16xf32>
    %656 = arith.addf %651, %655 : vector<1x16xf32>
    %657 = math.rsqrt %656 : vector<1x16xf32>
    %658 = vector.broadcast %657 : vector<1x16xf32> to vector<22x16xf32>
    %659 = arith.mulf %654, %658 : vector<22x16xf32>
    %660 = vector.extract_strided_slice %559 {offsets = [4, 0], sizes = [1, 16], strides = [1, 1]} : vector<6x16xf32> to vector<1x16xf32>
    %661 = vector.broadcast %660 : vector<1x16xf32> to vector<22x16xf32>
    %662 = arith.addf %659, %661 : vector<22x16xf32>
    %cst_166 = arith.constant dense<0.000000e+00> : vector<16xf32>
    %663 = vector.multi_reduction <add>, %662, %cst_166 [0] : vector<22x16xf32> to vector<16xf32>
    %664 = vector.shape_cast %663 : vector<16xf32> to vector<1x16xf32>
    %cst_167 = arith.constant 2.200000e+01 : f32
    %665 = vector.broadcast %cst_167 : f32 to vector<1x16xf32>
    %666 = arith.divf %664, %665 : vector<1x16xf32>
    %c1_168 = arith.constant 1 : index
    %c0_169 = arith.constant 0 : index
    %667 = vector.load %arg5[%c1_168, %c0_169] : memref<2x16xf32, #tpu.memory_space<vmem>>, vector<1x16xf32>
    tpu.vector_store %arg5[%c1_168, %c0_169], %666 {strides = array<i32>} : memref<2x16xf32, #tpu.memory_space<vmem>>, vector<1x16xf32>,
    return
  }
  func.func @transform_0(%arg0: i32) -> (i32, i32, i32) {
    %c0_i32 = arith.constant 0 : i32
    %c0_i32_0 = arith.constant 0 : i32
    %c0_i32_1 = arith.constant 0 : i32
    return %arg0, %c0_i32, %c0_i32_0 : i32, i32, i32
  }
  func.func @transform_1(%arg0: i32) -> (i32, i32, i32) {
    %c0_i32 = arith.constant 0 : i32
    %c0_i32_0 = arith.constant 0 : i32
    %c0_i32_1 = arith.constant 0 : i32
    %c0_i32_2 = arith.constant 0 : i32
    return %c0_i32, %c0_i32_0, %c0_i32_1 : i32, i32, i32
  }
  func.func @transform_2(%arg0: i32) -> (i32, i32, i32) {
    %c0_i32 = arith.constant 0 : i32
    %c0_i32_0 = arith.constant 0 : i32
    %c0_i32_1 = arith.constant 0 : i32
    %c0_i32_2 = arith.constant 0 : i32
    return %c0_i32, %c0_i32_0, %c0_i32_1 : i32, i32, i32
  }
  func.func @transform_3(%arg0: i32) -> (i32, i32, i32) {
    %c0_i32 = arith.constant 0 : i32
    %c0_i32_0 = arith.constant 0 : i32
    %c0_i32_1 = arith.constant 0 : i32
    %c0_i32_2 = arith.constant 0 : i32
    return %c0_i32, %c0_i32_0, %c0_i32_1 : i32, i32, i32
  }
  func.func @transform_4(%arg0: i32) -> (i32, i32) {
    %c0_i32 = arith.constant 0 : i32
    %c0_i32_0 = arith.constant 0 : i32
    return %arg0, %c0_i32 : i32, i32
  }
  func.func @transform_5(%arg0: i32) -> (i32, i32, i32) {
    %c0_i32 = arith.constant 0 : i32
    %c0_i32_0 = arith.constant 0 : i32
    %c0_i32_1 = arith.constant 0 : i32
    return %arg0, %c0_i32, %c0_i32_0 : i32, i32, i32
  }
  func.func @transform_6(%arg0: i32) -> (i32, i32, i32) {
    %c0_i32 = arith.constant 0 : i32
    %c0_i32_0 = arith.constant 0 : i32
    %c0_i32_1 = arith.constant 0 : i32
    return %arg0, %c0_i32, %c0_i32_0 : i32, i32, i32
  }
  func.func @transform_7(%arg0: i32) -> (i32, i32, i32) {
    %c0_i32 = arith.constant 0 : i32
    %c0_i32_0 = arith.constant 0 : i32
    %c0_i32_1 = arith.constant 0 : i32
    return %arg0, %c0_i32, %c0_i32_0 : i32, i32, i32
  }
}

</mosaic_0001>

<bundles_post_ra>
// kernel: forward.1
= control target key start
LH: loop header
LB: loop body
LE: loop exit
PB: predicated region body
PF: predicated region fallthrough
CT: control target
= control target key end

     0   :  { %vm39_vm0 = vcmask 1045504   ;;  %v123_v1 = vlaneseq  ;;  %v6929_v2 = vmov 0.0   ;;  %vm6930_vm1 = vmmov 0   ;;  %s9750_s0 = inlined_call_operand.vmem [shape: f32[2,22,22], index: 0, kind: input, shape index: {}]   ;;  %s9751_s1 = inlined_call_operand.vmem [shape: f32[3,22,32], index: 1, kind: input, shape index: {}]   ;;  %s9752_s2 = inlined_call_operand.vmem [shape: f32[3,352,44], index: 2, kind: input, shape index: {}]   ;;  %s9753_s3 = inlined_call_operand.vmem [shape: f32[3,6,16], index: 3, kind: input, shape index: {}]   ;;  %s9754_s4 = inlined_call_operand.hbm [shape: f32[2,16], index: 4, kind: output, shape index: {0}]   ;;  %s9755_s5 = inlined_call_operand.vmem [shape: f32[2,22,44], index: 5, kind: output, shape index: {1}]   ;;  %s9756_s6 = inlined_call_operand.vmem [shape: f32[2,22,44], index: 6, kind: output, shape index: {2}]   ;;  %s9757_s7 = inlined_call_operand.vmem [shape: f32[2,22,44], index: 7, kind: output, shape index: {3}]  }
   0x1   :  { %v27_v0 = vld [vmem:[%s9751_s1 + $0x10] sm:$0x3f]  ;;  %6272 = vmatprep.subr.mxu0 %v6929_v2  ;;  %v26_v3 = vld [vmem:[%s9751_s1 + $0x8] sm:$0xff]  ;;  %6278 = vmatprep.mubr.msk.f32.mxu0 %vm6930_vm1, %v6929_v2 }
   0x2   :  { %6273 = vmatpush3.msk.msra.mxu0 %vm39_vm0, %v27_v0  ;;  %v6992_v4 = vshrl.u32 %v123_v1, 7 }
   0x3   :  { %13 = vsyncpa [#allocation3], 0  ;;  %6274 = vmatprep.subr.mxu0 %v6929_v2  ;;  %v25_v5 = vld [vmem:[%s9751_s1] sm:$0xff]  ;;  %vm29_vm2 = vcmask 179200   ;;  %v23_v10 = vld [vmem:[%s9750_s0 + $0x8] sm:$0xff]  ;;  %s6931_s13 = smov 16  }
   0x4   :  { %v7001_v6 = vld [vmem:[%s9753_s3] sm:$0x3f]  ;;  %6275 = vmatpush3.msra.mxu0 %v26_v3  ;;  %v7007_v8 = vsub.s32 1, %v6992_v4  ;;  %v24_v11 = vld [vmem:[%s9750_s0 + $0x10] sm:$0x3f]  ;;  %v7030_v12 = vsub.s32 0, %v6992_v4 }
   0x5   :  { %v22_v7 = vld [vmem:[%s9750_s0] sm:$0xff]  ;;  %6276 = vmatprep.subr.mxu0 %v6929_v2  ;;  %s6932_s16 = smov 112   ;;  %s6933_s17 = smov 48   ;;  %v403_v28 = vld [vmem:[%s9752_s2 + $0xf8] sm:$0xff]  ;;  %v402_v30 = vld [vmem:[%s9752_s2 + $0xf0] sm:$0xff]  ;;  %vm207_vm3 = vcmask 130048  }
   0x6   :  { %6277 = vmatpush3.msra.mxu0 %v25_v5  ;;  %v133_v9 = vrot.slane %v7001_v6, %v7007_v8  ;;  %v7036_v15 = vrot.slane %v7001_v6, %v7030_v12  ;;  %s6934_s18 = smov 32   ;;  %s6935_s19 = smov 64   ;;  %v387_v29 = vld [vmem:[%s9752_s2 + $0x78] sm:$0xff]  ;;  %5838 = vmatprep.subr.mxu1 %v403_v28  ;;  %v386_v33 = vld [vmem:[%s9752_s2 + $0x70] sm:$0xff]  ;;  %v401_v34 = vld [vmem:[%s9752_s2 + $0xe8] sm:$0xff]  ;;  %vm211_vm4 = vcmask 261120  }
   0x7   :  { %6279 = vmatmul.mubr.msk.f32.vlgmr.msra.gmra.mxu0 %vm29_vm2, %v22_v7  ;;  %6287 = vmatprep.subr.mxu0 %v6929_v2  ;;  %s6936_s20 = smov 80   ;;  %s6937_s21 = smov 96   ;;  %v385_v35 = vld [vmem:[%s9752_s2 + $0x68] sm:$0xff]  ;;  %v400_v37 = vld [vmem:[%s9752_s2 + $0xe0] sm:$0xff]  ;;  %v399_v39 = vld [vmem:[%s9752_s2 + $0xd8] sm:$0xff]  ;;  %vm215_vm5 = vcmask 392192  }
   0x8   :  { %6281 = vmatprep.mubr.msk.f32.mxu0 %vm6930_vm1, %v6929_v2  ;;  %135 = vrot.lane.b32.xlu0 %v133_v9, %s6931_s13  ;;  %v384_v38 = vld [vmem:[%s9752_s2 + $0x60] sm:$0xff]  ;;  %v383_v40 = vld [vmem:[%s9752_s2 + $0x58] sm:$0xff]  ;;  %v398_v41 = vld [vmem:[%s9752_s2 + $0xd0] sm:$0xff]  ;;  %vm219_vm6 = vcmask 523264   ;;  %vm223_vm7 = vcmask 654336   ;;  %vm227_vm8 = vcmask 785408  }
   0x9   :  { %5839 = vmatpush3.msra.mxu1 %v387_v29  ;;  %v382_v42 = vld [vmem:[%s9752_s2 + $0x50] sm:$0xff]  ;;  %v397_v44 = vld [vmem:[%s9752_s2 + $0xc8] sm:$0xff]  ;;  %v396_v46 = vld [vmem:[%s9752_s2 + $0xc0] sm:$0xff]  ;;  %vm231_vm9 = vcmask 916480   ;;  %vm710_vm10 = vcmask 359600   ;;  %vm9759_vm11 = vcmask 357552  }
   0xa   :  { %5840 = vmatprep.subr.mxu1 %v402_v30  ;;  %v381_v45 = vld [vmem:[%s9752_s2 + $0x48] sm:$0xff]  ;;  %v380_v48 = vld [vmem:[%s9752_s2 + $0x40] sm:$0xff]  ;;  %v395_v49 = vld [vmem:[%s9752_s2 + $0xb8] sm:$0xff]  ;;  %s6938_s30 = smov 106   ;;  %vm591_vm12 = vcmask 177152   ;;  %s6939_s8 = smov 120  }
   0xb   :  { %6282 = vmatmul.mubr.msk.f32.gmra.mxu0 %vm29_vm2, %v23_v10  ;;  %5841 = vmatpush3.msra.mxu1 %v386_v33  ;;  %v379_v50 = vld [vmem:[%s9752_s2 + $0x38] sm:$0xff]  ;;  %v394_v54 = vld [vmem:[%s9752_s2 + $0xb0] sm:$0xff]  ;;  %v393_v57 = vld [vmem:[%s9752_s2 + $0xa8] sm:$0xff]  ;;  %vm865_vm13 = vcmask 359424   ;;  %vm9758_vm14 = vcmask 357376   ;;  %s6940_s22 = smov 8  }
   0xc   :  { %6284 = vmatprep.mubr.msk.f32.mxu0 %vm6930_vm1, %v6929_v2  ;;  %5842 = vmatprep.subr.mxu1 %v401_v34  ;;  %v415_v51 = vld [vmem:[%s9752_s2 + $0x158] sm:$0xff]  ;;  %v378_v55 = vld [vmem:[%s9752_s2 + $0x30] sm:$0xff]  ;;  %v413_v58 = vld [vmem:[%s9752_s2 + $0x148] sm:$0xff]  ;;  %vm882_vm15 = vcmask 64512  }
   0xd   :  { %5843 = vmatpush3.msra.mxu1 %v385_v35  ;;  %6288 = vmatpush3.msra.mxu0 %v415_v51  ;;  %v414_v56 = vld [vmem:[%s9752_s2 + $0x150] sm:$0xff]  ;;  %v377_v61 = vld [vmem:[%s9752_s2 + $0x28] sm:$0xff]  ;;  %v392_v62 = vld [vmem:[%s9752_s2 + $0xa0] sm:$0xff] }
   0xe   :  { %5844 = vmatprep.subr.mxu1 %v400_v37  ;;  %6289 = vmatprep.subr.mxu0 %v6929_v2  ;;  %v412_v63 = vld [vmem:[%s9752_s2 + $0x140] sm:$0xff]  ;;  %v391_v5 = vld [vmem:[%s9752_s2 + $0x98] sm:$0xff]  ;;  %v390_v10 = vld [vmem:[%s9752_s2 + $0x90] sm:$0xff] }
   0xf   :  { %6285 = vmatmul.mubr.msk.f32.gmra.mxu0 %vm29_vm2, %v24_v11  ;;  %5845 = vmatpush3.msra.mxu1 %v384_v38  ;;  %v376_v0 = vld [vmem:[%s9752_s2 + $0x20] sm:$0xff]  ;;  %v411_v7 = vld [vmem:[%s9752_s2 + $0x138] sm:$0xff]  ;;  %v410_v11 = vld [vmem:[%s9752_s2 + $0x130] sm:$0xff] }
  0x10   :  { %6311 = vmatprep.mubr.msk.f32.mxu0 %vm6930_vm1, %v6929_v2  ;;  %5846 = vmatprep.subr.mxu1 %v399_v39  ;;  %v375_v9 = vld [vmem:[%s9752_s2 + $0x18] sm:$0xff]  ;;  %v406_v28 = vld [vmem:[%s9752_s2 + $0x110] sm:$0xff]  ;;  %v404_v33 = vld [vmem:[%s9752_s2 + $0x100] sm:$0xff] }
  0x11   :  { %5847 = vmatpush3.msra.mxu1 %v383_v40  ;;  %6290 = vmatpush3.msra.mxu0 %v414_v56 }
  0x12   :  { %5848 = vmatprep.subr.mxu1 %v398_v41  ;;  %6291 = vmatprep.subr.mxu0 %v6929_v2 }
  0x13   :  { %5849 = vmatpush3.msra.mxu1 %v382_v42  ;;  %6292 = vmatpush3.msra.mxu0 %v413_v58 }
  0x14   :  { %5850 = vmatprep.subr.mxu1 %v397_v44  ;;  %6293 = vmatprep.subr.mxu0 %v6929_v2 }
  0x15   :  { %5851 = vmatpush3.msra.mxu1 %v381_v45  ;;  %6294 = vmatpush3.msra.mxu0 %v412_v63 }
  0x16   :  { %5852 = vmatprep.subr.mxu1 %v396_v46  ;;  %6295 = vmatprep.subr.mxu0 %v6929_v2 }
  0x17   :  { %5853 = vmatpush3.msra.mxu1 %v380_v48  ;;  %6296 = vmatpush3.msra.mxu0 %v411_v7 }
  0x18   :  { %5854 = vmatprep.subr.mxu1 %v395_v49  ;;  %6297 = vmatprep.subr.mxu0 %v6929_v2 }
  0x19   :  { %5855 = vmatpush3.msra.mxu1 %v379_v50  ;;  %6298 = vmatpush3.msra.mxu0 %v410_v11 }
  0x1a   :  { %5856 = vmatprep.subr.mxu1 %v394_v54  ;;  %6299 = vmatprep.subr.mxu0 %v6929_v2 }
  0x1b   :  { %5857 = vmatpush3.msra.mxu1 %v378_v55 }
  0x1c   :  { %5858 = vmatprep.subr.mxu1 %v393_v57 }
  0x1d   :  { %5859 = vmatpush3.msra.mxu1 %v377_v61 }
  0x1e   :  { %5860 = vmatprep.subr.mxu1 %v392_v62 }
  0x1f   :  { %5861 = vmatpush3.msra.mxu1 %v376_v0 }
  0x20   :  { %5862 = vmatprep.subr.mxu1 %v391_v5 }
  0x21   :  { %5863 = vmatpush3.msra.mxu1 %v375_v9 }
  0x22   :  { %5864 = vmatprep.subr.mxu1 %v390_v10 }
  0x7a   :  { %v7032_v13 = vpop.permute.xlu0 %135 }
  0xc7   :  { %v109_v14 = vpop.f32.mrf.mxu0 }
  0xc8   :  { %v7039_v16 = vadd.f32 %v7032_v13, %v109_v14  ;;  %v7046_v19 = vadd.f32 %v7036_v15, %v109_v14 }
  0xc9   :  { %v6280_v17 = vpop.f32.mrf.mxu0 }
  0xca   :  { %153 = vrot.lane.b32.xlu1 %v7039_v16, %s6931_s13  ;;  %144 = vrot.lane.b32.xlu0 %v7039_v16, %s6932_s16  ;;  %v244_v22 = vrot.slane %v7046_v19, 3  ;;  %v252_v24 = vrot.slane %v7046_v19, 5  ;;  %v256_v25 = vrot.slane %v7046_v19, 6  ;;  %v260_v26 = vrot.slane %v7046_v19, 7 }
  0xcb   :  { %v114_v18 = vpop.f32.mrf.mxu0  ;;  %v236_v27 = vrot.slane %v7046_v19, 1  ;;  %v240_v32 = vrot.slane %v7046_v19, 2  ;;  %v248_v36 = vrot.slane %v7046_v19, 4 }
  0xcc   :  { %v7080_v31 = vadd.f32 %v7032_v13, %v114_v18  ;;  %v7122_v43 = vadd.f32 %v7036_v15, %v114_v18  ;;  %v374_v18 = vld [vmem:[%s9752_s2 + $0x10] sm:$0xff] }
  0xcd   :  { %v6283_v20 = vpop.f32.mrf.mxu0  ;;  %5865 = vmatpush3.msra.mxu1 %v374_v18 }
  0xce   :  { %171 = vrot.lane.b32.xlu1 %v7039_v16, %s6933_s17  ;;  %162 = vrot.lane.b32.xlu0 %v7039_v16, %s6934_s18  ;;  %v269_v47 = vrot.slane %v7122_v43, 2  ;;  %v277_v52 = vrot.slane %v7122_v43, 4  ;;  %v265_v53 = vrot.slane %v7122_v43, 1  ;;  %v285_v59 = vrot.slane %v7122_v43, 6  ;;  %v389_v20 = vld [vmem:[%s9752_s2 + $0x88] sm:$0xff] }
  0xcf   :  { %v7052_v21 = vpop.f32.mrf.mxu0  ;;  %v273_v60 = vrot.slane %v7122_v43, 3  ;;  %v289_v1 = vrot.slane %v7122_v43, 7  ;;  %v281_v3 = vrot.slane %v7122_v43, 5  ;;  %5866 = vmatprep.subr.mxu1 %v389_v20 }
  0xd0   :  { %v7213_v14 = vadd.f32 %v7036_v15, %v7052_v21  ;;  %v7217_v17 = vadd.f32 %v7032_v13, %v7052_v21  ;;  %v409_v15 = vld [vmem:[%s9752_s2 + $0x128] sm:$0xff] }
  0xd1   :  { %v6286_v23 = vpop.f32.mrf.mxu0  ;;  %v373_v13 = vld [vmem:[%s9752_s2 + $0x8] sm:$0xff]  ;;  %6300 = vmatpush3.msra.mxu0 %v409_v15 }
  0xd2   :  { %180 = vrot.lane.b32.xlu1 %v7039_v16, %s6935_s19  ;;  %245 = vrot.lane.b32.xlu0 %v244_v22, %s6933_s17  ;;  %v312_v21 = vrot.slane %v7213_v14, 2  ;;  %v388_v22 = vld [vmem:[%s9752_s2 + $0x80] sm:$0xff]  ;;  %v324_v29 = vrot.slane %v7213_v14, 5  ;;  %v320_v30 = vrot.slane %v7213_v14, 4 }
  0xd3   :  { %v408_v23 = vld [vmem:[%s9752_s2 + $0x120] sm:$0xff]  ;;  %5867 = vmatpush3.msra.mxu1 %v373_v13  ;;  %6301 = vmatprep.subr.mxu0 %v6929_v2 }
  0xd4   :  { %5868 = vmatprep.subr.mxu1 %v388_v22  ;;  %6302 = vmatpush3.msra.mxu0 %v408_v23 }
  0xd5   :  { %6303 = vmatprep.subr.mxu0 %v6929_v2 }
  0xd6   :  { %189 = vrot.lane.b32.xlu1 %v7039_v16, %s6936_s20  ;;  %253 = vrot.lane.b32.xlu0 %v252_v24, %s6936_s20  ;;  %v372_v24 = vld [vmem:[%s9752_s2] sm:$0xff] }
  0xd7   :  { %5869 = vmatpush3.msra.mxu1 %v372_v24 }
  0xd8   :  { %6335 = vmatprep.subr.mxu1 %v6929_v2 }
  0xda   :  { %198 = vrot.lane.b32.xlu1 %v7039_v16, %s6937_s21  ;;  %257 = vrot.lane.b32.xlu0 %v256_v25, %s6937_s21  ;;  %v407_v25 = vld [vmem:[%s9752_s2 + $0x118] sm:$0xff] }
  0xdb   :  { %6304 = vmatpush3.msra.mxu0 %v407_v25 }
  0xdc   :  { %6305 = vmatprep.subr.mxu0 %v6929_v2 }
  0xdd   :  { %6306 = vmatpush3.msra.mxu0 %v406_v28 }
  0xde   :  { %261 = vrot.lane.b32.xlu0 %v260_v26, %s6932_s16  ;;  %237 = vrot.lane.b32.xlu1 %v236_v27, %s6931_s13  ;;  %v316_v26 = vrot.slane %v7213_v14, 3  ;;  %v308_v27 = vrot.slane %v7213_v14, 1 }
  0xdf   :  { %6307 = vmatprep.subr.mxu0 %v6929_v2 }
  0xe2   :  { %241 = vrot.lane.b32.xlu1 %v240_v32, %s6934_s18  ;;  %146 = vrot.lane.b32.xlu0 %v7080_v31, %s6932_s16  ;;  %v405_v32 = vld [vmem:[%s9752_s2 + $0x108] sm:$0xff] }
  0xe3   :  { %6308 = vmatpush3.msra.mxu0 %v405_v32 }
  0xe4   :  { %6309 = vmatprep.subr.mxu0 %v6929_v2 }
  0xe5   :  { %6310 = vmatpush3.msra.mxu0 %v404_v33 }
  0xe6   :  { %249 = vrot.lane.b32.xlu1 %v248_v36, %s6935_s19  ;;  %155 = vrot.lane.b32.xlu0 %v7080_v31, %s6931_s13 }
  0xe7   :  { %6320 = vmatprep.subr.mxu0 %v6929_v2 }
  0xea   :  { %173 = vrot.lane.b32.xlu1 %v7080_v31, %s6933_s17  ;;  %164 = vrot.lane.b32.xlu0 %v7080_v31, %s6934_s18 }
  0xee   :  { %191 = vrot.lane.b32.xlu1 %v7080_v31, %s6936_s20  ;;  %182 = vrot.lane.b32.xlu0 %v7080_v31, %s6935_s19 }
  0xf2   :  { %200 = vrot.lane.b32.xlu0 %v7080_v31, %s6937_s21  ;;  %270 = vrot.lane.b32.xlu1 %v269_v47, %s6934_s18 }
  0xf6   :  { %278 = vrot.lane.b32.xlu1 %v277_v52, %s6935_s19  ;;  %266 = vrot.lane.b32.xlu0 %v265_v53, %s6931_s13 }
  0xfa   :  { %286 = vrot.lane.b32.xlu1 %v285_v59, %s6937_s21  ;;  %274 = vrot.lane.b32.xlu0 %v273_v60, %s6933_s17 }
  0xfe   :  { %290 = vrot.lane.b32.xlu1 %v289_v1, %s6932_s16  ;;  %282 = vrot.lane.b32.xlu0 %v281_v3, %s6936_s20 }
 0x102   :  { %157 = vrot.lane.b32.xlu0 %v7217_v17, %s6931_s13  ;;  %148 = vrot.lane.b32.xlu1 %v7217_v17, %s6932_s16 }
 0x106   :  { %166 = vrot.lane.b32.xlu1 %v7217_v17, %s6934_s18  ;;  %313 = vrot.lane.b32.xlu0 %v312_v21, %s6934_s18 }
 0x10a   :  { %317 = vrot.lane.b32.xlu0 %v316_v26, %s6933_s17  ;;  %309 = vrot.lane.b32.xlu1 %v308_v27, %s6931_s13 }
 0x10e   :  { %325 = vrot.lane.b32.xlu0 %v324_v29, %s6936_s20  ;;  %321 = vrot.lane.b32.xlu1 %v320_v30, %s6935_s19 }
 0x112   :  { %184 = vrot.lane.b32.xlu0 %v7217_v17, %s6935_s19  ;;  %175 = vrot.lane.b32.xlu1 %v7217_v17, %s6933_s17 }
 0x116   :  { %202 = vrot.lane.b32.xlu0 %v7217_v17, %s6937_s21  ;;  %193 = vrot.lane.b32.xlu1 %v7217_v17, %s6936_s20 }
 0x13c   :  { %v154_v34 = vpop.permute.xlu1 %153  ;;  %v145_v35 = vpop.permute.xlu0 %144 }
 0x13d   :  { %v208_v62 = vsel %vm207_vm3, %v145_v35, %v7039_v16 }
 0x13e   :  { %v212_v7 = vsel %vm211_vm4, %v208_v62, %v154_v34 }
 0x140   :  { %v172_v36 = vpop.permute.xlu1 %171  ;;  %v163_v37 = vpop.permute.xlu0 %162 }
 0x141   :  { %v216_v10 = vsel %vm215_vm5, %v212_v7, %v163_v37 }
 0x142   :  { %v220_v21 = vsel %vm219_vm6, %v216_v10, %v172_v36 }
 0x144   :  { %v181_v38 = vpop.permute.xlu1 %180  ;;  %v246_v39 = vpop.permute.xlu0 %245 }
 0x145   :  { %v224_v23 = vsel %vm223_vm7, %v220_v21, %v181_v38 }
 0x148   :  { %v190_v40 = vpop.permute.xlu1 %189  ;;  %v254_v41 = vpop.permute.xlu0 %253 }
 0x149   :  { %v228_v28 = vsel %vm227_vm8, %v224_v23, %v190_v40 }
 0x14c   :  { %v199_v42 = vpop.permute.xlu1 %198  ;;  %v258_v44 = vpop.permute.xlu0 %257 }
 0x14d   :  { %v232_v30 = vsel %vm231_vm9, %v228_v28, %v199_v42 }
 0x150   :  { %v262_v45 = vpop.permute.xlu0 %261  ;;  %v238_v46 = vpop.permute.xlu1 %237 }
 0x151   :  { %v293_v53 = vsel %vm207_vm3, %v7046_v19, %v238_v46 }
 0x154   :  { %v242_v47 = vpop.permute.xlu1 %241  ;;  %v147_v48 = vpop.permute.xlu0 %146 }
 0x155   :  { %v294_v54 = vsel %vm211_vm4, %v293_v53, %v242_v47  ;;  %v209_v5 = vsel %vm207_vm3, %v147_v48, %v7080_v31 }
 0x156   :  { %v295_v57 = vsel %vm215_vm5, %v294_v54, %v246_v39 }
 0x158   :  { %v250_v49 = vpop.permute.xlu1 %249  ;;  %v156_v50 = vpop.permute.xlu0 %155 }
 0x159   :  { %v296_v58 = vsel %vm219_vm6, %v295_v57, %v250_v49  ;;  %v213_v9 = vsel %vm211_vm4, %v209_v5, %v156_v50 }
 0x15a   :  { %v297_v61 = vsel %vm223_vm7, %v296_v58, %v254_v41 }
 0x15b   :  { %v298_v1 = vsel %vm227_vm8, %v297_v61, %v258_v44 }
 0x15c   :  { %v174_v51 = vpop.permute.xlu1 %173  ;;  %v165_v52 = vpop.permute.xlu0 %164  ;;  %v299_v11 = vsel %vm231_vm9, %v298_v1, %v262_v45 }
 0x15d   :  { %v217_v16 = vsel %vm215_vm5, %v213_v9, %v165_v52  ;;  %v336_v22 = vrot.slane %v299_v11, %v7030_v12 }
 0x15e   :  { %v221_v31 = vsel %vm219_vm6, %v217_v16, %v174_v51 }
 0x15f   :  { %v345_v35 = vadd.f32 %v336_v22, %v232_v30 }
 0x160   :  { %v192_v55 = vpop.permute.xlu1 %191  ;;  %v183_v56 = vpop.permute.xlu0 %182 }
 0x161   :  { %v225_v24 = vsel %vm223_vm7, %v221_v31, %v183_v56  ;;  %v354_v45 = vmul.f32 0.2, %v345_v35 }
 0x162   :  { %v229_v33 = vsel %vm227_vm8, %v225_v24, %v192_v55 }
 0x163   :  { %v363_v51 = vmax.f32 %v345_v35, %v354_v45 }
 0x164   :  { %v201_v59 = vpop.permute.xlu0 %200  ;;  %v271_v60 = vpop.permute.xlu1 %270 }
 0x165   :  { %v233_v36 = vsel %vm231_vm9, %v229_v33, %v201_v59 }
 0x166   :  { %v348_v40 = vadd.f32 %v336_v22, %v233_v36 }
 0x168   :  { %v279_v63 = vpop.permute.xlu1 %278  ;;  %v267_v0 = vpop.permute.xlu0 %266  ;;  %v357_v50 = vmul.f32 0.2, %v348_v40 }
 0x169   :  { %v300_v3 = vsel %vm207_vm3, %v7122_v43, %v267_v0 }
 0x16a   :  { %v301_v20 = vsel %vm211_vm4, %v300_v3, %v271_v60  ;;  %v366_v58 = vmax.f32 %v348_v40, %v357_v50 }
 0x16c   :  { %v287_v18 = vpop.permute.xlu1 %286  ;;  %v275_v15 = vpop.permute.xlu0 %274 }
 0x16d   :  { %v302_v13 = vsel %vm215_vm5, %v301_v20, %v275_v15 }
 0x16e   :  { %v303_v26 = vsel %vm219_vm6, %v302_v13, %v279_v63 }
 0x170   :  { %v291_v25 = vpop.permute.xlu1 %290  ;;  %v283_v27 = vpop.permute.xlu0 %282 }
 0x171   :  { %v304_v29 = vsel %vm223_vm7, %v303_v26, %v283_v27 }
 0x172   :  { %v305_v32 = vsel %vm227_vm8, %v304_v29, %v287_v18 }
 0x173   :  { %v306_v34 = vsel %vm231_vm9, %v305_v32, %v291_v25 }
 0x174   :  { %v158_v37 = vpop.permute.xlu0 %157  ;;  %v149_v38 = vpop.permute.xlu1 %148  ;;  %v340_v39 = vrot.slane %v306_v34, %v7030_v12 }
 0x175   :  { %v210_v59 = vsel %vm207_vm3, %v149_v38, %v7217_v17 }
 0x176   :  { %v346_v41 = vadd.f32 %v340_v39, %v232_v30  ;;  %v349_v44 = vadd.f32 %v340_v39, %v233_v36  ;;  %v214_v0 = vsel %vm211_vm4, %v210_v59, %v158_v37 }
 0x178   :  { %v167_v46 = vpop.permute.xlu1 %166  ;;  %v314_v47 = vpop.permute.xlu0 %313  ;;  %v355_v42 = vmul.f32 0.2, %v346_v41  ;;  %v358_v48 = vmul.f32 0.2, %v349_v44 }
 0x179   :  { %v218_v3 = vsel %vm215_vm5, %v214_v0, %v167_v46 }
 0x17a   :  { %v364_v49 = vmax.f32 %v346_v41, %v355_v42  ;;  %v367_v54 = vmax.f32 %v349_v44, %v358_v48 }
 0x17c   :  { %489 = vmatprep.mubr.f32.mxu1 %v364_v49  ;;  %v318_v52 = vpop.permute.xlu0 %317  ;;  %v310_v53 = vpop.permute.xlu1 %309 }
 0x17d   :  { %v328_v55 = vsel %vm207_vm3, %v7213_v14, %v310_v53  ;;  %490 = vmatmul.mubr.f32.vlgmr.msra.gmra.mxu1 %v363_v51 }
 0x17e   :  { %v329_v56 = vsel %vm211_vm4, %v328_v55, %v314_v47  ;;  %494 = vmatprep.mubr.f32.mxu1 %v367_v54 }
 0x17f   :  { %v330_v57 = vsel %vm215_vm5, %v329_v56, %v318_v52 }
 0x180   :  { %v326_v60 = vpop.permute.xlu0 %325  ;;  %v322_v61 = vpop.permute.xlu1 %321 }
 0x181   :  { %v331_v62 = vsel %vm219_vm6, %v330_v57, %v322_v61  ;;  %495 = vmatmul.mubr.f32.gmra.mxu1 %v366_v58 }
 0x182   :  { %v332_v63 = vsel %vm223_vm7, %v331_v62, %v326_v60 }
 0x183   :  { %v344_v1 = vrot.slane %v332_v63, %v7030_v12 }
 0x184   :  { %v185_v5 = vpop.permute.xlu0 %184  ;;  %v176_v7 = vpop.permute.xlu1 %175 }
 0x185   :  { %v347_v9 = vadd.f32 %v344_v1, %v224_v23  ;;  %v222_v10 = vsel %vm219_vm6, %v218_v3, %v176_v7  ;;  %v350_v16 = vadd.f32 %v344_v1, %v225_v24 }
 0x186   :  { %v226_v17 = vsel %vm223_vm7, %v222_v10, %v185_v5 }
 0x187   :  { %v356_v11 = vmul.f32 0.2, %v347_v9  ;;  %v353_v13 = vadd.f32 %v344_v1, %v226_v17  ;;  %v359_v31 = vmul.f32 0.2, %v350_v16 }
 0x188   :  { %v203_v18 = vpop.permute.xlu0 %202  ;;  %v194_v20 = vpop.permute.xlu1 %193 }
 0x189   :  { %v365_v15 = vmax.f32 %v347_v9, %v356_v11  ;;  %v230_v21 = vsel %vm227_vm8, %v226_v17, %v194_v20  ;;  %v362_v23 = vmul.f32 0.2, %v353_v13  ;;  %v368_v24 = vmax.f32 %v350_v16, %v359_v31 }
 0x18a   :  { %v234_v25 = vsel %vm231_vm9, %v230_v21, %v203_v18 }
 0x18b   :  { %v351_v26 = vadd.f32 %v336_v22, %v234_v25  ;;  %v352_v27 = vadd.f32 %v340_v39, %v234_v25  ;;  %6312 = vmatmul.mubr.msk.f32.vlgmr.msra.gmra.mxu0 %vm227_vm8, %v365_v15  ;;  %v371_v32 = vmax.f32 %v353_v13, %v362_v23 }
 0x18c   :  { %6321 = vmatpush3.msk.msra.mxu0 %vm39_vm0, %v7213_v14  ;;  %6314 = vmatprep.mubr.msk.f32.mxu0 %vm6930_vm1, %v6929_v2 }
 0x18d   :  { %6322 = vmatprep.subr.mxu0 %v6929_v2  ;;  %v361_v28 = vmul.f32 0.2, %v352_v27  ;;  %v360_v29 = vmul.f32 0.2, %v351_v26 }
 0x18e   :  { %6323 = vmatpush3.msra.mxu0 %v7122_v43 }
 0x18f   :  { %6324 = vmatprep.subr.mxu0 %v6929_v2  ;;  %6315 = vmatmul.mubr.msk.f32.gmra.mxu0 %vm227_vm8, %v368_v24  ;;  %v370_v22 = vmax.f32 %v352_v27, %v361_v28  ;;  %v369_v30 = vmax.f32 %v351_v26, %v360_v29 }
 0x190   :  { %6325 = vmatpush3.msra.mxu0 %v7046_v19  ;;  %6317 = vmatprep.mubr.msk.f32.mxu0 %vm6930_vm1, %v6929_v2 }
 0x191   :  { %499 = vmatprep.mubr.f32.mxu1 %v370_v22  ;;  %6350 = vmatprep.subr.mxu0 %v6929_v2 }
 0x192   :  { %500 = vmatmul.mubr.f32.gmra.mxu1 %v369_v30 }
 0x193   :  { %6318 = vmatmul.mubr.msk.f32.gmra.mxu0 %vm227_vm8, %v371_v32  ;;  %6341 = vmatprep.mubr.msk.f32.mxu1 %vm6930_vm1, %v6929_v2 }
 0x194   :  { %6326 = vmatprep.mubr.msk.f32.mxu0 %vm6930_vm1, %v6929_v2 }
 0x23d   :  { %v5870_v33 = vpop.f32.mrf.mxu1 }
 0x23f   :  { %v5871_v34 = vpop.f32.mrf.mxu1 }
 0x240   :  { %v5872_v36 = vadd.f32 %v5871_v34, %v5870_v33 }
 0x241   :  { %v5873_v35 = vpop.f32.mrf.mxu1 }
 0x243   :  { %v5874_v37 = vpop.f32.mrf.mxu1 }
 0x244   :  { %v5875_v44 = vadd.f32 %v5874_v37, %v5873_v35 }
 0x24b   :  { %v571_v38 = vpop.f32.mrf.mxu0 }
 0x24c   :  { %v7352_v39 = vadd.f32 %v5872_v36, %v571_v38 }
 0x24d   :  { %v6313_v41 = vpop.f32.mrf.mxu0 }
 0x24e   :  { %v711_v40 = vsel %vm710_vm10, %v7352_v39, -inf  ;;  %v585_v10 = vsel %vm29_vm2, %v7352_v39, -inf }
 0x24f   :  { %712 = vmax.xlane.f32.xlu1 %v711_v40  ;;  %v576_v45 = vpop.f32.mrf.mxu0 }
 0x250   :  { %v7356_v46 = vadd.f32 %v5875_v44, %v576_v45 }
 0x251   :  { %v6316_v47 = vpop.f32.mrf.mxu0 }
 0x252   :  { %v5876_v42 = vpop.f32.mrf.mxu1  ;;  %v714_v48 = vsel %vm710_vm10, %v7356_v46, -inf  ;;  %v588_v20 = vsel %vm29_vm2, %v7356_v46, -inf }
 0x253   :  { %715 = vmax.xlane.f32.xlu0 %v714_v48  ;;  %v581_v49 = vpop.f32.mrf.mxu0 }
 0x254   :  { %v5877_v50 = vpop.f32.mrf.mxu1 }
 0x255   :  { %v5878_v51 = vadd.f32 %v5877_v50, %v5876_v42  ;;  %v6319_v52 = vpop.f32.mrf.mxu0 }
 0x257   :  { %v7360_v53 = vadd.f32 %v5878_v51, %v581_v49 }
 0x259   :  { %v718_v54 = vsel %vm9759_vm11, %v7360_v53, -inf  ;;  %v592_v17 = vsel %vm591_vm12, %v7360_v53, -inf }
 0x25a   :  { %719 = vmax.xlane.f32.xlu0 %v718_v54 }
 0x2d8   :  { %v713_v55 = vpop.xlane.xlu1 %712 }
 0x2d9   :  { %v721_v56 = vsub.f32 %v7352_v39, %v713_v55 }
 0x2db   :  { %v724_v57 = vmul.f32 1.442695, %v721_v56 }
 0x2dc   :  { %v716_v58 = vpop.xlane.xlu0 %715 }
 0x2dd   :  { %6745 = vpow2.f32 %v724_v57  ;;  %v722_v59 = vsub.f32 %v7356_v46, %v716_v58 }
 0x2df   :  { %v726_v60 = vmul.f32 1.442695, %v722_v59 }
 0x2e1   :  { %6747 = vpow2.f32 %v726_v60 }
 0x2e3   :  { %v720_v61 = vpop.xlane.xlu0 %719 }
 0x2e4   :  { %v723_v62 = vsub.f32 %v7360_v53, %v720_v61 }
 0x2e6   :  { %v728_v63 = vmul.f32 1.442695, %v723_v62 }
 0x2e8   :  { %6749 = vpow2.f32 %v728_v63 }
 0x2ea   :  { %v6746_v0 = vpop.eup %6745 }
 0x2eb   :  { %733 = vrot.lane.b32.xlu1 %v6746_v0, %s6938_s30 }
 0x2ee   :  { %v6748_v1 = vpop.eup %6747 }
 0x2ef   :  { %735 = vrot.lane.b32.xlu0 %v6748_v1, %s6938_s30 }
 0x2f5   :  { %v6750_v3 = vpop.eup %6749 }
 0x2f6   :  { %737 = vrot.lane.b32.xlu1 %v6750_v3, %s6938_s30 }
 0x35d   :  { %v734_v5 = vpop.permute.xlu1 %733 }
 0x35e   :  { %v742_v7 = vsel %vm29_vm2, %v734_v5, 0.0  ;;  %v7442_v5 = vld [vmem:[%s9753_s3 + $0x8] sm:$0x3f] }
 0x35f   :  { %743 = vadd.xlane.f32.xlu1 %v742_v7  ;;  %v1056_v7 = vrot.slane %v7442_v5, %v7007_v8 }
 0x361   :  { %v736_v9 = vpop.permute.xlu0 %735 }
 0x362   :  { %v745_v16 = vsel %vm29_vm2, %v736_v9, 0.0 }
 0x363   :  { %586 = vmax.xlane.f32.xlu1 %v585_v10  ;;  %746 = vadd.xlane.f32.xlu0 %v745_v16 }
 0x367   :  { %593 = vmax.xlane.f32.xlu1 %v592_v17 }
 0x368   :  { %v738_v11 = vpop.permute.xlu1 %737 }
 0x369   :  { %v748_v18 = vsel %vm591_vm12, %v738_v11, 0.0 }
 0x36a   :  { %749 = vadd.xlane.f32.xlu0 %v748_v18 }
 0x36e   :  { %589 = vmax.xlane.f32.xlu0 %v588_v20  ;;  %v7448_v20 = vsub.s32 2, %v6992_v4 }
 0x378   :  { %768 = vrot.lane.b32.xlu1 %v7122_v43, %s6939_s8 }
 0x37c   :  { %766 = vrot.lane.b32.xlu1 %v7046_v19, %s6939_s8 }
 0x384   :  { %770 = vrot.lane.b32.xlu0 %v7213_v14, %s6939_s8 }
 0x3e8   :  { %v744_v15 = vpop.xlane.xlu1 %743 }
 0x3e9   :  { %6751 = vrcp.f32 %v744_v15 }
 0x3ec   :  { %v747_v13 = vpop.xlane.xlu0 %746  ;;  %v587_v21 = vpop.xlane.xlu1 %586 }
 0x3ed   :  { %6753 = vrcp.f32 %v747_v13  ;;  %v595_v30 = vsub.f32 %v7352_v39, %v587_v21  ;;  %v889_v13 = vrot.slane %v7001_v6, %v7448_v20 }
 0x3ef   :  { %v598_v33 = vmul.f32 1.442695, %v595_v30 }
 0x3f0   :  { %v594_v31 = vpop.xlane.xlu1 %593 }
 0x3f1   :  { %v597_v34 = vsub.f32 %v7360_v53, %v594_v31 }
 0x3f3   :  { %v750_v25 = vpop.xlane.xlu0 %749  ;;  %v602_v36 = vmul.f32 1.442695, %v597_v34 }
 0x3f4   :  { %6755 = vrcp.f32 %v750_v25  ;;  %v769_v24 = vpop.permute.xlu1 %768 }
 0x3f5   :  { %6757 = vpow2.f32 %v598_v33 }
 0x3f6   :  { %v6752_v26 = vpop.eup %6751 }
 0x3f7   :  { %v590_v27 = vpop.xlane.xlu0 %589  ;;  %v754_v23 = vmul.f32 %v6752_v26, %v6746_v0 }
 0x3f8   :  { %v767_v14 = vpop.permute.xlu1 %766  ;;  %v596_v32 = vsub.f32 %v7356_v46, %v590_v27 }
 0x3f9   :  { %760 = vrot.lane.b32.xlu0 %v754_v23, %s6938_s30 }
 0x3fa   :  { %v6754_v43 = vpop.eup %6753  ;;  %v600_v35 = vmul.f32 1.442695, %v596_v32 }
 0x3fb   :  { %v771_v28 = vpop.permute.xlu0 %770  ;;  %v755_v19 = vmul.f32 %v6754_v43, %v6748_v1  ;;  %v5562_v1 = vld [vmem:[%s9751_s1 + $0x20] sm:$0xff] }
 0x3fc   :  { %6336 = vmatpush3.msk.msra.mxu1 %vm39_vm0, %v771_v28  ;;  %6759 = vpow2.f32 %v600_v35 }
 0x3fd   :  { %6337 = vmatprep.subr.mxu1 %v6929_v2  ;;  %762 = vrot.lane.b32.xlu1 %v755_v19, %s6938_s30  ;;  %6761 = vpow2.f32 %v602_v36 }
 0x3fe   :  { %6338 = vmatpush3.msra.mxu1 %v769_v24 }
 0x3ff   :  { %6339 = vmatprep.subr.mxu1 %v6929_v2 }
 0x400   :  { %6340 = vmatpush3.msra.mxu1 %v767_v14 }
 0x401   :  { %v6756_v29 = vpop.eup %6755 }
 0x402   :  { %v756_v22 = vmul.f32 %v6756_v29, %v6750_v3  ;;  %v6758_v37 = vpop.eup %6757  ;;  %v5561_v3 = vld [vmem:[%s9751_s1 + $0x18] sm:$0xff] }
 0x403   :  { %v604_v41 = vsel %vm29_vm2, %v6758_v37, 0.0 }
 0x404   :  { %764 = vrot.lane.b32.xlu0 %v756_v22, %s6938_s30 }
 0x409   :  { %v6760_v38 = vpop.eup %6759 }
 0x40a   :  { %v607_v44 = vsel %vm29_vm2, %v6760_v38, 0.0  ;;  %v6762_v40 = vpop.eup %6761 }
 0x40b   :  { %v610_v39 = vsel %vm591_vm12, %v6762_v40, 0.0 }
 0x421   :  { %605 = vadd.xlane.f32.xlu1 %v604_v41  ;;  %v7459_v41 = vsub.s32 5, %v6992_v4 }
 0x423   :  { %608 = vadd.xlane.f32.xlu0 %v607_v44 }
 0x427   :  { %611 = vadd.xlane.f32.xlu0 %v610_v39 }
 0x46b   :  { %v761_v45 = vpop.permute.xlu0 %760 }
 0x46c   :  { %6342 = vmatmul.mubr.msk.f32.vlgmr.msra.gmra.mxu1 %vm29_vm2, %v761_v45 }
 0x46d   :  { %6344 = vmatprep.mubr.msk.f32.mxu1 %vm6930_vm1, %v6929_v2 }
 0x46f   :  { %v763_v46 = vpop.permute.xlu1 %762 }
 0x470   :  { %6345 = vmatmul.mubr.msk.f32.gmra.mxu1 %vm29_vm2, %v763_v46 }
 0x471   :  { %6347 = vmatprep.mubr.msk.f32.mxu1 %vm6930_vm1, %v6929_v2 }
 0x476   :  { %v765_v47 = vpop.permute.xlu0 %764 }
 0x477   :  { %6348 = vmatmul.mubr.msk.f32.gmra.mxu1 %vm29_vm2, %v765_v47 }
 0x4aa   :  { %v606_v42 = vpop.xlane.xlu1 %605 }
 0x4ab   :  { %6763 = vrcp.f32 %v606_v42 }
 0x4ac   :  { %v609_v48 = vpop.xlane.xlu0 %608 }
 0x4ad   :  { %6765 = vrcp.f32 %v609_v48 }
 0x4b0   :  { %v612_v49 = vpop.xlane.xlu0 %611 }
 0x4b1   :  { %6767 = vrcp.f32 %v612_v49 }
 0x4b8   :  { %v6764_v50 = vpop.eup %6763 }
 0x4b9   :  { %v616_v51 = vmul.f32 %v6764_v50, %v6758_v37 }
 0x4ba   :  { %v6766_v52 = vpop.eup %6765 }
 0x4bb   :  { %v862_v53 = vsel %vm29_vm2, %v616_v51, %v754_v23  ;;  %6327 = vmatmul.mubr.msk.f32.vlgmr.msra.gmra.mxu0 %vm29_vm2, %v616_v51  ;;  %v617_v54 = vmul.f32 %v6766_v52, %v6760_v38 }
 0x4bc   :  { %866 = vst.msk [vmem:[%s9755_s5] sm:$0xff] %vm865_vm13, %v862_v53  ;;  %6329 = vmatprep.mubr.msk.f32.mxu0 %vm6930_vm1, %v6929_v2  ;;  %6351 = vmatpush3.msra.mxu0 %v5562_v1  ;;  %v7472_v1 = vsub.s32 4, %v6992_v4 }
 0x4bd   :  { %v863_v55 = vsel %vm29_vm2, %v617_v54, %v755_v19  ;;  %6352 = vmatprep.subr.mxu0 %v6929_v2 }
 0x4be   :  { %v6768_v56 = vpop.eup %6767  ;;  %867 = vst.msk [vmem:[%s9755_s5 + $0x8] sm:$0xff] %vm865_vm13, %v863_v55  ;;  %6353 = vmatpush3.msra.mxu0 %v5561_v3 }
 0x4bf   :  { %6330 = vmatmul.mubr.msk.f32.gmra.mxu0 %vm29_vm2, %v617_v54  ;;  %v618_v57 = vmul.f32 %v6768_v56, %v6762_v40  ;;  %6363 = vmatprep.subr.mxu0 %v6929_v2  ;;  %v6901_v40 = vld [vmem:[%s9753_s3] sm:$0x3f] }
 0x4c0   :  { %6332 = vmatprep.mubr.msk.f32.mxu0 %vm6930_vm1, %v6929_v2 }
 0x4c1   :  { %v864_v58 = vsel %vm29_vm2, %v618_v57, %v756_v22 }
 0x4c2   :  { %869 = vst.msk [vmem:[%s9755_s5 + $0x10] sm:$0x3f] %vm9758_vm14, %v864_v58  ;;  %vm899_vm14 = vcmask 128000  }
 0x4c3   :  { %6333 = vmatmul.mubr.msk.f32.gmra.mxu0 %vm29_vm2, %v618_v57 }
 0x4c4   :  { %6354 = vmatprep.mubr.msk.f32.mxu0 %vm6930_vm1, %v6929_v2 }
 0x52c   :  { %v848_v59 = vpop.f32.mrf.mxu1 }
 0x52d   :  { %873 = vrot.lane.b32.xlu1 %v848_v59, %s6940_s22 }
 0x52e   :  { %v6343_v60 = vpop.f32.mrf.mxu1 }
 0x530   :  { %v853_v61 = vpop.f32.mrf.mxu1 }
 0x531   :  { %875 = vrot.lane.b32.xlu0 %v853_v61, %s6940_s22 }
 0x532   :  { %v6346_v62 = vpop.f32.mrf.mxu1 }
 0x537   :  { %v858_v63 = vpop.f32.mrf.mxu1 }
 0x538   :  { %877 = vrot.lane.b32.xlu1 %v858_v63, %s6940_s22 }
 0x539   :  { %v6349_v0 = vpop.f32.mrf.mxu1 }
 0x53a   :  { %v7469_v0 = vsub.s32 3, %v6992_v4 }
 0x53c   :  { %1058 = vrot.lane.b32.xlu1 %v1056_v7, %s6931_s13  ;;  %v936_v3 = vrot.slane %v6901_v40, %v7469_v0  ;;  %v948_v7 = vrot.slane %v6901_v40, %v7472_v1 }
 0x57b   :  { %v696_v9 = vpop.f32.mrf.mxu0 }
 0x57d   :  { %v6328_v10 = vpop.f32.mrf.mxu0 }
 0x57f   :  { %v701_v16 = vpop.f32.mrf.mxu0 }
 0x581   :  { %v6331_v17 = vpop.f32.mrf.mxu0 }
 0x583   :  { %v706_v11 = vpop.f32.mrf.mxu0 }
 0x585   :  { %v6334_v18 = vpop.f32.mrf.mxu0 }
 0x59f   :  { %v874_v15 = vpop.permute.xlu1 %873 }
 0x5a0   :  { %v883_v21 = vsel %vm882_vm15, %v696_v9, %v874_v15 }
 0x5a1   :  { %v890_v27 = vadd.f32 %v889_v13, %v883_v21 }
 0x5a3   :  { %v876_v31 = vpop.permute.xlu0 %875  ;;  %v893_v24 = vmax.f32 %v890_v27, 0.0 }
 0x5a4   :  { %v884_v25 = vsel %vm882_vm15, %v701_v16, %v876_v31 }
 0x5a5   :  { %v891_v26 = vadd.f32 %v889_v13, %v884_v25  ;;  %v896_v29 = vsel %vm207_vm3, %v893_v24, 0.0 }
 0x5a7   :  { %v894_v23 = vmax.f32 %v891_v26, 0.0  ;;  %v7489_v26 = vrot.slane %v7442_v5, %v7030_v12 }
 0x5a9   :  { %v897_v19 = vsel %vm207_vm3, %v894_v23, 0.0 }
 0x5aa   :  { %v878_v43 = vpop.permute.xlu1 %877  ;;  %v898_v6 = vadd.f32 %v897_v19, %v896_v29 }
 0x5ab   :  { %v885_v28 = vsel %vm882_vm15, %v706_v11, %v878_v43 }
 0x5ac   :  { %v892_v14 = vadd.f32 %v889_v13, %v885_v28 }
 0x5ae   :  { %v895_v22 = vmax.f32 %v892_v14, 0.0  ;;  %v7485_v31 = vpop.permute.xlu1 %1058 }
 0x5b0   :  { %v900_v30 = vsel %vm899_vm14, %v895_v22, 0.0 }
 0x5b1   :  { %v901_v32 = vadd.f32 %v900_v30, %v898_v6 }
 0x5b3   :  { %v902_v33 = vrot.slane %v901_v32, 4 }
 0x5b5   :  { %v903_v34 = vadd.f32 %v902_v33, %v901_v32  ;;  %v5598_v32 = vld [vmem:[%s9752_s2 + $0x258] sm:$0xff] }
 0x5b6   :  { %5911 = vmatprep.subr.mxu1 %v5598_v32  ;;  %v5582_v33 = vld [vmem:[%s9752_s2 + $0x1d8] sm:$0xff] }
 0x5b7   :  { %v904_v35 = vrot.slane %v903_v34, 2  ;;  %5912 = vmatpush3.msra.mxu1 %v5582_v33  ;;  %v5602_v33 = vld [vmem:[%s9752_s2 + $0x278] sm:$0xff] }
 0x5b9   :  { %v905_v36 = vadd.f32 %v904_v35, %v903_v34  ;;  %v5597_v34 = vld [vmem:[%s9752_s2 + $0x250] sm:$0xff] }
 0x5ba   :  { %v5581_v35 = vld [vmem:[%s9752_s2 + $0x1d0] sm:$0xff]  ;;  %5913 = vmatprep.subr.mxu1 %v5597_v34 }
 0x5bb   :  { %v906_v37 = vrot.slane %v905_v36, 1  ;;  %5914 = vmatpush3.msra.mxu1 %v5581_v35  ;;  %v5601_v34 = vld [vmem:[%s9752_s2 + $0x270] sm:$0xff] }
 0x5bd   :  { %v907_v38 = vadd.f32 %v906_v37, %v905_v36 }
 0x5bf   :  { %v909_v44 = vmul.f32 0.045454547, %v907_v38  ;;  %v5596_v38 = vld [vmem:[%s9752_s2 + $0x248] sm:$0xff] }
 0x5c0   :  { %5915 = vmatprep.subr.mxu1 %v5596_v38  ;;  %v5599_v38 = vld [vmem:[%s9752_s2 + $0x260] sm:$0xff] }
 0x5c1   :  { %v910_v39 = vmul.f32 %v6901_v40, %v909_v44  ;;  %v5580_v44 = vld [vmem:[%s9752_s2 + $0x1c8] sm:$0xff]  ;;  %v5595_v40 = vld [vmem:[%s9752_s2 + $0x240] sm:$0xff] }
 0x5c2   :  { %5916 = vmatpush3.msra.mxu1 %v5580_v44 }
 0x5c3   :  { %v914_v45 = vrot.slane %v910_v39, %v7459_v41  ;;  %5917 = vmatprep.subr.mxu1 %v5595_v40 }
 0x5c5   :  { %v915_v46 = vsub.f32 %v893_v24, %v914_v45  ;;  %v916_v47 = vsub.f32 %v894_v23, %v914_v45  ;;  %v917_v42 = vsub.f32 %v895_v22, %v914_v45  ;;  %v5579_v45 = vld [vmem:[%s9752_s2 + $0x1c0] sm:$0xff] }
 0x5c6   :  { %5918 = vmatpush3.msra.mxu1 %v5579_v45 }
 0x5c7   :  { %v918_v48 = vmul.f32 %v915_v46, %v915_v46  ;;  %v919_v49 = vmul.f32 %v916_v47, %v916_v47  ;;  %v920_v50 = vmul.f32 %v917_v42, %v917_v42  ;;  %v937_v9 = vmul.f32 %v936_v3, %v915_v46  ;;  %v5594_v46 = vld [vmem:[%s9752_s2 + $0x238] sm:$0xff] }
 0x5c8   :  { %v938_v17 = vmul.f32 %v936_v3, %v916_v47  ;;  %v939_v15 = vmul.f32 %v936_v3, %v917_v42  ;;  %v5578_v47 = vld [vmem:[%s9752_s2 + $0x1b8] sm:$0xff]  ;;  %5919 = vmatprep.subr.mxu1 %v5594_v46  ;;  %v5572_v3 = vld [vmem:[%s9752_s2 + $0x188] sm:$0xff] }
 0x5c9   :  { %v921_v51 = vsel %vm207_vm3, %v918_v48, 0.0  ;;  %v922_v52 = vsel %vm207_vm3, %v919_v49, 0.0  ;;  %v924_v54 = vsel %vm899_vm14, %v920_v50, 0.0  ;;  %v5593_v48 = vld [vmem:[%s9752_s2 + $0x230] sm:$0xff]  ;;  %5920 = vmatpush3.msra.mxu1 %v5578_v47  ;;  %v5592_v50 = vld [vmem:[%s9752_s2 + $0x228] sm:$0xff] }
 0x5ca   :  { %v923_v53 = vadd.f32 %v922_v52, %v921_v51  ;;  %v5577_v49 = vld [vmem:[%s9752_s2 + $0x1b0] sm:$0xff]  ;;  %5921 = vmatprep.subr.mxu1 %v5593_v48  ;;  %v5576_v52 = vld [vmem:[%s9752_s2 + $0x1a8] sm:$0xff] }
 0x5cb   :  { %5922 = vmatpush3.msra.mxu1 %v5577_v49 }
 0x5cc   :  { %v925_v55 = vadd.f32 %v924_v54, %v923_v53  ;;  %5923 = vmatprep.subr.mxu1 %v5592_v50  ;;  %v5591_v53 = vld [vmem:[%s9752_s2 + $0x220] sm:$0xff] }
 0x5cd   :  { %v5575_v54 = vld [vmem:[%s9752_s2 + $0x1a0] sm:$0xff]  ;;  %5924 = vmatpush3.msra.mxu1 %v5576_v52 }
 0x5ce   :  { %v926_v56 = vrot.slane %v925_v55, 4  ;;  %5925 = vmatprep.subr.mxu1 %v5591_v53 }
 0x5cf   :  { %5926 = vmatpush3.msra.mxu1 %v5575_v54 }
 0x5d0   :  { %v927_v57 = vadd.f32 %v926_v56, %v925_v55  ;;  %v5590_v56 = vld [vmem:[%s9752_s2 + $0x218] sm:$0xff] }
 0x5d1   :  { %5927 = vmatprep.subr.mxu1 %v5590_v56 }
 0x5d2   :  { %v928_v58 = vrot.slane %v927_v57, 2 }
 0x5d4   :  { %v929_v59 = vadd.f32 %v928_v58, %v927_v57  ;;  %v5574_v57 = vld [vmem:[%s9752_s2 + $0x198] sm:$0xff]  ;;  %v5589_v58 = vld [vmem:[%s9752_s2 + $0x210] sm:$0xff] }
 0x5d5   :  { %5928 = vmatpush3.msra.mxu1 %v5574_v57 }
 0x5d6   :  { %v930_v60 = vrot.slane %v929_v59, 1  ;;  %5929 = vmatprep.subr.mxu1 %v5589_v58 }
 0x5d8   :  { %v931_v61 = vadd.f32 %v930_v60, %v929_v59  ;;  %v5573_v60 = vld [vmem:[%s9752_s2 + $0x190] sm:$0xff] }
 0x5d9   :  { %5930 = vmatpush3.msra.mxu1 %v5573_v60 }
 0x5da   :  { %v932_v62 = vmul.f32 0.045454547, %v931_v61  ;;  %v5610_v61 = vld [vmem:[%s9752_s2 + $0x2b8] sm:$0xff] }
 0x5dc   :  { %v940_v63 = vadd.f32 1e-05, %v932_v62  ;;  %v5588_v62 = vld [vmem:[%s9752_s2 + $0x208] sm:$0xff] }
 0x5dd   :  { %5931 = vmatprep.subr.mxu1 %v5588_v62 }
 0x5de   :  { %6769 = vrsqrt.f32 %v940_v63  ;;  %v5609_v63 = vld [vmem:[%s9752_s2 + $0x2b0] sm:$0xff]  ;;  %5932 = vmatpush3.msra.mxu1 %v5572_v3 }
 0x5eb   :  { %v6770_v10 = vpop.eup %6769 }
 0x5ec   :  { %v942_v16 = vmul.f32 %v6770_v10, %v937_v9  ;;  %v943_v18 = vmul.f32 %v6770_v10, %v938_v17  ;;  %v944_v13 = vmul.f32 %v6770_v10, %v939_v15  ;;  %v5587_v10 = vld [vmem:[%s9752_s2 + $0x200] sm:$0xff] }
 0x5ed   :  { %v5571_v17 = vld [vmem:[%s9752_s2 + $0x180] sm:$0xff]  ;;  %5933 = vmatprep.subr.mxu1 %v5587_v10 }
 0x5ee   :  { %v949_v11 = vadd.f32 %v948_v7, %v942_v16  ;;  %v950_v21 = vadd.f32 %v948_v7, %v943_v18  ;;  %v951_v4 = vadd.f32 %v948_v7, %v944_v13  ;;  %v5608_v16 = vld [vmem:[%s9752_s2 + $0x2a8] sm:$0xff]  ;;  %v5607_v18 = vld [vmem:[%s9752_s2 + $0x2a0] sm:$0xff]  ;;  %5934 = vmatpush3.msra.mxu1 %v5571_v17 }
 0x5f0   :  { %6355 = vmatmul.mubr.msk.f32.vlgmr.msra.gmra.mxu0 %vm207_vm3, %v949_v11  ;;  %v5586_v11 = vld [vmem:[%s9752_s2 + $0x1f8] sm:$0xff] }
 0x5f1   :  { %6357 = vmatprep.mubr.msk.f32.mxu0 %vm6930_vm1, %v6929_v2  ;;  %6364 = vmatpush3.msra.mxu0 %v5610_v61 }
 0x5f2   :  { %6365 = vmatprep.subr.mxu0 %v6929_v2  ;;  %5935 = vmatprep.subr.mxu1 %v5586_v11 }
 0x5f3   :  { %6366 = vmatpush3.msra.mxu0 %v5609_v63 }
 0x5f4   :  { %6358 = vmatmul.mubr.msk.f32.gmra.mxu0 %vm207_vm3, %v950_v21  ;;  %6367 = vmatprep.subr.mxu0 %v6929_v2  ;;  %v5570_v21 = vld [vmem:[%s9752_s2 + $0x178] sm:$0xff] }
 0x5f5   :  { %6360 = vmatprep.mubr.msk.f32.mxu0 %vm6930_vm1, %v6929_v2  ;;  %6368 = vmatpush3.msra.mxu0 %v5608_v16 }
 0x5f6   :  { %6369 = vmatprep.subr.mxu0 %v6929_v2  ;;  %5936 = vmatpush3.msra.mxu1 %v5570_v21 }
 0x5f7   :  { %6370 = vmatpush3.msra.mxu0 %v5607_v18 }
 0x5f8   :  { %6361 = vmatmul.mubr.msk.f32.gmra.mxu0 %vm207_vm3, %v951_v4  ;;  %v5585_v4 = vld [vmem:[%s9752_s2 + $0x1f0] sm:$0xff]  ;;  %6371 = vmatprep.subr.mxu0 %v6929_v2 }
 0x5f9   :  { %6387 = vmatprep.mubr.msk.f32.mxu0 %vm6930_vm1, %v6929_v2  ;;  %5937 = vmatprep.subr.mxu1 %v5585_v4 }
 0x6b0   :  { %v1032_v25 = vpop.f32.mrf.mxu0 }
 0x6b1   :  { %v7492_v27 = vadd.f32 %v7485_v31, %v1032_v25  ;;  %v7499_v43 = vadd.f32 %v7489_v26, %v1032_v25  ;;  %v5606_v25 = vld [vmem:[%s9752_s2 + $0x298] sm:$0xff] }
 0x6b2   :  { %v6356_v23 = vpop.f32.mrf.mxu0  ;;  %6372 = vmatpush3.msra.mxu0 %v5606_v25 }
 0x6b3   :  { %1076 = vrot.lane.b32.xlu0 %v7492_v27, %s6931_s13  ;;  %1067 = vrot.lane.b32.xlu1 %v7492_v27, %s6932_s16  ;;  %v1152_v19 = vrot.slane %v7499_v43, 1  ;;  %v1160_v29 = vrot.slane %v7499_v43, 3  ;;  %v1168_v22 = vrot.slane %v7499_v43, 5  ;;  %v1156_v6 = vrot.slane %v7499_v43, 2  ;;  %v5569_v23 = vld [vmem:[%s9752_s2 + $0x170] sm:$0xff] }
 0x6b4   :  { %v1037_v24 = vpop.f32.mrf.mxu0  ;;  %v1172_v30 = vrot.slane %v7499_v43, 6  ;;  %v1164_v36 = vrot.slane %v7499_v43, 4  ;;  %v1176_v37 = vrot.slane %v7499_v43, 7  ;;  %5938 = vmatpush3.msra.mxu1 %v5569_v23  ;;  %6373 = vmatprep.subr.mxu0 %v6929_v2 }
 0x6b5   :  { %v7549_v39 = vadd.f32 %v7485_v31, %v1037_v24  ;;  %v7565_v42 = vadd.f32 %v7489_v26, %v1037_v24 }
 0x6b6   :  { %v6359_v28 = vpop.f32.mrf.mxu0 }
 0x6b7   :  { %1094 = vrot.lane.b32.xlu0 %v7492_v27, %s6933_s17  ;;  %1085 = vrot.lane.b32.xlu1 %v7492_v27, %s6934_s18  ;;  %v1181_v51 = vrot.slane %v7565_v42, 1  ;;  %v1185_v55 = vrot.slane %v7565_v42, 2  ;;  %v1193_v59 = vrot.slane %v7565_v42, 4  ;;  %v1189_v7 = vrot.slane %v7565_v42, 3 }
 0x6b8   :  { %v7505_v5 = vpop.f32.mrf.mxu0  ;;  %v1201_v9 = vrot.slane %v7565_v42, 6  ;;  %v1197_v15 = vrot.slane %v7565_v42, 5  ;;  %v1205_v13 = vrot.slane %v7565_v42, 7 }
 0x6b9   :  { %v7666_v24 = vadd.f32 %v7489_v26, %v7505_v5  ;;  %v7670_v28 = vadd.f32 %v7485_v31, %v7505_v5  ;;  %v5568_v26 = vld [vmem:[%s9752_s2 + $0x168] sm:$0xff]  ;;  %v5583_v31 = vld [vmem:[%s9752_s2 + $0x1e0] sm:$0xff] }
 0x6ba   :  { %v6362_v14 = vpop.f32.mrf.mxu0  ;;  %v5604_v5 = vld [vmem:[%s9752_s2 + $0x288] sm:$0xff] }
 0x6bb   :  { %1103 = vrot.lane.b32.xlu0 %v7492_v27, %s6935_s19  ;;  %1153 = vrot.lane.b32.xlu1 %v1152_v19, %s6931_s13  ;;  %v5584_v19 = vld [vmem:[%s9752_s2 + $0x1e8] sm:$0xff]  ;;  %v5605_v14 = vld [vmem:[%s9752_s2 + $0x290] sm:$0xff]  ;;  %v1224_v32 = vrot.slane %v7666_v24, 1  ;;  %v1240_v35 = vrot.slane %v7666_v24, 5 }
 0x6bc   :  { %5939 = vmatprep.subr.mxu1 %v5584_v19  ;;  %6374 = vmatpush3.msra.mxu0 %v5605_v14 }
 0x6bd   :  { %5940 = vmatpush3.msra.mxu1 %v5568_v26  ;;  %6375 = vmatprep.subr.mxu0 %v6929_v2 }
 0x6be   :  { %5941 = vmatprep.subr.mxu1 %v5583_v31  ;;  %6376 = vmatpush3.msra.mxu0 %v5604_v5 }
 0x6bf   :  { %1112 = vrot.lane.b32.xlu0 %v7492_v27, %s6936_s20  ;;  %1161 = vrot.lane.b32.xlu1 %v1160_v29, %s6933_s17  ;;  %v1228_v29 = vrot.slane %v7666_v24, 2 }
 0x6c0   :  { %6377 = vmatprep.subr.mxu0 %v6929_v2 }
 0x6c3   :  { %1121 = vrot.lane.b32.xlu0 %v7492_v27, %s6937_s21  ;;  %1169 = vrot.lane.b32.xlu1 %v1168_v22, %s6936_s20  ;;  %v5567_v22 = vld [vmem:[%s9752_s2 + $0x160] sm:$0xff] }
 0x6c4   :  { %5942 = vmatpush3.msra.mxu1 %v5567_v22 }
 0x6c5   :  { %6396 = vmatprep.subr.mxu1 %v6929_v2 }
 0x6c7   :  { %1157 = vrot.lane.b32.xlu0 %v1156_v6, %s6934_s18  ;;  %1173 = vrot.lane.b32.xlu1 %v1172_v30, %s6937_s21  ;;  %v5603_v6 = vld [vmem:[%s9752_s2 + $0x280] sm:$0xff]  ;;  %v1232_v30 = vrot.slane %v7666_v24, 3 }
 0x6c8   :  { %6378 = vmatpush3.msra.mxu0 %v5603_v6 }
 0x6c9   :  { %6379 = vmatprep.subr.mxu0 %v6929_v2 }
 0x6ca   :  { %6380 = vmatpush3.msra.mxu0 %v5602_v33 }
 0x6cb   :  { %1165 = vrot.lane.b32.xlu0 %v1164_v36, %s6935_s19  ;;  %1177 = vrot.lane.b32.xlu1 %v1176_v37, %s6932_s16  ;;  %v1236_v36 = vrot.slane %v7666_v24, 4  ;;  %v5600_v37 = vld [vmem:[%s9752_s2 + $0x268] sm:$0xff] }
 0x6cc   :  { %6381 = vmatprep.subr.mxu0 %v6929_v2 }
 0x6cd   :  { %6382 = vmatpush3.msra.mxu0 %v5601_v34 }
 0x6ce   :  { %6383 = vmatprep.subr.mxu0 %v6929_v2 }
 0x6cf   :  { %1096 = vrot.lane.b32.xlu0 %v7549_v39, %s6933_s17  ;;  %1069 = vrot.lane.b32.xlu1 %v7549_v39, %s6932_s16 }
 0x6d0   :  { %6384 = vmatpush3.msra.mxu0 %v5600_v37 }
 0x6d1   :  { %6385 = vmatprep.subr.mxu0 %v6929_v2 }
 0x6d2   :  { %6386 = vmatpush3.msra.mxu0 %v5599_v38 }
 0x6d3   :  { %1114 = vrot.lane.b32.xlu0 %v7549_v39, %s6936_s20  ;;  %1078 = vrot.lane.b32.xlu1 %v7549_v39, %s6931_s13 }
 0x6d4   :  { %6411 = vmatprep.subr.mxu0 %v6929_v2 }
 0x6d7   :  { %1087 = vrot.lane.b32.xlu1 %v7549_v39, %s6934_s18  ;;  %1182 = vrot.lane.b32.xlu0 %v1181_v51, %s6931_s13 }
 0x6db   :  { %1105 = vrot.lane.b32.xlu1 %v7549_v39, %s6935_s19  ;;  %1186 = vrot.lane.b32.xlu0 %v1185_v55, %s6934_s18 }
 0x6df   :  { %1123 = vrot.lane.b32.xlu1 %v7549_v39, %s6937_s21  ;;  %1194 = vrot.lane.b32.xlu0 %v1193_v59, %s6935_s19 }
 0x6e3   :  { %1190 = vrot.lane.b32.xlu1 %v1189_v7, %s6933_s17  ;;  %1202 = vrot.lane.b32.xlu0 %v1201_v9, %s6937_s21 }
 0x6e7   :  { %1198 = vrot.lane.b32.xlu1 %v1197_v15, %s6936_s20  ;;  %1206 = vrot.lane.b32.xlu0 %v1205_v13, %s6932_s16 }
 0x6eb   :  { %1080 = vrot.lane.b32.xlu1 %v7670_v28, %s6931_s13  ;;  %1071 = vrot.lane.b32.xlu0 %v7670_v28, %s6932_s16 }
 0x6ef   :  { %1089 = vrot.lane.b32.xlu0 %v7670_v28, %s6934_s18  ;;  %1229 = vrot.lane.b32.xlu1 %v1228_v29, %s6934_s18 }
 0x6f3   :  { %1233 = vrot.lane.b32.xlu1 %v1232_v30, %s6933_s17  ;;  %1225 = vrot.lane.b32.xlu0 %v1224_v32, %s6931_s13 }
 0x6f7   :  { %1241 = vrot.lane.b32.xlu1 %v1240_v35, %s6936_s20  ;;  %1237 = vrot.lane.b32.xlu0 %v1236_v36, %s6935_s19 }
 0x6fb   :  { %1107 = vrot.lane.b32.xlu1 %v7670_v28, %s6935_s19  ;;  %1098 = vrot.lane.b32.xlu0 %v7670_v28, %s6933_s17 }
 0x6ff   :  { %1125 = vrot.lane.b32.xlu1 %v7670_v28, %s6937_s21  ;;  %1116 = vrot.lane.b32.xlu0 %v7670_v28, %s6936_s20 }
 0x725   :  { %v1077_v44 = vpop.permute.xlu0 %1076  ;;  %v1068_v40 = vpop.permute.xlu1 %1067 }
 0x726   :  { %v1130_v11 = vsel %vm207_vm3, %v1068_v40, %v7492_v27 }
 0x727   :  { %v1133_v4 = vsel %vm211_vm4, %v1130_v11, %v1077_v44 }
 0x729   :  { %v1095_v45 = vpop.permute.xlu0 %1094  ;;  %v1086_v46 = vpop.permute.xlu1 %1085 }
 0x72a   :  { %v1136_v19 = vsel %vm215_vm5, %v1133_v4, %v1086_v46 }
 0x72d   :  { %v1104_v47 = vpop.permute.xlu0 %1103  ;;  %v1154_v48 = vpop.permute.xlu1 %1153 }
 0x72e   :  { %v1209_v61 = vsel %vm207_vm3, %v7499_v43, %v1154_v48 }
 0x731   :  { %v1113_v49 = vpop.permute.xlu0 %1112  ;;  %v1162_v50 = vpop.permute.xlu1 %1161 }
 0x735   :  { %v1122_v51 = vpop.permute.xlu0 %1121  ;;  %v1170_v52 = vpop.permute.xlu1 %1169 }
 0x739   :  { %v1158_v53 = vpop.permute.xlu0 %1157  ;;  %v1174_v54 = vpop.permute.xlu1 %1173 }
 0x73a   :  { %v1210_v62 = vsel %vm211_vm4, %v1209_v61, %v1158_v53 }
 0x73b   :  { %v1211_v7 = vsel %vm215_vm5, %v1210_v62, %v1162_v50 }
 0x73d   :  { %v1166_v55 = vpop.permute.xlu0 %1165  ;;  %v1178_v56 = vpop.permute.xlu1 %1177 }
 0x73e   :  { %v1212_v9 = vsel %vm219_vm6, %v1211_v7, %v1166_v55 }
 0x73f   :  { %v1213_v17 = vsel %vm223_vm7, %v1212_v9, %v1170_v52 }
 0x740   :  { %v1214_v13 = vsel %vm227_vm8, %v1213_v17, %v1174_v54 }
 0x741   :  { %v1097_v57 = vpop.permute.xlu0 %1096  ;;  %v1070_v58 = vpop.permute.xlu1 %1069  ;;  %v1215_v14 = vsel %vm231_vm9, %v1214_v13, %v1178_v56 }
 0x742   :  { %v1131_v21 = vsel %vm207_vm3, %v1070_v58, %v7549_v39  ;;  %v1139_v39 = vsel %vm219_vm6, %v1136_v19, %v1095_v45  ;;  %v7760_v22 = vrot.slane %v1215_v14, %v7030_v12 }
 0x743   :  { %v1142_v30 = vsel %vm223_vm7, %v1139_v39, %v1104_v47 }
 0x744   :  { %v1145_v36 = vsel %vm227_vm8, %v1142_v30, %v1113_v49 }
 0x745   :  { %v1115_v59 = vpop.permute.xlu0 %1114  ;;  %v1079_v60 = vpop.permute.xlu1 %1078  ;;  %v1148_v38 = vsel %vm231_vm9, %v1145_v36, %v1122_v51 }
 0x746   :  { %v1134_v25 = vsel %vm211_vm4, %v1131_v21, %v1079_v60  ;;  %v1261_v40 = vadd.f32 %v7760_v22, %v1148_v38 }
 0x748   :  { %v1270_v54 = vmul.f32 0.2, %v1261_v40 }
 0x749   :  { %v1088_v63 = vpop.permute.xlu1 %1087  ;;  %v1183_v3 = vpop.permute.xlu0 %1182 }
 0x74a   :  { %v1216_v23 = vsel %vm207_vm3, %v7565_v42, %v1183_v3  ;;  %v1137_v27 = vsel %vm215_vm5, %v1134_v25, %v1088_v63  ;;  %v1279_v61 = vmax.f32 %v1261_v40, %v1270_v54 }
 0x74b   :  { %v1140_v6 = vsel %vm219_vm6, %v1137_v27, %v1097_v57 }
 0x74d   :  { %v1106_v10 = vpop.permute.xlu1 %1105  ;;  %v1187_v16 = vpop.permute.xlu0 %1186 }
 0x74e   :  { %v1217_v26 = vsel %vm211_vm4, %v1216_v23, %v1187_v16  ;;  %v1143_v32 = vsel %vm223_vm7, %v1140_v6, %v1106_v10 }
 0x74f   :  { %v1146_v45 = vsel %vm227_vm8, %v1143_v32, %v1115_v59 }
 0x751   :  { %v1124_v18 = vpop.permute.xlu1 %1123  ;;  %v1195_v15 = vpop.permute.xlu0 %1194 }
 0x752   :  { %v1149_v47 = vsel %vm231_vm9, %v1146_v45, %v1124_v18 }
 0x753   :  { %v1264_v55 = vadd.f32 %v7760_v22, %v1149_v47 }
 0x755   :  { %v1191_v31 = vpop.permute.xlu1 %1190  ;;  %v1203_v5 = vpop.permute.xlu0 %1202  ;;  %v1273_v59 = vmul.f32 0.2, %v1264_v55 }
 0x756   :  { %v1218_v29 = vsel %vm215_vm5, %v1217_v26, %v1191_v31 }
 0x757   :  { %v1219_v34 = vsel %vm219_vm6, %v1218_v29, %v1195_v15  ;;  %v1282_v16 = vmax.f32 %v1264_v55, %v1273_v59 }
 0x759   :  { %v1199_v33 = vpop.permute.xlu1 %1198  ;;  %v1207_v35 = vpop.permute.xlu0 %1206 }
 0x75a   :  { %v1220_v37 = vsel %vm223_vm7, %v1219_v34, %v1199_v33 }
 0x75b   :  { %v1221_v44 = vsel %vm227_vm8, %v1220_v37, %v1203_v5 }
 0x75c   :  { %v1222_v46 = vsel %vm231_vm9, %v1221_v44, %v1207_v35 }
 0x75d   :  { %v1256_v48 = vrot.slane %v1222_v46, %v7030_v12  ;;  %v1081_v50 = vpop.permute.xlu1 %1080  ;;  %v1072_v52 = vpop.permute.xlu0 %1071 }
 0x75e   :  { %v1132_v17 = vsel %vm207_vm3, %v1072_v52, %v7670_v28 }
 0x75f   :  { %v1262_v53 = vadd.f32 %v1256_v48, %v1148_v38  ;;  %v1265_v49 = vadd.f32 %v1256_v48, %v1149_v47  ;;  %v1135_v21 = vsel %vm211_vm4, %v1132_v17, %v1081_v50 }
 0x761   :  { %v1090_v51 = vpop.permute.xlu0 %1089  ;;  %v1230_v56 = vpop.permute.xlu1 %1229  ;;  %v1271_v57 = vmul.f32 0.2, %v1262_v53  ;;  %v1274_v58 = vmul.f32 0.2, %v1265_v49 }
 0x762   :  { %v1138_v28 = vsel %vm215_vm5, %v1135_v21, %v1090_v51 }
 0x763   :  { %v1280_v60 = vmax.f32 %v1262_v53, %v1271_v57  ;;  %v1283_v3 = vmax.f32 %v1265_v49, %v1274_v58 }
 0x765   :  { %1406 = vmatprep.mubr.f32.mxu1 %v1280_v60  ;;  %v1234_v62 = vpop.permute.xlu1 %1233  ;;  %v1226_v63 = vpop.permute.xlu0 %1225 }
 0x766   :  { %v1244_v7 = vsel %vm207_vm3, %v7666_v24, %v1226_v63  ;;  %1407 = vmatmul.mubr.f32.vlgmr.msra.gmra.mxu1 %v1279_v61 }
 0x767   :  { %v1245_v9 = vsel %vm211_vm4, %v1244_v7, %v1230_v56  ;;  %6397 = vmatpush3.msk.msra.mxu1 %vm39_vm0, %v7666_v24  ;;  %1411 = vmatprep.mubr.f32.mxu1 %v1283_v3 }
 0x768   :  { %6398 = vmatprep.subr.mxu1 %v6929_v2  ;;  %v1246_v10 = vsel %vm215_vm5, %v1245_v9, %v1234_v62 }
 0x769   :  { %6399 = vmatpush3.msra.mxu1 %v7565_v42  ;;  %v1242_v11 = vpop.permute.xlu1 %1241  ;;  %v1238_v18 = vpop.permute.xlu0 %1237 }
 0x76a   :  { %6400 = vmatprep.subr.mxu1 %v6929_v2  ;;  %v1247_v15 = vsel %vm219_vm6, %v1246_v10, %v1238_v18  ;;  %1412 = vmatmul.mubr.f32.gmra.mxu1 %v1282_v16 }
 0x76b   :  { %v1248_v13 = vsel %vm223_vm7, %v1247_v15, %v1242_v11  ;;  %6401 = vmatpush3.msra.mxu1 %v7499_v43 }
 0x76c   :  { %v1260_v4 = vrot.slane %v1248_v13, %v7030_v12  ;;  %6426 = vmatprep.subr.mxu1 %v6929_v2 }
 0x76d   :  { %v1108_v25 = vpop.permute.xlu1 %1107  ;;  %v1099_v23 = vpop.permute.xlu0 %1098 }
 0x76e   :  { %v1263_v19 = vadd.f32 %v1260_v4, %v1142_v30  ;;  %v1141_v14 = vsel %vm219_vm6, %v1138_v28, %v1099_v23  ;;  %v1266_v27 = vadd.f32 %v1260_v4, %v1143_v32 }
 0x76f   :  { %v1144_v26 = vsel %vm223_vm7, %v1141_v14, %v1108_v25 }
 0x770   :  { %v1272_v31 = vmul.f32 0.2, %v1263_v19  ;;  %v1269_v6 = vadd.f32 %v1260_v4, %v1144_v26  ;;  %v1275_v34 = vmul.f32 0.2, %v1266_v27 }
 0x771   :  { %v1126_v5 = vpop.permute.xlu1 %1125  ;;  %v1117_v29 = vpop.permute.xlu0 %1116 }
 0x772   :  { %v1281_v39 = vmax.f32 %v1263_v19, %v1272_v31  ;;  %v1147_v33 = vsel %vm227_vm8, %v1144_v26, %v1117_v29  ;;  %v1278_v30 = vmul.f32 0.2, %v1269_v6  ;;  %v1284_v32 = vmax.f32 %v1266_v27, %v1275_v34 }
 0x773   :  { %v1150_v35 = vsel %vm231_vm9, %v1147_v33, %v1126_v5 }
 0x774   :  { %v1267_v36 = vadd.f32 %v7760_v22, %v1150_v35  ;;  %v1268_v37 = vadd.f32 %v1256_v48, %v1150_v35  ;;  %6388 = vmatmul.mubr.msk.f32.vlgmr.msra.gmra.mxu0 %vm227_vm8, %v1281_v39  ;;  %v1287_v46 = vmax.f32 %v1269_v6, %v1278_v30 }
 0x775   :  { %6390 = vmatprep.mubr.msk.f32.mxu0 %vm6930_vm1, %v6929_v2 }
 0x776   :  { %v1277_v38 = vmul.f32 0.2, %v1268_v37  ;;  %v1276_v44 = vmul.f32 0.2, %v1267_v36 }
 0x778   :  { %6391 = vmatmul.mubr.msk.f32.gmra.mxu0 %vm227_vm8, %v1284_v32  ;;  %v1286_v40 = vmax.f32 %v1268_v37, %v1277_v38  ;;  %v1285_v45 = vmax.f32 %v1267_v36, %v1276_v44 }
 0x779   :  { %6393 = vmatprep.mubr.msk.f32.mxu0 %vm6930_vm1, %v6929_v2 }
 0x77a   :  { %1416 = vmatprep.mubr.f32.mxu1 %v1286_v40 }
 0x77b   :  { %1417 = vmatmul.mubr.f32.gmra.mxu1 %v1285_v45 }
 0x77c   :  { %6394 = vmatmul.mubr.msk.f32.gmra.mxu0 %vm227_vm8, %v1287_v46  ;;  %6402 = vmatprep.mubr.msk.f32.mxu1 %vm6930_vm1, %v6929_v2 }
 0x77d   :  { %6417 = vmatprep.mubr.msk.f32.mxu0 %vm6930_vm1, %v6929_v2 }
 0x826   :  { %v5943_v22 = vpop.f32.mrf.mxu1 }
 0x828   :  { %v5944_v47 = vpop.f32.mrf.mxu1 }
 0x829   :  { %v5945_v50 = vadd.f32 %v5944_v47, %v5943_v22 }
 0x82a   :  { %v5946_v48 = vpop.f32.mrf.mxu1 }
 0x82c   :  { %v5947_v52 = vpop.f32.mrf.mxu1 }
 0x82d   :  { %v5948_v55 = vadd.f32 %v5947_v52, %v5946_v48 }
 0x834   :  { %v1488_v53 = vpop.f32.mrf.mxu0 }
 0x835   :  { %v7810_v49 = vadd.f32 %v5945_v50, %v1488_v53 }
 0x836   :  { %v6389_v54 = vpop.f32.mrf.mxu0 }
 0x837   :  { %v1626_v51 = vsel %vm710_vm10, %v7810_v49, -inf  ;;  %v1502_v39 = vsel %vm29_vm2, %v7810_v49, -inf }
 0x838   :  { %1627 = vmax.xlane.f32.xlu0 %v1626_v51  ;;  %v1493_v56 = vpop.f32.mrf.mxu0 }
 0x839   :  { %v7814_v57 = vadd.f32 %v5948_v55, %v1493_v56 }
 0x83a   :  { %v6392_v58 = vpop.f32.mrf.mxu0 }
 0x83b   :  { %v5949_v60 = vpop.f32.mrf.mxu1  ;;  %v1629_v61 = vsel %vm710_vm10, %v7814_v57, -inf  ;;  %v1505_v31 = vsel %vm29_vm2, %v7814_v57, -inf }
 0x83c   :  { %1630 = vmax.xlane.f32.xlu1 %v1629_v61  ;;  %v1498_v59 = vpop.f32.mrf.mxu0 }
 0x83d   :  { %v5950_v62 = vpop.f32.mrf.mxu1 }
 0x83e   :  { %v5951_v63 = vadd.f32 %v5950_v62, %v5949_v60  ;;  %v6395_v3 = vpop.f32.mrf.mxu0 }
 0x840   :  { %v7818_v7 = vadd.f32 %v5951_v63, %v1498_v59 }
 0x842   :  { %v1632_v9 = vsel %vm9759_vm11, %v7818_v7, -inf  ;;  %v1508_v6 = vsel %vm591_vm12, %v7818_v7, -inf  ;;  %vm9760_vm11 = vcmask 357376  }
 0x843   :  { %1633 = vmax.xlane.f32.xlu0 %v1632_v9 }
 0x8c1   :  { %v1628_v10 = vpop.xlane.xlu0 %1627 }
 0x8c2   :  { %v1635_v16 = vsub.f32 %v7810_v49, %v1628_v10 }
 0x8c4   :  { %v1638_v17 = vmul.f32 1.442695, %v1635_v16 }
 0x8c5   :  { %v1631_v11 = vpop.xlane.xlu1 %1630 }
 0x8c6   :  { %6771 = vpow2.f32 %v1638_v17  ;;  %v1636_v18 = vsub.f32 %v7814_v57, %v1631_v11 }
 0x8c8   :  { %v1640_v15 = vmul.f32 1.442695, %v1636_v18 }
 0x8ca   :  { %6773 = vpow2.f32 %v1640_v15 }
 0x8cc   :  { %v1634_v13 = vpop.xlane.xlu0 %1633 }
 0x8cd   :  { %v1637_v21 = vsub.f32 %v7818_v7, %v1634_v13 }
 0x8cf   :  { %v1642_v4 = vmul.f32 1.442695, %v1637_v21 }
 0x8d1   :  { %6775 = vpow2.f32 %v1642_v4 }
 0x8d3   :  { %v6772_v28 = vpop.eup %6771 }
 0x8d4   :  { %1647 = vrot.lane.b32.xlu0 %v6772_v28, %s6938_s30 }
 0x8d7   :  { %v6774_v25 = vpop.eup %6773 }
 0x8d8   :  { %1649 = vrot.lane.b32.xlu1 %v6774_v25, %s6938_s30 }
 0x8de   :  { %v6776_v23 = vpop.eup %6775 }
 0x8df   :  { %1651 = vrot.lane.b32.xlu1 %v6776_v23, %s6938_s30 }
 0x946   :  { %v1648_v19 = vpop.permute.xlu0 %1647 }
 0x947   :  { %v1656_v14 = vsel %vm29_vm2, %v1648_v19, 0.0  ;;  %v5623_v19 = vld [vmem:[%s9751_s1 + $0x38] sm:$0xff] }
 0x948   :  { %1657 = vadd.xlane.f32.xlu0 %v1656_v14  ;;  %v5622_v14 = vld [vmem:[%s9751_s1 + $0x30] sm:$0xff] }
 0x94a   :  { %v1650_v27 = vpop.permute.xlu1 %1649 }
 0x94b   :  { %v1659_v26 = vsel %vm29_vm2, %v1650_v27, 0.0 }
 0x94c   :  { %1660 = vadd.xlane.f32.xlu1 %v1659_v26 }
 0x950   :  { %1506 = vmax.xlane.f32.xlu1 %v1505_v31  ;;  %v7900_v31 = vld [vmem:[%s9753_s3 + $0x10] sm:$0x3f] }
 0x951   :  { %v1652_v5 = vpop.permute.xlu1 %1651 }
 0x952   :  { %v1662_v29 = vsel %vm591_vm12, %v1652_v5, 0.0  ;;  %v1965_v5 = vrot.slane %v7900_v31, %v7007_v8 }
 0x953   :  { %1663 = vadd.xlane.f32.xlu0 %v1662_v29 }
 0x957   :  { %1503 = vmax.xlane.f32.xlu0 %v1502_v39 }
 0x95b   :  { %1509 = vmax.xlane.f32.xlu0 %v1508_v6 }
 0x961   :  { %1684 = vrot.lane.b32.xlu1 %v7666_v24, %s6939_s8 }
 0x965   :  { %1680 = vrot.lane.b32.xlu1 %v7499_v43, %s6939_s8 }
 0x971   :  { %1682 = vrot.lane.b32.xlu0 %v7565_v42, %s6939_s8 }
 0x9d1   :  { %v1658_v33 = vpop.xlane.xlu0 %1657 }
 0x9d2   :  { %6777 = vrcp.f32 %v1658_v33 }
 0x9d5   :  { %v1661_v34 = vpop.xlane.xlu1 %1660 }
 0x9d6   :  { %6779 = vrcp.f32 %v1661_v34 }
 0x9d9   :  { %v1507_v35 = vpop.xlane.xlu1 %1506 }
 0x9da   :  { %v1512_v52 = vsub.f32 %v7814_v57, %v1507_v35  ;;  %v6902_v35 = vld [vmem:[%s9753_s3 + $0x8] sm:$0x3f] }
 0x9dc   :  { %v1664_v36 = vpop.xlane.xlu0 %1663  ;;  %v1516_v53 = vmul.f32 1.442695, %v1512_v52 }
 0x9dd   :  { %6781 = vrcp.f32 %v1664_v36  ;;  %v1685_v37 = vpop.permute.xlu1 %1684  ;;  %v1800_v36 = vrot.slane %v6902_v35, %v7448_v20 }
 0x9de   :  { %6412 = vmatpush3.msk.msra.mxu0 %vm39_vm0, %v1685_v37 }
 0x9df   :  { %v6778_v30 = vpop.eup %6777  ;;  %6413 = vmatprep.subr.mxu0 %v6929_v2 }
 0x9e0   :  { %v1504_v24 = vpop.xlane.xlu0 %1503  ;;  %v1668_v32 = vmul.f32 %v6778_v30, %v6772_v28 }
 0x9e1   :  { %v1681_v45 = vpop.permute.xlu1 %1680  ;;  %v1511_v22 = vsub.f32 %v7810_v49, %v1504_v24 }
 0x9e2   :  { %1674 = vrot.lane.b32.xlu1 %v1668_v32, %s6938_s30 }
 0x9e3   :  { %v6780_v43 = vpop.eup %6779  ;;  %v1514_v47 = vmul.f32 1.442695, %v1511_v22 }
 0x9e4   :  { %v1510_v38 = vpop.xlane.xlu0 %1509  ;;  %v1669_v42 = vmul.f32 %v6780_v43, %v6774_v25 }
 0x9e5   :  { %v1513_v48 = vsub.f32 %v7818_v7, %v1510_v38  ;;  %6783 = vpow2.f32 %v1514_v47 }
 0x9e6   :  { %1676 = vrot.lane.b32.xlu0 %v1669_v42, %s6938_s30 }
 0x9e7   :  { %v1518_v50 = vmul.f32 1.442695, %v1513_v48 }
 0x9e8   :  { %v1683_v44 = vpop.permute.xlu0 %1682 }
 0x9e9   :  { %6414 = vmatpush3.msra.mxu0 %v1683_v44  ;;  %6785 = vpow2.f32 %v1518_v50 }
 0x9ea   :  { %v6782_v40 = vpop.eup %6781  ;;  %6415 = vmatprep.subr.mxu0 %v6929_v2  ;;  %6787 = vpow2.f32 %v1516_v53 }
 0x9eb   :  { %6416 = vmatpush3.msra.mxu0 %v1681_v45  ;;  %v1670_v46 = vmul.f32 %v6782_v40, %v6776_v23 }
 0x9ed   :  { %1678 = vrot.lane.b32.xlu1 %v1670_v46, %s6938_s30 }
 0x9f2   :  { %v6784_v54 = vpop.eup %6783 }
 0x9f3   :  { %v1520_v55 = vsel %vm29_vm2, %v6784_v54, 0.0 }
 0x9f6   :  { %v6786_v51 = vpop.eup %6785 }
 0x9f7   :  { %v1526_v56 = vsel %vm591_vm12, %v6786_v51, 0.0  ;;  %v6788_v49 = vpop.eup %6787 }
 0x9f8   :  { %v1523_v58 = vsel %vm29_vm2, %v6788_v49, 0.0 }
 0xa05   :  { %1521 = vadd.xlane.f32.xlu0 %v1520_v55 }
 0xa09   :  { %1527 = vadd.xlane.f32.xlu0 %v1526_v56 }
 0xa11   :  { %1524 = vadd.xlane.f32.xlu1 %v1523_v58 }
 0xa54   :  { %v1675_v60 = vpop.permute.xlu1 %1674 }
 0xa55   :  { %6418 = vmatmul.mubr.msk.f32.vlgmr.msra.gmra.mxu0 %vm29_vm2, %v1675_v60 }
 0xa56   :  { %6420 = vmatprep.mubr.msk.f32.mxu0 %vm6930_vm1, %v6929_v2 }
 0xa58   :  { %v1677_v57 = vpop.permute.xlu0 %1676 }
 0xa59   :  { %6421 = vmatmul.mubr.msk.f32.gmra.mxu0 %vm29_vm2, %v1677_v57 }
 0xa5a   :  { %6423 = vmatprep.mubr.msk.f32.mxu0 %vm6930_vm1, %v6929_v2 }
 0xa5f   :  { %v1679_v61 = vpop.permute.xlu1 %1678 }
 0xa60   :  { %6424 = vmatmul.mubr.msk.f32.gmra.mxu0 %vm29_vm2, %v1679_v61 }
 0xa8e   :  { %v1522_v59 = vpop.xlane.xlu0 %1521 }
 0xa8f   :  { %6789 = vrcp.f32 %v1522_v59 }
 0xa92   :  { %v1528_v62 = vpop.xlane.xlu0 %1527 }
 0xa93   :  { %6791 = vrcp.f32 %v1528_v62 }
 0xa9a   :  { %v1525_v63 = vpop.xlane.xlu1 %1524 }
 0xa9b   :  { %6793 = vrcp.f32 %v1525_v63 }
 0xa9c   :  { %v6790_v3 = vpop.eup %6789 }
 0xa9d   :  { %v1532_v7 = vmul.f32 %v6790_v3, %v6784_v54 }
 0xa9f   :  { %v1776_v9 = vsel %vm29_vm2, %v1532_v7, %v1668_v32  ;;  %6403 = vmatmul.mubr.msk.f32.vlgmr.msra.gmra.mxu1 %vm29_vm2, %v1532_v7 }
 0xaa0   :  { %v6792_v10 = vpop.eup %6791  ;;  %1779 = vst.msk [vmem:[%s9756_s6] sm:$0xff] %vm865_vm13, %v1776_v9  ;;  %6405 = vmatprep.mubr.msk.f32.mxu1 %vm6930_vm1, %v6929_v2  ;;  %6427 = vmatpush3.msra.mxu1 %v5623_v19  ;;  %v1845_v19 = vrot.slane %v6902_v35, %v7469_v0 }
 0xaa1   :  { %v1534_v16 = vmul.f32 %v6792_v10, %v6786_v51  ;;  %6428 = vmatprep.subr.mxu1 %v6929_v2 }
 0xaa2   :  { %6429 = vmatpush3.msra.mxu1 %v5622_v14 }
 0xaa3   :  { %v1778_v17 = vsel %vm29_vm2, %v1534_v16, %v1670_v46  ;;  %6439 = vmatprep.subr.mxu1 %v6929_v2 }
 0xaa4   :  { %1781 = vst.msk [vmem:[%s9756_s6 + $0x10] sm:$0x3f] %vm9760_vm11, %v1778_v17  ;;  %vm9761_vm11 = vcmask 357552  }
 0xaa8   :  { %v6794_v11 = vpop.eup %6793 }
 0xaa9   :  { %v1533_v18 = vmul.f32 %v6794_v11, %v6788_v49 }
 0xaab   :  { %6406 = vmatmul.mubr.msk.f32.gmra.mxu1 %vm29_vm2, %v1533_v18  ;;  %v1777_v15 = vsel %vm29_vm2, %v1533_v18, %v1669_v42 }
 0xaac   :  { %1780 = vst.msk [vmem:[%s9756_s6 + $0x8] sm:$0xff] %vm865_vm13, %v1777_v15  ;;  %6408 = vmatprep.mubr.msk.f32.mxu1 %vm6930_vm1, %v6929_v2 }
 0xaaf   :  { %6409 = vmatmul.mubr.msk.f32.gmra.mxu1 %vm29_vm2, %v1534_v16 }
 0xab0   :  { %6430 = vmatprep.mubr.msk.f32.mxu1 %vm6930_vm1, %v6929_v2 }
 0xb15   :  { %v1762_v13 = vpop.f32.mrf.mxu0 }
 0xb16   :  { %1785 = vrot.lane.b32.xlu0 %v1762_v13, %s6940_s22 }
 0xb17   :  { %v6419_v21 = vpop.f32.mrf.mxu0 }
 0xb19   :  { %v1767_v4 = vpop.f32.mrf.mxu0 }
 0xb1a   :  { %1787 = vrot.lane.b32.xlu1 %v1767_v4, %s6940_s22  ;;  %1967 = vrot.lane.b32.xlu0 %v1965_v5, %s6931_s13 }
 0xb1b   :  { %v6422_v28 = vpop.f32.mrf.mxu0 }
 0xb20   :  { %v1772_v25 = vpop.f32.mrf.mxu0 }
 0xb21   :  { %1789 = vrot.lane.b32.xlu1 %v1772_v25, %s6940_s22 }
 0xb22   :  { %v6425_v23 = vpop.f32.mrf.mxu0 }
 0xb5f   :  { %v1612_v27 = vpop.f32.mrf.mxu1 }
 0xb61   :  { %v6404_v26 = vpop.f32.mrf.mxu1 }
 0xb6b   :  { %v1617_v29 = vpop.f32.mrf.mxu1 }
 0xb6d   :  { %v6407_v39 = vpop.f32.mrf.mxu1 }
 0xb6f   :  { %v1622_v6 = vpop.f32.mrf.mxu1 }
 0xb71   :  { %v6410_v33 = vpop.f32.mrf.mxu1 }
 0xb88   :  { %v1786_v34 = vpop.permute.xlu0 %1785 }
 0xb89   :  { %v1794_v37 = vsel %vm882_vm15, %v1612_v27, %v1786_v34  ;;  %v1857_v27 = vrot.slane %v6902_v35, %v7472_v1 }
 0xb8a   :  { %v1801_v43 = vadd.f32 %v1800_v36, %v1794_v37 }
 0xb8c   :  { %v1788_v30 = vpop.permute.xlu1 %1787  ;;  %v1804_v42 = vmax.f32 %v1801_v43, 0.0 }
 0xb8d   :  { %v1795_v24 = vsel %vm882_vm15, %v1617_v29, %v1788_v30 }
 0xb8e   :  { %v1802_v32 = vadd.f32 %v1800_v36, %v1795_v24  ;;  %v1807_v22 = vsel %vm207_vm3, %v1804_v42, 0.0  ;;  %v7934_v24 = vrot.slane %v7900_v31, %v7030_v12 }
 0xb90   :  { %v1805_v38 = vmax.f32 %v1802_v32, 0.0 }
 0xb92   :  { %v1808_v45 = vsel %vm207_vm3, %v1805_v38, 0.0 }
 0xb93   :  { %v1790_v44 = vpop.permute.xlu1 %1789  ;;  %v1809_v48 = vadd.f32 %v1808_v45, %v1807_v22 }
 0xb94   :  { %v1796_v40 = vsel %vm882_vm15, %v1622_v6, %v1790_v44 }
 0xb95   :  { %v1803_v46 = vadd.f32 %v1800_v36, %v1796_v40 }
 0xb97   :  { %v1806_v47 = vmax.f32 %v1803_v46, 0.0 }
 0xb99   :  { %v1810_v50 = vsel %vm899_vm14, %v1806_v47, 0.0 }
 0xb9a   :  { %v1811_v52 = vadd.f32 %v1810_v50, %v1809_v48  ;;  %v5659_v50 = vld [vmem:[%s9752_s2 + $0x3b8] sm:$0xff] }
 0xb9b   :  { %5984 = vmatprep.subr.mxu0 %v5659_v50 }
 0xb9c   :  { %v1812_v53 = vrot.slane %v1811_v52, 4 }
 0xb9e   :  { %v1813_v54 = vadd.f32 %v1812_v53, %v1811_v52  ;;  %v5643_v52 = vld [vmem:[%s9752_s2 + $0x338] sm:$0xff]  ;;  %v5658_v53 = vld [vmem:[%s9752_s2 + $0x3b0] sm:$0xff] }
 0xb9f   :  { %5985 = vmatpush3.msra.mxu0 %v5643_v52  ;;  %v5663_v52 = vld [vmem:[%s9752_s2 + $0x3d8] sm:$0xff] }
 0xba0   :  { %v1814_v55 = vrot.slane %v1813_v54, 2  ;;  %5986 = vmatprep.subr.mxu0 %v5658_v53  ;;  %v5662_v53 = vld [vmem:[%s9752_s2 + $0x3d0] sm:$0xff] }
 0xba2   :  { %v1815_v51 = vadd.f32 %v1814_v55, %v1813_v54  ;;  %v5642_v54 = vld [vmem:[%s9752_s2 + $0x330] sm:$0xff] }
 0xba3   :  { %5987 = vmatpush3.msra.mxu0 %v5642_v54 }
 0xba4   :  { %v1816_v56 = vrot.slane %v1815_v51, 1 }
 0xba6   :  { %v1817_v49 = vadd.f32 %v1816_v56, %v1815_v51  ;;  %v5657_v56 = vld [vmem:[%s9752_s2 + $0x3a8] sm:$0xff] }
 0xba7   :  { %5988 = vmatprep.subr.mxu0 %v5657_v56  ;;  %v5660_v56 = vld [vmem:[%s9752_s2 + $0x3c0] sm:$0xff] }
 0xba8   :  { %v1818_v58 = vmul.f32 0.045454547, %v1817_v49  ;;  %v5641_v49 = vld [vmem:[%s9752_s2 + $0x328] sm:$0xff] }
 0xba9   :  { %5989 = vmatpush3.msra.mxu0 %v5641_v49 }
 0xbaa   :  { %v1819_v60 = vmul.f32 %v6902_v35, %v1818_v58  ;;  %v7930_v35 = vpop.permute.xlu0 %1967  ;;  %v5656_v58 = vld [vmem:[%s9752_s2 + $0x3a0] sm:$0xff] }
 0xbab   :  { %5990 = vmatprep.subr.mxu0 %v5656_v58 }
 0xbac   :  { %v1823_v57 = vrot.slane %v1819_v60, %v7459_v41 }
 0xbae   :  { %v1824_v61 = vsub.f32 %v1804_v42, %v1823_v57  ;;  %v1825_v59 = vsub.f32 %v1805_v38, %v1823_v57  ;;  %v1826_v62 = vsub.f32 %v1806_v47, %v1823_v57  ;;  %v5640_v57 = vld [vmem:[%s9752_s2 + $0x320] sm:$0xff] }
 0xbaf   :  { %5991 = vmatpush3.msra.mxu0 %v5640_v57 }
 0xbb0   :  { %v1827_v63 = vmul.f32 %v1824_v61, %v1824_v61  ;;  %v1828_v3 = vmul.f32 %v1825_v59, %v1825_v59  ;;  %v1829_v7 = vmul.f32 %v1826_v62, %v1826_v62  ;;  %v1846_v14 = vmul.f32 %v1845_v19, %v1824_v61  ;;  %v5655_v61 = vld [vmem:[%s9752_s2 + $0x398] sm:$0xff] }
 0xbb1   :  { %v1847_v29 = vmul.f32 %v1845_v19, %v1825_v59  ;;  %v1848_v33 = vmul.f32 %v1845_v19, %v1826_v62  ;;  %v5639_v59 = vld [vmem:[%s9752_s2 + $0x318] sm:$0xff]  ;;  %5992 = vmatprep.subr.mxu0 %v5655_v61  ;;  %v5633_v19 = vld [vmem:[%s9752_s2 + $0x2e8] sm:$0xff] }
 0xbb2   :  { %v1830_v9 = vsel %vm207_vm3, %v1827_v63, 0.0  ;;  %v1831_v10 = vsel %vm207_vm3, %v1828_v3, 0.0  ;;  %v1833_v17 = vsel %vm899_vm14, %v1829_v7, 0.0  ;;  %v5654_v63 = vld [vmem:[%s9752_s2 + $0x390] sm:$0xff]  ;;  %5993 = vmatpush3.msra.mxu0 %v5639_v59  ;;  %v5653_v7 = vld [vmem:[%s9752_s2 + $0x388] sm:$0xff] }
 0xbb3   :  { %v1832_v16 = vadd.f32 %v1831_v10, %v1830_v9  ;;  %v5638_v3 = vld [vmem:[%s9752_s2 + $0x310] sm:$0xff]  ;;  %5994 = vmatprep.subr.mxu0 %v5654_v63  ;;  %v5637_v10 = vld [vmem:[%s9752_s2 + $0x308] sm:$0xff] }
 0xbb4   :  { %5995 = vmatpush3.msra.mxu0 %v5638_v3 }
 0xbb5   :  { %v1834_v11 = vadd.f32 %v1833_v17, %v1832_v16  ;;  %5996 = vmatprep.subr.mxu0 %v5653_v7  ;;  %v5652_v16 = vld [vmem:[%s9752_s2 + $0x380] sm:$0xff] }
 0xbb6   :  { %v5636_v17 = vld [vmem:[%s9752_s2 + $0x300] sm:$0xff]  ;;  %5997 = vmatpush3.msra.mxu0 %v5637_v10 }
 0xbb7   :  { %v1835_v18 = vrot.slane %v1834_v11, 4  ;;  %5998 = vmatprep.subr.mxu0 %v5652_v16 }
 0xbb8   :  { %5999 = vmatpush3.msra.mxu0 %v5636_v17 }
 0xbb9   :  { %v1836_v15 = vadd.f32 %v1835_v18, %v1834_v11  ;;  %v5651_v18 = vld [vmem:[%s9752_s2 + $0x378] sm:$0xff] }
 0xbba   :  { %6000 = vmatprep.subr.mxu0 %v5651_v18 }
 0xbbb   :  { %v1837_v13 = vrot.slane %v1836_v15, 2 }
 0xbbd   :  { %v1838_v21 = vadd.f32 %v1837_v13, %v1836_v15  ;;  %v5635_v15 = vld [vmem:[%s9752_s2 + $0x2f8] sm:$0xff]  ;;  %v5650_v13 = vld [vmem:[%s9752_s2 + $0x370] sm:$0xff] }
 0xbbe   :  { %6001 = vmatpush3.msra.mxu0 %v5635_v15 }
 0xbbf   :  { %v1839_v4 = vrot.slane %v1838_v21, 1  ;;  %6002 = vmatprep.subr.mxu0 %v5650_v13 }
 0xbc1   :  { %v1840_v28 = vadd.f32 %v1839_v4, %v1838_v21  ;;  %v5634_v4 = vld [vmem:[%s9752_s2 + $0x2f0] sm:$0xff] }
 0xbc2   :  { %6003 = vmatpush3.msra.mxu0 %v5634_v4 }
 0xbc3   :  { %v1841_v25 = vmul.f32 0.045454547, %v1840_v28  ;;  %v5671_v28 = vld [vmem:[%s9752_s2 + $0x418] sm:$0xff] }
 0xbc5   :  { %v1849_v23 = vadd.f32 1e-05, %v1841_v25  ;;  %v5649_v25 = vld [vmem:[%s9752_s2 + $0x368] sm:$0xff] }
 0xbc6   :  { %6004 = vmatprep.subr.mxu0 %v5649_v25 }
 0xbc7   :  { %6795 = vrsqrt.f32 %v1849_v23  ;;  %v5670_v23 = vld [vmem:[%s9752_s2 + $0x410] sm:$0xff]  ;;  %6005 = vmatpush3.msra.mxu0 %v5633_v19 }
 0xbd4   :  { %v6796_v26 = vpop.eup %6795 }
 0xbd5   :  { %v1851_v5 = vmul.f32 %v6796_v26, %v1846_v14  ;;  %v1852_v6 = vmul.f32 %v6796_v26, %v1847_v29  ;;  %v1853_v34 = vmul.f32 %v6796_v26, %v1848_v33  ;;  %v5648_v26 = vld [vmem:[%s9752_s2 + $0x360] sm:$0xff] }
 0xbd6   :  { %v5632_v29 = vld [vmem:[%s9752_s2 + $0x2e0] sm:$0xff]  ;;  %6006 = vmatprep.subr.mxu0 %v5648_v26 }
 0xbd7   :  { %v1858_v39 = vadd.f32 %v1857_v27, %v1851_v5  ;;  %v1859_v36 = vadd.f32 %v1857_v27, %v1852_v6  ;;  %v1860_v37 = vadd.f32 %v1857_v27, %v1853_v34  ;;  %v5669_v5 = vld [vmem:[%s9752_s2 + $0x408] sm:$0xff]  ;;  %v5668_v6 = vld [vmem:[%s9752_s2 + $0x400] sm:$0xff]  ;;  %6007 = vmatpush3.msra.mxu0 %v5632_v29 }
 0xbd9   :  { %6431 = vmatmul.mubr.msk.f32.vlgmr.msra.gmra.mxu1 %vm207_vm3, %v1858_v39  ;;  %v5647_v39 = vld [vmem:[%s9752_s2 + $0x358] sm:$0xff] }
 0xbda   :  { %6433 = vmatprep.mubr.msk.f32.mxu1 %vm6930_vm1, %v6929_v2  ;;  %6440 = vmatpush3.msra.mxu1 %v5671_v28 }
 0xbdb   :  { %6441 = vmatprep.subr.mxu1 %v6929_v2  ;;  %6008 = vmatprep.subr.mxu0 %v5647_v39 }
 0xbdc   :  { %6442 = vmatpush3.msra.mxu1 %v5670_v23 }
 0xbdd   :  { %6434 = vmatmul.mubr.msk.f32.gmra.mxu1 %vm207_vm3, %v1859_v36  ;;  %6443 = vmatprep.subr.mxu1 %v6929_v2  ;;  %v5631_v36 = vld [vmem:[%s9752_s2 + $0x2d8] sm:$0xff] }
 0xbde   :  { %6436 = vmatprep.mubr.msk.f32.mxu1 %vm6930_vm1, %v6929_v2  ;;  %6444 = vmatpush3.msra.mxu1 %v5669_v5 }
 0xbdf   :  { %6445 = vmatprep.subr.mxu1 %v6929_v2  ;;  %6009 = vmatpush3.msra.mxu0 %v5631_v36 }
 0xbe0   :  { %6446 = vmatpush3.msra.mxu1 %v5668_v6 }
 0xbe1   :  { %6437 = vmatmul.mubr.msk.f32.gmra.mxu1 %vm207_vm3, %v1860_v37  ;;  %v5646_v37 = vld [vmem:[%s9752_s2 + $0x350] sm:$0xff]  ;;  %6447 = vmatprep.subr.mxu1 %v6929_v2 }
 0xbe2   :  { %6463 = vmatprep.mubr.msk.f32.mxu1 %vm6930_vm1, %v6929_v2  ;;  %6010 = vmatprep.subr.mxu0 %v5646_v37 }
 0xc99   :  { %v1941_v30 = vpop.f32.mrf.mxu1 }
 0xc9a   :  { %v7937_v32 = vadd.f32 %v7930_v35, %v1941_v30  ;;  %v7944_v42 = vadd.f32 %v7934_v24, %v1941_v30  ;;  %v5667_v30 = vld [vmem:[%s9752_s2 + $0x3f8] sm:$0xff] }
 0xc9b   :  { %v6432_v43 = vpop.f32.mrf.mxu1  ;;  %6448 = vmatpush3.msra.mxu1 %v5667_v30 }
 0xc9c   :  { %1985 = vrot.lane.b32.xlu1 %v7937_v32, %s6931_s13  ;;  %1976 = vrot.lane.b32.xlu0 %v7937_v32, %s6932_s16  ;;  %v2061_v40 = vrot.slane %v7944_v42, 1  ;;  %v2069_v46 = vrot.slane %v7944_v42, 3  ;;  %v2077_v22 = vrot.slane %v7944_v42, 5  ;;  %v2065_v47 = vrot.slane %v7944_v42, 2  ;;  %v5630_v43 = vld [vmem:[%s9752_s2 + $0x2d0] sm:$0xff] }
 0xc9d   :  { %v1946_v38 = vpop.f32.mrf.mxu1  ;;  %v2081_v48 = vrot.slane %v7944_v42, 6  ;;  %v2073_v55 = vrot.slane %v7944_v42, 4  ;;  %v2085_v51 = vrot.slane %v7944_v42, 7  ;;  %6011 = vmatpush3.msra.mxu0 %v5630_v43  ;;  %6449 = vmatprep.subr.mxu1 %v6929_v2 }
 0xc9e   :  { %v7994_v60 = vadd.f32 %v7930_v35, %v1946_v38  ;;  %v8010_v62 = vadd.f32 %v7934_v24, %v1946_v38 }
 0xc9f   :  { %v6435_v44 = vpop.f32.mrf.mxu1 }
 0xca0   :  { %2003 = vrot.lane.b32.xlu1 %v7937_v32, %s6933_s17  ;;  %1994 = vrot.lane.b32.xlu0 %v7937_v32, %s6934_s18  ;;  %v2090_v9 = vrot.slane %v8010_v62, 1  ;;  %v2094_v11 = vrot.slane %v8010_v62, 2  ;;  %v2102_v21 = vrot.slane %v8010_v62, 4  ;;  %v2098_v14 = vrot.slane %v8010_v62, 3 }
 0xca1   :  { %v7950_v31 = vpop.f32.mrf.mxu1  ;;  %v2110_v27 = vrot.slane %v8010_v62, 6  ;;  %v2106_v33 = vrot.slane %v8010_v62, 5  ;;  %v2114_v34 = vrot.slane %v8010_v62, 7 }
 0xca2   :  { %v8111_v38 = vadd.f32 %v7934_v24, %v7950_v31  ;;  %v8115_v44 = vadd.f32 %v7930_v35, %v7950_v31  ;;  %v5629_v24 = vld [vmem:[%s9752_s2 + $0x2c8] sm:$0xff]  ;;  %v5644_v35 = vld [vmem:[%s9752_s2 + $0x340] sm:$0xff] }
 0xca3   :  { %v6438_v45 = vpop.f32.mrf.mxu1  ;;  %v5665_v31 = vld [vmem:[%s9752_s2 + $0x3e8] sm:$0xff] }
 0xca4   :  { %2012 = vrot.lane.b32.xlu1 %v7937_v32, %s6935_s19  ;;  %2062 = vrot.lane.b32.xlu0 %v2061_v40, %s6931_s13  ;;  %v5645_v40 = vld [vmem:[%s9752_s2 + $0x348] sm:$0xff]  ;;  %v5666_v45 = vld [vmem:[%s9752_s2 + $0x3f0] sm:$0xff]  ;;  %v2133_v50 = vrot.slane %v8111_v38, 1  ;;  %v2149_v54 = vrot.slane %v8111_v38, 5 }
 0xca5   :  { %6012 = vmatprep.subr.mxu0 %v5645_v40  ;;  %6450 = vmatpush3.msra.mxu1 %v5666_v45 }
 0xca6   :  { %6013 = vmatpush3.msra.mxu0 %v5629_v24  ;;  %6451 = vmatprep.subr.mxu1 %v6929_v2 }
 0xca7   :  { %6014 = vmatprep.subr.mxu0 %v5644_v35  ;;  %6452 = vmatpush3.msra.mxu1 %v5665_v31 }
 0xca8   :  { %2021 = vrot.lane.b32.xlu1 %v7937_v32, %s6936_s20  ;;  %2070 = vrot.lane.b32.xlu0 %v2069_v46, %s6933_s17  ;;  %v2137_v46 = vrot.slane %v8111_v38, 2 }
 0xca9   :  { %6453 = vmatprep.subr.mxu1 %v6929_v2 }
 0xcac   :  { %2030 = vrot.lane.b32.xlu1 %v7937_v32, %s6937_s21  ;;  %2078 = vrot.lane.b32.xlu0 %v2077_v22, %s6936_s20  ;;  %v5628_v22 = vld [vmem:[%s9752_s2 + $0x2c0] sm:$0xff] }
 0xcad   :  { %6015 = vmatpush3.msra.mxu0 %v5628_v22 }
 0xcae   :  { %6472 = vmatprep.subr.mxu0 %v6929_v2 }
 0xcb0   :  { %2066 = vrot.lane.b32.xlu1 %v2065_v47, %s6934_s18  ;;  %2082 = vrot.lane.b32.xlu0 %v2081_v48, %s6937_s21  ;;  %v5664_v47 = vld [vmem:[%s9752_s2 + $0x3e0] sm:$0xff]  ;;  %v2141_v48 = vrot.slane %v8111_v38, 3 }
 0xcb1   :  { %6454 = vmatpush3.msra.mxu1 %v5664_v47 }
 0xcb2   :  { %6455 = vmatprep.subr.mxu1 %v6929_v2 }
 0xcb3   :  { %6456 = vmatpush3.msra.mxu1 %v5663_v52 }
 0xcb4   :  { %2074 = vrot.lane.b32.xlu1 %v2073_v55, %s6935_s19  ;;  %2086 = vrot.lane.b32.xlu0 %v2085_v51, %s6932_s16  ;;  %v2145_v55 = vrot.slane %v8111_v38, 4  ;;  %v5661_v51 = vld [vmem:[%s9752_s2 + $0x3c8] sm:$0xff] }
 0xcb5   :  { %6457 = vmatprep.subr.mxu1 %v6929_v2 }
 0xcb6   :  { %6458 = vmatpush3.msra.mxu1 %v5662_v53 }
 0xcb7   :  { %6459 = vmatprep.subr.mxu1 %v6929_v2 }
 0xcb8   :  { %2005 = vrot.lane.b32.xlu1 %v7994_v60, %s6933_s17  ;;  %1978 = vrot.lane.b32.xlu0 %v7994_v60, %s6932_s16 }
 0xcb9   :  { %6460 = vmatpush3.msra.mxu1 %v5661_v51 }
 0xcba   :  { %6461 = vmatprep.subr.mxu1 %v6929_v2 }
 0xcbb   :  { %6462 = vmatpush3.msra.mxu1 %v5660_v56 }
 0xcbc   :  { %2023 = vrot.lane.b32.xlu1 %v7994_v60, %s6936_s20  ;;  %1987 = vrot.lane.b32.xlu0 %v7994_v60, %s6931_s13 }
 0xcbd   :  { %6487 = vmatprep.subr.mxu1 %v6929_v2 }
 0xcc0   :  { %1996 = vrot.lane.b32.xlu0 %v7994_v60, %s6934_s18  ;;  %2091 = vrot.lane.b32.xlu1 %v2090_v9, %s6931_s13 }
 0xcc4   :  { %2014 = vrot.lane.b32.xlu0 %v7994_v60, %s6935_s19  ;;  %2095 = vrot.lane.b32.xlu1 %v2094_v11, %s6934_s18 }
 0xcc8   :  { %2032 = vrot.lane.b32.xlu0 %v7994_v60, %s6937_s21  ;;  %2103 = vrot.lane.b32.xlu1 %v2102_v21, %s6935_s19 }
 0xccc   :  { %2099 = vrot.lane.b32.xlu0 %v2098_v14, %s6933_s17  ;;  %2111 = vrot.lane.b32.xlu1 %v2110_v27, %s6937_s21 }
 0xcd0   :  { %2107 = vrot.lane.b32.xlu0 %v2106_v33, %s6936_s20  ;;  %2115 = vrot.lane.b32.xlu1 %v2114_v34, %s6932_s16 }
 0xcd4   :  { %1989 = vrot.lane.b32.xlu0 %v8115_v44, %s6931_s13  ;;  %1980 = vrot.lane.b32.xlu1 %v8115_v44, %s6932_s16 }
 0xcd8   :  { %1998 = vrot.lane.b32.xlu1 %v8115_v44, %s6934_s18  ;;  %2138 = vrot.lane.b32.xlu0 %v2137_v46, %s6934_s18 }
 0xcdc   :  { %2142 = vrot.lane.b32.xlu0 %v2141_v48, %s6933_s17  ;;  %2134 = vrot.lane.b32.xlu1 %v2133_v50, %s6931_s13 }
 0xce0   :  { %2150 = vrot.lane.b32.xlu0 %v2149_v54, %s6936_s20  ;;  %2146 = vrot.lane.b32.xlu1 %v2145_v55, %s6935_s19 }
 0xce4   :  { %2016 = vrot.lane.b32.xlu0 %v8115_v44, %s6935_s19  ;;  %2007 = vrot.lane.b32.xlu1 %v8115_v44, %s6933_s17 }
 0xce8   :  { %2034 = vrot.lane.b32.xlu0 %v8115_v44, %s6937_s21  ;;  %2025 = vrot.lane.b32.xlu1 %v8115_v44, %s6936_s20 }
 0xd0e   :  { %v1986_v49 = vpop.permute.xlu1 %1985  ;;  %v1977_v58 = vpop.permute.xlu0 %1976 }
 0xd0f   :  { %v2039_v39 = vsel %vm207_vm3, %v1977_v58, %v7937_v32 }
 0xd10   :  { %v2042_v37 = vsel %vm211_vm4, %v2039_v39, %v1986_v49 }
 0xd12   :  { %v2004_v57 = vpop.permute.xlu1 %2003  ;;  %v1995_v61 = vpop.permute.xlu0 %1994 }
 0xd13   :  { %v2045_v40 = vsel %vm215_vm5, %v2042_v37, %v1995_v61 }
 0xd16   :  { %v2013_v59 = vpop.permute.xlu1 %2012  ;;  %v2063_v63 = vpop.permute.xlu0 %2062 }
 0xd17   :  { %v2118_v28 = vsel %vm207_vm3, %v7944_v42, %v2063_v63 }
 0xd1a   :  { %v2022_v3 = vpop.permute.xlu1 %2021  ;;  %v2071_v7 = vpop.permute.xlu0 %2070 }
 0xd1e   :  { %v2031_v9 = vpop.permute.xlu1 %2030  ;;  %v2079_v10 = vpop.permute.xlu0 %2078 }
 0xd22   :  { %v2067_v16 = vpop.permute.xlu1 %2066  ;;  %v2083_v17 = vpop.permute.xlu0 %2082 }
 0xd23   :  { %v2119_v25 = vsel %vm211_vm4, %v2118_v28, %v2067_v16 }
 0xd24   :  { %v2120_v14 = vsel %vm215_vm5, %v2119_v25, %v2071_v7 }
 0xd26   :  { %v2075_v11 = vpop.permute.xlu1 %2074  ;;  %v2087_v18 = vpop.permute.xlu0 %2086 }
 0xd27   :  { %v2121_v27 = vsel %vm219_vm6, %v2120_v14, %v2075_v11 }
 0xd28   :  { %v2122_v29 = vsel %vm223_vm7, %v2121_v27, %v2079_v10 }
 0xd29   :  { %v2123_v34 = vsel %vm227_vm8, %v2122_v29, %v2083_v17 }
 0xd2a   :  { %v2006_v15 = vpop.permute.xlu1 %2005  ;;  %v1979_v13 = vpop.permute.xlu0 %1978  ;;  %v2124_v45 = vsel %vm231_vm9, %v2123_v34, %v2087_v18 }
 0xd2b   :  { %v2040_v36 = vsel %vm207_vm3, %v1979_v13, %v7994_v60  ;;  %v2048_v60 = vsel %vm219_vm6, %v2045_v40, %v2004_v57  ;;  %v8205_v22 = vrot.slane %v2124_v45, %v7030_v12 }
 0xd2c   :  { %v2051_v48 = vsel %vm223_vm7, %v2048_v60, %v2013_v59 }
 0xd2d   :  { %v2054_v55 = vsel %vm227_vm8, %v2051_v48, %v2022_v3 }
 0xd2e   :  { %v2024_v21 = vpop.permute.xlu1 %2023  ;;  %v1988_v4 = vpop.permute.xlu0 %1987  ;;  %v2057_v56 = vsel %vm231_vm9, %v2054_v55, %v2031_v9 }
 0xd2f   :  { %v2043_v30 = vsel %vm211_vm4, %v2040_v36, %v1988_v4  ;;  %v2170_v58 = vadd.f32 %v8205_v22, %v2057_v56 }
 0xd31   :  { %v2179_v17 = vmul.f32 0.2, %v2170_v58 }
 0xd32   :  { %v1997_v23 = vpop.permute.xlu0 %1996  ;;  %v2092_v19 = vpop.permute.xlu1 %2091 }
 0xd33   :  { %v2125_v43 = vsel %vm207_vm3, %v8010_v62, %v2092_v19  ;;  %v2046_v32 = vsel %vm215_vm5, %v2043_v30, %v1997_v23  ;;  %v2188_v28 = vmax.f32 %v2170_v58, %v2179_v17 }
 0xd34   :  { %v2049_v47 = vsel %vm219_vm6, %v2046_v32, %v2006_v15 }
 0xd36   :  { %v2015_v26 = vpop.permute.xlu0 %2014  ;;  %v2096_v5 = vpop.permute.xlu1 %2095 }
 0xd37   :  { %v2126_v24 = vsel %vm211_vm4, %v2125_v43, %v2096_v5  ;;  %v2052_v50 = vsel %vm223_vm7, %v2049_v47, %v2015_v26 }
 0xd38   :  { %v2055_v57 = vsel %vm227_vm8, %v2052_v50, %v2024_v21 }
 0xd3a   :  { %v2033_v6 = vpop.permute.xlu0 %2032  ;;  %v2104_v33 = vpop.permute.xlu1 %2103 }
 0xd3b   :  { %v2058_v59 = vsel %vm231_vm9, %v2055_v57, %v2033_v6 }
 0xd3c   :  { %v2173_v11 = vadd.f32 %v8205_v22, %v2058_v59 }
 0xd3e   :  { %v2100_v35 = vpop.permute.xlu0 %2099  ;;  %v2112_v31 = vpop.permute.xlu1 %2111  ;;  %v2182_v21 = vmul.f32 0.2, %v2173_v11 }
 0xd3f   :  { %v2127_v46 = vsel %vm215_vm5, %v2126_v24, %v2100_v35 }
 0xd40   :  { %v2128_v53 = vsel %vm219_vm6, %v2127_v46, %v2104_v33  ;;  %v2191_v5 = vmax.f32 %v2173_v11, %v2182_v21 }
 0xd42   :  { %v2108_v52 = vpop.permute.xlu0 %2107  ;;  %v2116_v54 = vpop.permute.xlu1 %2115 }
 0xd43   :  { %v2129_v51 = vsel %vm223_vm7, %v2128_v53, %v2108_v52 }
 0xd44   :  { %v2130_v49 = vsel %vm227_vm8, %v2129_v51, %v2112_v31 }
 0xd45   :  { %v2131_v61 = vsel %vm231_vm9, %v2130_v49, %v2116_v54 }
 0xd46   :  { %v2165_v63 = vrot.slane %v2131_v61, %v7030_v12  ;;  %v1990_v7 = vpop.permute.xlu0 %1989  ;;  %v1981_v10 = vpop.permute.xlu1 %1980 }
 0xd47   :  { %v2041_v29 = vsel %vm207_vm3, %v1981_v10, %v8115_v44 }
 0xd48   :  { %v2171_v16 = vadd.f32 %v2165_v63, %v2057_v56  ;;  %v2174_v3 = vadd.f32 %v2165_v63, %v2058_v59  ;;  %v2044_v36 = vsel %vm211_vm4, %v2041_v29, %v1990_v7 }
 0xd4a   :  { %v1999_v9 = vpop.permute.xlu1 %1998  ;;  %v2139_v18 = vpop.permute.xlu0 %2138  ;;  %v2180_v15 = vmul.f32 0.2, %v2171_v16  ;;  %v2183_v13 = vmul.f32 0.2, %v2174_v3 }
 0xd4b   :  { %v2047_v44 = vsel %vm215_vm5, %v2044_v36, %v1999_v9 }
 0xd4c   :  { %v2189_v4 = vmax.f32 %v2171_v16, %v2180_v15  ;;  %v2192_v19 = vmax.f32 %v2174_v3, %v2183_v13 }
 0xd4e   :  { %2315 = vmatprep.mubr.f32.mxu0 %v2189_v4  ;;  %v2143_v25 = vpop.permute.xlu0 %2142  ;;  %v2135_v23 = vpop.permute.xlu1 %2134 }
 0xd4f   :  { %v2153_v14 = vsel %vm207_vm3, %v8111_v38, %v2135_v23  ;;  %2316 = vmatmul.mubr.f32.vlgmr.msra.gmra.mxu0 %v2188_v28 }
 0xd50   :  { %v2154_v27 = vsel %vm211_vm4, %v2153_v14, %v2139_v18  ;;  %6473 = vmatpush3.msk.msra.mxu0 %vm39_vm0, %v8111_v38  ;;  %2320 = vmatprep.mubr.f32.mxu0 %v2192_v19 }
 0xd51   :  { %6474 = vmatprep.subr.mxu0 %v6929_v2  ;;  %v2155_v26 = vsel %vm215_vm5, %v2154_v27, %v2143_v25 }
 0xd52   :  { %6475 = vmatpush3.msra.mxu0 %v8010_v62  ;;  %v2151_v39 = vpop.permute.xlu0 %2150  ;;  %v2147_v6 = vpop.permute.xlu1 %2146 }
 0xd53   :  { %6476 = vmatprep.subr.mxu0 %v6929_v2  ;;  %v2156_v33 = vsel %vm219_vm6, %v2155_v26, %v2147_v6  ;;  %2321 = vmatmul.mubr.f32.gmra.mxu0 %v2191_v5 }
 0xd54   :  { %v2157_v34 = vsel %vm223_vm7, %v2156_v33, %v2151_v39  ;;  %6477 = vmatpush3.msra.mxu0 %v7944_v42 }
 0xd55   :  { %v2169_v37 = vrot.slane %v2157_v34, %v7030_v12  ;;  %6502 = vmatprep.subr.mxu0 %v6929_v2 }
 0xd56   :  { %v2017_v30 = vpop.permute.xlu0 %2016  ;;  %v2008_v43 = vpop.permute.xlu1 %2007 }
 0xd57   :  { %v2172_v40 = vadd.f32 %v2169_v37, %v2051_v48  ;;  %v2050_v45 = vsel %vm219_vm6, %v2047_v44, %v2008_v43  ;;  %v2175_v32 = vadd.f32 %v2169_v37, %v2052_v50 }
 0xd58   :  { %v2053_v24 = vsel %vm223_vm7, %v2050_v45, %v2017_v30 }
 0xd59   :  { %v2181_v35 = vmul.f32 0.2, %v2172_v40  ;;  %v2178_v47 = vadd.f32 %v2169_v37, %v2053_v24  ;;  %v2184_v53 = vmul.f32 0.2, %v2175_v32 }
 0xd5a   :  { %v2035_v31 = vpop.permute.xlu0 %2034  ;;  %v2026_v46 = vpop.permute.xlu1 %2025 }
 0xd5b   :  { %v2190_v60 = vmax.f32 %v2172_v40, %v2181_v35  ;;  %v2056_v52 = vsel %vm227_vm8, %v2053_v24, %v2026_v46  ;;  %v2187_v48 = vmul.f32 0.2, %v2178_v47  ;;  %v2193_v50 = vmax.f32 %v2175_v32, %v2184_v53 }
 0xd5c   :  { %v2059_v54 = vsel %vm231_vm9, %v2056_v52, %v2035_v31 }
 0xd5d   :  { %v2176_v55 = vadd.f32 %v8205_v22, %v2059_v54  ;;  %v2177_v51 = vadd.f32 %v2165_v63, %v2059_v54  ;;  %6464 = vmatmul.mubr.msk.f32.vlgmr.msra.gmra.mxu1 %vm227_vm8, %v2190_v60  ;;  %v2196_v61 = vmax.f32 %v2178_v47, %v2187_v48 }
 0xd5e   :  { %6466 = vmatprep.mubr.msk.f32.mxu1 %vm6930_vm1, %v6929_v2 }
 0xd5f   :  { %v2186_v56 = vmul.f32 0.2, %v2177_v51  ;;  %v2185_v49 = vmul.f32 0.2, %v2176_v55 }
 0xd61   :  { %6467 = vmatmul.mubr.msk.f32.gmra.mxu1 %vm227_vm8, %v2193_v50  ;;  %v2195_v58 = vmax.f32 %v2177_v51, %v2186_v56  ;;  %v2194_v57 = vmax.f32 %v2176_v55, %v2185_v49 }
 0xd62   :  { %6469 = vmatprep.mubr.msk.f32.mxu1 %vm6930_vm1, %v6929_v2 }
 0xd63   :  { %2325 = vmatprep.mubr.f32.mxu0 %v2195_v58  ;;  %v2787_v58 = vld [vmem:[%s9751_s1 + $0x10] sm:$0x3f] }
 0xd64   :  { %2326 = vmatmul.mubr.f32.gmra.mxu0 %v2194_v57 }
 0xd65   :  { %6470 = vmatmul.mubr.msk.f32.gmra.mxu1 %vm227_vm8, %v2196_v61  ;;  %6478 = vmatprep.mubr.msk.f32.mxu0 %vm6930_vm1, %v6929_v2  ;;  %v2786_v61 = vld [vmem:[%s9751_s1 + $0x8] sm:$0xff] }
 0xd66   :  { %6493 = vmatprep.mubr.msk.f32.mxu1 %vm6930_vm1, %v6929_v2 }
 0xe0f   :  { %v6016_v22 = vpop.f32.mrf.mxu0 }
 0xe11   :  { %v6017_v59 = vpop.f32.mrf.mxu0 }
 0xe12   :  { %v6018_v7 = vadd.f32 %v6017_v59, %v6016_v22 }
 0xe13   :  { %v6019_v63 = vpop.f32.mrf.mxu0 }
 0xe15   :  { %v6020_v10 = vpop.f32.mrf.mxu0 }
 0xe16   :  { %v6021_v11 = vadd.f32 %v6020_v10, %v6019_v63 }
 0xe1d   :  { %v2397_v16 = vpop.f32.mrf.mxu1 }
 0xe1e   :  { %v2398_v3 = vadd.f32 %v6018_v7, %v2397_v16  ;;  %v2785_v7 = vld [vmem:[%s9751_s1] sm:$0xff] }
 0xe1f   :  { %v6465_v17 = vpop.f32.mrf.mxu1 }
 0xe20   :  { %v2411_v9 = vsel %vm29_vm2, %v2398_v3, -inf  ;;  %v2535_v45 = vsel %vm710_vm10, %v2398_v3, -inf  ;;  %v2788_v17 = vld [vmem:[%s9753_s3] sm:$0x3f] }
 0xe21   :  { %v2402_v18 = vpop.f32.mrf.mxu1  ;;  %2412 = vmax.xlane.f32.xlu1 %v2411_v9 }
 0xe22   :  { %v2403_v15 = vadd.f32 %v6021_v11, %v2402_v18  ;;  %v5683_v11 = vld [vmem:[%s9750_s0 + $0x18] sm:$0xff]  ;;  %v2891_v18 = vrot.slane %v2788_v17, %v7007_v8 }
 0xe23   :  { %v6468_v13 = vpop.f32.mrf.mxu1 }
 0xe24   :  { %v6022_v4 = vpop.f32.mrf.mxu0  ;;  %v2414_v28 = vsel %vm29_vm2, %v2403_v15, -inf  ;;  %v2538_v31 = vsel %vm710_vm10, %v2403_v15, -inf  ;;  %v5684_v13 = vld [vmem:[%s9750_s0 + $0x20] sm:$0xff] }
 0xe25   :  { %v2407_v21 = vpop.f32.mrf.mxu1  ;;  %2415 = vmax.xlane.f32.xlu0 %v2414_v28 }
 0xe26   :  { %v6023_v25 = vpop.f32.mrf.mxu0 }
 0xe27   :  { %v6024_v23 = vadd.f32 %v6023_v25, %v6022_v4  ;;  %v6471_v19 = vpop.f32.mrf.mxu1  ;;  %v5685_v4 = vld [vmem:[%s9750_s0 + $0x28] sm:$0x3f] }
 0xe29   :  { %v2408_v14 = vadd.f32 %v6024_v23, %v2407_v21 }
 0xe2b   :  { %v2417_v27 = vsel %vm591_vm12, %v2408_v14, -inf  ;;  %v2541_v35 = vsel %vm9761_vm11, %v2408_v14, -inf  ;;  %vm9762_vm11 = vcmask 357376  }
 0xe2c   :  { %2418 = vmax.xlane.f32.xlu0 %v2417_v27 }
 0xeaa   :  { %v2413_v26 = vpop.xlane.xlu1 %2412 }
 0xeab   :  { %v2420_v5 = vsub.f32 %v2398_v3, %v2413_v26 }
 0xead   :  { %v2423_v29 = vmul.f32 1.442695, %v2420_v5 }
 0xeae   :  { %v2416_v39 = vpop.xlane.xlu0 %2415 }
 0xeaf   :  { %6797 = vpow2.f32 %v2423_v29  ;;  %v2421_v6 = vsub.f32 %v2403_v15, %v2416_v39 }
 0xeb1   :  { %v2425_v33 = vmul.f32 1.442695, %v2421_v6 }
 0xeb3   :  { %6799 = vpow2.f32 %v2425_v33 }
 0xeb5   :  { %v2419_v34 = vpop.xlane.xlu0 %2418 }
 0xeb6   :  { %v2422_v36 = vsub.f32 %v2408_v14, %v2419_v34 }
 0xeb8   :  { %v2427_v37 = vmul.f32 1.442695, %v2422_v36 }
 0xeba   :  { %6801 = vpow2.f32 %v2427_v37 }
 0xebc   :  { %v6798_v44 = vpop.eup %6797 }
 0xebd   :  { %v2429_v30 = vsel %vm29_vm2, %v6798_v44, 0.0 }
 0xebe   :  { %2430 = vadd.xlane.f32.xlu1 %v2429_v30 }
 0xec0   :  { %v6800_v43 = vpop.eup %6799 }
 0xec1   :  { %v2432_v40 = vsel %vm29_vm2, %v6800_v43, 0.0 }
 0xec2   :  { %2433 = vadd.xlane.f32.xlu0 %v2432_v40 }
 0xec6   :  { %2536 = vmax.xlane.f32.xlu0 %v2535_v45 }
 0xec7   :  { %v6802_v32 = vpop.eup %6801 }
 0xec8   :  { %v2435_v24 = vsel %vm591_vm12, %v6802_v32, 0.0 }
 0xec9   :  { %2436 = vadd.xlane.f32.xlu1 %v2435_v24 }
 0xeca   :  { %2542 = vmax.xlane.f32.xlu0 %v2541_v35 }
 0xecd   :  { %2539 = vmax.xlane.f32.xlu1 %v2538_v31 }
 0xf47   :  { %v2431_v46 = vpop.xlane.xlu1 %2430 }
 0xf48   :  { %6803 = vrcp.f32 %v2431_v46 }
 0xf4b   :  { %v2434_v60 = vpop.xlane.xlu0 %2433 }
 0xf4c   :  { %6805 = vrcp.f32 %v2434_v60 }
 0xf4f   :  { %v2537_v47 = vpop.xlane.xlu0 %2536 }
 0xf50   :  { %v2544_v52 = vsub.f32 %v2398_v3, %v2537_v47 }
 0xf52   :  { %v2547_v53 = vmul.f32 1.442695, %v2544_v52  ;;  %v2437_v54 = vpop.xlane.xlu1 %2436 }
 0xf53   :  { %6807 = vrcp.f32 %v2437_v54  ;;  %v2543_v55 = vpop.xlane.xlu0 %2542 }
 0xf54   :  { %6809 = vpow2.f32 %v2547_v53  ;;  %v2546_v51 = vsub.f32 %v2408_v14, %v2543_v55 }
 0xf55   :  { %v6804_v48 = vpop.eup %6803 }
 0xf56   :  { %v8264_v50 = vmul.f32 %v6804_v48, %v6798_v44  ;;  %v2551_v56 = vmul.f32 1.442695, %v2546_v51  ;;  %v2540_v49 = vpop.xlane.xlu1 %2539 }
 0xf57   :  { %v2545_v57 = vsub.f32 %v2403_v15, %v2540_v49 }
 0xf58   :  { %6811 = vpow2.f32 %v2551_v56  ;;  %6479 = vmatmul.mubr.msk.f32.vlgmr.msra.gmra.mxu0 %vm29_vm2, %v8264_v50 }
 0xf59   :  { %v6806_v22 = vpop.eup %6805  ;;  %v2549_v59 = vmul.f32 1.442695, %v2545_v57  ;;  %6481 = vmatprep.mubr.msk.f32.mxu0 %vm6930_vm1, %v6929_v2  ;;  %6503 = vmatpush3.msk.msra.mxu0 %vm39_vm0, %v2787_v58 }
 0xf5a   :  { %v8277_v63 = vmul.f32 %v6806_v22, %v6800_v43  ;;  %6504 = vmatprep.subr.mxu0 %v6929_v2  ;;  %v2884_v43 = vrot.slane %v2788_v17, %v7030_v12 }
 0xf5b   :  { %6813 = vpow2.f32 %v2549_v59  ;;  %6505 = vmatpush3.msra.mxu0 %v2786_v61 }
 0xf5c   :  { %6482 = vmatmul.mubr.msk.f32.gmra.mxu0 %vm29_vm2, %v8277_v63  ;;  %6506 = vmatprep.subr.mxu0 %v6929_v2 }
 0xf5d   :  { %6484 = vmatprep.mubr.msk.f32.mxu0 %vm6930_vm1, %v6929_v2  ;;  %6507 = vmatpush3.msra.mxu0 %v2785_v7 }
 0xf5e   :  { %6517 = vmatprep.subr.mxu0 %v6929_v2 }
 0xf60   :  { %v6808_v10 = vpop.eup %6807 }
 0xf61   :  { %v8289_v16 = vpop.eup %6809  ;;  %v8291_v3 = vmul.f32 %v6808_v10, %v6802_v32 }
 0xf62   :  { %2556 = vrot.lane.b32.xlu1 %v8289_v16, %s6938_s30 }
 0xf63   :  { %6485 = vmatmul.mubr.msk.f32.gmra.mxu0 %vm29_vm2, %v8291_v3 }
 0xf64   :  { %6508 = vmatprep.mubr.msk.f32.mxu0 %vm6930_vm1, %v6929_v2 }
 0xf65   :  { %v8305_v9 = vpop.eup %6811 }
 0xf66   :  { %2560 = vrot.lane.b32.xlu1 %v8305_v9, %s6938_s30 }
 0xf67   :  { %6509 = vmatmul.mubr.msk.f32.vlgmr.msra.gmra.mxu0 %vm29_vm2, %v5683_v11 }
 0xf68   :  { %v8311_v15 = vpop.eup %6813  ;;  %6511 = vmatprep.mubr.msk.f32.mxu0 %vm6930_vm1, %v6929_v2 }
 0xf69   :  { %2558 = vrot.lane.b32.xlu0 %v8311_v15, %s6938_s30 }
 0xf6a   :  { %2893 = vrot.lane.b32.xlu1 %v2891_v18, %s6931_s13 }
 0xf6b   :  { %6512 = vmatmul.mubr.msk.f32.gmra.mxu0 %vm29_vm2, %v5684_v13 }
 0xf6c   :  { %6514 = vmatprep.mubr.msk.f32.mxu0 %vm6930_vm1, %v6929_v2 }
 0xf6d   :  { %2593 = vrot.lane.b32.xlu0 %v8111_v38, %s6939_s8 }
 0xf6e   :  { %2591 = vrot.lane.b32.xlu1 %v8010_v62, %s6939_s8 }
 0xf6f   :  { %6515 = vmatmul.mubr.msk.f32.gmra.mxu0 %vm29_vm2, %v5685_v4  ;;  %v3154_v4 = vld [vmem:[%s9752_s2 + $0xf8] sm:$0xff] }
 0xf70   :  { %6541 = vmatprep.mubr.msk.f32.mxu0 %vm6930_vm1, %v6929_v2 }
 0xf72   :  { %2589 = vrot.lane.b32.xlu1 %v7944_v42, %s6939_s8 }
 0xfd4   :  { %v2557_v28 = vpop.permute.xlu1 %2556 }
 0xfd5   :  { %v2565_v21 = vsel %vm29_vm2, %v2557_v28, 0.0 }
 0xfd6   :  { %2566 = vadd.xlane.f32.xlu1 %v2565_v21  ;;  %v3166_v21 = vld [vmem:[%s9752_s2 + $0x158] sm:$0xff] }
 0xfd7   :  { %6518 = vmatpush3.msra.mxu0 %v3166_v21  ;;  %v3144_v21 = vld [vmem:[%s9752_s2 + $0xa8] sm:$0xff] }
 0xfd8   :  { %v2561_v25 = vpop.permute.xlu1 %2560  ;;  %6519 = vmatprep.subr.mxu0 %v6929_v2 }
 0xfd9   :  { %v2571_v27 = vsel %vm591_vm12, %v2561_v25, 0.0  ;;  %v3165_v25 = vld [vmem:[%s9752_s2 + $0x150] sm:$0xff] }
 0xfda   :  { %6520 = vmatpush3.msra.mxu0 %v3165_v25 }
 0xfdb   :  { %v2559_v23 = vpop.permute.xlu0 %2558  ;;  %6521 = vmatprep.subr.mxu0 %v6929_v2 }
 0xfdc   :  { %v2894_v19 = vpop.permute.xlu1 %2893  ;;  %v2568_v38 = vsel %vm29_vm2, %v2559_v23, 0.0  ;;  %v3164_v23 = vld [vmem:[%s9752_s2 + $0x148] sm:$0xff] }
 0xfdd   :  { %2569 = vadd.xlane.f32.xlu0 %v2568_v38  ;;  %6522 = vmatpush3.msra.mxu0 %v3164_v23  ;;  %v3162_v38 = vld [vmem:[%s9752_s2 + $0x138] sm:$0xff]  ;;  %v3128_v23 = vld [vmem:[%s9752_s2 + $0x28] sm:$0xff] }
 0xfde   :  { %6523 = vmatprep.subr.mxu0 %v6929_v2 }
 0xfdf   :  { %v2594_v14 = vpop.permute.xlu0 %2593 }
 0xfe0   :  { %6488 = vmatpush3.msk.msra.mxu1 %vm39_vm0, %v2594_v14  ;;  %v2592_v62 = vpop.permute.xlu1 %2591  ;;  %v3161_v14 = vld [vmem:[%s9752_s2 + $0x130] sm:$0xff] }
 0xfe1   :  { %6489 = vmatprep.subr.mxu1 %v6929_v2  ;;  %2572 = vadd.xlane.f32.xlu0 %v2571_v27 }
 0xfe2   :  { %6490 = vmatpush3.msra.mxu1 %v2592_v62  ;;  %v3160_v62 = vld [vmem:[%s9752_s2 + $0x128] sm:$0xff] }
 0xfe3   :  { %6491 = vmatprep.subr.mxu1 %v6929_v2 }
 0xfe4   :  { %v2590_v42 = vpop.permute.xlu1 %2589 }
 0xfe5   :  { %6492 = vmatpush3.msra.mxu1 %v2590_v42  ;;  %v3159_v42 = vld [vmem:[%s9752_s2 + $0x120] sm:$0xff] }
 0xfe6   :  { %6058 = vmatprep.subr.mxu1 %v3154_v4  ;;  %v3129_v4 = vld [vmem:[%s9752_s2 + $0x30] sm:$0xff] }
0x1018   :  { %v8342_v26 = vpop.f32.mrf.mxu0 }
0x101a   :  { %v6480_v5 = vpop.f32.mrf.mxu0 }
0x101c   :  { %v8344_v29 = vpop.f32.mrf.mxu0 }
0x101e   :  { %v6483_v39 = vpop.f32.mrf.mxu0 }
0x101f   :  { %v3158_v39 = vld [vmem:[%s9752_s2 + $0x118] sm:$0xff] }
0x1023   :  { %v8346_v6 = vpop.f32.mrf.mxu0 }
0x1025   :  { %v6486_v33 = vpop.f32.mrf.mxu0 }
0x1026   :  { %v3157_v33 = vld [vmem:[%s9752_s2 + $0x110] sm:$0xff] }
0x1027   :  { %v2867_v34 = vpop.f32.mrf.mxu0 }
0x1028   :  { %v8348_v36 = vadd.f32 %v2894_v19, %v2867_v34  ;;  %v8355_v32 = vadd.f32 %v2884_v43, %v2867_v34  ;;  %v3156_v34 = vld [vmem:[%s9752_s2 + $0x108] sm:$0xff] }
0x1029   :  { %v6510_v37 = vpop.f32.mrf.mxu0 }
0x102a   :  { %2911 = vrot.lane.b32.xlu1 %v8348_v36, %s6931_s13  ;;  %v2991_v24 = vrot.slane %v8355_v32, 2  ;;  %v2999_v35 = vrot.slane %v8355_v32, 4  ;;  %v3007_v13 = vrot.slane %v8355_v32, 6  ;;  %v3011_v28 = vrot.slane %v8355_v32, 7  ;;  %v3155_v37 = vld [vmem:[%s9752_s2 + $0x100] sm:$0xff] }
0x102b   :  { %v2872_v44 = vpop.f32.mrf.mxu0 }
0x102c   :  { %v8365_v31 = vadd.f32 %v2894_v19, %v2872_v44  ;;  %v8367_v46 = vadd.f32 %v2884_v43, %v2872_v44 }
0x102d   :  { %v6513_v30 = vpop.f32.mrf.mxu0 }
0x102e   :  { %2929 = vrot.lane.b32.xlu1 %v8348_v36, %s6933_s17  ;;  %v3016_v60 = vrot.slane %v8367_v46, 1  ;;  %v3020_v47 = vrot.slane %v8367_v46, 2  ;;  %v3028_v52 = vrot.slane %v8367_v46, 4  ;;  %v3036_v53 = vrot.slane %v8367_v46, 6 }
0x102f   :  { %v2877_v40 = vpop.f32.mrf.mxu0  ;;  %v3040_v54 = vrot.slane %v8367_v46, 7  ;;  %v3024_v27 = vrot.slane %v8367_v46, 3  ;;  %v3032_v5 = vrot.slane %v8367_v46, 5 }
0x1030   :  { %v8383_v55 = vadd.f32 %v2894_v19, %v2877_v40  ;;  %v8387_v48 = vadd.f32 %v2884_v43, %v2877_v40  ;;  %v3163_v19 = vld [vmem:[%s9752_s2 + $0x140] sm:$0xff] }
0x1031   :  { %v6516_v45 = vpop.f32.mrf.mxu0  ;;  %6524 = vmatpush3.msra.mxu0 %v3163_v19  ;;  %v3143_v19 = vld [vmem:[%s9752_s2 + $0xa0] sm:$0xff] }
0x1032   :  { %2938 = vrot.lane.b32.xlu1 %v8348_v36, %s6935_s19  ;;  %v3059_v49 = vrot.slane %v8387_v48, 1  ;;  %v3063_v57 = vrot.slane %v8387_v48, 2  ;;  %v3067_v59 = vrot.slane %v8387_v48, 3  ;;  %v3075_v10 = vrot.slane %v8387_v48, 5  ;;  %6525 = vmatprep.subr.mxu0 %v6929_v2 }
0x1033   :  { %6526 = vmatpush3.msra.mxu0 %v3162_v38  ;;  %v3071_v44 = vrot.slane %v8387_v48, 4  ;;  %v3127_v38 = vld [vmem:[%s9752_s2 + $0x20] sm:$0xff] }
0x1034   :  { %6527 = vmatprep.subr.mxu0 %v6929_v2 }
0x1035   :  { %6528 = vmatpush3.msra.mxu0 %v3161_v14 }
0x1036   :  { %2947 = vrot.lane.b32.xlu1 %v8348_v36, %s6936_s20  ;;  %6529 = vmatprep.subr.mxu0 %v6929_v2 }
0x1037   :  { %6530 = vmatpush3.msra.mxu0 %v3160_v62  ;;  %v3142_v62 = vld [vmem:[%s9752_s2 + $0x98] sm:$0xff] }
0x1038   :  { %6531 = vmatprep.subr.mxu0 %v6929_v2 }
0x1039   :  { %6532 = vmatpush3.msra.mxu0 %v3159_v42  ;;  %v3141_v42 = vld [vmem:[%s9752_s2 + $0x90] sm:$0xff] }
0x103a   :  { %2992 = vrot.lane.b32.xlu1 %v2991_v24, %s6934_s18  ;;  %6533 = vmatprep.subr.mxu0 %v6929_v2 }
0x103b   :  { %6534 = vmatpush3.msra.mxu0 %v3158_v39  ;;  %v3125_v39 = vld [vmem:[%s9752_s2 + $0x10] sm:$0xff] }
0x103c   :  { %6535 = vmatprep.subr.mxu0 %v6929_v2 }
0x103d   :  { %6536 = vmatpush3.msra.mxu0 %v3157_v33 }
0x103e   :  { %3000 = vrot.lane.b32.xlu1 %v2999_v35, %s6935_s19  ;;  %6537 = vmatprep.subr.mxu0 %v6929_v2 }
0x103f   :  { %6538 = vmatpush3.msra.mxu0 %v3156_v34  ;;  %v3140_v34 = vld [vmem:[%s9752_s2 + $0x88] sm:$0xff] }
0x1040   :  { %6539 = vmatprep.subr.mxu0 %v6929_v2 }
0x1041   :  { %6540 = vmatpush3.msra.mxu0 %v3155_v37  ;;  %v3124_v37 = vld [vmem:[%s9752_s2 + $0x8] sm:$0xff] }
0x1042   :  { %2922 = vrot.lane.b32.xlu1 %v8365_v31, %s6934_s18  ;;  %6565 = vmatprep.subr.mxu0 %v6929_v2 }
0x1046   :  { %2940 = vrot.lane.b32.xlu1 %v8365_v31, %s6935_s19 }
0x104a   :  { %3017 = vrot.lane.b32.xlu1 %v3016_v60, %s6931_s13  ;;  %v3138_v60 = vld [vmem:[%s9752_s2 + $0x78] sm:$0xff] }
0x104e   :  { %3021 = vrot.lane.b32.xlu1 %v3020_v47, %s6934_s18 }
0x1052   :  { %3029 = vrot.lane.b32.xlu1 %v3028_v52, %s6935_s19  ;;  %v3153_v52 = vld [vmem:[%s9752_s2 + $0xf0] sm:$0xff] }
0x1056   :  { %3037 = vrot.lane.b32.xlu1 %v3036_v53, %s6937_s21  ;;  %v3137_v53 = vld [vmem:[%s9752_s2 + $0x70] sm:$0xff] }
0x105a   :  { %3041 = vrot.lane.b32.xlu1 %v3040_v54, %s6932_s16 }
0x105e   :  { %2915 = vrot.lane.b32.xlu1 %v8383_v55, %s6931_s13 }
0x105f   :  { %v2567_v51 = vpop.xlane.xlu1 %2566 }
0x1060   :  { %6815 = vrcp.f32 %v2567_v51  ;;  %v3152_v51 = vld [vmem:[%s9752_s2 + $0xe8] sm:$0xff] }
0x1062   :  { %2924 = vrot.lane.b32.xlu1 %v8383_v55, %s6934_s18 }
0x1066   :  { %v2570_v56 = vpop.xlane.xlu0 %2569  ;;  %2933 = vrot.lane.b32.xlu1 %v8383_v55, %s6933_s17 }
0x1067   :  { %6817 = vrcp.f32 %v2570_v56  ;;  %v3136_v56 = vld [vmem:[%s9752_s2 + $0x68] sm:$0xff] }
0x106a   :  { %v2573_v58 = vpop.xlane.xlu0 %2572  ;;  %3060 = vrot.lane.b32.xlu1 %v3059_v49, %s6931_s13  ;;  %v3151_v49 = vld [vmem:[%s9752_s2 + $0xe0] sm:$0xff] }
0x106b   :  { %6819 = vrcp.f32 %v2573_v58  ;;  %v3135_v58 = vld [vmem:[%s9752_s2 + $0x60] sm:$0xff] }
0x106d   :  { %v6816_v61 = vpop.eup %6815 }
0x106e   :  { %3064 = vrot.lane.b32.xlu1 %v3063_v57, %s6934_s18  ;;  %v2577_v22 = vmul.f32 %v6816_v61, %v8289_v16  ;;  %v3150_v61 = vld [vmem:[%s9752_s2 + $0xd8] sm:$0xff] }
0x1070   :  { %2583 = vrot.lane.b32.xlu0 %v2577_v22, %s6938_s30  ;;  %v2685_v7 = vsel %vm29_vm2, %v8264_v50, %v2577_v22 }
0x1071   :  { %2688 = vst.msk [vmem:[%s9757_s7] sm:$0xff] %vm865_vm13, %v2685_v7  ;;  %v3149_v7 = vld [vmem:[%s9752_s2 + $0xd0] sm:$0xff] }
0x1072   :  { %3068 = vrot.lane.b32.xlu1 %v3067_v59, %s6933_s17  ;;  %v3134_v59 = vld [vmem:[%s9752_s2 + $0x58] sm:$0xff] }
0x1074   :  { %v6818_v17 = vpop.eup %6817 }
0x1075   :  { %v2578_v11 = vmul.f32 %v6818_v17, %v8311_v15 }
0x1076   :  { %3076 = vrot.lane.b32.xlu1 %v3075_v10, %s6936_s20  ;;  %v3133_v10 = vld [vmem:[%s9752_s2 + $0x50] sm:$0xff] }
0x1077   :  { %v2686_v16 = vsel %vm29_vm2, %v8277_v63, %v2578_v11  ;;  %2585 = vrot.lane.b32.xlu0 %v2578_v11, %s6938_s30  ;;  %v2987_v63 = vrot.slane %v8355_v32, 1  ;;  %v3148_v11 = vld [vmem:[%s9752_s2 + $0xc8] sm:$0xff] }
0x1078   :  { %v6820_v50 = vpop.eup %6819  ;;  %2689 = vst.msk [vmem:[%s9757_s7 + $0x8] sm:$0xff] %vm865_vm13, %v2686_v16  ;;  %v3132_v16 = vld [vmem:[%s9752_s2 + $0x48] sm:$0xff] }
0x1079   :  { %v2579_v18 = vmul.f32 %v6820_v50, %v8305_v9  ;;  %v3003_v9 = vrot.slane %v8355_v32, 5  ;;  %v3147_v50 = vld [vmem:[%s9752_s2 + $0xc0] sm:$0xff] }
0x107a   :  { %2951 = vrot.lane.b32.xlu1 %v8383_v55, %s6936_s20 }
0x107b   :  { %v2687_v15 = vsel %vm29_vm2, %v8291_v3, %v2579_v18  ;;  %2587 = vrot.lane.b32.xlu0 %v2579_v18, %s6938_s30  ;;  %v2995_v3 = vrot.slane %v8355_v32, 3 }
0x107c   :  { %2690 = vst.msk [vmem:[%s9757_s7 + $0x10] sm:$0x3f] %vm9762_vm11, %v2687_v15  ;;  %v3131_v15 = vld [vmem:[%s9752_s2 + $0x40] sm:$0xff]  ;;  %vm9763_vm11 = vcmask 357552  }
0x107f   :  { %2902 = vrot.lane.b32.xlu0 %v8348_v36, %s6932_s16 }
0x1083   :  { %2920 = vrot.lane.b32.xlu0 %v8348_v36, %s6934_s18 }
0x1087   :  { %2956 = vrot.lane.b32.xlu0 %v8348_v36, %s6937_s21 }
0x108b   :  { %2988 = vrot.lane.b32.xlu0 %v2987_v63, %s6931_s13 }
0x108f   :  { %2996 = vrot.lane.b32.xlu0 %v2995_v3, %s6933_s17  ;;  %v3146_v3 = vld [vmem:[%s9752_s2 + $0xb8] sm:$0xff] }
0x1093   :  { %3004 = vrot.lane.b32.xlu0 %v3003_v9, %s6936_s20  ;;  %v3130_v9 = vld [vmem:[%s9752_s2 + $0x38] sm:$0xff] }
0x1097   :  { %3008 = vrot.lane.b32.xlu0 %v3007_v13, %s6937_s21  ;;  %v3145_v13 = vld [vmem:[%s9752_s2 + $0xb0] sm:$0xff] }
0x109b   :  { %3012 = vrot.lane.b32.xlu0 %v3011_v28, %s6932_s16 }
0x109c   :  { %v8512_v30 = vpop.permute.xlu1 %2911 }
0x109f   :  { %2904 = vrot.lane.b32.xlu0 %v8365_v31, %s6932_s16 }
0x10a0   :  { %v8516_v43 = vpop.permute.xlu1 %2929 }
0x10a3   :  { %2913 = vrot.lane.b32.xlu0 %v8365_v31, %s6931_s13 }
0x10a4   :  { %v8520_v40 = vpop.permute.xlu1 %2938 }
0x10a7   :  { %2931 = vrot.lane.b32.xlu0 %v8365_v31, %s6933_s17 }
0x10a8   :  { %v8522_v45 = vpop.permute.xlu1 %2947 }
0x10ab   :  { %2949 = vrot.lane.b32.xlu0 %v8365_v31, %s6936_s20 }
0x10ac   :  { %v8524_v24 = vpop.permute.xlu1 %2992 }
0x10af   :  { %2958 = vrot.lane.b32.xlu0 %v8365_v31, %s6937_s21 }
0x10b0   :  { %v8526_v35 = vpop.permute.xlu1 %3000 }
0x10b3   :  { %3025 = vrot.lane.b32.xlu0 %v3024_v27, %s6933_s17  ;;  %v3126_v27 = vld [vmem:[%s9752_s2 + $0x18] sm:$0xff] }
0x10b4   :  { %v8538_v54 = vpop.permute.xlu1 %2922 }
0x10b7   :  { %3033 = vrot.lane.b32.xlu0 %v3032_v5, %s6936_s20 }
0x10b8   :  { %v8557_v22 = vpop.permute.xlu1 %2940 }
0x10bb   :  { %2906 = vrot.lane.b32.xlu0 %v8383_v55, %s6932_s16 }
0x10bc   :  { %v8581_v18 = vpop.permute.xlu1 %3017 }
0x10bf   :  { %3072 = vrot.lane.b32.xlu0 %v3071_v44, %s6935_s19  ;;  %v3139_v44 = vld [vmem:[%s9752_s2 + $0x80] sm:$0xff] }
0x10c0   :  { %v3022_v25 = vpop.permute.xlu1 %3021 }
0x10c3   :  { %2942 = vrot.lane.b32.xlu0 %v8383_v55, %s6935_s19 }
0x10c4   :  { %v3030_v5 = vpop.permute.xlu1 %3029 }
0x10c7   :  { %2960 = vrot.lane.b32.xlu0 %v8383_v55, %s6937_s21 }
0x10e2   :  { %v2584_v47 = vpop.permute.xlu0 %2583 }
0x10e3   :  { %6494 = vmatmul.mubr.msk.f32.vlgmr.msra.gmra.mxu1 %vm29_vm2, %v2584_v47 }
0x10e4   :  { %6496 = vmatprep.mubr.msk.f32.mxu1 %vm6930_vm1, %v6929_v2  ;;  %6059 = vmatpush3.msra.mxu1 %v3138_v60  ;;  %v3123_v60 = vld [vmem:[%s9752_s2] sm:$0xff] }
0x10e5   :  { %6060 = vmatprep.subr.mxu1 %v3153_v52  ;;  %v3038_v52 = vpop.permute.xlu1 %3037 }
0x10e6   :  { %6061 = vmatpush3.msra.mxu1 %v3137_v53 }
0x10e7   :  { %6062 = vmatprep.subr.mxu1 %v3152_v51 }
0x10e8   :  { %6063 = vmatpush3.msra.mxu1 %v3136_v56 }
0x10e9   :  { %v2586_v57 = vpop.permute.xlu0 %2585  ;;  %6064 = vmatprep.subr.mxu1 %v3151_v49  ;;  %v3042_v51 = vpop.permute.xlu1 %3041 }
0x10ea   :  { %6497 = vmatmul.mubr.msk.f32.gmra.mxu1 %vm29_vm2, %v2586_v57 }
0x10eb   :  { %6499 = vmatprep.mubr.msk.f32.mxu1 %vm6930_vm1, %v6929_v2  ;;  %6065 = vmatpush3.msra.mxu1 %v3135_v58 }
0x10ec   :  { %6066 = vmatprep.subr.mxu1 %v3150_v61 }
0x10ed   :  { %v2588_v17 = vpop.permute.xlu0 %2587  ;;  %6067 = vmatpush3.msra.mxu1 %v3134_v59  ;;  %v2916_v58 = vpop.permute.xlu1 %2915 }
0x10ee   :  { %6500 = vmatmul.mubr.msk.f32.gmra.mxu1 %vm29_vm2, %v2588_v17  ;;  %6068 = vmatprep.subr.mxu1 %v3149_v7 }
0x10ef   :  { %6069 = vmatpush3.msra.mxu1 %v3133_v10 }
0x10f0   :  { %6070 = vmatprep.subr.mxu1 %v3148_v11 }
0x10f1   :  { %v2903_v63 = vpop.permute.xlu0 %2902  ;;  %6071 = vmatpush3.msra.mxu1 %v3132_v16  ;;  %v2925_v61 = vpop.permute.xlu1 %2924 }
0x10f2   :  { %6072 = vmatprep.subr.mxu1 %v3147_v50  ;;  %v2965_v17 = vsel %vm207_vm3, %v2903_v63, %v8348_v36 }
0x10f3   :  { %6073 = vmatpush3.msra.mxu1 %v3131_v15  ;;  %v2968_v50 = vsel %vm211_vm4, %v2965_v17, %v8512_v30 }
0x10f4   :  { %6074 = vmatprep.subr.mxu1 %v3146_v3 }
0x10f5   :  { %v2921_v28 = vpop.permute.xlu0 %2920  ;;  %6075 = vmatpush3.msra.mxu1 %v3130_v9  ;;  %v2934_v10 = vpop.permute.xlu1 %2933 }
0x10f6   :  { %6076 = vmatprep.subr.mxu1 %v3145_v13  ;;  %v2971_v3 = vsel %vm215_vm5, %v2968_v50, %v2921_v28 }
0x10f7   :  { %6077 = vmatpush3.msra.mxu1 %v3129_v4 }
0x10f8   :  { %6078 = vmatprep.subr.mxu1 %v3144_v21  ;;  %v2974_v21 = vsel %vm219_vm6, %v2971_v3, %v8516_v43 }
0x10f9   :  { %v8610_v14 = vpop.permute.xlu0 %2956  ;;  %6079 = vmatpush3.msra.mxu1 %v3128_v23  ;;  %v3061_v13 = vpop.permute.xlu1 %3060  ;;  %v2977_v43 = vsel %vm223_vm7, %v2974_v21, %v8520_v40 }
0x10fa   :  { %6080 = vmatprep.subr.mxu1 %v3143_v19 }
0x10fb   :  { %6081 = vmatpush3.msra.mxu1 %v3127_v38 }
0x10fc   :  { %6082 = vmatprep.subr.mxu1 %v3142_v62 }
0x10fd   :  { %v2989_v33 = vpop.permute.xlu0 %2988  ;;  %6083 = vmatpush3.msra.mxu1 %v3126_v27  ;;  %v3065_v62 = vpop.permute.xlu1 %3064 }
0x10fe   :  { %6084 = vmatprep.subr.mxu1 %v3141_v42  ;;  %v3044_v11 = vsel %vm207_vm3, %v8355_v32, %v2989_v33 }
0x10ff   :  { %6085 = vmatpush3.msra.mxu1 %v3125_v39  ;;  %v3045_v15 = vsel %vm211_vm4, %v3044_v11, %v8524_v24  ;;  %v3051_v24 = vsel %vm207_vm3, %v8367_v46, %v8581_v18  ;;  %v2980_v18 = vsel %vm227_vm8, %v2977_v43, %v8522_v45 }
0x1100   :  { %6086 = vmatprep.subr.mxu1 %v3140_v34  ;;  %v3052_v19 = vsel %vm211_vm4, %v3051_v24, %v3022_v25  ;;  %v2983_v34 = vsel %vm231_vm9, %v2980_v18, %v8610_v14  ;;  %v3079_v14 = vsel %vm207_vm3, %v8387_v48, %v3061_v13 }
0x1101   :  { %v2997_v47 = vpop.permute.xlu0 %2996  ;;  %6087 = vmatpush3.msra.mxu1 %v3124_v37 }
0x1102   :  { %6088 = vmatprep.subr.mxu1 %v3139_v44  ;;  %v3046_v9 = vsel %vm215_vm5, %v3045_v15, %v2997_v47  ;;  %v3069_v44 = vpop.permute.xlu1 %3068 }
0x1103   :  { %6089 = vmatpush3.msra.mxu1 %v3123_v60  ;;  %v3047_v36 = vsel %vm219_vm6, %v3046_v9, %v8526_v35 }
0x1104   :  { %6550 = vmatprep.subr.mxu1 %v6929_v2 }
0x1105   :  { %v3005_v53 = vpop.permute.xlu0 %3004 }
0x1106   :  { %v3048_v63 = vsel %vm223_vm7, %v3047_v36, %v3005_v53  ;;  %v3077_v15 = vpop.permute.xlu1 %3076 }
0x1109   :  { %v3009_v56 = vpop.permute.xlu0 %3008 }
0x110a   :  { %v3049_v28 = vsel %vm227_vm8, %v3048_v63, %v3009_v56 }
0x110d   :  { %v3013_v49 = vpop.permute.xlu0 %3012 }
0x110e   :  { %v3050_v35 = vsel %vm231_vm9, %v3049_v28, %v3013_v49 }
0x110f   :  { %v3087_v42 = vrot.slane %v3050_v35, %v7030_v12 }
0x1111   :  { %v2905_v57 = vpop.permute.xlu0 %2904  ;;  %v3096_v60 = vadd.f32 %v3087_v42, %v2983_v34 }
0x1112   :  { %v2966_v30 = vsel %vm207_vm3, %v2905_v57, %v8365_v31 }
0x1115   :  { %v2914_v59 = vpop.permute.xlu0 %2913 }
0x1116   :  { %v2969_v23 = vsel %vm211_vm4, %v2966_v30, %v2914_v59  ;;  %v3080_v59 = vsel %vm211_vm4, %v3079_v14, %v3065_v62 }
0x1117   :  { %v2972_v31 = vsel %vm215_vm5, %v2969_v23, %v8538_v54 }
0x1119   :  { %v2932_v7 = vpop.permute.xlu0 %2931 }
0x111a   :  { %v2975_v39 = vsel %vm219_vm6, %v2972_v31, %v2932_v7  ;;  %v3105_v7 = vmul.f32 0.2, %v3096_v60 }
0x111b   :  { %v2978_v37 = vsel %vm223_vm7, %v2975_v39, %v8557_v22 }
0x111d   :  { %v2950_v16 = vpop.permute.xlu0 %2949 }
0x111e   :  { %v2981_v45 = vsel %vm227_vm8, %v2978_v37, %v2950_v16 }
0x1121   :  { %v2959_v4 = vpop.permute.xlu0 %2958 }
0x1122   :  { %v2984_v53 = vsel %vm231_vm9, %v2981_v45, %v2959_v4 }
0x1123   :  { %v3099_v17 = vadd.f32 %v3087_v42, %v2984_v53 }
0x1125   :  { %v3026_v38 = vpop.permute.xlu0 %3025  ;;  %v3108_v4 = vmul.f32 0.2, %v3099_v17 }
0x1126   :  { %v3053_v27 = vsel %vm215_vm5, %v3052_v19, %v3026_v38 }
0x1127   :  { %v3054_v33 = vsel %vm219_vm6, %v3053_v27, %v3030_v5  ;;  %v3117_v35 = vmax.f32 %v3099_v17, %v3108_v4 }
0x1129   :  { %v3034_v25 = vpop.permute.xlu0 %3033 }
0x112a   :  { %v3055_v40 = vsel %vm223_vm7, %v3054_v33, %v3034_v25 }
0x112b   :  { %v3056_v54 = vsel %vm227_vm8, %v3055_v40, %v3038_v52 }
0x112c   :  { %v3057_v47 = vsel %vm231_vm9, %v3056_v54, %v3042_v51  ;;  %v3081_v51 = vsel %vm215_vm5, %v3080_v59, %v3069_v44 }
0x112d   :  { %v3091_v5 = vrot.slane %v3057_v47, %v7030_v12  ;;  %v2907_v56 = vpop.permute.xlu0 %2906 }
0x112e   :  { %v2967_v49 = vsel %vm207_vm3, %v2907_v56, %v8383_v55 }
0x112f   :  { %v2970_v22 = vsel %vm211_vm4, %v2967_v49, %v2916_v58  ;;  %v3097_v52 = vadd.f32 %v3091_v5, %v2983_v34  ;;  %v3100_v57 = vadd.f32 %v3091_v5, %v2984_v53  ;;  %v3114_v58 = vmax.f32 %v3096_v60, %v3105_v7 }
0x1130   :  { %v2973_v55 = vsel %vm215_vm5, %v2970_v22, %v2925_v61  ;;  %v2952_v61 = vpop.permute.xlu1 %2951 }
0x1131   :  { %v3073_v11 = vpop.permute.xlu0 %3072  ;;  %v3106_v16 = vmul.f32 0.2, %v3097_v52  ;;  %v3109_v50 = vmul.f32 0.2, %v3100_v57  ;;  %v2976_v63 = vsel %vm219_vm6, %v2973_v55, %v2934_v10 }
0x1132   :  { %v3082_v3 = vsel %vm219_vm6, %v3081_v51, %v3073_v11 }
0x1133   :  { %v3083_v9 = vsel %vm223_vm7, %v3082_v3, %v3077_v15  ;;  %v3115_v13 = vmax.f32 %v3097_v52, %v3106_v16  ;;  %v3118_v30 = vmax.f32 %v3100_v57, %v3109_v50 }
0x1134   :  { %v3095_v21 = vrot.slane %v3083_v9, %v7030_v12 }
0x1135   :  { %v2943_v36 = vpop.permute.xlu0 %2942  ;;  %3240 = vmatprep.mubr.f32.mxu1 %v3115_v13 }
0x1136   :  { %v3098_v24 = vadd.f32 %v3095_v21, %v2977_v43  ;;  %v2979_v28 = vsel %vm223_vm7, %v2976_v63, %v2943_v36  ;;  %3241 = vmatmul.mubr.f32.vlgmr.msra.gmra.mxu1 %v3114_v58  ;;  %v3101_v23 = vadd.f32 %v3095_v21, %v2978_v37 }
0x1137   :  { %6551 = vmatpush3.msk.msra.mxu1 %vm39_vm0, %v8387_v48  ;;  %3245 = vmatprep.mubr.f32.mxu1 %v3118_v30  ;;  %v2982_v10 = vsel %vm227_vm8, %v2979_v28, %v2952_v61  ;;  %v3104_v43 = vadd.f32 %v3095_v21, %v2979_v28 }
0x1138   :  { %v3107_v19 = vmul.f32 0.2, %v3098_v24  ;;  %6552 = vmatprep.subr.mxu1 %v6929_v2  ;;  %v3110_v31 = vmul.f32 0.2, %v3101_v23 }
0x1139   :  { %6553 = vmatpush3.msra.mxu1 %v8367_v46  ;;  %v2961_v38 = vpop.permute.xlu0 %2960  ;;  %v3113_v40 = vmul.f32 0.2, %v3104_v43 }
0x113a   :  { %v3116_v62 = vmax.f32 %v3098_v24, %v3107_v19  ;;  %v2985_v27 = vsel %vm231_vm9, %v2982_v10, %v2961_v38  ;;  %6554 = vmatprep.subr.mxu1 %v6929_v2  ;;  %3246 = vmatmul.mubr.f32.gmra.mxu1 %v3117_v35  ;;  %v3119_v34 = vmax.f32 %v3101_v23, %v3110_v31 }
0x113b   :  { %v3102_v18 = vadd.f32 %v3087_v42, %v2985_v27  ;;  %v3103_v39 = vadd.f32 %v3091_v5, %v2985_v27  ;;  %6555 = vmatpush3.msra.mxu1 %v8355_v32  ;;  %v3122_v42 = vmax.f32 %v3104_v43, %v3113_v40 }
0x113c   :  { %6542 = vmatmul.mubr.msk.f32.vlgmr.msra.gmra.mxu0 %vm227_vm8, %v3116_v62  ;;  %6580 = vmatprep.subr.mxu1 %v6929_v2 }
0x113d   :  { %v3111_v25 = vmul.f32 0.2, %v3102_v18  ;;  %v3112_v33 = vmul.f32 0.2, %v3103_v39  ;;  %6544 = vmatprep.mubr.msk.f32.mxu0 %vm6930_vm1, %v6929_v2 }
0x113f   :  { %v3121_v37 = vmax.f32 %v3103_v39, %v3112_v33  ;;  %v3120_v54 = vmax.f32 %v3102_v18, %v3111_v25 }
0x1140   :  { %6545 = vmatmul.mubr.msk.f32.gmra.mxu0 %vm227_vm8, %v3119_v34 }
0x1141   :  { %3250 = vmatprep.mubr.f32.mxu1 %v3121_v37  ;;  %6547 = vmatprep.mubr.msk.f32.mxu0 %vm6930_vm1, %v6929_v2 }
0x1142   :  { %3251 = vmatmul.mubr.f32.gmra.mxu1 %v3120_v54 }
0x1143   :  { %6556 = vmatprep.mubr.msk.f32.mxu1 %vm6930_vm1, %v6929_v2 }
0x1144   :  { %6548 = vmatmul.mubr.msk.f32.gmra.mxu0 %vm227_vm8, %v3122_v42 }
0x1145   :  { %6571 = vmatprep.mubr.msk.f32.mxu0 %vm6930_vm1, %v6929_v2 }
0x11a3   :  { %v8714_v44 = vpop.f32.mrf.mxu1 }
0x11a5   :  { %v6495_v60 = vpop.f32.mrf.mxu1 }
0x11aa   :  { %v8716_v45 = vpop.f32.mrf.mxu1 }
0x11ac   :  { %v6498_v47 = vpop.f32.mrf.mxu1 }
0x11ae   :  { %v8718_v53 = vpop.f32.mrf.mxu1 }
0x11b0   :  { %v6501_v5 = vpop.f32.mrf.mxu1 }
0x11f6   :  { %v6090_v56 = vpop.f32.mrf.mxu1 }
0x11f8   :  { %v6091_v49 = vpop.f32.mrf.mxu1 }
0x11f9   :  { %v6092_v22 = vadd.f32 %v6091_v49, %v6090_v56 }
0x11fa   :  { %v6093_v14 = vpop.f32.mrf.mxu1 }
0x11fc   :  { %v6094_v52 = vpop.f32.mrf.mxu1  ;;  %v3322_v57 = vpop.f32.mrf.mxu0 }
0x11fd   :  { %v8720_v59 = vadd.f32 %v6092_v22, %v3322_v57  ;;  %v6095_v17 = vadd.f32 %v6094_v52, %v6093_v14 }
0x11fe   :  { %v6543_v7 = vpop.f32.mrf.mxu0 }
0x11ff   :  { %v3460_v51 = vsel %vm710_vm10, %v8720_v59, -inf  ;;  %v3336_v39 = vsel %vm29_vm2, %v8720_v59, -inf }
0x1200   :  { %3461 = vmax.xlane.f32.xlu1 %v3460_v51  ;;  %v3327_v11 = vpop.f32.mrf.mxu0 }
0x1201   :  { %v8724_v16 = vadd.f32 %v6095_v17, %v3327_v11 }
0x1202   :  { %v6096_v50 = vpop.f32.mrf.mxu1  ;;  %v6546_v15 = vpop.f32.mrf.mxu0 }
0x1203   :  { %v3463_v3 = vsel %vm710_vm10, %v8724_v16, -inf  ;;  %v3339_v34 = vsel %vm29_vm2, %v8724_v16, -inf }
0x1204   :  { %3464 = vmax.xlane.f32.xlu0 %v3463_v3  ;;  %v6097_v55 = vpop.f32.mrf.mxu1  ;;  %v3332_v9 = vpop.f32.mrf.mxu0 }
0x1205   :  { %v6098_v13 = vadd.f32 %v6097_v55, %v6096_v50 }
0x1206   :  { %v6549_v58 = vpop.f32.mrf.mxu0 }
0x1207   :  { %v8728_v4 = vadd.f32 %v6098_v13, %v3332_v9 }
0x1209   :  { %v3466_v21 = vsel %vm9763_vm11, %v8728_v4, -inf  ;;  %v3342_v25 = vsel %vm591_vm12, %v8728_v4, -inf  ;;  %vm9764_vm11 = vcmask 357376  }
0x120a   :  { %3467 = vmax.xlane.f32.xlu0 %v3466_v21 }
0x1289   :  { %v3462_v36 = vpop.xlane.xlu1 %3461 }
0x128a   :  { %v3469_v63 = vsub.f32 %v8720_v59, %v3462_v36 }
0x128c   :  { %v3472_v30 = vmul.f32 1.442695, %v3469_v63 }
0x128d   :  { %v3465_v24 = vpop.xlane.xlu0 %3464 }
0x128e   :  { %6821 = vpow2.f32 %v3472_v30  ;;  %v3470_v28 = vsub.f32 %v8724_v16, %v3465_v24 }
0x1290   :  { %v3474_v23 = vmul.f32 1.442695, %v3470_v28 }
0x1292   :  { %6823 = vpow2.f32 %v3474_v23 }
0x1293   :  { %v3468_v61 = vpop.xlane.xlu0 %3467 }
0x1294   :  { %v3471_v19 = vsub.f32 %v8728_v4, %v3468_v61 }
0x1296   :  { %v3476_v35 = vmul.f32 1.442695, %v3471_v19 }
0x1298   :  { %6825 = vpow2.f32 %v3476_v35 }
0x129b   :  { %v6822_v38 = vpop.eup %6821 }
0x129c   :  { %3481 = vrot.lane.b32.xlu1 %v6822_v38, %s6938_s30 }
0x129f   :  { %v6824_v10 = vpop.eup %6823 }
0x12a0   :  { %3483 = vrot.lane.b32.xlu0 %v6824_v10, %s6938_s30 }
0x12a5   :  { %v6826_v62 = vpop.eup %6825 }
0x12a6   :  { %3485 = vrot.lane.b32.xlu1 %v6826_v62, %s6938_s30 }
0x130e   :  { %v3482_v43 = vpop.permute.xlu1 %3481 }
0x130f   :  { %v3490_v27 = vsel %vm29_vm2, %v3482_v43, 0.0 }
0x1310   :  { %3491 = vadd.xlane.f32.xlu1 %v3490_v27 }
0x1312   :  { %v3484_v31 = vpop.permute.xlu0 %3483 }
0x1313   :  { %v3493_v18 = vsel %vm29_vm2, %v3484_v31, 0.0 }
0x1314   :  { %3494 = vadd.xlane.f32.xlu0 %v3493_v18  ;;  %3337 = vmax.xlane.f32.xlu1 %v3336_v39 }
0x1318   :  { %3343 = vmax.xlane.f32.xlu1 %v3342_v25  ;;  %v3486_v33 = vpop.permute.xlu1 %3485 }
0x1319   :  { %v3496_v40 = vsel %vm591_vm12, %v3486_v33, 0.0  ;;  %v5705_v33 = vld [vmem:[%s9751_s1 + $0x20] sm:$0xff] }
0x131a   :  { %3497 = vadd.xlane.f32.xlu0 %v3496_v40  ;;  %v5704_v40 = vld [vmem:[%s9751_s1 + $0x18] sm:$0xff] }
0x131e   :  { %3340 = vmax.xlane.f32.xlu0 %v3339_v34  ;;  %v8810_v34 = vld [vmem:[%s9753_s3 + $0x8] sm:$0x3f] }
0x1329   :  { %3516 = vrot.lane.b32.xlu1 %v8367_v46, %s6939_s8 }
0x132d   :  { %3514 = vrot.lane.b32.xlu1 %v8355_v32, %s6939_s8 }
0x1334   :  { %3518 = vrot.lane.b32.xlu0 %v8387_v48, %s6939_s8 }
0x1399   :  { %v3492_v37 = vpop.xlane.xlu1 %3491 }
0x139a   :  { %6827 = vrcp.f32 %v3492_v37  ;;  %v3798_v37 = vrot.slane %v8810_v34, %v7007_v8 }
0x139d   :  { %v3495_v54 = vpop.xlane.xlu0 %3494  ;;  %v3338_v42 = vpop.xlane.xlu1 %3337 }
0x139e   :  { %6829 = vrcp.f32 %v3495_v54  ;;  %v3345_v7 = vsub.f32 %v8720_v59, %v3338_v42 }
0x13a0   :  { %v3348_v51 = vmul.f32 1.442695, %v3345_v7 }
0x13a1   :  { %v3344_v60 = vpop.xlane.xlu1 %3343 }
0x13a2   :  { %v3347_v11 = vsub.f32 %v8728_v4, %v3344_v60 }
0x13a3   :  { %v3498_v47 = vpop.xlane.xlu0 %3497 }
0x13a4   :  { %6831 = vrcp.f32 %v3498_v47  ;;  %v3352_v15 = vmul.f32 1.442695, %v3347_v11 }
0x13a5   :  { %v3517_v14 = vpop.permute.xlu1 %3516  ;;  %6833 = vpow2.f32 %v3348_v51 }
0x13a7   :  { %v6828_v5 = vpop.eup %6827  ;;  %v3341_v56 = vpop.xlane.xlu0 %3340 }
0x13a8   :  { %v3502_v49 = vmul.f32 %v6828_v5, %v6822_v38  ;;  %v3346_v17 = vsub.f32 %v8724_v16, %v3341_v56 }
0x13a9   :  { %v3515_v48 = vpop.permute.xlu1 %3514 }
0x13aa   :  { %3508 = vrot.lane.b32.xlu0 %v3502_v49, %s6938_s30  ;;  %v3350_v50 = vmul.f32 1.442695, %v3346_v17 }
0x13ab   :  { %v6830_v46 = vpop.eup %6829  ;;  %v3519_v22 = vpop.permute.xlu0 %3518 }
0x13ac   :  { %6566 = vmatpush3.msk.msra.mxu0 %vm39_vm0, %v3519_v22  ;;  %v3503_v32 = vmul.f32 %v6830_v46, %v6824_v10  ;;  %6835 = vpow2.f32 %v3350_v50 }
0x13ad   :  { %6567 = vmatprep.subr.mxu0 %v6929_v2  ;;  %6837 = vpow2.f32 %v3352_v15 }
0x13ae   :  { %3510 = vrot.lane.b32.xlu1 %v3503_v32, %s6938_s30  ;;  %6568 = vmatpush3.msra.mxu0 %v3517_v14  ;;  %v6903_v14 = vld [vmem:[%s9753_s3] sm:$0x3f] }
0x13af   :  { %6569 = vmatprep.subr.mxu0 %v6929_v2  ;;  %v3635_v46 = vrot.slane %v6903_v14, %v7448_v20 }
0x13b0   :  { %6570 = vmatpush3.msra.mxu0 %v3515_v48 }
0x13b1   :  { %v6832_v52 = vpop.eup %6831 }
0x13b2   :  { %v3504_v57 = vmul.f32 %v6832_v52, %v6826_v62  ;;  %v6834_v3 = vpop.eup %6833 }
0x13b3   :  { %v3354_v9 = vsel %vm29_vm2, %v6834_v3, 0.0 }
0x13b4   :  { %3512 = vrot.lane.b32.xlu0 %v3504_v57, %s6938_s30 }
0x13b9   :  { %v6836_v55 = vpop.eup %6835 }
0x13ba   :  { %v3357_v13 = vsel %vm29_vm2, %v6836_v55, 0.0  ;;  %v6838_v58 = vpop.eup %6837 }
0x13bb   :  { %v3360_v59 = vsel %vm591_vm12, %v6838_v58, 0.0 }
0x13d2   :  { %3355 = vadd.xlane.f32.xlu1 %v3354_v9 }
0x13d3   :  { %3358 = vadd.xlane.f32.xlu0 %v3357_v13 }
0x13d7   :  { %3361 = vadd.xlane.f32.xlu0 %v3360_v59 }
0x141c   :  { %v3509_v16 = vpop.permute.xlu0 %3508 }
0x141d   :  { %6572 = vmatmul.mubr.msk.f32.vlgmr.msra.gmra.mxu0 %vm29_vm2, %v3509_v16 }
0x141e   :  { %6574 = vmatprep.mubr.msk.f32.mxu0 %vm6930_vm1, %v6929_v2 }
0x1420   :  { %v3511_v4 = vpop.permute.xlu1 %3510 }
0x1421   :  { %6575 = vmatmul.mubr.msk.f32.gmra.mxu0 %vm29_vm2, %v3511_v4 }
0x1422   :  { %6577 = vmatprep.mubr.msk.f32.mxu0 %vm6930_vm1, %v6929_v2 }
0x1426   :  { %v3513_v21 = vpop.permute.xlu0 %3512 }
0x1427   :  { %6578 = vmatmul.mubr.msk.f32.gmra.mxu0 %vm29_vm2, %v3513_v21 }
0x145b   :  { %v3356_v36 = vpop.xlane.xlu1 %3355 }
0x145c   :  { %6839 = vrcp.f32 %v3356_v36  ;;  %v3359_v63 = vpop.xlane.xlu0 %3358 }
0x145d   :  { %6841 = vrcp.f32 %v3359_v63 }
0x1460   :  { %v3362_v30 = vpop.xlane.xlu0 %3361 }
0x1461   :  { %6843 = vrcp.f32 %v3362_v30 }
0x1469   :  { %v6840_v24 = vpop.eup %6839 }
0x146a   :  { %v6842_v28 = vpop.eup %6841  ;;  %v3366_v23 = vmul.f32 %v6840_v24, %v6834_v3 }
0x146b   :  { %v3367_v61 = vmul.f32 %v6842_v28, %v6836_v55 }
0x146c   :  { %v3610_v19 = vsel %vm29_vm2, %v3366_v23, %v3502_v49  ;;  %6557 = vmatmul.mubr.msk.f32.vlgmr.msra.gmra.mxu1 %vm29_vm2, %v3366_v23 }
0x146d   :  { %5701 = vst.msk [vmem:[%s9755_s5 + $0x18] sm:$0xff] %vm865_vm13, %v3610_v19  ;;  %6559 = vmatprep.mubr.msk.f32.mxu1 %vm6930_vm1, %v6929_v2  ;;  %v3611_v35 = vsel %vm29_vm2, %v3367_v61, %v3503_v32  ;;  %6581 = vmatpush3.msra.mxu1 %v5705_v33 }
0x146e   :  { %v6844_v38 = vpop.eup %6843  ;;  %5702 = vst.msk [vmem:[%s9755_s5 + $0x20] sm:$0xff] %vm865_vm13, %v3611_v35  ;;  %6582 = vmatprep.subr.mxu1 %v6929_v2 }
0x146f   :  { %v3368_v10 = vmul.f32 %v6844_v38, %v6838_v58  ;;  %6583 = vmatpush3.msra.mxu1 %v5704_v40 }
0x1470   :  { %6560 = vmatmul.mubr.msk.f32.gmra.mxu1 %vm29_vm2, %v3367_v61  ;;  %6593 = vmatprep.subr.mxu1 %v6929_v2 }
0x1471   :  { %6562 = vmatprep.mubr.msk.f32.mxu1 %vm6930_vm1, %v6929_v2  ;;  %v3612_v62 = vsel %vm29_vm2, %v3368_v10, %v3504_v57 }
0x1472   :  { %5703 = vst.msk [vmem:[%s9755_s5 + $0x28] sm:$0x3f] %vm9764_vm11, %v3612_v62  ;;  %vm9765_vm11 = vcmask 357552  }
0x1474   :  { %6563 = vmatmul.mubr.msk.f32.gmra.mxu1 %vm29_vm2, %v3368_v10 }
0x1475   :  { %6584 = vmatprep.mubr.msk.f32.mxu1 %vm6930_vm1, %v6929_v2 }
0x14dd   :  { %v3596_v43 = vpop.f32.mrf.mxu0 }
0x14de   :  { %3620 = vrot.lane.b32.xlu1 %v3596_v43, %s6940_s22 }
0x14df   :  { %v6573_v27 = vpop.f32.mrf.mxu0 }
0x14e1   :  { %v3601_v31 = vpop.f32.mrf.mxu0 }
0x14e2   :  { %3622 = vrot.lane.b32.xlu0 %v3601_v31, %s6940_s22 }
0x14e3   :  { %v6576_v18 = vpop.f32.mrf.mxu0 }
0x14e7   :  { %v3606_v39 = vpop.f32.mrf.mxu0 }
0x14e8   :  { %3624 = vrot.lane.b32.xlu1 %v3606_v39, %s6940_s22 }
0x14e9   :  { %v6579_v25 = vpop.f32.mrf.mxu0 }
0x14ec   :  { %3800 = vrot.lane.b32.xlu1 %v3798_v37, %s6931_s13 }
0x152c   :  { %v3446_v54 = vpop.f32.mrf.mxu1 }
0x152e   :  { %v6558_v42 = vpop.f32.mrf.mxu1 }
0x1530   :  { %v3451_v60 = vpop.f32.mrf.mxu1 }
0x1532   :  { %v6561_v47 = vpop.f32.mrf.mxu1 }
0x1533   :  { %v3680_v47 = vrot.slane %v6903_v14, %v7469_v0 }
0x1534   :  { %v3456_v5 = vpop.f32.mrf.mxu1 }
0x1536   :  { %v6564_v56 = vpop.f32.mrf.mxu1 }
0x1537   :  { %v3692_v56 = vrot.slane %v6903_v14, %v7472_v1 }
0x1550   :  { %v3621_v49 = vpop.permute.xlu1 %3620 }
0x1551   :  { %v3629_v22 = vsel %vm882_vm15, %v3446_v54, %v3621_v49 }
0x1552   :  { %v3636_v52 = vadd.f32 %v3635_v46, %v3629_v22 }
0x1554   :  { %v3623_v32 = vpop.permute.xlu0 %3622  ;;  %v3639_v17 = vmax.f32 %v3636_v52, 0.0 }
0x1555   :  { %v3630_v48 = vsel %vm882_vm15, %v3451_v60, %v3623_v32 }
0x1556   :  { %v3637_v57 = vadd.f32 %v3635_v46, %v3630_v48  ;;  %v3642_v3 = vsel %vm207_vm3, %v3639_v17, 0.0 }
0x1558   :  { %v3640_v7 = vmax.f32 %v3637_v57, 0.0 }
0x155a   :  { %v3625_v51 = vpop.permute.xlu1 %3624  ;;  %v3643_v50 = vsel %vm207_vm3, %v3640_v7, 0.0 }
0x155b   :  { %v3631_v11 = vsel %vm882_vm15, %v3456_v5, %v3625_v51  ;;  %v3644_v9 = vadd.f32 %v3643_v50, %v3642_v3 }
0x155c   :  { %v3638_v15 = vadd.f32 %v3635_v46, %v3631_v11  ;;  %v8844_v11 = vrot.slane %v8810_v34, %v7030_v12 }
0x155e   :  { %v3641_v55 = vmax.f32 %v3638_v15, 0.0 }
0x1560   :  { %v3645_v13 = vsel %vm899_vm14, %v3641_v55, 0.0 }
0x1561   :  { %v3646_v58 = vadd.f32 %v3645_v13, %v3644_v9 }
0x1563   :  { %v3647_v59 = vrot.slane %v3646_v58, 4 }
0x1565   :  { %v3648_v16 = vadd.f32 %v3647_v59, %v3646_v58 }
0x1567   :  { %v3649_v4 = vrot.slane %v3648_v16, 2 }
0x1569   :  { %v3650_v21 = vadd.f32 %v3649_v4, %v3648_v16 }
0x156b   :  { %v3651_v36 = vrot.slane %v3650_v21, 1 }
0x156d   :  { %v3652_v63 = vadd.f32 %v3651_v36, %v3650_v21  ;;  %v5741_v36 = vld [vmem:[%s9752_s2 + $0x258] sm:$0xff] }
0x156e   :  { %6131 = vmatprep.subr.mxu0 %v5741_v36  ;;  %v5727_v36 = vld [vmem:[%s9752_s2 + $0x1e8] sm:$0xff] }
0x156f   :  { %v3653_v30 = vmul.f32 0.045454547, %v3652_v63  ;;  %v5725_v63 = vld [vmem:[%s9752_s2 + $0x1d8] sm:$0xff] }
0x1570   :  { %6132 = vmatpush3.msra.mxu0 %v5725_v63  ;;  %v5748_v63 = vld [vmem:[%s9752_s2 + $0x290] sm:$0xff] }
0x1571   :  { %v3654_v24 = vmul.f32 %v6903_v14, %v3653_v30  ;;  %v8840_v14 = vpop.permute.xlu1 %3800  ;;  %v5740_v30 = vld [vmem:[%s9752_s2 + $0x250] sm:$0xff] }
0x1572   :  { %6133 = vmatprep.subr.mxu0 %v5740_v30 }
0x1573   :  { %v3658_v28 = vrot.slane %v3654_v24, %v7459_v41  ;;  %v5724_v24 = vld [vmem:[%s9752_s2 + $0x1d0] sm:$0xff] }
0x1574   :  { %6134 = vmatpush3.msra.mxu0 %v5724_v24  ;;  %v5710_v24 = vld [vmem:[%s9752_s2 + $0x160] sm:$0xff] }
0x1575   :  { %v3659_v23 = vsub.f32 %v3639_v17, %v3658_v28  ;;  %v3660_v61 = vsub.f32 %v3640_v7, %v3658_v28  ;;  %v3661_v19 = vsub.f32 %v3641_v55, %v3658_v28 }
0x1577   :  { %v3662_v35 = vmul.f32 %v3659_v23, %v3659_v23  ;;  %v3663_v38 = vmul.f32 %v3660_v61, %v3660_v61  ;;  %v3664_v10 = vmul.f32 %v3661_v19, %v3661_v19  ;;  %v3681_v5 = vmul.f32 %v3680_v47, %v3659_v23 }
0x1578   :  { %v3682_v22 = vmul.f32 %v3680_v47, %v3660_v61  ;;  %v3683_v52 = vmul.f32 %v3680_v47, %v3661_v19  ;;  %v5739_v61 = vld [vmem:[%s9752_s2 + $0x248] sm:$0xff]  ;;  %v5732_v47 = vld [vmem:[%s9752_s2 + $0x210] sm:$0xff] }
0x1579   :  { %v3665_v62 = vsel %vm207_vm3, %v3662_v35, 0.0  ;;  %v3666_v43 = vsel %vm207_vm3, %v3663_v38, 0.0  ;;  %v3668_v31 = vsel %vm899_vm14, %v3664_v10, 0.0  ;;  %v5723_v19 = vld [vmem:[%s9752_s2 + $0x1c8] sm:$0xff]  ;;  %v5738_v35 = vld [vmem:[%s9752_s2 + $0x240] sm:$0xff]  ;;  %6135 = vmatprep.subr.mxu0 %v5739_v61 }
0x157a   :  { %v3667_v27 = vadd.f32 %v3666_v43, %v3665_v62  ;;  %6136 = vmatpush3.msra.mxu0 %v5723_v19  ;;  %v5722_v10 = vld [vmem:[%s9752_s2 + $0x1c0] sm:$0xff]  ;;  %v5737_v62 = vld [vmem:[%s9752_s2 + $0x238] sm:$0xff] }
0x157b   :  { %6137 = vmatprep.subr.mxu0 %v5738_v35  ;;  %v5721_v43 = vld [vmem:[%s9752_s2 + $0x1b8] sm:$0xff]  ;;  %v5744_v35 = vld [vmem:[%s9752_s2 + $0x270] sm:$0xff] }
0x157c   :  { %v3669_v18 = vadd.f32 %v3668_v31, %v3667_v27  ;;  %6138 = vmatpush3.msra.mxu0 %v5722_v10  ;;  %v5736_v31 = vld [vmem:[%s9752_s2 + $0x230] sm:$0xff]  ;;  %v5745_v19 = vld [vmem:[%s9752_s2 + $0x278] sm:$0xff] }
0x157d   :  { %6139 = vmatprep.subr.mxu0 %v5737_v62 }
0x157e   :  { %v3670_v39 = vrot.slane %v3669_v18, 4  ;;  %6140 = vmatpush3.msra.mxu0 %v5721_v43  ;;  %v5743_v43 = vld [vmem:[%s9752_s2 + $0x268] sm:$0xff] }
0x157f   :  { %6141 = vmatprep.subr.mxu0 %v5736_v31  ;;  %v5742_v31 = vld [vmem:[%s9752_s2 + $0x260] sm:$0xff] }
0x1580   :  { %v3671_v25 = vadd.f32 %v3670_v39, %v3669_v18  ;;  %v5720_v18 = vld [vmem:[%s9752_s2 + $0x1b0] sm:$0xff]  ;;  %v5735_v39 = vld [vmem:[%s9752_s2 + $0x228] sm:$0xff] }
0x1581   :  { %6142 = vmatpush3.msra.mxu0 %v5720_v18 }
0x1582   :  { %v3672_v33 = vrot.slane %v3671_v25, 2  ;;  %6143 = vmatprep.subr.mxu0 %v5735_v39 }
0x1584   :  { %v3673_v40 = vadd.f32 %v3672_v33, %v3671_v25  ;;  %v5719_v33 = vld [vmem:[%s9752_s2 + $0x1a8] sm:$0xff] }
0x1585   :  { %6144 = vmatpush3.msra.mxu0 %v5719_v33 }
0x1586   :  { %v3674_v37 = vrot.slane %v3673_v40, 1 }
0x1588   :  { %v3675_v54 = vadd.f32 %v3674_v37, %v3673_v40  ;;  %v5734_v40 = vld [vmem:[%s9752_s2 + $0x220] sm:$0xff] }
0x1589   :  { %v5718_v37 = vld [vmem:[%s9752_s2 + $0x1a0] sm:$0xff]  ;;  %6145 = vmatprep.subr.mxu0 %v5734_v40 }
0x158a   :  { %v3676_v42 = vmul.f32 0.045454547, %v3675_v54  ;;  %6146 = vmatpush3.msra.mxu0 %v5718_v37 }
0x158c   :  { %v3684_v60 = vadd.f32 1e-05, %v3676_v42  ;;  %v5733_v42 = vld [vmem:[%s9752_s2 + $0x218] sm:$0xff] }
0x158d   :  { %6147 = vmatprep.subr.mxu0 %v5733_v42 }
0x158e   :  { %6845 = vrsqrt.f32 %v3684_v60  ;;  %v5717_v60 = vld [vmem:[%s9752_s2 + $0x198] sm:$0xff] }
0x158f   :  { %6148 = vmatpush3.msra.mxu0 %v5717_v60 }
0x1590   :  { %6149 = vmatprep.subr.mxu0 %v5732_v47 }
0x159b   :  { %v6846_v49 = vpop.eup %6845 }
0x159c   :  { %v3686_v46 = vmul.f32 %v6846_v49, %v3681_v5  ;;  %v3687_v48 = vmul.f32 %v6846_v49, %v3682_v22  ;;  %v3688_v57 = vmul.f32 %v6846_v49, %v3683_v52  ;;  %v5753_v49 = vld [vmem:[%s9752_s2 + $0x2b8] sm:$0xff]  ;;  %v5715_v22 = vld [vmem:[%s9752_s2 + $0x188] sm:$0xff] }
0x159e   :  { %v3693_v32 = vadd.f32 %v3692_v56, %v3686_v46  ;;  %v3694_v7 = vadd.f32 %v3692_v56, %v3687_v48  ;;  %v3695_v17 = vadd.f32 %v3692_v56, %v3688_v57  ;;  %v5716_v56 = vld [vmem:[%s9752_s2 + $0x190] sm:$0xff]  ;;  %v5731_v46 = vld [vmem:[%s9752_s2 + $0x208] sm:$0xff]  ;;  %v5730_v57 = vld [vmem:[%s9752_s2 + $0x200] sm:$0xff] }
0x159f   :  { %6150 = vmatpush3.msra.mxu0 %v5716_v56 }
0x15a0   :  { %6585 = vmatmul.mubr.msk.f32.vlgmr.msra.gmra.mxu1 %vm207_vm3, %v3693_v32  ;;  %v5752_v32 = vld [vmem:[%s9752_s2 + $0x2b0] sm:$0xff]  ;;  %6151 = vmatprep.subr.mxu0 %v5731_v46 }
0x15a1   :  { %6587 = vmatprep.mubr.msk.f32.mxu1 %vm6930_vm1, %v6929_v2  ;;  %6594 = vmatpush3.msra.mxu1 %v5753_v49 }
0x15a2   :  { %6595 = vmatprep.subr.mxu1 %v6929_v2  ;;  %6152 = vmatpush3.msra.mxu0 %v5715_v22 }
0x15a3   :  { %6596 = vmatpush3.msra.mxu1 %v5752_v32  ;;  %6153 = vmatprep.subr.mxu0 %v5730_v57 }
0x15a4   :  { %6588 = vmatmul.mubr.msk.f32.gmra.mxu1 %vm207_vm3, %v3694_v7  ;;  %v5751_v7 = vld [vmem:[%s9752_s2 + $0x2a8] sm:$0xff]  ;;  %6597 = vmatprep.subr.mxu1 %v6929_v2 }
0x15a5   :  { %6590 = vmatprep.mubr.msk.f32.mxu1 %vm6930_vm1, %v6929_v2  ;;  %6598 = vmatpush3.msra.mxu1 %v5751_v7 }
0x15a6   :  { %6599 = vmatprep.subr.mxu1 %v6929_v2 }
0x15a8   :  { %6591 = vmatmul.mubr.msk.f32.gmra.mxu1 %vm207_vm3, %v3695_v17  ;;  %v5714_v17 = vld [vmem:[%s9752_s2 + $0x180] sm:$0xff] }
0x15a9   :  { %6617 = vmatprep.mubr.msk.f32.mxu1 %vm6930_vm1, %v6929_v2  ;;  %6154 = vmatpush3.msra.mxu0 %v5714_v17 }
0x1660   :  { %v3774_v51 = vpop.f32.mrf.mxu1 }
0x1661   :  { %v8847_v50 = vadd.f32 %v8840_v14, %v3774_v51  ;;  %v8854_v55 = vadd.f32 %v8844_v11, %v3774_v51  ;;  %v5729_v51 = vld [vmem:[%s9752_s2 + $0x1f8] sm:$0xff] }
0x1662   :  { %v6586_v15 = vpop.f32.mrf.mxu1  ;;  %6155 = vmatprep.subr.mxu0 %v5729_v51 }
0x1663   :  { %3818 = vrot.lane.b32.xlu0 %v8847_v50, %s6931_s13  ;;  %3809 = vrot.lane.b32.xlu1 %v8847_v50, %s6932_s16  ;;  %v3894_v13 = vrot.slane %v8854_v55, 1  ;;  %v3902_v59 = vrot.slane %v8854_v55, 3  ;;  %v3910_v16 = vrot.slane %v8854_v55, 5  ;;  %v3898_v4 = vrot.slane %v8854_v55, 2  ;;  %v5750_v15 = vld [vmem:[%s9752_s2 + $0x2a0] sm:$0xff] }
0x1664   :  { %v3779_v3 = vpop.f32.mrf.mxu1  ;;  %v3914_v21 = vrot.slane %v8854_v55, 6  ;;  %v3906_v28 = vrot.slane %v8854_v55, 4  ;;  %v3918_v23 = vrot.slane %v8854_v55, 7  ;;  %6600 = vmatpush3.msra.mxu1 %v5750_v15 }
0x1665   :  { %v8904_v38 = vadd.f32 %v8840_v14, %v3779_v3  ;;  %v8920_v27 = vadd.f32 %v8844_v11, %v3779_v3  ;;  %6601 = vmatprep.subr.mxu1 %v6929_v2 }
0x1666   :  { %v6589_v9 = vpop.f32.mrf.mxu1 }
0x1667   :  { %3836 = vrot.lane.b32.xlu0 %v8847_v50, %s6933_s17  ;;  %3827 = vrot.lane.b32.xlu1 %v8847_v50, %s6934_s18  ;;  %v3923_v25 = vrot.slane %v8920_v27, 1  ;;  %v3927_v54 = vrot.slane %v8920_v27, 2  ;;  %v3935_v5 = vrot.slane %v8920_v27, 4  ;;  %v3943_v48 = vrot.slane %v8920_v27, 6 }
0x1668   :  { %v8860_v34 = vpop.f32.mrf.mxu1  ;;  %v3931_v52 = vrot.slane %v8920_v27, 3  ;;  %v3947_v3 = vrot.slane %v8920_v27, 7  ;;  %v3939_v9 = vrot.slane %v8920_v27, 5 }
0x166a   :  { %v6592_v58 = vpop.f32.mrf.mxu1 }
0x166b   :  { %3845 = vrot.lane.b32.xlu0 %v8847_v50, %s6935_s19  ;;  %3895 = vrot.lane.b32.xlu1 %v3894_v13, %s6931_s13  ;;  %v5713_v13 = vld [vmem:[%s9752_s2 + $0x178] sm:$0xff]  ;;  %v5728_v58 = vld [vmem:[%s9752_s2 + $0x1f0] sm:$0xff] }
0x166c   :  { %6156 = vmatpush3.msra.mxu0 %v5713_v13 }
0x166d   :  { %6157 = vmatprep.subr.mxu0 %v5728_v58 }
0x166f   :  { %3854 = vrot.lane.b32.xlu0 %v8847_v50, %s6936_s20  ;;  %3903 = vrot.lane.b32.xlu1 %v3902_v59, %s6933_s17  ;;  %v5749_v59 = vld [vmem:[%s9752_s2 + $0x298] sm:$0xff] }
0x1670   :  { %6602 = vmatpush3.msra.mxu1 %v5749_v59 }
0x1671   :  { %6603 = vmatprep.subr.mxu1 %v6929_v2 }
0x1672   :  { %6604 = vmatpush3.msra.mxu1 %v5748_v63 }
0x1673   :  { %3863 = vrot.lane.b32.xlu0 %v8847_v50, %s6937_s21  ;;  %3911 = vrot.lane.b32.xlu1 %v3910_v16, %s6936_s20  ;;  %v5712_v16 = vld [vmem:[%s9752_s2 + $0x170] sm:$0xff] }
0x1674   :  { %6158 = vmatpush3.msra.mxu0 %v5712_v16  ;;  %6605 = vmatprep.subr.mxu1 %v6929_v2 }
0x1675   :  { %6159 = vmatprep.subr.mxu0 %v5727_v36 }
0x1677   :  { %3899 = vrot.lane.b32.xlu0 %v3898_v4, %s6934_s18  ;;  %3915 = vrot.lane.b32.xlu1 %v3914_v21, %s6937_s21  ;;  %v9021_v4 = vadd.f32 %v8844_v11, %v8860_v34  ;;  %v9025_v21 = vadd.f32 %v8840_v14, %v8860_v34  ;;  %v5711_v11 = vld [vmem:[%s9752_s2 + $0x168] sm:$0xff]  ;;  %v5726_v14 = vld [vmem:[%s9752_s2 + $0x1e0] sm:$0xff] }
0x1678   :  { %v5747_v34 = vld [vmem:[%s9752_s2 + $0x288] sm:$0xff]  ;;  %6160 = vmatpush3.msra.mxu0 %v5711_v11 }
0x1679   :  { %v3970_v30 = vrot.slane %v9021_v4, 2  ;;  %6161 = vmatprep.subr.mxu0 %v5726_v14  ;;  %6606 = vmatpush3.msra.mxu1 %v5747_v34  ;;  %v3974_v61 = vrot.slane %v9021_v4, 3  ;;  %v3978_v10 = vrot.slane %v9021_v4, 4  ;;  %v3982_v62 = vrot.slane %v9021_v4, 5 }
0x167a   :  { %6162 = vmatpush3.msra.mxu0 %v5710_v24  ;;  %6607 = vmatprep.subr.mxu1 %v6929_v2 }
0x167b   :  { %3907 = vrot.lane.b32.xlu0 %v3906_v28, %s6935_s19  ;;  %3919 = vrot.lane.b32.xlu1 %v3918_v23, %s6932_s16  ;;  %v5746_v28 = vld [vmem:[%s9752_s2 + $0x280] sm:$0xff]  ;;  %v3966_v23 = vrot.slane %v9021_v4, 1 }
0x167c   :  { %6626 = vmatprep.subr.mxu0 %v6929_v2  ;;  %6608 = vmatpush3.msra.mxu1 %v5746_v28 }
0x167d   :  { %6609 = vmatprep.subr.mxu1 %v6929_v2 }
0x167e   :  { %6610 = vmatpush3.msra.mxu1 %v5745_v19 }
0x167f   :  { %3838 = vrot.lane.b32.xlu0 %v8904_v38, %s6933_s17  ;;  %3811 = vrot.lane.b32.xlu1 %v8904_v38, %s6932_s16 }
0x1680   :  { %6611 = vmatprep.subr.mxu1 %v6929_v2 }
0x1681   :  { %6612 = vmatpush3.msra.mxu1 %v5744_v35 }
0x1682   :  { %6613 = vmatprep.subr.mxu1 %v6929_v2 }
0x1683   :  { %3856 = vrot.lane.b32.xlu0 %v8904_v38, %s6936_s20  ;;  %3820 = vrot.lane.b32.xlu1 %v8904_v38, %s6931_s13 }
0x1684   :  { %6614 = vmatpush3.msra.mxu1 %v5743_v43 }
0x1685   :  { %6615 = vmatprep.subr.mxu1 %v6929_v2 }
0x1686   :  { %6616 = vmatpush3.msra.mxu1 %v5742_v31 }
0x1687   :  { %3924 = vrot.lane.b32.xlu0 %v3923_v25, %s6931_s13  ;;  %3829 = vrot.lane.b32.xlu1 %v8904_v38, %s6934_s18 }
0x1688   :  { %6641 = vmatprep.subr.mxu1 %v6929_v2 }
0x168b   :  { %3928 = vrot.lane.b32.xlu0 %v3927_v54, %s6934_s18  ;;  %3847 = vrot.lane.b32.xlu1 %v8904_v38, %s6935_s19 }
0x168f   :  { %3936 = vrot.lane.b32.xlu0 %v3935_v5, %s6935_s19  ;;  %3865 = vrot.lane.b32.xlu1 %v8904_v38, %s6937_s21 }
0x1693   :  { %3944 = vrot.lane.b32.xlu0 %v3943_v48, %s6937_s21  ;;  %3932 = vrot.lane.b32.xlu1 %v3931_v52, %s6933_s17 }
0x1697   :  { %3948 = vrot.lane.b32.xlu0 %v3947_v3, %s6932_s16  ;;  %3940 = vrot.lane.b32.xlu1 %v3939_v9, %s6936_s20 }
0x169b   :  { %3813 = vrot.lane.b32.xlu0 %v9025_v21, %s6932_s16  ;;  %3822 = vrot.lane.b32.xlu1 %v9025_v21, %s6931_s13 }
0x169f   :  { %3831 = vrot.lane.b32.xlu0 %v9025_v21, %s6934_s18  ;;  %3971 = vrot.lane.b32.xlu1 %v3970_v30, %s6934_s18 }
0x16a3   :  { %3967 = vrot.lane.b32.xlu0 %v3966_v23, %s6931_s13  ;;  %3975 = vrot.lane.b32.xlu1 %v3974_v61, %s6933_s17 }
0x16a7   :  { %3979 = vrot.lane.b32.xlu0 %v3978_v10, %s6935_s19  ;;  %3983 = vrot.lane.b32.xlu1 %v3982_v62, %s6936_s20 }
0x16ab   :  { %3840 = vrot.lane.b32.xlu0 %v9025_v21, %s6933_s17  ;;  %3849 = vrot.lane.b32.xlu1 %v9025_v21, %s6935_s19 }
0x16af   :  { %3858 = vrot.lane.b32.xlu0 %v9025_v21, %s6936_s20  ;;  %3867 = vrot.lane.b32.xlu1 %v9025_v21, %s6937_s21 }
0x16d5   :  { %v3819_v18 = vpop.permute.xlu0 %3818  ;;  %v3810_v39 = vpop.permute.xlu1 %3809 }
0x16d6   :  { %v3872_v59 = vsel %vm207_vm3, %v3810_v39, %v8847_v50 }
0x16d7   :  { %v3875_v14 = vsel %vm211_vm4, %v3872_v59, %v3819_v18 }
0x16d9   :  { %v3837_v25 = vpop.permute.xlu0 %3836  ;;  %v3828_v33 = vpop.permute.xlu1 %3827 }
0x16da   :  { %v3878_v24 = vsel %vm215_vm5, %v3875_v14, %v3828_v33 }
0x16dd   :  { %v3846_v40 = vpop.permute.xlu0 %3845  ;;  %v3896_v37 = vpop.permute.xlu1 %3895 }
0x16de   :  { %v3951_v57 = vsel %vm207_vm3, %v8854_v55, %v3896_v37 }
0x16e1   :  { %v3855_v54 = vpop.permute.xlu0 %3854  ;;  %v3904_v42 = vpop.permute.xlu1 %3903 }
0x16e5   :  { %v3864_v60 = vpop.permute.xlu0 %3863  ;;  %v3912_v47 = vpop.permute.xlu1 %3911 }
0x16e9   :  { %v3900_v5 = vpop.permute.xlu0 %3899  ;;  %v3916_v56 = vpop.permute.xlu1 %3915 }
0x16ea   :  { %v3952_v7 = vsel %vm211_vm4, %v3951_v57, %v3900_v5 }
0x16eb   :  { %v3953_v15 = vsel %vm215_vm5, %v3952_v7, %v3904_v42 }
0x16ed   :  { %v3908_v49 = vpop.permute.xlu0 %3907  ;;  %v3920_v46 = vpop.permute.xlu1 %3919 }
0x16ee   :  { %v3954_v3 = vsel %vm219_vm6, %v3953_v15, %v3908_v49 }
0x16ef   :  { %v3955_v58 = vsel %vm223_vm7, %v3954_v3, %v3912_v47 }
0x16f0   :  { %v3956_v63 = vsel %vm227_vm8, %v3955_v58, %v3916_v56 }
0x16f1   :  { %v3839_v22 = vpop.permute.xlu0 %3838  ;;  %v3812_v32 = vpop.permute.xlu1 %3811  ;;  %v3957_v28 = vsel %vm231_vm9, %v3956_v63, %v3920_v46 }
0x16f2   :  { %v3873_v11 = vsel %vm207_vm3, %v3812_v32, %v8904_v38  ;;  %v3881_v38 = vsel %vm219_vm6, %v3878_v24, %v3837_v25  ;;  %v9115_v10 = vrot.slane %v3957_v28, %v7030_v12 }
0x16f3   :  { %v3884_v43 = vsel %vm223_vm7, %v3881_v38, %v3846_v40 }
0x16f4   :  { %v3887_v37 = vsel %vm227_vm8, %v3884_v43, %v3855_v54 }
0x16f5   :  { %v3857_v48 = vpop.permute.xlu0 %3856  ;;  %v3821_v52 = vpop.permute.xlu1 %3820  ;;  %v3890_v47 = vsel %vm231_vm9, %v3887_v37, %v3864_v60 }
0x16f6   :  { %v3876_v34 = vsel %vm211_vm4, %v3873_v11, %v3821_v52  ;;  %v4003_v5 = vadd.f32 %v9115_v10, %v3890_v47 }
0x16f8   :  { %v4012_v57 = vmul.f32 0.2, %v4003_v5 }
0x16f9   :  { %v3925_v17 = vpop.permute.xlu0 %3924  ;;  %v3830_v51 = vpop.permute.xlu1 %3829 }
0x16fa   :  { %v3958_v30 = vsel %vm207_vm3, %v8920_v27, %v3925_v17  ;;  %v3879_v50 = vsel %vm215_vm5, %v3876_v34, %v3830_v51 }
0x16fb   :  { %v3882_v62 = vsel %vm219_vm6, %v3879_v50, %v3839_v22 }
0x16fd   :  { %v3929_v9 = vpop.permute.xlu0 %3928  ;;  %v3848_v13 = vpop.permute.xlu1 %3847 }
0x16fe   :  { %v3959_v23 = vsel %vm211_vm4, %v3958_v30, %v3929_v9  ;;  %v3885_v31 = vsel %vm223_vm7, %v3882_v62, %v3848_v13  ;;  %v4021_v9 = vmax.f32 %v4003_v5, %v4012_v57 }
0x16ff   :  { %v3888_v56 = vsel %vm227_vm8, %v3885_v31, %v3857_v48 }
0x1701   :  { %v3937_v16 = vpop.permute.xlu0 %3936  ;;  %v3866_v36 = vpop.permute.xlu1 %3865 }
0x1702   :  { %v3891_v49 = vsel %vm231_vm9, %v3888_v56, %v3866_v36 }
0x1703   :  { %v4006_v7 = vadd.f32 %v9115_v10, %v3891_v49 }
0x1705   :  { %v3945_v61 = vpop.permute.xlu0 %3944  ;;  %v3933_v19 = vpop.permute.xlu1 %3932  ;;  %v4015_v48 = vmul.f32 0.2, %v4006_v7 }
0x1706   :  { %v3960_v35 = vsel %vm215_vm5, %v3959_v23, %v3933_v19 }
0x1707   :  { %v3961_v39 = vsel %vm219_vm6, %v3960_v35, %v3937_v16  ;;  %v4024_v11 = vmax.f32 %v4006_v7, %v4015_v48 }
0x1709   :  { %v3949_v18 = vpop.permute.xlu0 %3948  ;;  %v3941_v33 = vpop.permute.xlu1 %3940 }
0x170a   :  { %v3962_v42 = vsel %vm223_vm7, %v3961_v39, %v3941_v33 }
0x170b   :  { %v3963_v25 = vsel %vm227_vm8, %v3962_v42, %v3945_v61 }
0x170c   :  { %v3964_v40 = vsel %vm231_vm9, %v3963_v25, %v3949_v18 }
0x170d   :  { %v3998_v46 = vrot.slane %v3964_v40, %v7030_v12  ;;  %v3814_v22 = vpop.permute.xlu0 %3813  ;;  %v3823_v32 = vpop.permute.xlu1 %3822 }
0x170e   :  { %v3874_v14 = vsel %vm207_vm3, %v3814_v22, %v9025_v21 }
0x170f   :  { %v4004_v52 = vadd.f32 %v3998_v46, %v3890_v47  ;;  %v4007_v54 = vadd.f32 %v3998_v46, %v3891_v49  ;;  %v3877_v50 = vsel %vm211_vm4, %v3874_v14, %v3823_v32 }
0x1711   :  { %v3832_v60 = vpop.permute.xlu0 %3831  ;;  %v3972_v17 = vpop.permute.xlu1 %3971  ;;  %v4013_v51 = vmul.f32 0.2, %v4004_v52  ;;  %v4016_v15 = vmul.f32 0.2, %v4007_v54 }
0x1712   :  { %v3880_v21 = vsel %vm215_vm5, %v3877_v50, %v3832_v60 }
0x1713   :  { %v4022_v3 = vmax.f32 %v4004_v52, %v4013_v51  ;;  %v4025_v59 = vmax.f32 %v4007_v54, %v4016_v15 }
0x1715   :  { %v3968_v13 = vpop.permute.xlu0 %3967  ;;  %4147 = vmatprep.mubr.f32.mxu0 %v4022_v3  ;;  %v3976_v58 = vpop.permute.xlu1 %3975 }
0x1716   :  { %v3986_v16 = vsel %vm207_vm3, %v9021_v4, %v3968_v13  ;;  %4148 = vmatmul.mubr.f32.vlgmr.msra.gmra.mxu0 %v4021_v9 }
0x1717   :  { %v3987_v36 = vsel %vm211_vm4, %v3986_v16, %v3972_v17  ;;  %6627 = vmatpush3.msk.msra.mxu0 %vm39_vm0, %v9021_v4  ;;  %4152 = vmatprep.mubr.f32.mxu0 %v4025_v59 }
0x1718   :  { %v3988_v63 = vsel %vm215_vm5, %v3987_v36, %v3976_v58  ;;  %6628 = vmatprep.subr.mxu0 %v6929_v2 }
0x1719   :  { %6629 = vmatpush3.msra.mxu0 %v8920_v27  ;;  %v3980_v34 = vpop.permute.xlu0 %3979  ;;  %v3984_v30 = vpop.permute.xlu1 %3983 }
0x171a   :  { %v3989_v24 = vsel %vm219_vm6, %v3988_v63, %v3980_v34  ;;  %6630 = vmatprep.subr.mxu0 %v6929_v2  ;;  %4153 = vmatmul.mubr.f32.gmra.mxu0 %v4024_v11 }
0x171b   :  { %v3990_v28 = vsel %vm223_vm7, %v3989_v24, %v3984_v30  ;;  %6631 = vmatpush3.msra.mxu0 %v8854_v55 }
0x171c   :  { %v4002_v23 = vrot.slane %v3990_v28, %v7030_v12  ;;  %6656 = vmatprep.subr.mxu0 %v6929_v2 }
0x171d   :  { %v3841_v61 = vpop.permute.xlu0 %3840  ;;  %v3850_v19 = vpop.permute.xlu1 %3849 }
0x171e   :  { %v4005_v35 = vadd.f32 %v4002_v23, %v3884_v43  ;;  %v4008_v38 = vadd.f32 %v4002_v23, %v3885_v31  ;;  %v3883_v62 = vsel %vm219_vm6, %v3880_v21, %v3841_v61 }
0x171f   :  { %v3886_v18 = vsel %vm223_vm7, %v3883_v62, %v3850_v19 }
0x1720   :  { %v4014_v39 = vmul.f32 0.2, %v4005_v35  ;;  %v4017_v42 = vmul.f32 0.2, %v4008_v38  ;;  %v4011_v25 = vadd.f32 %v4002_v23, %v3886_v18 }
0x1721   :  { %v3859_v33 = vpop.permute.xlu0 %3858  ;;  %v3868_v37 = vpop.permute.xlu1 %3867 }
0x1722   :  { %v4023_v47 = vmax.f32 %v4005_v35, %v4014_v39  ;;  %v3889_v5 = vsel %vm227_vm8, %v3886_v18, %v3859_v33  ;;  %v4020_v43 = vmul.f32 0.2, %v4011_v25  ;;  %v4026_v32 = vmax.f32 %v4008_v38, %v4017_v42 }
0x1723   :  { %v3892_v56 = vsel %vm231_vm9, %v3889_v5, %v3868_v37 }
0x1724   :  { %v4009_v40 = vadd.f32 %v9115_v10, %v3892_v56  ;;  %v4010_v49 = vadd.f32 %v3998_v46, %v3892_v56  ;;  %6618 = vmatmul.mubr.msk.f32.vlgmr.msra.gmra.mxu1 %vm227_vm8, %v4023_v47  ;;  %v4029_v57 = vmax.f32 %v4011_v25, %v4020_v43 }
0x1725   :  { %6620 = vmatprep.mubr.msk.f32.mxu1 %vm6930_vm1, %v6929_v2 }
0x1726   :  { %v4018_v31 = vmul.f32 0.2, %v4009_v40  ;;  %v4019_v22 = vmul.f32 0.2, %v4010_v49 }
0x1728   :  { %6621 = vmatmul.mubr.msk.f32.gmra.mxu1 %vm227_vm8, %v4026_v32  ;;  %v4028_v52 = vmax.f32 %v4010_v49, %v4019_v22  ;;  %v4027_v54 = vmax.f32 %v4009_v40, %v4018_v31 }
0x1729   :  { %6623 = vmatprep.mubr.msk.f32.mxu1 %vm6930_vm1, %v6929_v2 }
0x172a   :  { %4157 = vmatprep.mubr.f32.mxu0 %v4028_v52 }
0x172b   :  { %4158 = vmatmul.mubr.f32.gmra.mxu0 %v4027_v54 }
0x172c   :  { %6624 = vmatmul.mubr.msk.f32.gmra.mxu1 %vm227_vm8, %v4029_v57  ;;  %6632 = vmatprep.mubr.msk.f32.mxu0 %vm6930_vm1, %v6929_v2 }
0x172d   :  { %6647 = vmatprep.mubr.msk.f32.mxu1 %vm6930_vm1, %v6929_v2 }
0x17d6   :  { %v6163_v10 = vpop.f32.mrf.mxu0 }
0x17d8   :  { %v6164_v46 = vpop.f32.mrf.mxu0 }
0x17d9   :  { %v6165_v60 = vadd.f32 %v6164_v46, %v6163_v10 }
0x17da   :  { %v6166_v7 = vpop.f32.mrf.mxu0 }
0x17dc   :  { %v6167_v17 = vpop.f32.mrf.mxu0 }
0x17dd   :  { %v6168_v9 = vadd.f32 %v6167_v17, %v6166_v7 }
0x17e4   :  { %v4229_v51 = vpop.f32.mrf.mxu1 }
0x17e5   :  { %v9165_v15 = vadd.f32 %v6165_v60, %v4229_v51 }
0x17e6   :  { %v6619_v3 = vpop.f32.mrf.mxu1 }
0x17e7   :  { %v4367_v48 = vsel %vm710_vm10, %v9165_v15, -inf  ;;  %v4243_v49 = vsel %vm29_vm2, %v9165_v15, -inf }
0x17e8   :  { %4368 = vmax.xlane.f32.xlu0 %v4367_v48  ;;  %v4234_v13 = vpop.f32.mrf.mxu1 }
0x17e9   :  { %v9169_v58 = vadd.f32 %v6168_v9, %v4234_v13 }
0x17ea   :  { %v6622_v59 = vpop.f32.mrf.mxu1 }
0x17eb   :  { %v6169_v16 = vpop.f32.mrf.mxu0  ;;  %v4370_v36 = vsel %vm710_vm10, %v9169_v58, -inf  ;;  %v4246_v5 = vsel %vm29_vm2, %v9169_v58, -inf }
0x17ec   :  { %4371 = vmax.xlane.f32.xlu1 %v4370_v36  ;;  %v4239_v63 = vpop.f32.mrf.mxu1 }
0x17ed   :  { %v6170_v11 = vpop.f32.mrf.mxu0 }
0x17ee   :  { %v6171_v14 = vadd.f32 %v6170_v11, %v6169_v16  ;;  %v6625_v34 = vpop.f32.mrf.mxu1 }
0x17f0   :  { %v9173_v30 = vadd.f32 %v6171_v14, %v4239_v63 }
0x17f2   :  { %v4373_v24 = vsel %vm9765_vm11, %v9173_v30, -inf  ;;  %v4249_v43 = vsel %vm591_vm12, %v9173_v30, -inf  ;;  %vm9766_vm11 = vcmask 357376  }
0x17f3   :  { %4374 = vmax.xlane.f32.xlu0 %v4373_v24 }
0x1871   :  { %v4369_v28 = vpop.xlane.xlu0 %4368 }
0x1872   :  { %v4376_v50 = vsub.f32 %v9165_v15, %v4369_v28 }
0x1874   :  { %v4379_v23 = vmul.f32 1.442695, %v4376_v50 }
0x1875   :  { %v4372_v21 = vpop.xlane.xlu1 %4371 }
0x1876   :  { %6847 = vpow2.f32 %v4379_v23  ;;  %v4377_v61 = vsub.f32 %v9169_v58, %v4372_v21 }
0x1878   :  { %v4381_v19 = vmul.f32 1.442695, %v4377_v61 }
0x187a   :  { %6849 = vpow2.f32 %v4381_v19 }
0x187c   :  { %v4375_v35 = vpop.xlane.xlu0 %4374 }
0x187d   :  { %v4378_v38 = vsub.f32 %v9173_v30, %v4375_v35 }
0x187f   :  { %v4383_v62 = vmul.f32 1.442695, %v4378_v38 }
0x1881   :  { %6851 = vpow2.f32 %v4383_v62 }
0x1883   :  { %v6848_v18 = vpop.eup %6847 }
0x1884   :  { %4388 = vrot.lane.b32.xlu0 %v6848_v18, %s6938_s30 }
0x1887   :  { %v6850_v39 = vpop.eup %6849 }
0x1888   :  { %4390 = vrot.lane.b32.xlu1 %v6850_v39, %s6938_s30 }
0x188e   :  { %v6852_v33 = vpop.eup %6851 }
0x188f   :  { %4392 = vrot.lane.b32.xlu1 %v6852_v33, %s6938_s30 }
0x18f6   :  { %v4389_v37 = vpop.permute.xlu0 %4388 }
0x18f7   :  { %v4397_v42 = vsel %vm29_vm2, %v4389_v37, 0.0 }
0x18f8   :  { %4398 = vadd.xlane.f32.xlu0 %v4397_v42 }
0x18fa   :  { %v4391_v47 = vpop.permute.xlu1 %4390 }
0x18fb   :  { %v4400_v25 = vsel %vm29_vm2, %v4391_v47, 0.0 }
0x18fc   :  { %4401 = vadd.xlane.f32.xlu1 %v4400_v25 }
0x1900   :  { %4247 = vmax.xlane.f32.xlu1 %v4246_v5 }
0x1901   :  { %v4393_v56 = vpop.permute.xlu1 %4392 }
0x1902   :  { %v4403_v40 = vsel %vm591_vm12, %v4393_v56, 0.0 }
0x1903   :  { %4404 = vadd.xlane.f32.xlu0 %v4403_v40  ;;  %v5769_v40 = vld [vmem:[%s9751_s1 + $0x38] sm:$0xff] }
0x1907   :  { %4244 = vmax.xlane.f32.xlu0 %v4243_v49  ;;  %v5768_v49 = vld [vmem:[%s9751_s1 + $0x30] sm:$0xff] }
0x190b   :  { %4250 = vmax.xlane.f32.xlu0 %v4249_v43 }
0x1911   :  { %4425 = vrot.lane.b32.xlu1 %v9021_v4, %s6939_s8 }
0x1915   :  { %4421 = vrot.lane.b32.xlu1 %v8854_v55, %s6939_s8 }
0x1921   :  { %4423 = vrot.lane.b32.xlu0 %v8920_v27, %s6939_s8 }
0x1981   :  { %v4399_v31 = vpop.xlane.xlu0 %4398 }
0x1982   :  { %6853 = vrcp.f32 %v4399_v31 }
0x1985   :  { %v4402_v22 = vpop.xlane.xlu1 %4401 }
0x1986   :  { %6855 = vrcp.f32 %v4402_v22  ;;  %v9255_v22 = vld [vmem:[%s9753_s3 + $0x10] sm:$0x3f] }
0x1989   :  { %v4248_v32 = vpop.xlane.xlu1 %4247 }
0x198a   :  { %v4253_v59 = vsub.f32 %v9169_v58, %v4248_v32  ;;  %v4705_v32 = vrot.slane %v9255_v22, %v7007_v8 }
0x198c   :  { %v4405_v52 = vpop.xlane.xlu0 %4404  ;;  %v4257_v16 = vmul.f32 1.442695, %v4253_v59 }
0x198d   :  { %6857 = vrcp.f32 %v4405_v52  ;;  %v4426_v54 = vpop.permute.xlu1 %4425 }
0x198e   :  { %6642 = vmatpush3.msk.msra.mxu1 %vm39_vm0, %v4426_v54 }
0x198f   :  { %v6854_v57 = vpop.eup %6853  ;;  %6643 = vmatprep.subr.mxu1 %v6929_v2 }
0x1990   :  { %v4245_v4 = vpop.xlane.xlu0 %4244  ;;  %v4409_v10 = vmul.f32 %v6854_v57, %v6848_v18 }
0x1991   :  { %v4422_v17 = vpop.permute.xlu1 %4421  ;;  %v4252_v3 = vsub.f32 %v9165_v15, %v4245_v4 }
0x1992   :  { %4415 = vrot.lane.b32.xlu1 %v4409_v10, %s6938_s30 }
0x1993   :  { %v6856_v55 = vpop.eup %6855  ;;  %v4255_v9 = vmul.f32 1.442695, %v4252_v3 }
0x1994   :  { %v4251_v46 = vpop.xlane.xlu0 %4250  ;;  %v4410_v27 = vmul.f32 %v6856_v55, %v6850_v39  ;;  %v6904_v55 = vld [vmem:[%s9753_s3 + $0x8] sm:$0x3f] }
0x1995   :  { %v4254_v48 = vsub.f32 %v9173_v30, %v4251_v46  ;;  %6859 = vpow2.f32 %v4255_v9  ;;  %v4542_v46 = vrot.slane %v6904_v55, %v7448_v20 }
0x1996   :  { %4417 = vrot.lane.b32.xlu0 %v4410_v27, %s6938_s30 }
0x1997   :  { %v4259_v13 = vmul.f32 1.442695, %v4254_v48 }
0x1998   :  { %v4424_v7 = vpop.permute.xlu0 %4423 }
0x1999   :  { %6644 = vmatpush3.msra.mxu1 %v4424_v7  ;;  %6861 = vpow2.f32 %v4259_v13 }
0x199a   :  { %v6858_v60 = vpop.eup %6857  ;;  %6645 = vmatprep.subr.mxu1 %v6929_v2  ;;  %6863 = vpow2.f32 %v4257_v16 }
0x199b   :  { %6646 = vmatpush3.msra.mxu1 %v4422_v17  ;;  %v4411_v51 = vmul.f32 %v6858_v60, %v6852_v33 }
0x199d   :  { %4419 = vrot.lane.b32.xlu1 %v4411_v51, %s6938_s30 }
0x19a2   :  { %v6860_v36 = vpop.eup %6859 }
0x19a3   :  { %v4261_v63 = vsel %vm29_vm2, %v6860_v36, 0.0 }
0x19a6   :  { %v6862_v11 = vpop.eup %6861 }
0x19a7   :  { %v4267_v14 = vsel %vm591_vm12, %v6862_v11, 0.0  ;;  %v6864_v15 = vpop.eup %6863 }
0x19a8   :  { %v4264_v34 = vsel %vm29_vm2, %v6864_v15, 0.0 }
0x19b5   :  { %4262 = vadd.xlane.f32.xlu0 %v4261_v63 }
0x19b9   :  { %4268 = vadd.xlane.f32.xlu0 %v4267_v14 }
0x19c1   :  { %4265 = vadd.xlane.f32.xlu1 %v4264_v34 }
0x1a04   :  { %v4416_v30 = vpop.permute.xlu1 %4415 }
0x1a05   :  { %6648 = vmatmul.mubr.msk.f32.vlgmr.msra.gmra.mxu1 %vm29_vm2, %v4416_v30 }
0x1a06   :  { %6650 = vmatprep.mubr.msk.f32.mxu1 %vm6930_vm1, %v6929_v2 }
0x1a08   :  { %v4418_v58 = vpop.permute.xlu0 %4417 }
0x1a09   :  { %6651 = vmatmul.mubr.msk.f32.gmra.mxu1 %vm29_vm2, %v4418_v58 }
0x1a0a   :  { %6653 = vmatprep.mubr.msk.f32.mxu1 %vm6930_vm1, %v6929_v2 }
0x1a0f   :  { %v4420_v24 = vpop.permute.xlu1 %4419 }
0x1a10   :  { %6654 = vmatmul.mubr.msk.f32.gmra.mxu1 %vm29_vm2, %v4420_v24 }
0x1a3e   :  { %v4263_v28 = vpop.xlane.xlu0 %4262 }
0x1a3f   :  { %6865 = vrcp.f32 %v4263_v28 }
0x1a42   :  { %v4269_v50 = vpop.xlane.xlu0 %4268 }
0x1a43   :  { %6867 = vrcp.f32 %v4269_v50 }
0x1a4a   :  { %v4266_v23 = vpop.xlane.xlu1 %4265 }
0x1a4b   :  { %6869 = vrcp.f32 %v4266_v23 }
0x1a4c   :  { %v6866_v21 = vpop.eup %6865 }
0x1a4d   :  { %v4273_v61 = vmul.f32 %v6866_v21, %v6860_v36 }
0x1a4f   :  { %v4517_v19 = vsel %vm29_vm2, %v4273_v61, %v4409_v10  ;;  %6633 = vmatmul.mubr.msk.f32.vlgmr.msra.gmra.mxu0 %vm29_vm2, %v4273_v61 }
0x1a50   :  { %v6868_v35 = vpop.eup %6867  ;;  %5765 = vst.msk [vmem:[%s9756_s6 + $0x18] sm:$0xff] %vm865_vm13, %v4517_v19  ;;  %6635 = vmatprep.mubr.msk.f32.mxu0 %vm6930_vm1, %v6929_v2  ;;  %6657 = vmatpush3.msra.mxu0 %v5769_v40 }
0x1a51   :  { %v4275_v38 = vmul.f32 %v6868_v35, %v6862_v11  ;;  %6658 = vmatprep.subr.mxu0 %v6929_v2 }
0x1a52   :  { %6659 = vmatpush3.msra.mxu0 %v5768_v49 }
0x1a53   :  { %v4519_v62 = vsel %vm29_vm2, %v4275_v38, %v4411_v51  ;;  %6669 = vmatprep.subr.mxu0 %v6929_v2 }
0x1a54   :  { %5767 = vst.msk [vmem:[%s9756_s6 + $0x28] sm:$0x3f] %vm9766_vm11, %v4519_v62 }
0x1a58   :  { %v6870_v18 = vpop.eup %6869 }
0x1a59   :  { %v4274_v39 = vmul.f32 %v6870_v18, %v6864_v15 }
0x1a5b   :  { %6636 = vmatmul.mubr.msk.f32.gmra.mxu0 %vm29_vm2, %v4274_v39  ;;  %v4518_v33 = vsel %vm29_vm2, %v4274_v39, %v4410_v27 }
0x1a5c   :  { %5766 = vst.msk [vmem:[%s9756_s6 + $0x20] sm:$0xff] %vm865_vm13, %v4518_v33  ;;  %6638 = vmatprep.mubr.msk.f32.mxu0 %vm6930_vm1, %v6929_v2 }
0x1a5f   :  { %6639 = vmatmul.mubr.msk.f32.gmra.mxu0 %vm29_vm2, %v4275_v38 }
0x1a60   :  { %6660 = vmatprep.mubr.msk.f32.mxu0 %vm6930_vm1, %v6929_v2 }
0x1ac5   :  { %v4503_v37 = vpop.f32.mrf.mxu1 }
0x1ac6   :  { %4527 = vrot.lane.b32.xlu0 %v4503_v37, %s6940_s22 }
0x1ac7   :  { %v6649_v42 = vpop.f32.mrf.mxu1 }
0x1ac9   :  { %v4508_v47 = vpop.f32.mrf.mxu1 }
0x1aca   :  { %4529 = vrot.lane.b32.xlu1 %v4508_v47, %s6940_s22  ;;  %4707 = vrot.lane.b32.xlu0 %v4705_v32, %s6931_s13 }
0x1acb   :  { %v6652_v25 = vpop.f32.mrf.mxu1 }
0x1ad0   :  { %v4513_v5 = vpop.f32.mrf.mxu1 }
0x1ad1   :  { %4531 = vrot.lane.b32.xlu1 %v4513_v5, %s6940_s22 }
0x1ad2   :  { %v6655_v56 = vpop.f32.mrf.mxu1 }
0x1b0f   :  { %v4353_v43 = vpop.f32.mrf.mxu0 }
0x1b11   :  { %v6634_v31 = vpop.f32.mrf.mxu0 }
0x1b1b   :  { %v4358_v52 = vpop.f32.mrf.mxu0 }
0x1b1d   :  { %v6637_v54 = vpop.f32.mrf.mxu0 }
0x1b1f   :  { %v4363_v57 = vpop.f32.mrf.mxu0 }
0x1b21   :  { %v6640_v4 = vpop.f32.mrf.mxu0 }
0x1b38   :  { %v4528_v10 = vpop.permute.xlu0 %4527 }
0x1b39   :  { %v4536_v27 = vsel %vm882_vm15, %v4353_v43, %v4528_v10 }
0x1b3a   :  { %v4543_v8 = vadd.f32 %v4542_v46, %v4536_v27 }
0x1b3c   :  { %v4530_v7 = vpop.permute.xlu1 %4529  ;;  %v4546_v3 = vmax.f32 %v4543_v8, 0.0 }
0x1b3d   :  { %v4537_v60 = vsel %vm882_vm15, %v4358_v52, %v4530_v7  ;;  %v4587_v52 = vrot.slane %v6904_v55, %v7469_v0 }
0x1b3e   :  { %v4544_v17 = vadd.f32 %v4542_v46, %v4537_v60  ;;  %v4549_v16 = vsel %vm207_vm3, %v4546_v3, 0.0 }
0x1b40   :  { %v4547_v51 = vmax.f32 %v4544_v17, 0.0 }
0x1b42   :  { %v4550_v13 = vsel %vm207_vm3, %v4547_v51, 0.0 }
0x1b43   :  { %v4532_v9 = vpop.permute.xlu1 %4531  ;;  %v4551_v63 = vadd.f32 %v4550_v13, %v4549_v16 }
0x1b44   :  { %v4538_v48 = vsel %vm882_vm15, %v4363_v57, %v4532_v9  ;;  %v4599_v57 = vrot.slane %v6904_v55, %v7472_v1  ;;  %v9289_v9 = vrot.slane %v9255_v22, %v7030_v12 }
0x1b45   :  { %v4545_v59 = vadd.f32 %v4542_v46, %v4538_v48 }
0x1b47   :  { %v4548_v36 = vmax.f32 %v4545_v59, 0.0 }
0x1b49   :  { %v4552_v11 = vsel %vm899_vm14, %v4548_v36, 0.0 }
0x1b4a   :  { %v4553_v14 = vadd.f32 %v4552_v11, %v4551_v63 }
0x1b4c   :  { %v4554_v15 = vrot.slane %v4553_v14, 4 }
0x1b4e   :  { %v4555_v34 = vadd.f32 %v4554_v15, %v4553_v14 }
0x1b50   :  { %v4556_v30 = vrot.slane %v4555_v34, 2 }
0x1b52   :  { %v4557_v58 = vadd.f32 %v4556_v30, %v4555_v34 }
0x1b54   :  { %v4558_v24 = vrot.slane %v4557_v58, 1 }
0x1b56   :  { %v4559_v28 = vadd.f32 %v4558_v24, %v4557_v58  ;;  %v5805_v58 = vld [vmem:[%s9752_s2 + $0x3b8] sm:$0xff] }
0x1b57   :  { %6204 = vmatprep.subr.mxu1 %v5805_v58  ;;  %v5789_v24 = vld [vmem:[%s9752_s2 + $0x338] sm:$0xff]  ;;  %v5812_v58 = vld [vmem:[%s9752_s2 + $0x3f0] sm:$0xff] }
0x1b58   :  { %v4560_v50 = vmul.f32 0.045454547, %v4559_v28  ;;  %v5804_v28 = vld [vmem:[%s9752_s2 + $0x3b0] sm:$0xff]  ;;  %6205 = vmatpush3.msra.mxu1 %v5789_v24 }
0x1b59   :  { %6206 = vmatprep.subr.mxu1 %v5804_v28  ;;  %v5774_v28 = vld [vmem:[%s9752_s2 + $0x2c0] sm:$0xff] }
0x1b5a   :  { %v4561_v23 = vmul.f32 %v6904_v55, %v4560_v50  ;;  %v9285_v55 = vpop.permute.xlu0 %4707  ;;  %v5788_v50 = vld [vmem:[%s9752_s2 + $0x330] sm:$0xff] }
0x1b5b   :  { %6207 = vmatpush3.msra.mxu1 %v5788_v50  ;;  %v5810_v50 = vld [vmem:[%s9752_s2 + $0x3e0] sm:$0xff] }
0x1b5c   :  { %v4565_v21 = vrot.slane %v4561_v23, %v7459_v41 }
0x1b5e   :  { %v4566_v61 = vsub.f32 %v4546_v3, %v4565_v21  ;;  %v4567_v19 = vsub.f32 %v4547_v51, %v4565_v21  ;;  %v4568_v35 = vsub.f32 %v4548_v36, %v4565_v21 }
0x1b60   :  { %v4569_v38 = vmul.f32 %v4566_v61, %v4566_v61  ;;  %v4570_v62 = vmul.f32 %v4567_v19, %v4567_v19  ;;  %v4571_v18 = vmul.f32 %v4568_v35, %v4568_v35  ;;  %v4588_v54 = vmul.f32 %v4587_v52, %v4566_v61  ;;  %v5803_v61 = vld [vmem:[%s9752_s2 + $0x3a8] sm:$0xff] }
0x1b61   :  { %v4589_v46 = vmul.f32 %v4587_v52, %v4567_v19  ;;  %v4590_v60 = vmul.f32 %v4587_v52, %v4568_v35  ;;  %v5787_v19 = vld [vmem:[%s9752_s2 + $0x328] sm:$0xff]  ;;  %v5802_v35 = vld [vmem:[%s9752_s2 + $0x3a0] sm:$0xff]  ;;  %6208 = vmatprep.subr.mxu1 %v5803_v61  ;;  %v5809_v61 = vld [vmem:[%s9752_s2 + $0x3d8] sm:$0xff] }
0x1b62   :  { %v4572_v39 = vsel %vm207_vm3, %v4569_v38, 0.0  ;;  %v4573_v33 = vsel %vm207_vm3, %v4570_v62, 0.0  ;;  %v4575_v42 = vsel %vm899_vm14, %v4571_v18, 0.0  ;;  %6209 = vmatpush3.msra.mxu1 %v5787_v19  ;;  %v5786_v62 = vld [vmem:[%s9752_s2 + $0x320] sm:$0xff]  ;;  %v5801_v18 = vld [vmem:[%s9752_s2 + $0x398] sm:$0xff]  ;;  %v5808_v19 = vld [vmem:[%s9752_s2 + $0x3d0] sm:$0xff] }
0x1b63   :  { %v4574_v37 = vadd.f32 %v4573_v33, %v4572_v39  ;;  %6210 = vmatprep.subr.mxu1 %v5802_v35  ;;  %v5785_v39 = vld [vmem:[%s9752_s2 + $0x318] sm:$0xff] }
0x1b64   :  { %6211 = vmatpush3.msra.mxu1 %v5786_v62 }
0x1b65   :  { %v4576_v47 = vadd.f32 %v4575_v42, %v4574_v37  ;;  %6212 = vmatprep.subr.mxu1 %v5801_v18  ;;  %v5800_v37 = vld [vmem:[%s9752_s2 + $0x390] sm:$0xff]  ;;  %v5807_v18 = vld [vmem:[%s9752_s2 + $0x3c8] sm:$0xff] }
0x1b66   :  { %6213 = vmatpush3.msra.mxu1 %v5785_v39  ;;  %v5784_v42 = vld [vmem:[%s9752_s2 + $0x310] sm:$0xff]  ;;  %v5806_v39 = vld [vmem:[%s9752_s2 + $0x3c0] sm:$0xff] }
0x1b67   :  { %v4577_v25 = vrot.slane %v4576_v47, 4  ;;  %6214 = vmatprep.subr.mxu1 %v5800_v37 }
0x1b68   :  { %6215 = vmatpush3.msra.mxu1 %v5784_v42 }
0x1b69   :  { %v4578_v5 = vadd.f32 %v4577_v25, %v4576_v47  ;;  %v5799_v47 = vld [vmem:[%s9752_s2 + $0x388] sm:$0xff] }
0x1b6a   :  { %6216 = vmatprep.subr.mxu1 %v5799_v47 }
0x1b6b   :  { %v4579_v56 = vrot.slane %v4578_v5, 2 }
0x1b6d   :  { %v4580_v40 = vadd.f32 %v4579_v56, %v4578_v5  ;;  %v5783_v5 = vld [vmem:[%s9752_s2 + $0x308] sm:$0xff]  ;;  %v5798_v56 = vld [vmem:[%s9752_s2 + $0x380] sm:$0xff] }
0x1b6e   :  { %6217 = vmatpush3.msra.mxu1 %v5783_v5 }
0x1b6f   :  { %v4581_v49 = vrot.slane %v4580_v40, 1  ;;  %6218 = vmatprep.subr.mxu1 %v5798_v56 }
0x1b71   :  { %v4582_v43 = vadd.f32 %v4581_v49, %v4580_v40  ;;  %v5782_v40 = vld [vmem:[%s9752_s2 + $0x300] sm:$0xff] }
0x1b72   :  { %6219 = vmatpush3.msra.mxu1 %v5782_v40 }
0x1b73   :  { %v4583_v31 = vmul.f32 0.045454547, %v4582_v43  ;;  %v5797_v43 = vld [vmem:[%s9752_s2 + $0x378] sm:$0xff] }
0x1b74   :  { %6220 = vmatprep.subr.mxu1 %v5797_v43 }
0x1b75   :  { %v4591_v32 = vadd.f32 1e-05, %v4583_v31  ;;  %v5781_v31 = vld [vmem:[%s9752_s2 + $0x2f8] sm:$0xff] }
0x1b76   :  { %6221 = vmatpush3.msra.mxu1 %v5781_v31 }
0x1b77   :  { %6871 = vrsqrt.f32 %v4591_v32  ;;  %v5796_v32 = vld [vmem:[%s9752_s2 + $0x370] sm:$0xff] }
0x1b78   :  { %6222 = vmatprep.subr.mxu1 %v5796_v32 }
0x1b84   :  { %v6872_v4 = vpop.eup %6871 }
0x1b85   :  { %v4593_v10 = vmul.f32 %v6872_v4, %v4588_v54  ;;  %v4594_v7 = vmul.f32 %v6872_v4, %v4589_v46  ;;  %v4595_v17 = vmul.f32 %v6872_v4, %v4590_v60  ;;  %v5780_v54 = vld [vmem:[%s9752_s2 + $0x2f0] sm:$0xff]  ;;  %v5795_v4 = vld [vmem:[%s9752_s2 + $0x368] sm:$0xff]  ;;  %v5794_v60 = vld [vmem:[%s9752_s2 + $0x360] sm:$0xff] }
0x1b86   :  { %v5779_v46 = vld [vmem:[%s9752_s2 + $0x2e8] sm:$0xff]  ;;  %6223 = vmatpush3.msra.mxu1 %v5780_v54 }
0x1b87   :  { %v4600_v27 = vadd.f32 %v4599_v57, %v4593_v10  ;;  %v4601_v8 = vadd.f32 %v4599_v57, %v4594_v7  ;;  %v4602_v51 = vadd.f32 %v4599_v57, %v4595_v17  ;;  %v5817_v57 = vld [vmem:[%s9752_s2 + $0x418] sm:$0xff]  ;;  %v5816_v10 = vld [vmem:[%s9752_s2 + $0x410] sm:$0xff]  ;;  %6224 = vmatprep.subr.mxu1 %v5795_v4  ;;  %v5815_v17 = vld [vmem:[%s9752_s2 + $0x408] sm:$0xff] }
0x1b88   :  { %6225 = vmatpush3.msra.mxu1 %v5779_v46 }
0x1b89   :  { %6661 = vmatmul.mubr.msk.f32.vlgmr.msra.gmra.mxu0 %vm207_vm3, %v4600_v27  ;;  %6226 = vmatprep.subr.mxu1 %v5794_v60 }
0x1b8a   :  { %6663 = vmatprep.mubr.msk.f32.mxu0 %vm6930_vm1, %v6929_v2  ;;  %6670 = vmatpush3.msra.mxu0 %v5817_v57 }
0x1b8b   :  { %6671 = vmatprep.subr.mxu0 %v6929_v2 }
0x1b8c   :  { %6672 = vmatpush3.msra.mxu0 %v5816_v10 }
0x1b8d   :  { %6664 = vmatmul.mubr.msk.f32.gmra.mxu0 %vm207_vm3, %v4601_v8  ;;  %v5778_v8 = vld [vmem:[%s9752_s2 + $0x2e0] sm:$0xff]  ;;  %6673 = vmatprep.subr.mxu0 %v6929_v2 }
0x1b8e   :  { %6666 = vmatprep.mubr.msk.f32.mxu0 %vm6930_vm1, %v6929_v2  ;;  %6674 = vmatpush3.msra.mxu0 %v5815_v17 }
0x1b8f   :  { %6227 = vmatpush3.msra.mxu1 %v5778_v8  ;;  %6675 = vmatprep.subr.mxu0 %v6929_v2 }
0x1b91   :  { %6667 = vmatmul.mubr.msk.f32.gmra.mxu0 %vm207_vm3, %v4602_v51  ;;  %v5793_v51 = vld [vmem:[%s9752_s2 + $0x358] sm:$0xff] }
0x1b92   :  { %6693 = vmatprep.mubr.msk.f32.mxu0 %vm6930_vm1, %v6929_v2  ;;  %6228 = vmatprep.subr.mxu1 %v5793_v51 }
0x1c49   :  { %v4681_v3 = vpop.f32.mrf.mxu0 }
0x1c4a   :  { %v9292_v48 = vadd.f32 %v9285_v55, %v4681_v3  ;;  %v9299_v16 = vadd.f32 %v9289_v9, %v4681_v3  ;;  %v5814_v3 = vld [vmem:[%s9752_s2 + $0x400] sm:$0xff] }
0x1c4b   :  { %v6662_v13 = vpop.f32.mrf.mxu0  ;;  %6676 = vmatpush3.msra.mxu0 %v5814_v3 }
0x1c4c   :  { %4725 = vrot.lane.b32.xlu1 %v9292_v48, %s6931_s13  ;;  %4716 = vrot.lane.b32.xlu0 %v9292_v48, %s6932_s16  ;;  %v4801_v63 = vrot.slane %v9299_v16, 1  ;;  %v4809_v14 = vrot.slane %v9299_v16, 3  ;;  %v4817_v15 = vrot.slane %v9299_v16, 5  ;;  %v4805_v34 = vrot.slane %v9299_v16, 2 }
0x1c4d   :  { %v4686_v59 = vpop.f32.mrf.mxu0  ;;  %v4821_v30 = vrot.slane %v9299_v16, 6  ;;  %v4813_v23 = vrot.slane %v9299_v16, 4  ;;  %v4825_v21 = vrot.slane %v9299_v16, 7  ;;  %6677 = vmatprep.subr.mxu0 %v6929_v2 }
0x1c4e   :  { %v9349_v38 = vadd.f32 %v9285_v55, %v4686_v59  ;;  %v9365_v33 = vadd.f32 %v9289_v9, %v4686_v59 }
0x1c4f   :  { %v6665_v36 = vpop.f32.mrf.mxu0 }
0x1c50   :  { %4743 = vrot.lane.b32.xlu1 %v9292_v48, %s6933_s17  ;;  %4734 = vrot.lane.b32.xlu0 %v9292_v48, %s6934_s18  ;;  %v4830_v25 = vrot.slane %v9365_v33, 1  ;;  %v4834_v49 = vrot.slane %v9365_v33, 2  ;;  %v4842_v52 = vrot.slane %v9365_v33, 4  ;;  %v4838_v27 = vrot.slane %v9365_v33, 3  ;;  %v5777_v36 = vld [vmem:[%s9752_s2 + $0x2d8] sm:$0xff] }
0x1c51   :  { %v9305_v22 = vpop.f32.mrf.mxu0  ;;  %v4850_v7 = vrot.slane %v9365_v33, 6  ;;  %v4846_v13 = vrot.slane %v9365_v33, 5  ;;  %v4854_v59 = vrot.slane %v9365_v33, 7  ;;  %6229 = vmatpush3.msra.mxu1 %v5777_v36 }
0x1c53   :  { %v6668_v11 = vpop.f32.mrf.mxu0 }
0x1c54   :  { %4752 = vrot.lane.b32.xlu1 %v9292_v48, %s6935_s19  ;;  %4802 = vrot.lane.b32.xlu0 %v4801_v63, %s6931_s13  ;;  %v5792_v63 = vld [vmem:[%s9752_s2 + $0x350] sm:$0xff]  ;;  %v5813_v11 = vld [vmem:[%s9752_s2 + $0x3f8] sm:$0xff] }
0x1c55   :  { %6230 = vmatprep.subr.mxu1 %v5792_v63  ;;  %6678 = vmatpush3.msra.mxu0 %v5813_v11 }
0x1c56   :  { %6679 = vmatprep.subr.mxu0 %v6929_v2 }
0x1c57   :  { %6680 = vmatpush3.msra.mxu0 %v5812_v58 }
0x1c58   :  { %4761 = vrot.lane.b32.xlu1 %v9292_v48, %s6936_s20  ;;  %4810 = vrot.lane.b32.xlu0 %v4809_v14, %s6933_s17  ;;  %v5776_v14 = vld [vmem:[%s9752_s2 + $0x2d0] sm:$0xff] }
0x1c59   :  { %6231 = vmatpush3.msra.mxu1 %v5776_v14  ;;  %6681 = vmatprep.subr.mxu0 %v6929_v2 }
0x1c5c   :  { %4770 = vrot.lane.b32.xlu1 %v9292_v48, %s6937_s21  ;;  %4818 = vrot.lane.b32.xlu0 %v4817_v15, %s6936_s20  ;;  %v9466_v15 = vadd.f32 %v9289_v9, %v9305_v22  ;;  %v5775_v9 = vld [vmem:[%s9752_s2 + $0x2c8] sm:$0xff] }
0x1c5e   :  { %v4877_v24 = vrot.slane %v9466_v15, 2  ;;  %v4889_v35 = vrot.slane %v9466_v15, 5  ;;  %v4885_v62 = vrot.slane %v9466_v15, 4 }
0x1c60   :  { %4806 = vrot.lane.b32.xlu1 %v4805_v34, %s6934_s18  ;;  %4822 = vrot.lane.b32.xlu0 %v4821_v30, %s6937_s21  ;;  %v9470_v34 = vadd.f32 %v9285_v55, %v9305_v22  ;;  %v5791_v30 = vld [vmem:[%s9752_s2 + $0x348] sm:$0xff]  ;;  %v5790_v55 = vld [vmem:[%s9752_s2 + $0x340] sm:$0xff] }
0x1c61   :  { %v5811_v22 = vld [vmem:[%s9752_s2 + $0x3e8] sm:$0xff]  ;;  %6232 = vmatprep.subr.mxu1 %v5791_v30 }
0x1c62   :  { %6233 = vmatpush3.msra.mxu1 %v5775_v9  ;;  %6682 = vmatpush3.msra.mxu0 %v5811_v22 }
0x1c63   :  { %6234 = vmatprep.subr.mxu1 %v5790_v55  ;;  %6683 = vmatprep.subr.mxu0 %v6929_v2 }
0x1c64   :  { %4814 = vrot.lane.b32.xlu1 %v4813_v23, %s6935_s19  ;;  %4826 = vrot.lane.b32.xlu0 %v4825_v21, %s6932_s16  ;;  %v4881_v23 = vrot.slane %v9466_v15, 3  ;;  %v4873_v21 = vrot.slane %v9466_v15, 1 }
0x1c65   :  { %6235 = vmatpush3.msra.mxu1 %v5774_v28  ;;  %6684 = vmatpush3.msra.mxu0 %v5810_v50 }
0x1c66   :  { %6702 = vmatprep.subr.mxu1 %v6929_v2  ;;  %6685 = vmatprep.subr.mxu0 %v6929_v2 }
0x1c67   :  { %6686 = vmatpush3.msra.mxu0 %v5809_v61 }
0x1c68   :  { %4745 = vrot.lane.b32.xlu1 %v9349_v38, %s6933_s17  ;;  %4718 = vrot.lane.b32.xlu0 %v9349_v38, %s6932_s16 }
0x1c69   :  { %6687 = vmatprep.subr.mxu0 %v6929_v2 }
0x1c6a   :  { %6688 = vmatpush3.msra.mxu0 %v5808_v19 }
0x1c6b   :  { %6689 = vmatprep.subr.mxu0 %v6929_v2 }
0x1c6c   :  { %4763 = vrot.lane.b32.xlu1 %v9349_v38, %s6936_s20  ;;  %4727 = vrot.lane.b32.xlu0 %v9349_v38, %s6931_s13 }
0x1c6d   :  { %6690 = vmatpush3.msra.mxu0 %v5807_v18 }
0x1c6e   :  { %6691 = vmatprep.subr.mxu0 %v6929_v2 }
0x1c6f   :  { %6692 = vmatpush3.msra.mxu0 %v5806_v39 }
0x1c70   :  { %4736 = vrot.lane.b32.xlu0 %v9349_v38, %s6934_s18  ;;  %4831 = vrot.lane.b32.xlu1 %v4830_v25, %s6931_s13 }
0x1c71   :  { %6717 = vmatprep.subr.mxu0 %v6929_v2 }
0x1c74   :  { %4754 = vrot.lane.b32.xlu0 %v9349_v38, %s6935_s19  ;;  %4835 = vrot.lane.b32.xlu1 %v4834_v49, %s6934_s18 }
0x1c78   :  { %4772 = vrot.lane.b32.xlu0 %v9349_v38, %s6937_s21  ;;  %4843 = vrot.lane.b32.xlu1 %v4842_v52, %s6935_s19 }
0x1c7c   :  { %4839 = vrot.lane.b32.xlu0 %v4838_v27, %s6933_s17  ;;  %4851 = vrot.lane.b32.xlu1 %v4850_v7, %s6937_s21 }
0x1c80   :  { %4847 = vrot.lane.b32.xlu0 %v4846_v13, %s6936_s20  ;;  %4855 = vrot.lane.b32.xlu1 %v4854_v59, %s6932_s16 }
0x1c84   :  { %4729 = vrot.lane.b32.xlu0 %v9470_v34, %s6931_s13  ;;  %4720 = vrot.lane.b32.xlu1 %v9470_v34, %s6932_s16 }
0x1c88   :  { %4738 = vrot.lane.b32.xlu1 %v9470_v34, %s6934_s18  ;;  %4878 = vrot.lane.b32.xlu0 %v4877_v24, %s6934_s18 }
0x1c8c   :  { %4882 = vrot.lane.b32.xlu0 %v4881_v23, %s6933_s17  ;;  %4874 = vrot.lane.b32.xlu1 %v4873_v21, %s6931_s13 }
0x1c90   :  { %4890 = vrot.lane.b32.xlu0 %v4889_v35, %s6936_s20  ;;  %4886 = vrot.lane.b32.xlu1 %v4885_v62, %s6935_s19 }
0x1c94   :  { %4756 = vrot.lane.b32.xlu0 %v9470_v34, %s6935_s19  ;;  %4747 = vrot.lane.b32.xlu1 %v9470_v34, %s6933_s17 }
0x1c98   :  { %4774 = vrot.lane.b32.xlu0 %v9470_v34, %s6937_s21  ;;  %4765 = vrot.lane.b32.xlu1 %v9470_v34, %s6936_s20 }
0x1cbe   :  { %v4726_v37 = vpop.permute.xlu1 %4725  ;;  %v4717_v42 = vpop.permute.xlu0 %4716 }
0x1cbf   :  { %v4779_v63 = vsel %vm207_vm3, %v4717_v42, %v9292_v48 }
0x1cc0   :  { %v4782_v9 = vsel %vm211_vm4, %v4779_v63, %v4726_v37 }
0x1cc2   :  { %v4744_v47 = vpop.permute.xlu1 %4743  ;;  %v4735_v25 = vpop.permute.xlu0 %4734 }
0x1cc3   :  { %v4785_v24 = vsel %vm215_vm5, %v4782_v9, %v4735_v25 }
0x1cc6   :  { %v4753_v5 = vpop.permute.xlu1 %4752  ;;  %v4803_v56 = vpop.permute.xlu0 %4802 }
0x1cc7   :  { %v4858_v7 = vsel %vm207_vm3, %v9299_v16, %v4803_v56 }
0x1cca   :  { %v4762_v40 = vpop.permute.xlu1 %4761  ;;  %v4811_v49 = vpop.permute.xlu0 %4810 }
0x1cce   :  { %v4771_v43 = vpop.permute.xlu1 %4770  ;;  %v4819_v31 = vpop.permute.xlu0 %4818 }
0x1cd2   :  { %v4807_v32 = vpop.permute.xlu1 %4806  ;;  %v4823_v52 = vpop.permute.xlu0 %4822 }
0x1cd3   :  { %v4859_v60 = vsel %vm211_vm4, %v4858_v7, %v4807_v32 }
0x1cd4   :  { %v4860_v51 = vsel %vm215_vm5, %v4859_v60, %v4811_v49 }
0x1cd6   :  { %v4815_v54 = vpop.permute.xlu1 %4814  ;;  %v4827_v57 = vpop.permute.xlu0 %4826 }
0x1cd7   :  { %v4861_v3 = vsel %vm219_vm6, %v4860_v51, %v4815_v54 }
0x1cd8   :  { %v4862_v36 = vsel %vm223_vm7, %v4861_v3, %v4819_v31 }
0x1cd9   :  { %v4863_v30 = vsel %vm227_vm8, %v4862_v36, %v4823_v52 }
0x1cda   :  { %v4746_v4 = vpop.permute.xlu1 %4745  ;;  %v4719_v10 = vpop.permute.xlu0 %4718  ;;  %v4864_v28 = vsel %vm231_vm9, %v4863_v30, %v4827_v57 }
0x1cdb   :  { %v4780_v58 = vsel %vm207_vm3, %v4719_v10, %v9349_v38  ;;  %v4788_v38 = vsel %vm219_vm6, %v4785_v24, %v4744_v47  ;;  %v9560_v19 = vrot.slane %v4864_v28, %v7030_v12 }
0x1cdc   :  { %v4791_v62 = vsel %vm223_vm7, %v4788_v38, %v4753_v5 }
0x1cdd   :  { %v4794_v25 = vsel %vm227_vm8, %v4791_v62, %v4762_v40 }
0x1cde   :  { %v4764_v46 = vpop.permute.xlu1 %4763  ;;  %v4728_v27 = vpop.permute.xlu0 %4727  ;;  %v4797_v49 = vsel %vm231_vm9, %v4794_v25, %v4771_v43 }
0x1cdf   :  { %v4783_v55 = vsel %vm211_vm4, %v4780_v58, %v4728_v27  ;;  %v4910_v31 = vadd.f32 %v9560_v19, %v4797_v49 }
0x1ce1   :  { %v4919_v27 = vmul.f32 0.2, %v4910_v31 }
0x1ce2   :  { %v4737_v17 = vpop.permute.xlu0 %4736  ;;  %v4832_v8 = vpop.permute.xlu1 %4831 }
0x1ce3   :  { %v4865_v22 = vsel %vm207_vm3, %v9365_v33, %v4832_v8  ;;  %v4786_v48 = vsel %vm215_vm5, %v4783_v55, %v4737_v17  ;;  %v4928_v3 = vmax.f32 %v4910_v31, %v4919_v27 }
0x1ce4   :  { %v4789_v35 = vsel %vm219_vm6, %v4786_v48, %v4746_v4 }
0x1ce6   :  { %v4755_v13 = vpop.permute.xlu0 %4754  ;;  %v4836_v59 = vpop.permute.xlu1 %4835 }
0x1ce7   :  { %v4866_v50 = vsel %vm211_vm4, %v4865_v22, %v4836_v59  ;;  %v4792_v18 = vsel %vm223_vm7, %v4789_v35, %v4755_v13 }
0x1ce8   :  { %v4795_v32 = vsel %vm227_vm8, %v4792_v18, %v4764_v46 }
0x1cea   :  { %v4773_v11 = vpop.permute.xlu0 %4772  ;;  %v4844_v14 = vpop.permute.xlu1 %4843 }
0x1ceb   :  { %v4798_v52 = vsel %vm231_vm9, %v4795_v32, %v4773_v11 }
0x1cec   :  { %v4913_v7 = vadd.f32 %v9560_v19, %v4798_v52 }
0x1cee   :  { %v4840_v23 = vpop.permute.xlu0 %4839  ;;  %v4852_v21 = vpop.permute.xlu1 %4851  ;;  %v4922_v46 = vmul.f32 0.2, %v4913_v7 }
0x1cef   :  { %v4867_v61 = vsel %vm215_vm5, %v4866_v50, %v4840_v23 }
0x1cf0   :  { %v4868_v37 = vsel %vm219_vm6, %v4867_v61, %v4844_v14  ;;  %v4931_v30 = vmax.f32 %v4913_v7, %v4922_v46 }
0x1cf2   :  { %v4848_v39 = vpop.permute.xlu0 %4847  ;;  %v4856_v42 = vpop.permute.xlu1 %4855 }
0x1cf3   :  { %v4869_v56 = vsel %vm223_vm7, %v4868_v37, %v4848_v39 }
0x1cf4   :  { %v4870_v47 = vsel %vm227_vm8, %v4869_v56, %v4852_v21 }
0x1cf5   :  { %v4871_v5 = vsel %vm231_vm9, %v4870_v47, %v4856_v42 }
0x1cf6   :  { %v4905_v54 = vrot.slane %v4871_v5, %v7030_v12  ;;  %v4730_v57 = vpop.permute.xlu0 %4729  ;;  %v4721_v4 = vpop.permute.xlu1 %4720 }
0x1cf7   :  { %v4781_v58 = vsel %vm207_vm3, %v4721_v4, %v9470_v34 }
0x1cf8   :  { %v4911_v10 = vadd.f32 %v4905_v54, %v4797_v49  ;;  %v4914_v40 = vadd.f32 %v4905_v54, %v4798_v52  ;;  %v4784_v28 = vsel %vm211_vm4, %v4781_v58, %v4730_v57 }
0x1cfa   :  { %v4739_v43 = vpop.permute.xlu1 %4738  ;;  %v4879_v60 = vpop.permute.xlu0 %4878  ;;  %v4920_v17 = vmul.f32 0.2, %v4911_v10  ;;  %v4923_v8 = vmul.f32 0.2, %v4914_v40 }
0x1cfb   :  { %v4787_v50 = vsel %vm215_vm5, %v4784_v28, %v4739_v43 }
0x1cfc   :  { %v4929_v51 = vmax.f32 %v4911_v10, %v4920_v17  ;;  %v4932_v36 = vmax.f32 %v4914_v40, %v4923_v8 }
0x1cfe   :  { %5054 = vmatprep.mubr.f32.mxu1 %v4929_v51  ;;  %v4883_v13 = vpop.permute.xlu0 %4882  ;;  %v4875_v59 = vpop.permute.xlu1 %4874 }
0x1cff   :  { %v4893_v63 = vsel %vm207_vm3, %v9466_v15, %v4875_v59  ;;  %5055 = vmatmul.mubr.f32.vlgmr.msra.gmra.mxu1 %v4928_v3 }
0x1d00   :  { %v4894_v11 = vsel %vm211_vm4, %v4893_v63, %v4879_v60  ;;  %6703 = vmatpush3.msk.msra.mxu1 %vm39_vm0, %v9466_v15  ;;  %5059 = vmatprep.mubr.f32.mxu1 %v4932_v36  ;;  %vm9767_vm4 = vcmask 357552  }
0x1d01   :  { %6704 = vmatprep.subr.mxu1 %v6929_v2  ;;  %v4895_v14 = vsel %vm215_vm5, %v4894_v11, %v4883_v13 }
0x1d02   :  { %6705 = vmatpush3.msra.mxu1 %v9365_v33  ;;  %v4891_v9 = vpop.permute.xlu0 %4890  ;;  %v4887_v55 = vpop.permute.xlu1 %4886 }
0x1d03   :  { %6706 = vmatprep.subr.mxu1 %v6929_v2  ;;  %v4896_v22 = vsel %vm219_vm6, %v4895_v14, %v4887_v55  ;;  %5060 = vmatmul.mubr.f32.gmra.mxu1 %v4931_v30 }
0x1d04   :  { %v4897_v24 = vsel %vm223_vm7, %v4896_v22, %v4891_v9  ;;  %6707 = vmatpush3.msra.mxu1 %v9299_v16 }
0x1d05   :  { %v4909_v48 = vrot.slane %v4897_v24, %v7030_v12 }
0x1d06   :  { %v4757_v34 = vpop.permute.xlu0 %4756  ;;  %v4748_v23 = vpop.permute.xlu1 %4747 }
0x1d07   :  { %v4912_v21 = vadd.f32 %v4909_v48, %v4791_v62  ;;  %v4790_v61 = vsel %vm219_vm6, %v4787_v50, %v4748_v23  ;;  %v4915_v38 = vadd.f32 %v4909_v48, %v4792_v18 }
0x1d08   :  { %v4793_v35 = vsel %vm223_vm7, %v4790_v61, %v4757_v34 }
0x1d09   :  { %v4921_v39 = vmul.f32 0.2, %v4912_v21  ;;  %v4918_v56 = vadd.f32 %v4909_v48, %v4793_v35  ;;  %v4924_v47 = vmul.f32 0.2, %v4915_v38 }
0x1d0a   :  { %v4775_v37 = vpop.permute.xlu0 %4774  ;;  %v4766_v42 = vpop.permute.xlu1 %4765 }
0x1d0b   :  { %v4930_v25 = vmax.f32 %v4912_v21, %v4921_v39  ;;  %v4796_v49 = vsel %vm227_vm8, %v4793_v35, %v4766_v42  ;;  %v4927_v62 = vmul.f32 0.2, %v4918_v56  ;;  %v4933_v18 = vmax.f32 %v4915_v38, %v4924_v47 }
0x1d0c   :  { %v4799_v12 = vsel %vm231_vm9, %v4796_v49, %v4775_v37 }
0x1d0d   :  { %v4916_v31 = vadd.f32 %v9560_v19, %v4799_v12  ;;  %v4917_v32 = vadd.f32 %v4905_v54, %v4799_v12  ;;  %6694 = vmatmul.mubr.msk.f32.vlgmr.msra.gmra.mxu0 %vm227_vm8, %v4930_v25  ;;  %v4936_v10 = vmax.f32 %v4918_v56, %v4927_v62 }
0x1d0e   :  { %6696 = vmatprep.mubr.msk.f32.mxu0 %vm6930_vm1, %v6929_v2 }
0x1d0f   :  { %v4926_v5 = vmul.f32 0.2, %v4917_v32  ;;  %v4925_v52 = vmul.f32 0.2, %v4916_v31 }
0x1d11   :  { %6697 = vmatmul.mubr.msk.f32.gmra.mxu0 %vm227_vm8, %v4933_v18  ;;  %v4935_v57 = vmax.f32 %v4917_v32, %v4926_v5  ;;  %v4934_v4 = vmax.f32 %v4916_v31, %v4925_v52 }
0x1d12   :  { %6699 = vmatprep.mubr.msk.f32.mxu0 %vm6930_vm1, %v6929_v2 }
0x1d13   :  { %5064 = vmatprep.mubr.f32.mxu1 %v4935_v57 }
0x1d14   :  { %5065 = vmatmul.mubr.f32.gmra.mxu1 %v4934_v4 }
0x1d15   :  { %6700 = vmatmul.mubr.msk.f32.gmra.mxu0 %vm227_vm8, %v4936_v10  ;;  %6708 = vmatprep.mubr.msk.f32.mxu1 %vm6930_vm1, %v6929_v2 }
0x1d16   :  { %6723 = vmatprep.mubr.msk.f32.mxu0 %vm6930_vm1, %v6929_v2 }
0x1dbf   :  { %v6236_v19 = vpop.f32.mrf.mxu1 }
0x1dc1   :  { %v6237_v54 = vpop.f32.mrf.mxu1 }
0x1dc2   :  { %v6238_v27 = vadd.f32 %v6237_v54, %v6236_v19 }
0x1dc3   :  { %v6239_v40 = vpop.f32.mrf.mxu1 }
0x1dc5   :  { %v6240_v7 = vpop.f32.mrf.mxu1 }
0x1dc6   :  { %v6241_v8 = vadd.f32 %v6240_v7, %v6239_v40 }
0x1dcd   :  { %v5136_v43 = vpop.f32.mrf.mxu0 }
0x1dce   :  { %v9609_v60 = vadd.f32 %v6238_v27, %v5136_v43 }
0x1dcf   :  { %v6695_v17 = vpop.f32.mrf.mxu0 }
0x1dd0   :  { %v5274_v51 = vsel %vm710_vm10, %v9609_v60, -inf  ;;  %v5150_v56 = vsel %vm29_vm2, %v9609_v60, -inf }
0x1dd1   :  { %5275 = vmax.xlane.f32.xlu1 %v5274_v51  ;;  %v5141_v3 = vpop.f32.mrf.mxu0 }
0x1dd2   :  { %v9613_v46 = vadd.f32 %v6241_v8, %v5141_v3 }
0x1dd3   :  { %v6698_v13 = vpop.f32.mrf.mxu0 }
0x1dd4   :  { %v6242_v59 = vpop.f32.mrf.mxu1  ;;  %v5277_v36 = vsel %vm710_vm10, %v9613_v46, -inf  ;;  %v5153_v31 = vsel %vm29_vm2, %v9613_v46, -inf }
0x1dd5   :  { %5278 = vmax.xlane.f32.xlu0 %v5277_v36  ;;  %v5146_v63 = vpop.f32.mrf.mxu0 }
0x1dd6   :  { %v6243_v11 = vpop.f32.mrf.mxu1 }
0x1dd7   :  { %v6244_v14 = vadd.f32 %v6243_v11, %v6242_v59  ;;  %v6701_v30 = vpop.f32.mrf.mxu0 }
0x1dd9   :  { %v9617_v58 = vadd.f32 %v6244_v14, %v5146_v63 }
0x1ddb   :  { %v5280_v9 = vsel %vm9767_vm4, %v9617_v58, -inf  ;;  %v5156_v49 = vsel %vm591_vm12, %v9617_v58, -inf }
0x1ddc   :  { %5281 = vmax.xlane.f32.xlu0 %v5280_v9  ;;  %v6905_v9 = vld [vmem:[%s9753_s3 + $0x10] sm:$0x3f] }
0x1e5a   :  { %v5276_v55 = vpop.xlane.xlu1 %5275 }
0x1e5b   :  { %v5283_v22 = vsub.f32 %v9609_v60, %v5276_v55  ;;  %v2709_v55 = vrot.slane %v6905_v9, %v7448_v20 }
0x1e5d   :  { %v5286_v24 = vmul.f32 1.442695, %v5283_v22 }
0x1e5e   :  { %v5279_v28 = vpop.xlane.xlu0 %5278 }
0x1e5f   :  { %6873 = vpow2.f32 %v5286_v24  ;;  %v5284_v48 = vsub.f32 %v9613_v46, %v5279_v28 }
0x1e61   :  { %v5288_v50 = vmul.f32 1.442695, %v5284_v48 }
0x1e63   :  { %6875 = vpow2.f32 %v5288_v50 }
0x1e65   :  { %v5282_v34 = vpop.xlane.xlu0 %5281 }
0x1e66   :  { %v5285_v23 = vsub.f32 %v9617_v58, %v5282_v34 }
0x1e68   :  { %v5290_v21 = vmul.f32 1.442695, %v5285_v23 }
0x1e6a   :  { %6877 = vpow2.f32 %v5290_v21 }
0x1e6c   :  { %v6874_v61 = vpop.eup %6873 }
0x1e6d   :  { %5295 = vrot.lane.b32.xlu1 %v6874_v61, %s6938_s30 }
0x1e70   :  { %v6876_v38 = vpop.eup %6875 }
0x1e71   :  { %5297 = vrot.lane.b32.xlu0 %v6876_v38, %s6938_s30 }
0x1e77   :  { %v6878_v35 = vpop.eup %6877 }
0x1e78   :  { %5299 = vrot.lane.b32.xlu1 %v6878_v35, %s6938_s30 }
0x1edf   :  { %v5296_v39 = vpop.permute.xlu1 %5295 }
0x1ee0   :  { %v5304_v37 = vsel %vm29_vm2, %v5296_v39, 0.0 }
0x1ee1   :  { %5305 = vadd.xlane.f32.xlu1 %v5304_v37 }
0x1ee3   :  { %v5298_v42 = vpop.permute.xlu0 %5297 }
0x1ee4   :  { %v5307_v25 = vsel %vm29_vm2, %v5298_v42, 0.0 }
0x1ee5   :  { %5151 = vmax.xlane.f32.xlu1 %v5150_v56  ;;  %5308 = vadd.xlane.f32.xlu0 %v5307_v25 }
0x1ee9   :  { %5157 = vmax.xlane.f32.xlu1 %v5156_v49 }
0x1eea   :  { %v5300_v47 = vpop.permute.xlu1 %5299 }
0x1eeb   :  { %v5310_v12 = vsel %vm591_vm12, %v5300_v47, 0.0 }
0x1eec   :  { %5311 = vadd.xlane.f32.xlu0 %v5310_v12 }
0x1ef0   :  { %5154 = vmax.xlane.f32.xlu0 %v5153_v31 }
0x1efa   :  { %5330 = vrot.lane.b32.xlu1 %v9365_v33, %s6939_s8 }
0x1efe   :  { %5328 = vrot.lane.b32.xlu1 %v9299_v16, %s6939_s8 }
0x1f06   :  { %5332 = vrot.lane.b32.xlu0 %v9466_v15, %s6939_s8 }
0x1f6a   :  { %v5306_v32 = vpop.xlane.xlu1 %5305 }
0x1f6b   :  { %6879 = vrcp.f32 %v5306_v32 }
0x1f6e   :  { %v5309_v62 = vpop.xlane.xlu0 %5308  ;;  %v5152_v18 = vpop.xlane.xlu1 %5151 }
0x1f6f   :  { %6881 = vrcp.f32 %v5309_v62  ;;  %v5159_v7 = vsub.f32 %v9609_v60, %v5152_v18 }
0x1f71   :  { %v5162_v17 = vmul.f32 1.442695, %v5159_v7 }
0x1f72   :  { %v5158_v5 = vpop.xlane.xlu1 %5157 }
0x1f73   :  { %v5161_v8 = vsub.f32 %v9617_v58, %v5158_v5 }
0x1f75   :  { %v5312_v52 = vpop.xlane.xlu0 %5311  ;;  %v5166_v3 = vmul.f32 1.442695, %v5161_v8 }
0x1f76   :  { %6883 = vrcp.f32 %v5312_v52  ;;  %v5331_v19 = vpop.permute.xlu1 %5330 }
0x1f77   :  { %6885 = vpow2.f32 %v5162_v17 }
0x1f78   :  { %v6880_v57 = vpop.eup %6879 }
0x1f79   :  { %v5155_v4 = vpop.xlane.xlu0 %5154  ;;  %v9642_v10 = vmul.f32 %v6880_v57, %v6874_v61 }
0x1f7a   :  { %v5329_v15 = vpop.permute.xlu1 %5328  ;;  %v5160_v43 = vsub.f32 %v9613_v46, %v5155_v4 }
0x1f7b   :  { %5322 = vrot.lane.b32.xlu0 %v9642_v10, %s6938_s30 }
0x1f7c   :  { %v6882_v16 = vpop.eup %6881  ;;  %v5164_v51 = vmul.f32 1.442695, %v5160_v43 }
0x1f7d   :  { %v5333_v33 = vpop.permute.xlu0 %5332  ;;  %v9646_v54 = vmul.f32 %v6882_v16, %v6876_v38 }
0x1f7e   :  { %6718 = vmatpush3.msk.msra.mxu0 %vm39_vm0, %v5333_v33  ;;  %6887 = vpow2.f32 %v5164_v51  ;;  %vm9768_vm0 = vmmov %vm9766_vm11 }
0x1f7f   :  { %6719 = vmatprep.subr.mxu0 %v6929_v2  ;;  %5324 = vrot.lane.b32.xlu1 %v9646_v54, %s6938_s30  ;;  %6889 = vpow2.f32 %v5166_v3 }
0x1f80   :  { %6720 = vmatpush3.msra.mxu0 %v5331_v19 }
0x1f81   :  { %6721 = vmatprep.subr.mxu0 %v6929_v2 }
0x1f82   :  { %6722 = vmatpush3.msra.mxu0 %v5329_v15 }
0x1f83   :  { %v6884_v40 = vpop.eup %6883 }
0x1f84   :  { %v9653_v27 = vmul.f32 %v6884_v40, %v6878_v35  ;;  %v6886_v13 = vpop.eup %6885 }
0x1f85   :  { %v5168_v36 = vsel %vm29_vm2, %v6886_v13, 0.0 }
0x1f86   :  { %5326 = vrot.lane.b32.xlu0 %v9653_v27, %s6938_s30 }
0x1f8b   :  { %v6888_v59 = vpop.eup %6887 }
0x1f8c   :  { %v5171_v63 = vsel %vm29_vm2, %v6888_v59, 0.0  ;;  %v6890_v11 = vpop.eup %6889 }
0x1f8d   :  { %v5174_v60 = vsel %vm591_vm12, %v6890_v11, 0.0 }
0x1fa3   :  { %5169 = vadd.xlane.f32.xlu1 %v5168_v36 }
0x1fa5   :  { %5172 = vadd.xlane.f32.xlu0 %v5171_v63 }
0x1fa9   :  { %5175 = vadd.xlane.f32.xlu0 %v5174_v60  ;;  %v2751_v60 = vrot.slane %v6905_v9, %v7469_v0 }
0x1fb4   :  { %2694 = vrot.lane.b32.xlu1 %v8714_v44, %s6940_s22 }
0x1fbf   :  { %2696 = vrot.lane.b32.xlu0 %v8716_v45, %s6940_s22 }
0x1fc3   :  { %2698 = vrot.lane.b32.xlu0 %v8718_v53, %s6940_s22 }
0x1fed   :  { %v5323_v46 = vpop.permute.xlu0 %5322 }
0x1fee   :  { %6724 = vmatmul.mubr.msk.f32.vlgmr.msra.gmra.mxu0 %vm29_vm2, %v5323_v46  ;;  %v2763_v46 = vrot.slane %v6905_v9, %v7472_v1 }
0x1fef   :  { %6726 = vmatprep.mubr.msk.f32.mxu0 %vm6930_vm1, %v6929_v2 }
0x1ff1   :  { %v5325_v14 = vpop.permute.xlu1 %5324 }
0x1ff2   :  { %6727 = vmatmul.mubr.msk.f32.gmra.mxu0 %vm29_vm2, %v5325_v14 }
0x1ff3   :  { %6729 = vmatprep.mubr.msk.f32.mxu0 %vm6930_vm1, %v6929_v2 }
0x1ff8   :  { %v5327_v30 = vpop.permute.xlu0 %5326 }
0x1ff9   :  { %6730 = vmatmul.mubr.msk.f32.gmra.mxu0 %vm29_vm2, %v5327_v30 }
0x202c   :  { %v5170_v44 = vpop.xlane.xlu1 %5169 }
0x202d   :  { %6891 = vrcp.f32 %v5170_v44 }
0x202e   :  { %v5173_v45 = vpop.xlane.xlu0 %5172 }
0x202f   :  { %6893 = vrcp.f32 %v5173_v45 }
0x2030   :  { %v2695_v53 = vpop.permute.xlu1 %2694 }
0x2031   :  { %v2703_v22 = vsel %vm882_vm15, %v8342_v26, %v2695_v53 }
0x2032   :  { %v5176_v58 = vpop.xlane.xlu0 %5175  ;;  %v2710_v48 = vadd.f32 %v2709_v55, %v2703_v22 }
0x2033   :  { %6895 = vrcp.f32 %v5176_v58 }
0x2034   :  { %v2713_v39 = vsel %vm207_vm3, %v2710_v48, 0.0 }
0x2036   :  { %v2697_v24 = vpop.permute.xlu0 %2696 }
0x2037   :  { %v2704_v28 = vsel %vm882_vm15, %v8344_v29, %v2697_v24 }
0x2038   :  { %v2711_v50 = vadd.f32 %v2709_v55, %v2704_v28 }
0x203a   :  { %v6892_v34 = vpop.eup %6891  ;;  %v2714_v23 = vsel %vm207_vm3, %v2711_v50, 0.0  ;;  %v2699_v21 = vpop.permute.xlu0 %2698 }
0x203b   :  { %v5180_v61 = vmul.f32 %v6892_v34, %v6886_v13  ;;  %v2705_v38 = vsel %vm882_vm15, %v8346_v6, %v2699_v21  ;;  %v2715_v42 = vadd.f32 %v2714_v23, %v2713_v39 }
0x203c   :  { %v6894_v35 = vpop.eup %6893  ;;  %v2712_v37 = vadd.f32 %v2709_v55, %v2705_v38 }
0x203d   :  { %v5424_v26 = vsel %vm29_vm2, %v5180_v61, %v9642_v10  ;;  %6709 = vmatmul.mubr.msk.f32.vlgmr.msra.gmra.mxu1 %vm29_vm2, %v5180_v61  ;;  %v5181_v29 = vmul.f32 %v6894_v35, %v6888_v59 }
0x203e   :  { %5829 = vst.msk [vmem:[%s9757_s7 + $0x18] sm:$0xff] %vm865_vm13, %v5424_v26  ;;  %v2716_v25 = vsel %vm899_vm14, %v2712_v37, 0.0  ;;  %6711 = vmatprep.mubr.msk.f32.mxu1 %vm6930_vm1, %v6929_v2 }
0x203f   :  { %v2717_v6 = vadd.f32 %v2716_v25, %v2715_v42  ;;  %v5425_v56 = vsel %vm29_vm2, %v5181_v29, %v9646_v54 }
0x2040   :  { %v6896_v49 = vpop.eup %6895  ;;  %5830 = vst.msk [vmem:[%s9757_s7 + $0x20] sm:$0xff] %vm865_vm13, %v5425_v56 }
0x2041   :  { %v2718_v47 = vrot.slane %v2717_v6, 4  ;;  %6712 = vmatmul.mubr.msk.f32.gmra.mxu1 %vm29_vm2, %v5181_v29  ;;  %v5182_v12 = vmul.f32 %v6896_v49, %v6890_v11 }
0x2042   :  { %6714 = vmatprep.mubr.msk.f32.mxu1 %vm6930_vm1, %v6929_v2  ;;  %vm2779_vm1 = vcmask 122880  }
0x2043   :  { %v2719_v31 = vadd.f32 %v2718_v47, %v2717_v6  ;;  %v5426_v32 = vsel %vm29_vm2, %v5182_v12, %v9653_v27 }
0x2044   :  { %5831 = vst.msk [vmem:[%s9757_s7 + $0x28] sm:$0x3f] %vm9768_vm0, %v5426_v32 }
0x2045   :  { %v2720_v62 = vrot.slane %v2719_v31, 2  ;;  %6715 = vmatmul.mubr.msk.f32.gmra.mxu1 %vm29_vm2, %v5182_v12 }
0x2047   :  { %v2721_v18 = vadd.f32 %v2720_v62, %v2719_v31 }
0x2049   :  { %v2722_v5 = vrot.slane %v2721_v18, 1 }
0x204b   :  { %v2723_v52 = vadd.f32 %v2722_v5, %v2721_v18 }
0x204d   :  { %v2724_v57 = vmul.f32 0.045454547, %v2723_v52 }
0x204f   :  { %v2725_v4 = vmul.f32 %v6905_v9, %v2724_v57  ;;  %v6906_v57 = vld [vmem:[%s9753_s3 + $0x10] sm:$0x3f]  ;;  %s6941_s3 = smov [#allocation2]  }
0x2051   :  { %v2729_v10 = vrot.slane %v2725_v4, %v7459_v41  ;;  %v5449_v4 = vrot.slane %v6906_v57, %v7448_v20 }
0x2053   :  { %v2730_v2 = vsub.f32 %v2710_v48, %v2729_v10  ;;  %v2731_v19 = vsub.f32 %v2711_v50, %v2729_v10  ;;  %v2732_v16 = vsub.f32 %v2712_v37, %v2729_v10 }
0x2055   :  { %v2733_v33 = vmul.f32 %v2730_v2, %v2730_v2  ;;  %v2734_v54 = vmul.f32 %v2731_v19, %v2731_v19  ;;  %v2735_v15 = vmul.f32 %v2732_v16, %v2732_v16  ;;  %v2752_v14 = vmul.f32 %v2751_v60, %v2730_v2 }
0x2056   :  { %v2753_v30 = vmul.f32 %v2751_v60, %v2731_v19  ;;  %v2754_v44 = vmul.f32 %v2751_v60, %v2732_v16 }
0x2057   :  { %v2736_v40 = vsel %vm207_vm3, %v2733_v33, 0.0  ;;  %v2737_v27 = vsel %vm207_vm3, %v2734_v54, 0.0  ;;  %v2739_v43 = vsel %vm899_vm14, %v2735_v15, 0.0 }
0x2058   :  { %v2738_v7 = vadd.f32 %v2737_v27, %v2736_v40 }
0x205a   :  { %v2740_v17 = vadd.f32 %v2739_v43, %v2738_v7 }
0x205c   :  { %v2741_v8 = vrot.slane %v2740_v17, 4 }
0x205e   :  { %v2742_v51 = vadd.f32 %v2741_v8, %v2740_v17 }
0x2060   :  { %v2743_v3 = vrot.slane %v2742_v51, 2 }
0x2062   :  { %v2744_v13 = vadd.f32 %v2743_v3, %v2742_v51 }
0x2064   :  { %v2745_v59 = vrot.slane %v2744_v13, 1 }
0x2066   :  { %v2746_v36 = vadd.f32 %v2745_v59, %v2744_v13 }
0x2068   :  { %v2747_v63 = vmul.f32 0.045454547, %v2746_v36 }
0x206a   :  { %v2755_v11 = vadd.f32 1e-05, %v2747_v63 }
0x206c   :  { %6897 = vrsqrt.f32 %v2755_v11 }
0x2079   :  { %v6898_v45 = vpop.eup %6897 }
0x207a   :  { %v2757_v53 = vmul.f32 %v6898_v45, %v2752_v14  ;;  %v2758_v58 = vmul.f32 %v6898_v45, %v2753_v30  ;;  %v2759_v55 = vmul.f32 %v6898_v45, %v2754_v44 }
0x207c   :  { %v2766_v22 = vadd.f32 %v2763_v46, %v2759_v55  ;;  %v2764_v24 = vadd.f32 %v2763_v46, %v2757_v53  ;;  %v2765_v28 = vadd.f32 %v2763_v46, %v2758_v58 }
0x207e   :  { %v2767_v48 = vsel %vm207_vm3, %v2764_v24, 0.0  ;;  %v2768_v50 = vsel %vm207_vm3, %v2765_v28, 0.0  ;;  %v2770_v23 = vsel %vm899_vm14, %v2766_v22, 0.0 }
0x207f   :  { %v2769_v34 = vadd.f32 %v2768_v50, %v2767_v48 }
0x2081   :  { %v2771_v21 = vadd.f32 %v2770_v23, %v2769_v34 }
0x2083   :  { %v2772_v61 = vrot.slane %v2771_v21, 4 }
0x2085   :  { %v2773_v9 = vadd.f32 %v2772_v61, %v2771_v21 }
0x2087   :  { %v2774_v38 = vrot.slane %v2773_v9, 2 }
0x2089   :  { %v2775_v35 = vadd.f32 %v2774_v38, %v2773_v9  ;;  %v5491_v9 = vrot.slane %v6906_v57, %v7469_v0  ;;  %v5503_v38 = vrot.slane %v6906_v57, %v7472_v1 }
0x208b   :  { %v2776_v39 = vrot.slane %v2775_v35, 1 }
0x208d   :  { %v2777_v37 = vadd.f32 %v2776_v39, %v2775_v35 }
0x208f   :  { %v2778_v26 = vmul.f32 0.045454547, %v2777_v37 }
0x2091   :  { %2780 = vst.msk [vmem:[#allocation2] sm:$0x1] %vm2779_vm1, %v2778_v26 }
0x20ae   :  { %v5410_v42 = vpop.f32.mrf.mxu0 }
0x20af   :  { %5434 = vrot.lane.b32.xlu1 %v5410_v42, %s6940_s22 }
0x20b0   :  { %v6725_v29 = vpop.f32.mrf.mxu0 }
0x20b2   :  { %v5415_v25 = vpop.f32.mrf.mxu0 }
0x20b3   :  { %5436 = vrot.lane.b32.xlu1 %v5415_v25, %s6940_s22 }
0x20b4   :  { %v6728_v6 = vpop.f32.mrf.mxu0 }
0x20b9   :  { %v5420_v56 = vpop.f32.mrf.mxu0 }
0x20ba   :  { %5438 = vrot.lane.b32.xlu1 %v5420_v56, %s6940_s22  ;;  %s5526_s22 = sshll.u32 %s6941_s3, 4  ;;  %s5527_s22 = int_to_ptr.vmem [resolvable:$true] %s5526_s22 }
0x20bb   :  { %v6731_v49 = vpop.f32.mrf.mxu0  ;;  %s6907_s11 = scalar_lea.vmem %s5527_s22, 32  ;;  %p6912_p1 = scmp.lt.s32.totalorder %s5527_s22, %s5527_s22 }
0x20bc   :  { %p6908_p0 = scmp.ne.s32.totalorder %s5527_s22, %s6907_s11  ;;  %p6913_p2 = scmp.lt.s32.totalorder %s6907_s11, %s6907_s11 }
0x20be   :  { %p6914_p3 = por %p6913_p2, %p6912_p1 }
0x20c0   :  { %p6915_p4 = pnand %p6914_p3, %p6908_p0 }
0x20fd   :  { %v5260_v47 = vpop.f32.mrf.mxu1 }
0x20ff   :  { %v6710_v12 = vpop.f32.mrf.mxu1 }
0x2101   :  { %v5265_v31 = vpop.f32.mrf.mxu1 }
0x2103   :  { %v6713_v32 = vpop.f32.mrf.mxu1 }
0x2105   :  { %v5270_v62 = vpop.f32.mrf.mxu1 }
0x2107   :  { %v6716_v18 = vpop.f32.mrf.mxu1 }
0x2121   :  { %v5435_v5 = vpop.permute.xlu1 %5434 }
0x2122   :  { %v5443_v2 = vsel %vm882_vm15, %v5260_v47, %v5435_v5 }
0x2123   :  { %v5450_v16 = vadd.f32 %v5449_v4, %v5443_v2 }
0x2125   :  { %v5437_v52 = vpop.permute.xlu1 %5436  ;;  %v5453_v40 = vsel %vm207_vm3, %v5450_v16, 0.0 }
0x2126   :  { %v5444_v10 = vsel %vm882_vm15, %v5265_v31, %v5437_v52 }
0x2127   :  { %v5451_v19 = vadd.f32 %v5449_v4, %v5444_v10 }
0x2129   :  { %v5454_v33 = vsel %vm207_vm3, %v5451_v19, 0.0 }
0x212a   :  { %v5455_v7 = vadd.f32 %v5454_v33, %v5453_v40 }
0x212c   :  { %v5439_v54 = vpop.permute.xlu1 %5438 }
0x212d   :  { %v5445_v15 = vsel %vm882_vm15, %v5270_v62, %v5439_v54 }
0x212e   :  { %v5452_v27 = vadd.f32 %v5449_v4, %v5445_v15 }
0x2130   :  { %v5456_v43 = vsel %vm899_vm14, %v5452_v27, 0.0 }
0x2131   :  { %v5457_v17 = vadd.f32 %v5456_v43, %v5455_v7 }
0x2133   :  { %v5458_v8 = vrot.slane %v5457_v17, 4 }
0x2135   :  { %v5459_v20 = vadd.f32 %v5458_v8, %v5457_v17 }
0x2137   :  { %v5460_v51 = vrot.slane %v5459_v20, 2 }
0x2139   :  { %v5461_v3 = vadd.f32 %v5460_v51, %v5459_v20 }
0x213b   :  { %v5462_v13 = vrot.slane %v5461_v3, 1 }
0x213d   :  { %v5463_v59 = vadd.f32 %v5462_v13, %v5461_v3 }
0x213f   :  { %v5464_v36 = vmul.f32 0.045454547, %v5463_v59 }
0x2141   :  { %v5465_v63 = vmul.f32 %v6906_v57, %v5464_v36 }
0x2143   :  { %v5469_v11 = vrot.slane %v5465_v63, %v7459_v41 }
0x2145   :  { %v5470_v60 = vsub.f32 %v5450_v16, %v5469_v11  ;;  %v5471_v46 = vsub.f32 %v5451_v19, %v5469_v11  ;;  %v5472_v14 = vsub.f32 %v5452_v27, %v5469_v11 }
0x2147   :  { %v5473_v30 = vmul.f32 %v5470_v60, %v5470_v60  ;;  %v5474_v44 = vmul.f32 %v5471_v46, %v5471_v46  ;;  %v5475_v45 = vmul.f32 %v5472_v14, %v5472_v14  ;;  %v5492_v35 = vmul.f32 %v5491_v9, %v5470_v60 }
0x2148   :  { %v5493_v39 = vmul.f32 %v5491_v9, %v5471_v46  ;;  %v5494_v37 = vmul.f32 %v5491_v9, %v5472_v14 }
0x2149   :  { %v5476_v53 = vsel %vm207_vm3, %v5473_v30, 0.0  ;;  %v5477_v58 = vsel %vm207_vm3, %v5474_v44, 0.0  ;;  %v5479_v22 = vsel %vm899_vm14, %v5475_v45, 0.0 }
0x214a   :  { %v5478_v55 = vadd.f32 %v5477_v58, %v5476_v53 }
0x214c   :  { %v5480_v24 = vadd.f32 %v5479_v22, %v5478_v55 }
0x214e   :  { %v5481_v28 = vrot.slane %v5480_v24, 4 }
0x2150   :  { %v5482_v48 = vadd.f32 %v5481_v28, %v5480_v24 }
0x2152   :  { %v5483_v50 = vrot.slane %v5482_v48, 2 }
0x2154   :  { %v5484_v34 = vadd.f32 %v5483_v50, %v5482_v48 }
0x2156   :  { %v5485_v23 = vrot.slane %v5484_v34, 1 }
0x2158   :  { %v5486_v41 = vadd.f32 %v5485_v23, %v5484_v34 }
0x215a   :  { %v5487_v21 = vmul.f32 0.045454547, %v5486_v41 }
0x215c   :  { %v5495_v61 = vadd.f32 1e-05, %v5487_v21 }
0x215e   :  { %6899 = vrsqrt.f32 %v5495_v61 }
0x216b   :  { %v6900_v26 = vpop.eup %6899 }
0x216c   :  { %v5497_v42 = vmul.f32 %v6900_v26, %v5492_v35  ;;  %v5498_v29 = vmul.f32 %v6900_v26, %v5493_v39  ;;  %v5499_v25 = vmul.f32 %v6900_v26, %v5494_v37 }
0x216e   :  { %v5506_v6 = vadd.f32 %v5503_v38, %v5499_v25  ;;  %v5504_v56 = vadd.f32 %v5503_v38, %v5497_v42  ;;  %v5505_v49 = vadd.f32 %v5503_v38, %v5498_v29 }
0x2170   :  { %v5507_v47 = vsel %vm207_vm3, %v5504_v56, 0.0  ;;  %v5508_v12 = vsel %vm207_vm3, %v5505_v49, 0.0  ;;  %v5510_v32 = vsel %vm899_vm14, %v5506_v6, 0.0 }
0x2171   :  { %v5509_v31 = vadd.f32 %v5508_v12, %v5507_v47 }
0x2173   :  { %v5511_v0 = vadd.f32 %v5510_v32, %v5509_v31 }
0x2175   :  { %v5512_v62 = vrot.slane %v5511_v0, 4 }
0x2177   :  { %v5513_v1 = vadd.f32 %v5512_v62, %v5511_v0 }
0x2179   :  { %v5514_v18 = vrot.slane %v5513_v1, 2 }
0x217b   :  { %v5515_v5 = vadd.f32 %v5514_v18, %v5513_v1 }
0x217d   :  { %v5516_v52 = vrot.slane %v5515_v5, 1 }
0x217f   :  { %v5517_v57 = vadd.f32 %v5516_v52, %v5515_v5 }
0x2181   :  { %v5518_v4 = vmul.f32 0.045454547, %v5517_v57 }
0x2183   :  { %5519 = vst.msk [vmem:[#allocation2 + $0x1] sm:$0x1] %vm2779_vm1, %v5518_v4 }
0x2184   :  { %6918 = shalt.err (!%p6915_p4)
}
0x2185   :  { %5529 = dma.vmem_to_hbm [thread:$0]  %s5527_s22, 32, %s9754_s4, [#allocation3]  }
0x2186   :  { %6927 = dma.done.wait [#allocation3], 32  }
0x2187   :  { %6928 = vsyncadd [#allocation3], 4294967264 }
0x2188   :  { %5545 = vsyncpa [#allocation3], 1 }

</bundles_post_ra>
